<compile_context>
chip_gen: v5e
topology: v5e:2x2
jax: 0.10.0
libtpu: 0.0.40
codegen_flags: <defaults>
</compile_context>

<pallas_src>
import math
import numpy as np
import jax
import jax.numpy as jnp
from jax.experimental import pallas as pl
from jax.experimental.pallas import tpu as pltpu

# ---- small hyper-parameters consistent with MotionDecoder.__init__ ----
D_MODEL = 32
N_HEADS = 4
D_K = D_MODEL // N_HEADS
N_QUERIES = 4
N_LAYERS = 2
D_FF = 64
T_HORIZON = 8
OUT_DIM = 4
SEQ_LEN = 8
BATCH = 2
L_DEC = T_HORIZON * N_QUERIES          # 32 decoder tokens (horizon * queries)
D_HALF = D_MODEL // 2
D_QUART = D_MODEL // 4
LN_EPS = 1e-5

CONF_COL = D_MODEL + OUT_DIM           # lane holding the confidence column
OUT_COLS = 40                          # lanes of the single packed output slab
SLAB_LANES = 128                       # lane width of the packed constants slab


# ------------------------- static packed-slab layout -------------------------

def _make_layout():
    """Row layout of the packed f32 [rows, 128] constants slab.
    Every item starts at an 8-row-aligned offset (sublane-tile aligned)."""
    layout = {}
    row = 0

    def add(name, r, c):
        nonlocal row
        layout[name] = (row, r, c)
        row += ((r + 7) // 8) * 8

    for l in range(N_LAYERS):
        add(f"wqkv_s{l}", D_MODEL, 3 * D_MODEL)
        add(f"bqkv_s{l}", 1, 3 * D_MODEL)
        add(f"wo_s{l}", D_MODEL, D_MODEL)
        add(f"bo_s{l}", 1, D_MODEL)
        add(f"wq_c{l}", D_MODEL, D_MODEL)
        add(f"bq_c{l}", 1, D_MODEL)
        add(f"wkv_c{l}", D_MODEL, 2 * D_MODEL)
        add(f"bkv_c{l}", 1, 2 * D_MODEL)
        add(f"wo_c{l}", D_MODEL, D_MODEL)
        add(f"bo_c{l}", 1, D_MODEL)
        add(f"w1_{l}", D_MODEL, D_FF)
        add(f"b1_{l}", 1, D_FF)
        add(f"w2_{l}", D_FF, D_MODEL)
        add(f"b2_{l}", 1, D_MODEL)
        for i in range(3):
            add(f"gamma{l}_{i}", 1, D_MODEL)
            add(f"beta{l}_{i}", 1, D_MODEL)
    add("tw1", D_MODEL, D_HALF)
    add("tb1", 1, D_HALF)
    add("tw2", D_HALF, OUT_DIM)
    add("tb2", 1, OUT_DIM)
    add("cw1", D_MODEL, D_QUART)
    add("cb1", 1, D_QUART)
    add("cw2", D_QUART, 1)
    add("cb2", 1, 1)
    add("x0", BATCH * L_DEC, D_MODEL)              # initial decoder tokens (queries + pos enc)
    add("hm_self", N_HEADS * L_DEC, D_MODEL)       # head-packed lane mask for self-attn keys
    add("hm_cross", N_HEADS * SEQ_LEN, D_MODEL)    # head-packed lane mask for cross-attn keys
    add("sel", BATCH * N_QUERIES, BATCH * L_DEC)   # horizon-mean selection (pre-scaled by 1/T)
    return layout, row


_LAYOUT, _SLAB_ROWS = _make_layout()


# ------------------------- in-kernel helpers -------------------------

def _layer_norm(x, g, b):
    mu = jnp.mean(x, axis=-1, keepdims=True)
    var = jnp.mean((x - mu) ** 2, axis=-1, keepdims=True)
    return (x - mu) * jax.lax.rsqrt(var + LN_EPS) * g + b


def _fast_recip(x):
    # EUP approximate reciprocal + one Newton step -> ~f32 accuracy.  Only used on
    # strictly-positive softmax denominators.
    r = pl.reciprocal(x, approx=True)
    return r * (2.0 - x * r)


# ------------------------- fused Pallas kernel -------------------------

def motion_decoder_kernel(mem_ref, w_ref, out_ref, ctx_sc):
    def get(name):
        r0, r, c = _LAYOUT[name]
        return w_ref[r0:r0 + r, 0:c]

    mem = mem_ref[...]                 # [B*SEQ_LEN, D]
    x = get("x0")                      # [B*L_DEC, D]  queries + pos enc (baked at prepare time)
    hm_self = get("hm_self")           # [H*L_DEC, D]
    hm_cross = get("hm_cross")         # [H*SEQ_LEN, D]
    inv_scale = 1.0 / math.sqrt(D_K)

    def attention(q_all, k_all, v_all, wo, bo, hm, l_k):
        """Head-packed-lane attention.  K/V are stacked per head and lane-masked, so one
        matmul gives all N_HEADS heads' scores; `P @ hm` gives the per-head softmax
        denominators broadcast to each head's lanes.  q-side masking is unnecessary
        because K/V are already masked per head block."""
        for b in range(BATCH):
            q = q_all[b * L_DEC:(b + 1) * L_DEC]                      # [L_DEC, D]
            k = k_all[b * l_k:(b + 1) * l_k]                          # [l_k, D]
            v = v_all[b * l_k:(b + 1) * l_k]
            k_stack = jnp.concatenate([k] * N_HEADS, axis=0) * hm     # [H*l_k, D]
            v_stack = jnp.concatenate([v] * N_HEADS, axis=0) * hm
            s = jax.lax.dot_general(q, k_stack, (((1,), (1,)), ((), ())),
                                    preferred_element_type=jnp.float32) * inv_scale
            # softmax is shift-invariant per head block -> row-global max is safe
            p = jnp.exp(s - jnp.max(s, axis=-1, keepdims=True))       # [L_DEC, H*l_k]
            ctx = jnp.dot(p, v_stack, preferred_element_type=jnp.float32)   # merged heads
            denom = jnp.dot(p, hm, preferred_element_type=jnp.float32)      # per-head sums
            ctx_sc[b * L_DEC:(b + 1) * L_DEC, :] = ctx * _fast_recip(denom)
        return jnp.dot(ctx_sc[...], wo, preferred_element_type=jnp.float32) + bo

    # ---- decoder layer stack ----
    for l in range(N_LAYERS):
        # self attention (fused QKV projection: one [.,32]x[32,96] matmul)
        qkv = jnp.dot(x, get(f"wqkv_s{l}"), preferred_element_type=jnp.float32) + get(f"bqkv_s{l}")
        a = attention(qkv[:, :D_MODEL], qkv[:, D_MODEL:2 * D_MODEL], qkv[:, 2 * D_MODEL:],
                      get(f"wo_s{l}"), get(f"bo_s{l}"), hm_self, L_DEC)
        x = _layer_norm(x + a, get(f"gamma{l}_0"), get(f"beta{l}_0"))

        # cross attention over encoded context (fused KV projection on memory)
        q = jnp.dot(x, get(f"wq_c{l}"), preferred_element_type=jnp.float32) + get(f"bq_c{l}")
        kv = jnp.dot(mem, get(f"wkv_c{l}"), preferred_element_type=jnp.float32) + get(f"bkv_c{l}")
        a = attention(q, kv[:, :D_MODEL], kv[:, D_MODEL:],
                      get(f"wo_c{l}"), get(f"bo_c{l}"), hm_cross, SEQ_LEN)
        x = _layer_norm(x + a, get(f"gamma{l}_1"), get(f"beta{l}_1"))

        # feed-forward
        h = jnp.maximum(
            jnp.dot(x, get(f"w1_{l}"), preferred_element_type=jnp.float32) + get(f"b1_{l}"), 0.0)
        f = jnp.dot(h, get(f"w2_{l}"), preferred_element_type=jnp.float32) + get(f"b2_{l}")
        x = _layer_norm(x + f, get(f"gamma{l}_2"), get(f"beta{l}_2"))

    # ---- trajectory head: Linear -> ReLU -> Linear ----
    th = jnp.maximum(
        jnp.dot(x, get("tw1"), preferred_element_type=jnp.float32) + get("tb1"), 0.0)
    traj = jnp.dot(th, get("tw2"), preferred_element_type=jnp.float32) + get("tb2")

    # ---- confidence head: mean over horizon via pre-scaled selection matmul ----
    cm = jnp.dot(get("sel"), x, preferred_element_type=jnp.float32)          # [B*Q, D]
    ch = jnp.maximum(
        jnp.dot(cm, get("cw1"), preferred_element_type=jnp.float32) + get("cb1"), 0.0)
    conf = jax.nn.sigmoid(
        jnp.dot(ch, get("cw2"), preferred_element_type=jnp.float32) + get("cb2"))

    # ---- single packed output slab: lanes [0:32]=dec, [32:36]=traj, lane 36 rows 0:8 = conf ----
    out_ref[...] = jnp.zeros_like(out_ref)
    out_ref[:, 0:D_MODEL] = x
    out_ref[:, D_MODEL:D_MODEL + OUT_DIM] = traj
    out_ref[0:BATCH * N_QUERIES, CONF_COL:CONF_COL + 1] = conf


# ------------------------- one-time host-side parameter packing -------------------------

def _head_mask(l_k):
    m = np.zeros((N_HEADS * l_k, D_MODEL), np.float32)
    for h in range(N_HEADS):
        m[h * l_k:(h + 1) * l_k, h * D_K:(h + 1) * D_K] = 1.0
    return m


def _sel_matrix():
    sel = np.zeros((BATCH * N_QUERIES, BATCH * L_DEC), np.float32)
    for b in range(BATCH):
        for q in range(N_QUERIES):
            for t in range(T_HORIZON):
                sel[b * N_QUERIES + q, b * L_DEC + t * N_QUERIES + q] = 1.0 / T_HORIZON
    return sel


def prepare_params(p):
    """One-time repacking of PyTorch-layout params into a single f32 [_SLAB_ROWS, 128]
    slab: weights transposed to [in, out], QKV/KV fused, head masks, the confidence
    selection matrix and the initial query tokens baked in.  Runs once, outside jit."""
    slab = np.zeros((_SLAB_ROWS, SLAB_LANES), np.float32)

    def put(name, arr):
        r0, r, c = _LAYOUT[name]
        a = np.asarray(arr, np.float32)
        assert a.shape == (r, c), (name, a.shape, (r, c))
        slab[r0:r0 + r, :c] = a

    for l in range(N_LAYERS):
        wq, wk, wv = (np.asarray(p["wqkv_s"][l, i]) for i in range(3))     # [out, in]
        put(f"wqkv_s{l}", np.concatenate([wq.T, wk.T, wv.T], axis=1))
        put(f"bqkv_s{l}", np.concatenate([np.asarray(p["bqkv_s"][l, i]) for i in range(3)], axis=1))
        put(f"wo_s{l}", np.asarray(p["wo_s"][l]).T)
        put(f"bo_s{l}", np.asarray(p["bo_s"][l]))
        cq, ck, cv = (np.asarray(p["wqkv_c"][l, i]) for i in range(3))
        put(f"wq_c{l}", cq.T)
        put(f"bq_c{l}", np.asarray(p["bqkv_c"][l, 0]))
        put(f"wkv_c{l}", np.concatenate([ck.T, cv.T], axis=1))
        put(f"bkv_c{l}", np.concatenate([np.asarray(p["bqkv_c"][l, 1]),
                                         np.asarray(p["bqkv_c"][l, 2])], axis=1))
        put(f"wo_c{l}", np.asarray(p["wo_c"][l]).T)
        put(f"bo_c{l}", np.asarray(p["bo_c"][l]))
        put(f"w1_{l}", np.asarray(p["w1"][l]).T)
        put(f"b1_{l}", np.asarray(p["b1"][l]))
        put(f"w2_{l}", np.asarray(p["w2"][l]).T)
        put(f"b2_{l}", np.asarray(p["b2"][l]))
        for i in range(3):
            put(f"gamma{l}_{i}", np.asarray(p["gamma"][l, i]))
            put(f"beta{l}_{i}", np.asarray(p["beta"][l, i]))
    put("tw1", np.asarray(p["tw1"]).T)
    put("tb1", np.asarray(p["tb1"]))
    put("tw2", np.asarray(p["tw2"]).T)
    put("tb2", np.asarray(p["tb2"]))
    put("cw1", np.asarray(p["cw1"]).T)
    put("cb1", np.asarray(p["cb1"]))
    put("cw2", np.asarray(p["cw2"]).T)
    put("cb2", np.asarray(p["cb2"]))

    # initial decoder tokens: query_emb[q] + pos_enc[t], flattened and tiled over batch
    qe = np.asarray(p["query_emb"])
    pe = np.asarray(p["pos_enc"])
    qflat = (pe[:, None, :] + qe[None, :, :]).reshape(L_DEC, D_MODEL)
    put("x0", np.tile(qflat, (BATCH, 1)))
    put("hm_self", _head_mask(L_DEC))
    put("hm_cross", _head_mask(SEQ_LEN))
    put("sel", _sel_matrix())
    return jnp.asarray(slab)


# ------------------------- wrapper -------------------------

def motion_decoder_forward(context, packed_weights):
    B = context.shape[0]
    assert B == BATCH and context.shape[1] == SEQ_LEN and context.shape[2] == D_MODEL
    mem_flat = context.reshape(B * SEQ_LEN, D_MODEL).astype(jnp.float32)

    # Single fused, grid-free pallas_call: 2 input DMAs, 1 packed output DMA.
    # NOTE: on v7x (2 TensorCores) a grid=(BATCH,) with dimension_semantics=("parallel",)
    # could shard the two (fully separable) batch elements across cores; kept grid-free
    # here, which is the right form for single-TC v5e/v6e per the perf review.
    out = pl.pallas_call(
        motion_decoder_kernel,
        out_shape=jax.ShapeDtypeStruct((B * L_DEC, OUT_COLS), jnp.float32),
        scratch_shapes=[pltpu.VMEM((BATCH * L_DEC, D_MODEL), jnp.float32)],
    )(mem_flat, packed_weights)

    dec = out[:, :D_MODEL].reshape(B, T_HORIZON, N_QUERIES, D_MODEL)
    traj = out[:, D_MODEL:D_MODEL + OUT_DIM].reshape(B, T_HORIZON, N_QUERIES, OUT_DIM)
    conf = out[:BATCH * N_QUERIES, CONF_COL].reshape(B, N_QUERIES)
    return {"trajectories": traj, "confidences": conf, "query_features": dec}


# ------------------------- deterministic parameter init (PyTorch layout) -------------------------

def init_params(key):
    keys = list(jax.random.split(key, 32))
    it = iter(keys)

    def rnd(shape, scale=0.05):
        return (scale * jax.random.normal(next(it), shape)).astype(jnp.float32)

    p = {}
    p["query_emb"] = jax.random.normal(next(it), (N_QUERIES, D_MODEL)).astype(jnp.float32)
    p["pos_enc"] = jax.random.normal(next(it), (T_HORIZON, D_MODEL)).astype(jnp.float32)
    p["wqkv_s"] = rnd((N_LAYERS, 3, D_MODEL, D_MODEL))
    p["bqkv_s"] = rnd((N_LAYERS, 3, 1, D_MODEL))
    p["wo_s"] = rnd((N_LAYERS, D_MODEL, D_MODEL))
    p["bo_s"] = rnd((N_LAYERS, 1, D_MODEL))
    p["wqkv_c"] = rnd((N_LAYERS, 3, D_MODEL, D_MODEL))
    p["bqkv_c"] = rnd((N_LAYERS, 3, 1, D_MODEL))
    p["wo_c"] = rnd((N_LAYERS, D_MODEL, D_MODEL))
    p["bo_c"] = rnd((N_LAYERS, 1, D_MODEL))
    p["w1"] = rnd((N_LAYERS, D_FF, D_MODEL))
    p["b1"] = rnd((N_LAYERS, 1, D_FF))
    p["w2"] = rnd((N_LAYERS, D_MODEL, D_FF))
    p["b2"] = rnd((N_LAYERS, 1, D_MODEL))
    p["gamma"] = jnp.ones((N_LAYERS, 3, 1, D_MODEL), jnp.float32)
    p["beta"] = jnp.zeros((N_LAYERS, 3, 1, D_MODEL), jnp.float32)
    p["tw1"] = rnd((D_HALF, D_MODEL))
    p["tb1"] = rnd((1, D_HALF))
    p["tw2"] = rnd((OUT_DIM, D_HALF))
    p["tb2"] = rnd((1, OUT_DIM))
    p["cw1"] = rnd((D_QUART, D_MODEL))
    p["cb1"] = rnd((1, D_QUART))
    p["cw2"] = rnd((1, D_QUART))
    p["cb2"] = rnd((1, 1))
    return p


# ------------------------- pure-JAX reference (for verification) -------------------------

def ref_forward(context, p):
    B = context.shape[0]
    qseq = p["query_emb"][None, None] + p["pos_enc"][None, :, None]
    x = jnp.broadcast_to(qseq, (B, T_HORIZON, N_QUERIES, D_MODEL)).reshape(B, L_DEC, D_MODEL)

    def mha_ref(xq, mem, wq, bq, wk, bk, wv, bv, wo, bo):
        Bq, Lq, _ = xq.shape
        Lk = mem.shape[1]
        Q = (xq @ wq.T + bq[0]).reshape(Bq, Lq, N_HEADS, D_K).transpose(0, 2, 1, 3)
        K = (mem @ wk.T + bk[0]).reshape(Bq, Lk, N_HEADS, D_K).transpose(0, 2, 1, 3)
        V = (mem @ wv.T + bv[0]).reshape(Bq, Lk, N_HEADS, D_K).transpose(0, 2, 1, 3)
        s = jnp.einsum("bhqd,bhkd->bhqk", Q, K) / math.sqrt(D_K)
        a = jax.nn.softmax(s, axis=-1)
        c = jnp.einsum("bhqk,bhkd->bhqd", a, V).transpose(0, 2, 1, 3).reshape(Bq, Lq, D_MODEL)
        return c @ wo.T + bo[0]

    def ln(x, g, b):
        mu = x.mean(-1, keepdims=True)
        var = ((x - mu) ** 2).mean(-1, keepdims=True)
        return (x - mu) / jnp.sqrt(var + LN_EPS) * g[0] + b[0]

    for l in range(N_LAYERS):
        a = mha_ref(x, x, p["wqkv_s"][l, 0], p["bqkv_s"][l, 0], p["wqkv_s"][l, 1],
                    p["bqkv_s"][l, 1], p["wqkv_s"][l, 2], p["bqkv_s"][l, 2],
                    p["wo_s"][l], p["bo_s"][l])
        x = ln(x + a, p["gamma"][l, 0], p["beta"][l, 0])
        a = mha_ref(x, context, p["wqkv_c"][l, 0], p["bqkv_c"][l, 0], p["wqkv_c"][l, 1],
                    p["bqkv_c"][l, 1], p["wqkv_c"][l, 2], p["bqkv_c"][l, 2],
                    p["wo_c"][l], p["bo_c"][l])
        x = ln(x + a, p["gamma"][l, 1], p["beta"][l, 1])
        h = jax.nn.relu(x @ p["w1"][l].T + p["b1"][l][0])
        f = h @ p["w2"][l].T + p["b2"][l][0]
        x = ln(x + f, p["gamma"][l, 2], p["beta"][l, 2])

    dec = x.reshape(B, T_HORIZON, N_QUERIES, D_MODEL)
    traj = jax.nn.relu(dec @ p["tw1"].T + p["tb1"][0]) @ p["tw2"].T + p["tb2"][0]
    cm = dec.mean(axis=1)
    conf = jax.nn.sigmoid(jax.nn.relu(cm @ p["cw1"].T + p["cb1"][0]) @ p["cw2"].T + p["cb2"][0])
    return traj, conf[..., 0], dec


# ------------------------- main -------------------------

if __name__ == "__main__":
    key = jax.random.PRNGKey(0)
    pkey, ckey = jax.random.split(key)
    params = init_params(pkey)
    context = jax.random.normal(ckey, (BATCH, SEQ_LEN, D_MODEL), dtype=jnp.float32)

    packed = prepare_params(params)            # one-time host-side repacking (outside jit)
    fwd = jax.jit(motion_decoder_forward)
    out = fwd(context, packed)
    jax.block_until_ready(out)

    ref_traj, ref_conf, ref_feat = ref_forward(context, params)
    assert out["trajectories"].shape == (BATCH, T_HORIZON, N_QUERIES, OUT_DIM)
    assert out["confidences"].shape == (BATCH, N_QUERIES)
    assert out["query_features"].shape == (BATCH, T_HORIZON, N_QUERIES, D_MODEL)
    assert jnp.allclose(out["trajectories"], ref_traj, atol=1e-3, rtol=1e-3)
    assert jnp.allclose(out["confidences"], ref_conf, atol=1e-3, rtol=1e-3)
    assert jnp.allclose(out["query_features"], ref_feat, atol=1e-3, rtol=1e-3)
    print("KERNEL_OK")
</pallas_src>

<mosaic_0001>
module attributes {stable_mosaic.version = 11 : i64} {
  func.func @motion_decoder_kernel(%arg0: memref<16x32xf32, #tpu.memory_space<vmem>>, %arg1: memref<1072x128xf32, #tpu.memory_space<vmem>>, %arg2: memref<64x40xf32, #tpu.memory_space<vmem>>, %arg3: memref<64x32xf32, #tpu.memory_space<vmem>>) attributes {dimension_semantics = [], scalar_prefetch = 0 : i64, scratch_operands = 1 : i64, tpu.core_type = #tpu.core_type<tc>} {
    %c0 = arith.constant 0 : index
    %c0_0 = arith.constant 0 : index
    %0 = vector.load %arg0[%c0, %c0_0] : memref<16x32xf32, #tpu.memory_space<vmem>>, vector<16x32xf32>
    %c840 = arith.constant 840 : index
    %c0_1 = arith.constant 0 : index
    %1 = vector.load %arg1[%c840, %c0_1] : memref<1072x128xf32, #tpu.memory_space<vmem>>, vector<64x32xf32>
    %c904 = arith.constant 904 : index
    %c0_2 = arith.constant 0 : index
    %2 = vector.load %arg1[%c904, %c0_2] : memref<1072x128xf32, #tpu.memory_space<vmem>>, vector<128x32xf32>
    %c1032 = arith.constant 1032 : index
    %c0_3 = arith.constant 0 : index
    %3 = vector.load %arg1[%c1032, %c0_3] : memref<1072x128xf32, #tpu.memory_space<vmem>>, vector<32x32xf32>
    %c0_4 = arith.constant 0 : index
    %c0_5 = arith.constant 0 : index
    %4 = vector.load %arg1[%c0_4, %c0_5] : memref<1072x128xf32, #tpu.memory_space<vmem>>, vector<32x96xf32>
    %cst = arith.constant dense<0.000000e+00> : vector<64x96xf32>
    %5 = tpu.matmul %1, %4, %cst {dimension_numbers = #tpu.dot_dimension_numbers<[1], [0], [0], [1], [0, 0, 1, 1], [], []>} : vector<64x32xf32>, vector<32x96xf32>, vector<64x96xf32> -> vector<64x96xf32>
    %c32 = arith.constant 32 : index
    %c0_6 = arith.constant 0 : index
    %6 = vector.load %arg1[%c32, %c0_6] : memref<1072x128xf32, #tpu.memory_space<vmem>>, vector<1x96xf32>
    %7 = vector.broadcast %6 : vector<1x96xf32> to vector<64x96xf32>
    %8 = arith.addf %5, %7 : vector<64x96xf32>
    %9 = vector.extract_strided_slice %8 {offsets = [0, 0], sizes = [64, 32], strides = [1, 1]} : vector<64x96xf32> to vector<64x32xf32>
    %10 = vector.extract_strided_slice %8 {offsets = [0, 32], sizes = [64, 32], strides = [1, 1]} : vector<64x96xf32> to vector<64x32xf32>
    %11 = vector.extract_strided_slice %8 {offsets = [0, 64], sizes = [64, 32], strides = [1, 1]} : vector<64x96xf32> to vector<64x32xf32>
    %c40 = arith.constant 40 : index
    %c0_7 = arith.constant 0 : index
    %12 = vector.load %arg1[%c40, %c0_7] : memref<1072x128xf32, #tpu.memory_space<vmem>>, vector<32x32xf32>
    %c72 = arith.constant 72 : index
    %c0_8 = arith.constant 0 : index
    %13 = vector.load %arg1[%c72, %c0_8] : memref<1072x128xf32, #tpu.memory_space<vmem>>, vector<1x32xf32>
    %14 = vector.extract_strided_slice %9 {offsets = [0, 0], sizes = [32, 32], strides = [1, 1]} : vector<64x32xf32> to vector<32x32xf32>
    %15 = vector.extract_strided_slice %10 {offsets = [0, 0], sizes = [32, 32], strides = [1, 1]} : vector<64x32xf32> to vector<32x32xf32>
    %16 = vector.extract_strided_slice %11 {offsets = [0, 0], sizes = [32, 32], strides = [1, 1]} : vector<64x32xf32> to vector<32x32xf32>
    %17 = tpu.concatenate %15, %15, %15, %15 in 0 : vector<32x32xf32>, vector<32x32xf32>, vector<32x32xf32>, vector<32x32xf32> -> vector<128x32xf32>
    %18 = arith.mulf %17, %2 : vector<128x32xf32>
    %19 = tpu.concatenate %16, %16, %16, %16 in 0 : vector<32x32xf32>, vector<32x32xf32>, vector<32x32xf32>, vector<32x32xf32> -> vector<128x32xf32>
    %20 = arith.mulf %19, %2 : vector<128x32xf32>
    %cst_9 = arith.constant dense<0.000000e+00> : vector<32x128xf32>
    %21 = tpu.matmul %14, %18, %cst_9 {dimension_numbers = #tpu.dot_dimension_numbers<[1], [1], [0], [0], [0, 0, 1, 0], [], []>} : vector<32x32xf32>, vector<128x32xf32>, vector<32x128xf32> -> vector<32x128xf32>
    %cst_10 = arith.constant 0.353553385 : f32
    %22 = vector.broadcast %cst_10 : f32 to vector<32x128xf32>
    %23 = arith.mulf %21, %22 : vector<32x128xf32>
    %cst_11 = arith.constant dense<0xFF800000> : vector<32xf32>
    %24 = vector.multi_reduction <maximumf>, %23, %cst_11 [1] : vector<32x128xf32> to vector<32xf32>
    %25 = vector.shape_cast %24 : vector<32xf32> to vector<32x1xf32>
    %26 = vector.broadcast %25 : vector<32x1xf32> to vector<32x128xf32>
    %27 = arith.subf %23, %26 : vector<32x128xf32>
    %28 = math.exp %27 : vector<32x128xf32>
    %cst_12 = arith.constant dense<0.000000e+00> : vector<32x32xf32>
    %29 = tpu.matmul %28, %20, %cst_12 {dimension_numbers = #tpu.dot_dimension_numbers<[1], [0], [0], [1], [0, 0, 1, 1], [], []>} : vector<32x128xf32>, vector<128x32xf32>, vector<32x32xf32> -> vector<32x32xf32>
    %cst_13 = arith.constant dense<0.000000e+00> : vector<32x32xf32>
    %30 = tpu.matmul %28, %2, %cst_13 {dimension_numbers = #tpu.dot_dimension_numbers<[1], [0], [0], [1], [0, 0, 1, 1], [], []>} : vector<32x128xf32>, vector<128x32xf32>, vector<32x32xf32> -> vector<32x32xf32>
    %31 = tpu.reciprocal %30 {approx = true} : vector<32x32xf32> -> vector<32x32xf32>
    %32 = arith.mulf %30, %31 : vector<32x32xf32>
    %cst_14 = arith.constant 2.000000e+00 : f32
    %33 = vector.broadcast %cst_14 : f32 to vector<32x32xf32>
    %34 = arith.subf %33, %32 : vector<32x32xf32>
    %35 = arith.mulf %31, %34 : vector<32x32xf32>
    %36 = arith.mulf %29, %35 : vector<32x32xf32>
    %c0_15 = arith.constant 0 : index
    %c0_16 = arith.constant 0 : index
    %37 = vector.load %arg3[%c0_15, %c0_16] : memref<64x32xf32, #tpu.memory_space<vmem>>, vector<32x32xf32>
    tpu.vector_store %arg3[%c0_15, %c0_16], %36 {strides = array<i32>} : memref<64x32xf32, #tpu.memory_space<vmem>>, vector<32x32xf32>,
    %38 = vector.extract_strided_slice %9 {offsets = [32, 0], sizes = [32, 32], strides = [1, 1]} : vector<64x32xf32> to vector<32x32xf32>
    %39 = vector.extract_strided_slice %10 {offsets = [32, 0], sizes = [32, 32], strides = [1, 1]} : vector<64x32xf32> to vector<32x32xf32>
    %40 = vector.extract_strided_slice %11 {offsets = [32, 0], sizes = [32, 32], strides = [1, 1]} : vector<64x32xf32> to vector<32x32xf32>
    %41 = tpu.concatenate %39, %39, %39, %39 in 0 : vector<32x32xf32>, vector<32x32xf32>, vector<32x32xf32>, vector<32x32xf32> -> vector<128x32xf32>
    %42 = arith.mulf %41, %2 : vector<128x32xf32>
    %43 = tpu.concatenate %40, %40, %40, %40 in 0 : vector<32x32xf32>, vector<32x32xf32>, vector<32x32xf32>, vector<32x32xf32> -> vector<128x32xf32>
    %44 = arith.mulf %43, %2 : vector<128x32xf32>
    %cst_17 = arith.constant dense<0.000000e+00> : vector<32x128xf32>
    %45 = tpu.matmul %38, %42, %cst_17 {dimension_numbers = #tpu.dot_dimension_numbers<[1], [1], [0], [0], [0, 0, 1, 0], [], []>} : vector<32x32xf32>, vector<128x32xf32>, vector<32x128xf32> -> vector<32x128xf32>
    %cst_18 = arith.constant 0.353553385 : f32
    %46 = vector.broadcast %cst_18 : f32 to vector<32x128xf32>
    %47 = arith.mulf %45, %46 : vector<32x128xf32>
    %cst_19 = arith.constant dense<0xFF800000> : vector<32xf32>
    %48 = vector.multi_reduction <maximumf>, %47, %cst_19 [1] : vector<32x128xf32> to vector<32xf32>
    %49 = vector.shape_cast %48 : vector<32xf32> to vector<32x1xf32>
    %50 = vector.broadcast %49 : vector<32x1xf32> to vector<32x128xf32>
    %51 = arith.subf %47, %50 : vector<32x128xf32>
    %52 = math.exp %51 : vector<32x128xf32>
    %cst_20 = arith.constant dense<0.000000e+00> : vector<32x32xf32>
    %53 = tpu.matmul %52, %44, %cst_20 {dimension_numbers = #tpu.dot_dimension_numbers<[1], [0], [0], [1], [0, 0, 1, 1], [], []>} : vector<32x128xf32>, vector<128x32xf32>, vector<32x32xf32> -> vector<32x32xf32>
    %cst_21 = arith.constant dense<0.000000e+00> : vector<32x32xf32>
    %54 = tpu.matmul %52, %2, %cst_21 {dimension_numbers = #tpu.dot_dimension_numbers<[1], [0], [0], [1], [0, 0, 1, 1], [], []>} : vector<32x128xf32>, vector<128x32xf32>, vector<32x32xf32> -> vector<32x32xf32>
    %55 = tpu.reciprocal %54 {approx = true} : vector<32x32xf32> -> vector<32x32xf32>
    %56 = arith.mulf %54, %55 : vector<32x32xf32>
    %cst_22 = arith.constant 2.000000e+00 : f32
    %57 = vector.broadcast %cst_22 : f32 to vector<32x32xf32>
    %58 = arith.subf %57, %56 : vector<32x32xf32>
    %59 = arith.mulf %55, %58 : vector<32x32xf32>
    %60 = arith.mulf %53, %59 : vector<32x32xf32>
    %c32_23 = arith.constant 32 : index
    %c0_24 = arith.constant 0 : index
    %61 = vector.load %arg3[%c32_23, %c0_24] : memref<64x32xf32, #tpu.memory_space<vmem>>, vector<32x32xf32>
    tpu.vector_store %arg3[%c32_23, %c0_24], %60 {strides = array<i32>} : memref<64x32xf32, #tpu.memory_space<vmem>>, vector<32x32xf32>,
    %c0_25 = arith.constant 0 : index
    %c0_26 = arith.constant 0 : index
    %62 = vector.load %arg3[%c0_25, %c0_26] : memref<64x32xf32, #tpu.memory_space<vmem>>, vector<64x32xf32>
    %cst_27 = arith.constant dense<0.000000e+00> : vector<64x32xf32>
    %63 = tpu.matmul %62, %12, %cst_27 {dimension_numbers = #tpu.dot_dimension_numbers<[1], [0], [0], [1], [0, 0, 1, 1], [], []>} : vector<64x32xf32>, vector<32x32xf32>, vector<64x32xf32> -> vector<64x32xf32>
    %64 = vector.broadcast %13 : vector<1x32xf32> to vector<64x32xf32>
    %65 = arith.addf %63, %64 : vector<64x32xf32>
    %66 = arith.addf %1, %65 : vector<64x32xf32>
    %c312 = arith.constant 312 : index
    %c0_28 = arith.constant 0 : index
    %67 = vector.load %arg1[%c312, %c0_28] : memref<1072x128xf32, #tpu.memory_space<vmem>>, vector<1x32xf32>
    %c320 = arith.constant 320 : index
    %c0_29 = arith.constant 0 : index
    %68 = vector.load %arg1[%c320, %c0_29] : memref<1072x128xf32, #tpu.memory_space<vmem>>, vector<1x32xf32>
    %cst_30 = arith.constant dense<0.000000e+00> : vector<64xf32>
    %69 = vector.multi_reduction <add>, %66, %cst_30 [1] : vector<64x32xf32> to vector<64xf32>
    %70 = vector.shape_cast %69 : vector<64xf32> to vector<64x1xf32>
    %cst_31 = arith.constant 3.200000e+01 : f32
    %71 = vector.broadcast %cst_31 : f32 to vector<64x1xf32>
    %72 = arith.divf %70, %71 : vector<64x1xf32>
    %73 = vector.broadcast %72 : vector<64x1xf32> to vector<64x32xf32>
    %74 = arith.subf %66, %73 : vector<64x32xf32>
    %75 = arith.mulf %74, %74 : vector<64x32xf32>
    %cst_32 = arith.constant dense<0.000000e+00> : vector<64xf32>
    %76 = vector.multi_reduction <add>, %75, %cst_32 [1] : vector<64x32xf32> to vector<64xf32>
    %77 = vector.shape_cast %76 : vector<64xf32> to vector<64x1xf32>
    %cst_33 = arith.constant 3.200000e+01 : f32
    %78 = vector.broadcast %cst_33 : f32 to vector<64x1xf32>
    %79 = arith.divf %77, %78 : vector<64x1xf32>
    %80 = vector.broadcast %72 : vector<64x1xf32> to vector<64x32xf32>
    %81 = arith.subf %66, %80 : vector<64x32xf32>
    %cst_34 = arith.constant 9.99999974E-6 : f32
    %82 = vector.broadcast %cst_34 : f32 to vector<64x1xf32>
    %83 = arith.addf %79, %82 : vector<64x1xf32>
    %84 = math.rsqrt %83 : vector<64x1xf32>
    %85 = vector.broadcast %84 : vector<64x1xf32> to vector<64x32xf32>
    %86 = arith.mulf %81, %85 : vector<64x32xf32>
    %87 = vector.broadcast %67 : vector<1x32xf32> to vector<64x32xf32>
    %88 = arith.mulf %86, %87 : vector<64x32xf32>
    %89 = vector.broadcast %68 : vector<1x32xf32> to vector<64x32xf32>
    %90 = arith.addf %88, %89 : vector<64x32xf32>
    %c80 = arith.constant 80 : index
    %c0_35 = arith.constant 0 : index
    %91 = vector.load %arg1[%c80, %c0_35] : memref<1072x128xf32, #tpu.memory_space<vmem>>, vector<32x32xf32>
    %cst_36 = arith.constant dense<0.000000e+00> : vector<64x32xf32>
    %92 = tpu.matmul %90, %91, %cst_36 {dimension_numbers = #tpu.dot_dimension_numbers<[1], [0], [0], [1], [0, 0, 1, 1], [], []>} : vector<64x32xf32>, vector<32x32xf32>, vector<64x32xf32> -> vector<64x32xf32>
    %c112 = arith.constant 112 : index
    %c0_37 = arith.constant 0 : index
    %93 = vector.load %arg1[%c112, %c0_37] : memref<1072x128xf32, #tpu.memory_space<vmem>>, vector<1x32xf32>
    %94 = vector.broadcast %93 : vector<1x32xf32> to vector<64x32xf32>
    %95 = arith.addf %92, %94 : vector<64x32xf32>
    %c120 = arith.constant 120 : index
    %c0_38 = arith.constant 0 : index
    %96 = vector.load %arg1[%c120, %c0_38] : memref<1072x128xf32, #tpu.memory_space<vmem>>, vector<32x64xf32>
    %cst_39 = arith.constant dense<0.000000e+00> : vector<16x64xf32>
    %97 = tpu.matmul %0, %96, %cst_39 {dimension_numbers = #tpu.dot_dimension_numbers<[1], [0], [0], [1], [0, 0, 1, 1], [], []>} : vector<16x32xf32>, vector<32x64xf32>, vector<16x64xf32> -> vector<16x64xf32>
    %c152 = arith.constant 152 : index
    %c0_40 = arith.constant 0 : index
    %98 = vector.load %arg1[%c152, %c0_40] : memref<1072x128xf32, #tpu.memory_space<vmem>>, vector<1x64xf32>
    %99 = vector.broadcast %98 : vector<1x64xf32> to vector<16x64xf32>
    %100 = arith.addf %97, %99 : vector<16x64xf32>
    %101 = vector.extract_strided_slice %100 {offsets = [0, 0], sizes = [16, 32], strides = [1, 1]} : vector<16x64xf32> to vector<16x32xf32>
    %102 = vector.extract_strided_slice %100 {offsets = [0, 32], sizes = [16, 32], strides = [1, 1]} : vector<16x64xf32> to vector<16x32xf32>
    %c160 = arith.constant 160 : index
    %c0_41 = arith.constant 0 : index
    %103 = vector.load %arg1[%c160, %c0_41] : memref<1072x128xf32, #tpu.memory_space<vmem>>, vector<32x32xf32>
    %c192 = arith.constant 192 : index
    %c0_42 = arith.constant 0 : index
    %104 = vector.load %arg1[%c192, %c0_42] : memref<1072x128xf32, #tpu.memory_space<vmem>>, vector<1x32xf32>
    %105 = vector.extract_strided_slice %95 {offsets = [0, 0], sizes = [32, 32], strides = [1, 1]} : vector<64x32xf32> to vector<32x32xf32>
    %106 = vector.extract_strided_slice %101 {offsets = [0, 0], sizes = [8, 32], strides = [1, 1]} : vector<16x32xf32> to vector<8x32xf32>
    %107 = vector.extract_strided_slice %102 {offsets = [0, 0], sizes = [8, 32], strides = [1, 1]} : vector<16x32xf32> to vector<8x32xf32>
    %108 = tpu.concatenate %106, %106, %106, %106 in 0 : vector<8x32xf32>, vector<8x32xf32>, vector<8x32xf32>, vector<8x32xf32> -> vector<32x32xf32>
    %109 = arith.mulf %108, %3 : vector<32x32xf32>
    %110 = tpu.concatenate %107, %107, %107, %107 in 0 : vector<8x32xf32>, vector<8x32xf32>, vector<8x32xf32>, vector<8x32xf32> -> vector<32x32xf32>
    %111 = arith.mulf %110, %3 : vector<32x32xf32>
    %cst_43 = arith.constant dense<0.000000e+00> : vector<32x32xf32>
    %112 = tpu.matmul %105, %109, %cst_43 {dimension_numbers = #tpu.dot_dimension_numbers<[1], [1], [0], [0], [0, 0, 1, 0], [], []>} : vector<32x32xf32>, vector<32x32xf32>, vector<32x32xf32> -> vector<32x32xf32>
    %cst_44 = arith.constant 0.353553385 : f32
    %113 = vector.broadcast %cst_44 : f32 to vector<32x32xf32>
    %114 = arith.mulf %112, %113 : vector<32x32xf32>
    %cst_45 = arith.constant dense<0xFF800000> : vector<32xf32>
    %115 = vector.multi_reduction <maximumf>, %114, %cst_45 [1] : vector<32x32xf32> to vector<32xf32>
    %116 = vector.shape_cast %115 : vector<32xf32> to vector<32x1xf32>
    %117 = vector.broadcast %116 : vector<32x1xf32> to vector<32x32xf32>
    %118 = arith.subf %114, %117 : vector<32x32xf32>
    %119 = math.exp %118 : vector<32x32xf32>
    %cst_46 = arith.constant dense<0.000000e+00> : vector<32x32xf32>
    %120 = tpu.matmul %119, %111, %cst_46 {dimension_numbers = #tpu.dot_dimension_numbers<[1], [0], [0], [1], [0, 0, 1, 1], [], []>} : vector<32x32xf32>, vector<32x32xf32>, vector<32x32xf32> -> vector<32x32xf32>
    %cst_47 = arith.constant dense<0.000000e+00> : vector<32x32xf32>
    %121 = tpu.matmul %119, %3, %cst_47 {dimension_numbers = #tpu.dot_dimension_numbers<[1], [0], [0], [1], [0, 0, 1, 1], [], []>} : vector<32x32xf32>, vector<32x32xf32>, vector<32x32xf32> -> vector<32x32xf32>
    %122 = tpu.reciprocal %121 {approx = true} : vector<32x32xf32> -> vector<32x32xf32>
    %123 = arith.mulf %121, %122 : vector<32x32xf32>
    %cst_48 = arith.constant 2.000000e+00 : f32
    %124 = vector.broadcast %cst_48 : f32 to vector<32x32xf32>
    %125 = arith.subf %124, %123 : vector<32x32xf32>
    %126 = arith.mulf %122, %125 : vector<32x32xf32>
    %127 = arith.mulf %120, %126 : vector<32x32xf32>
    %c0_49 = arith.constant 0 : index
    %c0_50 = arith.constant 0 : index
    %128 = vector.load %arg3[%c0_49, %c0_50] : memref<64x32xf32, #tpu.memory_space<vmem>>, vector<32x32xf32>
    tpu.vector_store %arg3[%c0_49, %c0_50], %127 {strides = array<i32>} : memref<64x32xf32, #tpu.memory_space<vmem>>, vector<32x32xf32>,
    %129 = vector.extract_strided_slice %95 {offsets = [32, 0], sizes = [32, 32], strides = [1, 1]} : vector<64x32xf32> to vector<32x32xf32>
    %130 = vector.extract_strided_slice %101 {offsets = [8, 0], sizes = [8, 32], strides = [1, 1]} : vector<16x32xf32> to vector<8x32xf32>
    %131 = vector.extract_strided_slice %102 {offsets = [8, 0], sizes = [8, 32], strides = [1, 1]} : vector<16x32xf32> to vector<8x32xf32>
    %132 = tpu.concatenate %130, %130, %130, %130 in 0 : vector<8x32xf32>, vector<8x32xf32>, vector<8x32xf32>, vector<8x32xf32> -> vector<32x32xf32>
    %133 = arith.mulf %132, %3 : vector<32x32xf32>
    %134 = tpu.concatenate %131, %131, %131, %131 in 0 : vector<8x32xf32>, vector<8x32xf32>, vector<8x32xf32>, vector<8x32xf32> -> vector<32x32xf32>
    %135 = arith.mulf %134, %3 : vector<32x32xf32>
    %cst_51 = arith.constant dense<0.000000e+00> : vector<32x32xf32>
    %136 = tpu.matmul %129, %133, %cst_51 {dimension_numbers = #tpu.dot_dimension_numbers<[1], [1], [0], [0], [0, 0, 1, 0], [], []>} : vector<32x32xf32>, vector<32x32xf32>, vector<32x32xf32> -> vector<32x32xf32>
    %cst_52 = arith.constant 0.353553385 : f32
    %137 = vector.broadcast %cst_52 : f32 to vector<32x32xf32>
    %138 = arith.mulf %136, %137 : vector<32x32xf32>
    %cst_53 = arith.constant dense<0xFF800000> : vector<32xf32>
    %139 = vector.multi_reduction <maximumf>, %138, %cst_53 [1] : vector<32x32xf32> to vector<32xf32>
    %140 = vector.shape_cast %139 : vector<32xf32> to vector<32x1xf32>
    %141 = vector.broadcast %140 : vector<32x1xf32> to vector<32x32xf32>
    %142 = arith.subf %138, %141 : vector<32x32xf32>
    %143 = math.exp %142 : vector<32x32xf32>
    %cst_54 = arith.constant dense<0.000000e+00> : vector<32x32xf32>
    %144 = tpu.matmul %143, %135, %cst_54 {dimension_numbers = #tpu.dot_dimension_numbers<[1], [0], [0], [1], [0, 0, 1, 1], [], []>} : vector<32x32xf32>, vector<32x32xf32>, vector<32x32xf32> -> vector<32x32xf32>
    %cst_55 = arith.constant dense<0.000000e+00> : vector<32x32xf32>
    %145 = tpu.matmul %143, %3, %cst_55 {dimension_numbers = #tpu.dot_dimension_numbers<[1], [0], [0], [1], [0, 0, 1, 1], [], []>} : vector<32x32xf32>, vector<32x32xf32>, vector<32x32xf32> -> vector<32x32xf32>
    %146 = tpu.reciprocal %145 {approx = true} : vector<32x32xf32> -> vector<32x32xf32>
    %147 = arith.mulf %145, %146 : vector<32x32xf32>
    %cst_56 = arith.constant 2.000000e+00 : f32
    %148 = vector.broadcast %cst_56 : f32 to vector<32x32xf32>
    %149 = arith.subf %148, %147 : vector<32x32xf32>
    %150 = arith.mulf %146, %149 : vector<32x32xf32>
    %151 = arith.mulf %144, %150 : vector<32x32xf32>
    %c32_57 = arith.constant 32 : index
    %c0_58 = arith.constant 0 : index
    %152 = vector.load %arg3[%c32_57, %c0_58] : memref<64x32xf32, #tpu.memory_space<vmem>>, vector<32x32xf32>
    tpu.vector_store %arg3[%c32_57, %c0_58], %151 {strides = array<i32>} : memref<64x32xf32, #tpu.memory_space<vmem>>, vector<32x32xf32>,
    %c0_59 = arith.constant 0 : index
    %c0_60 = arith.constant 0 : index
    %153 = vector.load %arg3[%c0_59, %c0_60] : memref<64x32xf32, #tpu.memory_space<vmem>>, vector<64x32xf32>
    %cst_61 = arith.constant dense<0.000000e+00> : vector<64x32xf32>
    %154 = tpu.matmul %153, %103, %cst_61 {dimension_numbers = #tpu.dot_dimension_numbers<[1], [0], [0], [1], [0, 0, 1, 1], [], []>} : vector<64x32xf32>, vector<32x32xf32>, vector<64x32xf32> -> vector<64x32xf32>
    %155 = vector.broadcast %104 : vector<1x32xf32> to vector<64x32xf32>
    %156 = arith.addf %154, %155 : vector<64x32xf32>
    %157 = arith.addf %90, %156 : vector<64x32xf32>
    %c328 = arith.constant 328 : index
    %c0_62 = arith.constant 0 : index
    %158 = vector.load %arg1[%c328, %c0_62] : memref<1072x128xf32, #tpu.memory_space<vmem>>, vector<1x32xf32>
    %c336 = arith.constant 336 : index
    %c0_63 = arith.constant 0 : index
    %159 = vector.load %arg1[%c336, %c0_63] : memref<1072x128xf32, #tpu.memory_space<vmem>>, vector<1x32xf32>
    %cst_64 = arith.constant dense<0.000000e+00> : vector<64xf32>
    %160 = vector.multi_reduction <add>, %157, %cst_64 [1] : vector<64x32xf32> to vector<64xf32>
    %161 = vector.shape_cast %160 : vector<64xf32> to vector<64x1xf32>
    %cst_65 = arith.constant 3.200000e+01 : f32
    %162 = vector.broadcast %cst_65 : f32 to vector<64x1xf32>
    %163 = arith.divf %161, %162 : vector<64x1xf32>
    %164 = vector.broadcast %163 : vector<64x1xf32> to vector<64x32xf32>
    %165 = arith.subf %157, %164 : vector<64x32xf32>
    %166 = arith.mulf %165, %165 : vector<64x32xf32>
    %cst_66 = arith.constant dense<0.000000e+00> : vector<64xf32>
    %167 = vector.multi_reduction <add>, %166, %cst_66 [1] : vector<64x32xf32> to vector<64xf32>
    %168 = vector.shape_cast %167 : vector<64xf32> to vector<64x1xf32>
    %cst_67 = arith.constant 3.200000e+01 : f32
    %169 = vector.broadcast %cst_67 : f32 to vector<64x1xf32>
    %170 = arith.divf %168, %169 : vector<64x1xf32>
    %171 = vector.broadcast %163 : vector<64x1xf32> to vector<64x32xf32>
    %172 = arith.subf %157, %171 : vector<64x32xf32>
    %cst_68 = arith.constant 9.99999974E-6 : f32
    %173 = vector.broadcast %cst_68 : f32 to vector<64x1xf32>
    %174 = arith.addf %170, %173 : vector<64x1xf32>
    %175 = math.rsqrt %174 : vector<64x1xf32>
    %176 = vector.broadcast %175 : vector<64x1xf32> to vector<64x32xf32>
    %177 = arith.mulf %172, %176 : vector<64x32xf32>
    %178 = vector.broadcast %158 : vector<1x32xf32> to vector<64x32xf32>
    %179 = arith.mulf %177, %178 : vector<64x32xf32>
    %180 = vector.broadcast %159 : vector<1x32xf32> to vector<64x32xf32>
    %181 = arith.addf %179, %180 : vector<64x32xf32>
    %c200 = arith.constant 200 : index
    %c0_69 = arith.constant 0 : index
    %182 = vector.load %arg1[%c200, %c0_69] : memref<1072x128xf32, #tpu.memory_space<vmem>>, vector<32x64xf32>
    %cst_70 = arith.constant dense<0.000000e+00> : vector<64x64xf32>
    %183 = tpu.matmul %181, %182, %cst_70 {dimension_numbers = #tpu.dot_dimension_numbers<[1], [0], [0], [1], [0, 0, 1, 1], [], []>} : vector<64x32xf32>, vector<32x64xf32>, vector<64x64xf32> -> vector<64x64xf32>
    %c232 = arith.constant 232 : index
    %c0_71 = arith.constant 0 : index
    %184 = vector.load %arg1[%c232, %c0_71] : memref<1072x128xf32, #tpu.memory_space<vmem>>, vector<1x64xf32>
    %185 = vector.broadcast %184 : vector<1x64xf32> to vector<64x64xf32>
    %186 = arith.addf %183, %185 : vector<64x64xf32>
    %cst_72 = arith.constant 0.000000e+00 : f32
    %187 = vector.broadcast %cst_72 : f32 to vector<64x64xf32>
    %188 = arith.maximumf %186, %187 : vector<64x64xf32>
    %c240 = arith.constant 240 : index
    %c0_73 = arith.constant 0 : index
    %189 = vector.load %arg1[%c240, %c0_73] : memref<1072x128xf32, #tpu.memory_space<vmem>>, vector<64x32xf32>
    %cst_74 = arith.constant dense<0.000000e+00> : vector<64x32xf32>
    %190 = tpu.matmul %188, %189, %cst_74 {dimension_numbers = #tpu.dot_dimension_numbers<[1], [0], [0], [1], [0, 0, 1, 1], [], []>} : vector<64x64xf32>, vector<64x32xf32>, vector<64x32xf32> -> vector<64x32xf32>
    %c304 = arith.constant 304 : index
    %c0_75 = arith.constant 0 : index
    %191 = vector.load %arg1[%c304, %c0_75] : memref<1072x128xf32, #tpu.memory_space<vmem>>, vector<1x32xf32>
    %192 = vector.broadcast %191 : vector<1x32xf32> to vector<64x32xf32>
    %193 = arith.addf %190, %192 : vector<64x32xf32>
    %194 = arith.addf %181, %193 : vector<64x32xf32>
    %c344 = arith.constant 344 : index
    %c0_76 = arith.constant 0 : index
    %195 = vector.load %arg1[%c344, %c0_76] : memref<1072x128xf32, #tpu.memory_space<vmem>>, vector<1x32xf32>
    %c352 = arith.constant 352 : index
    %c0_77 = arith.constant 0 : index
    %196 = vector.load %arg1[%c352, %c0_77] : memref<1072x128xf32, #tpu.memory_space<vmem>>, vector<1x32xf32>
    %cst_78 = arith.constant dense<0.000000e+00> : vector<64xf32>
    %197 = vector.multi_reduction <add>, %194, %cst_78 [1] : vector<64x32xf32> to vector<64xf32>
    %198 = vector.shape_cast %197 : vector<64xf32> to vector<64x1xf32>
    %cst_79 = arith.constant 3.200000e+01 : f32
    %199 = vector.broadcast %cst_79 : f32 to vector<64x1xf32>
    %200 = arith.divf %198, %199 : vector<64x1xf32>
    %201 = vector.broadcast %200 : vector<64x1xf32> to vector<64x32xf32>
    %202 = arith.subf %194, %201 : vector<64x32xf32>
    %203 = arith.mulf %202, %202 : vector<64x32xf32>
    %cst_80 = arith.constant dense<0.000000e+00> : vector<64xf32>
    %204 = vector.multi_reduction <add>, %203, %cst_80 [1] : vector<64x32xf32> to vector<64xf32>
    %205 = vector.shape_cast %204 : vector<64xf32> to vector<64x1xf32>
    %cst_81 = arith.constant 3.200000e+01 : f32
    %206 = vector.broadcast %cst_81 : f32 to vector<64x1xf32>
    %207 = arith.divf %205, %206 : vector<64x1xf32>
    %208 = vector.broadcast %200 : vector<64x1xf32> to vector<64x32xf32>
    %209 = arith.subf %194, %208 : vector<64x32xf32>
    %cst_82 = arith.constant 9.99999974E-6 : f32
    %210 = vector.broadcast %cst_82 : f32 to vector<64x1xf32>
    %211 = arith.addf %207, %210 : vector<64x1xf32>
    %212 = math.rsqrt %211 : vector<64x1xf32>
    %213 = vector.broadcast %212 : vector<64x1xf32> to vector<64x32xf32>
    %214 = arith.mulf %209, %213 : vector<64x32xf32>
    %215 = vector.broadcast %195 : vector<1x32xf32> to vector<64x32xf32>
    %216 = arith.mulf %214, %215 : vector<64x32xf32>
    %217 = vector.broadcast %196 : vector<1x32xf32> to vector<64x32xf32>
    %218 = arith.addf %216, %217 : vector<64x32xf32>
    %c360 = arith.constant 360 : index
    %c0_83 = arith.constant 0 : index
    %219 = vector.load %arg1[%c360, %c0_83] : memref<1072x128xf32, #tpu.memory_space<vmem>>, vector<32x96xf32>
    %cst_84 = arith.constant dense<0.000000e+00> : vector<64x96xf32>
    %220 = tpu.matmul %218, %219, %cst_84 {dimension_numbers = #tpu.dot_dimension_numbers<[1], [0], [0], [1], [0, 0, 1, 1], [], []>} : vector<64x32xf32>, vector<32x96xf32>, vector<64x96xf32> -> vector<64x96xf32>
    %c392 = arith.constant 392 : index
    %c0_85 = arith.constant 0 : index
    %221 = vector.load %arg1[%c392, %c0_85] : memref<1072x128xf32, #tpu.memory_space<vmem>>, vector<1x96xf32>
    %222 = vector.broadcast %221 : vector<1x96xf32> to vector<64x96xf32>
    %223 = arith.addf %220, %222 : vector<64x96xf32>
    %224 = vector.extract_strided_slice %223 {offsets = [0, 0], sizes = [64, 32], strides = [1, 1]} : vector<64x96xf32> to vector<64x32xf32>
    %225 = vector.extract_strided_slice %223 {offsets = [0, 32], sizes = [64, 32], strides = [1, 1]} : vector<64x96xf32> to vector<64x32xf32>
    %226 = vector.extract_strided_slice %223 {offsets = [0, 64], sizes = [64, 32], strides = [1, 1]} : vector<64x96xf32> to vector<64x32xf32>
    %c400 = arith.constant 400 : index
    %c0_86 = arith.constant 0 : index
    %227 = vector.load %arg1[%c400, %c0_86] : memref<1072x128xf32, #tpu.memory_space<vmem>>, vector<32x32xf32>
    %c432 = arith.constant 432 : index
    %c0_87 = arith.constant 0 : index
    %228 = vector.load %arg1[%c432, %c0_87] : memref<1072x128xf32, #tpu.memory_space<vmem>>, vector<1x32xf32>
    %229 = vector.extract_strided_slice %224 {offsets = [0, 0], sizes = [32, 32], strides = [1, 1]} : vector<64x32xf32> to vector<32x32xf32>
    %230 = vector.extract_strided_slice %225 {offsets = [0, 0], sizes = [32, 32], strides = [1, 1]} : vector<64x32xf32> to vector<32x32xf32>
    %231 = vector.extract_strided_slice %226 {offsets = [0, 0], sizes = [32, 32], strides = [1, 1]} : vector<64x32xf32> to vector<32x32xf32>
    %232 = tpu.concatenate %230, %230, %230, %230 in 0 : vector<32x32xf32>, vector<32x32xf32>, vector<32x32xf32>, vector<32x32xf32> -> vector<128x32xf32>
    %233 = arith.mulf %232, %2 : vector<128x32xf32>
    %234 = tpu.concatenate %231, %231, %231, %231 in 0 : vector<32x32xf32>, vector<32x32xf32>, vector<32x32xf32>, vector<32x32xf32> -> vector<128x32xf32>
    %235 = arith.mulf %234, %2 : vector<128x32xf32>
    %cst_88 = arith.constant dense<0.000000e+00> : vector<32x128xf32>
    %236 = tpu.matmul %229, %233, %cst_88 {dimension_numbers = #tpu.dot_dimension_numbers<[1], [1], [0], [0], [0, 0, 1, 0], [], []>} : vector<32x32xf32>, vector<128x32xf32>, vector<32x128xf32> -> vector<32x128xf32>
    %cst_89 = arith.constant 0.353553385 : f32
    %237 = vector.broadcast %cst_89 : f32 to vector<32x128xf32>
    %238 = arith.mulf %236, %237 : vector<32x128xf32>
    %cst_90 = arith.constant dense<0xFF800000> : vector<32xf32>
    %239 = vector.multi_reduction <maximumf>, %238, %cst_90 [1] : vector<32x128xf32> to vector<32xf32>
    %240 = vector.shape_cast %239 : vector<32xf32> to vector<32x1xf32>
    %241 = vector.broadcast %240 : vector<32x1xf32> to vector<32x128xf32>
    %242 = arith.subf %238, %241 : vector<32x128xf32>
    %243 = math.exp %242 : vector<32x128xf32>
    %cst_91 = arith.constant dense<0.000000e+00> : vector<32x32xf32>
    %244 = tpu.matmul %243, %235, %cst_91 {dimension_numbers = #tpu.dot_dimension_numbers<[1], [0], [0], [1], [0, 0, 1, 1], [], []>} : vector<32x128xf32>, vector<128x32xf32>, vector<32x32xf32> -> vector<32x32xf32>
    %cst_92 = arith.constant dense<0.000000e+00> : vector<32x32xf32>
    %245 = tpu.matmul %243, %2, %cst_92 {dimension_numbers = #tpu.dot_dimension_numbers<[1], [0], [0], [1], [0, 0, 1, 1], [], []>} : vector<32x128xf32>, vector<128x32xf32>, vector<32x32xf32> -> vector<32x32xf32>
    %246 = tpu.reciprocal %245 {approx = true} : vector<32x32xf32> -> vector<32x32xf32>
    %247 = arith.mulf %245, %246 : vector<32x32xf32>
    %cst_93 = arith.constant 2.000000e+00 : f32
    %248 = vector.broadcast %cst_93 : f32 to vector<32x32xf32>
    %249 = arith.subf %248, %247 : vector<32x32xf32>
    %250 = arith.mulf %246, %249 : vector<32x32xf32>
    %251 = arith.mulf %244, %250 : vector<32x32xf32>
    %c0_94 = arith.constant 0 : index
    %c0_95 = arith.constant 0 : index
    %252 = vector.load %arg3[%c0_94, %c0_95] : memref<64x32xf32, #tpu.memory_space<vmem>>, vector<32x32xf32>
    tpu.vector_store %arg3[%c0_94, %c0_95], %251 {strides = array<i32>} : memref<64x32xf32, #tpu.memory_space<vmem>>, vector<32x32xf32>,
    %253 = vector.extract_strided_slice %224 {offsets = [32, 0], sizes = [32, 32], strides = [1, 1]} : vector<64x32xf32> to vector<32x32xf32>
    %254 = vector.extract_strided_slice %225 {offsets = [32, 0], sizes = [32, 32], strides = [1, 1]} : vector<64x32xf32> to vector<32x32xf32>
    %255 = vector.extract_strided_slice %226 {offsets = [32, 0], sizes = [32, 32], strides = [1, 1]} : vector<64x32xf32> to vector<32x32xf32>
    %256 = tpu.concatenate %254, %254, %254, %254 in 0 : vector<32x32xf32>, vector<32x32xf32>, vector<32x32xf32>, vector<32x32xf32> -> vector<128x32xf32>
    %257 = arith.mulf %256, %2 : vector<128x32xf32>
    %258 = tpu.concatenate %255, %255, %255, %255 in 0 : vector<32x32xf32>, vector<32x32xf32>, vector<32x32xf32>, vector<32x32xf32> -> vector<128x32xf32>
    %259 = arith.mulf %258, %2 : vector<128x32xf32>
    %cst_96 = arith.constant dense<0.000000e+00> : vector<32x128xf32>
    %260 = tpu.matmul %253, %257, %cst_96 {dimension_numbers = #tpu.dot_dimension_numbers<[1], [1], [0], [0], [0, 0, 1, 0], [], []>} : vector<32x32xf32>, vector<128x32xf32>, vector<32x128xf32> -> vector<32x128xf32>
    %cst_97 = arith.constant 0.353553385 : f32
    %261 = vector.broadcast %cst_97 : f32 to vector<32x128xf32>
    %262 = arith.mulf %260, %261 : vector<32x128xf32>
    %cst_98 = arith.constant dense<0xFF800000> : vector<32xf32>
    %263 = vector.multi_reduction <maximumf>, %262, %cst_98 [1] : vector<32x128xf32> to vector<32xf32>
    %264 = vector.shape_cast %263 : vector<32xf32> to vector<32x1xf32>
    %265 = vector.broadcast %264 : vector<32x1xf32> to vector<32x128xf32>
    %266 = arith.subf %262, %265 : vector<32x128xf32>
    %267 = math.exp %266 : vector<32x128xf32>
    %cst_99 = arith.constant dense<0.000000e+00> : vector<32x32xf32>
    %268 = tpu.matmul %267, %259, %cst_99 {dimension_numbers = #tpu.dot_dimension_numbers<[1], [0], [0], [1], [0, 0, 1, 1], [], []>} : vector<32x128xf32>, vector<128x32xf32>, vector<32x32xf32> -> vector<32x32xf32>
    %cst_100 = arith.constant dense<0.000000e+00> : vector<32x32xf32>
    %269 = tpu.matmul %267, %2, %cst_100 {dimension_numbers = #tpu.dot_dimension_numbers<[1], [0], [0], [1], [0, 0, 1, 1], [], []>} : vector<32x128xf32>, vector<128x32xf32>, vector<32x32xf32> -> vector<32x32xf32>
    %270 = tpu.reciprocal %269 {approx = true} : vector<32x32xf32> -> vector<32x32xf32>
    %271 = arith.mulf %269, %270 : vector<32x32xf32>
    %cst_101 = arith.constant 2.000000e+00 : f32
    %272 = vector.broadcast %cst_101 : f32 to vector<32x32xf32>
    %273 = arith.subf %272, %271 : vector<32x32xf32>
    %274 = arith.mulf %270, %273 : vector<32x32xf32>
    %275 = arith.mulf %268, %274 : vector<32x32xf32>
    %c32_102 = arith.constant 32 : index
    %c0_103 = arith.constant 0 : index
    %276 = vector.load %arg3[%c32_102, %c0_103] : memref<64x32xf32, #tpu.memory_space<vmem>>, vector<32x32xf32>
    tpu.vector_store %arg3[%c32_102, %c0_103], %275 {strides = array<i32>} : memref<64x32xf32, #tpu.memory_space<vmem>>, vector<32x32xf32>,
    %c0_104 = arith.constant 0 : index
    %c0_105 = arith.constant 0 : index
    %277 = vector.load %arg3[%c0_104, %c0_105] : memref<64x32xf32, #tpu.memory_space<vmem>>, vector<64x32xf32>
    %cst_106 = arith.constant dense<0.000000e+00> : vector<64x32xf32>
    %278 = tpu.matmul %277, %227, %cst_106 {dimension_numbers = #tpu.dot_dimension_numbers<[1], [0], [0], [1], [0, 0, 1, 1], [], []>} : vector<64x32xf32>, vector<32x32xf32>, vector<64x32xf32> -> vector<64x32xf32>
    %279 = vector.broadcast %228 : vector<1x32xf32> to vector<64x32xf32>
    %280 = arith.addf %278, %279 : vector<64x32xf32>
    %281 = arith.addf %218, %280 : vector<64x32xf32>
    %c672 = arith.constant 672 : index
    %c0_107 = arith.constant 0 : index
    %282 = vector.load %arg1[%c672, %c0_107] : memref<1072x128xf32, #tpu.memory_space<vmem>>, vector<1x32xf32>
    %c680 = arith.constant 680 : index
    %c0_108 = arith.constant 0 : index
    %283 = vector.load %arg1[%c680, %c0_108] : memref<1072x128xf32, #tpu.memory_space<vmem>>, vector<1x32xf32>
    %cst_109 = arith.constant dense<0.000000e+00> : vector<64xf32>
    %284 = vector.multi_reduction <add>, %281, %cst_109 [1] : vector<64x32xf32> to vector<64xf32>
    %285 = vector.shape_cast %284 : vector<64xf32> to vector<64x1xf32>
    %cst_110 = arith.constant 3.200000e+01 : f32
    %286 = vector.broadcast %cst_110 : f32 to vector<64x1xf32>
    %287 = arith.divf %285, %286 : vector<64x1xf32>
    %288 = vector.broadcast %287 : vector<64x1xf32> to vector<64x32xf32>
    %289 = arith.subf %281, %288 : vector<64x32xf32>
    %290 = arith.mulf %289, %289 : vector<64x32xf32>
    %cst_111 = arith.constant dense<0.000000e+00> : vector<64xf32>
    %291 = vector.multi_reduction <add>, %290, %cst_111 [1] : vector<64x32xf32> to vector<64xf32>
    %292 = vector.shape_cast %291 : vector<64xf32> to vector<64x1xf32>
    %cst_112 = arith.constant 3.200000e+01 : f32
    %293 = vector.broadcast %cst_112 : f32 to vector<64x1xf32>
    %294 = arith.divf %292, %293 : vector<64x1xf32>
    %295 = vector.broadcast %287 : vector<64x1xf32> to vector<64x32xf32>
    %296 = arith.subf %281, %295 : vector<64x32xf32>
    %cst_113 = arith.constant 9.99999974E-6 : f32
    %297 = vector.broadcast %cst_113 : f32 to vector<64x1xf32>
    %298 = arith.addf %294, %297 : vector<64x1xf32>
    %299 = math.rsqrt %298 : vector<64x1xf32>
    %300 = vector.broadcast %299 : vector<64x1xf32> to vector<64x32xf32>
    %301 = arith.mulf %296, %300 : vector<64x32xf32>
    %302 = vector.broadcast %282 : vector<1x32xf32> to vector<64x32xf32>
    %303 = arith.mulf %301, %302 : vector<64x32xf32>
    %304 = vector.broadcast %283 : vector<1x32xf32> to vector<64x32xf32>
    %305 = arith.addf %303, %304 : vector<64x32xf32>
    %c440 = arith.constant 440 : index
    %c0_114 = arith.constant 0 : index
    %306 = vector.load %arg1[%c440, %c0_114] : memref<1072x128xf32, #tpu.memory_space<vmem>>, vector<32x32xf32>
    %cst_115 = arith.constant dense<0.000000e+00> : vector<64x32xf32>
    %307 = tpu.matmul %305, %306, %cst_115 {dimension_numbers = #tpu.dot_dimension_numbers<[1], [0], [0], [1], [0, 0, 1, 1], [], []>} : vector<64x32xf32>, vector<32x32xf32>, vector<64x32xf32> -> vector<64x32xf32>
    %c472 = arith.constant 472 : index
    %c0_116 = arith.constant 0 : index
    %308 = vector.load %arg1[%c472, %c0_116] : memref<1072x128xf32, #tpu.memory_space<vmem>>, vector<1x32xf32>
    %309 = vector.broadcast %308 : vector<1x32xf32> to vector<64x32xf32>
    %310 = arith.addf %307, %309 : vector<64x32xf32>
    %c480 = arith.constant 480 : index
    %c0_117 = arith.constant 0 : index
    %311 = vector.load %arg1[%c480, %c0_117] : memref<1072x128xf32, #tpu.memory_space<vmem>>, vector<32x64xf32>
    %cst_118 = arith.constant dense<0.000000e+00> : vector<16x64xf32>
    %312 = tpu.matmul %0, %311, %cst_118 {dimension_numbers = #tpu.dot_dimension_numbers<[1], [0], [0], [1], [0, 0, 1, 1], [], []>} : vector<16x32xf32>, vector<32x64xf32>, vector<16x64xf32> -> vector<16x64xf32>
    %c512 = arith.constant 512 : index
    %c0_119 = arith.constant 0 : index
    %313 = vector.load %arg1[%c512, %c0_119] : memref<1072x128xf32, #tpu.memory_space<vmem>>, vector<1x64xf32>
    %314 = vector.broadcast %313 : vector<1x64xf32> to vector<16x64xf32>
    %315 = arith.addf %312, %314 : vector<16x64xf32>
    %316 = vector.extract_strided_slice %315 {offsets = [0, 0], sizes = [16, 32], strides = [1, 1]} : vector<16x64xf32> to vector<16x32xf32>
    %317 = vector.extract_strided_slice %315 {offsets = [0, 32], sizes = [16, 32], strides = [1, 1]} : vector<16x64xf32> to vector<16x32xf32>
    %c520 = arith.constant 520 : index
    %c0_120 = arith.constant 0 : index
    %318 = vector.load %arg1[%c520, %c0_120] : memref<1072x128xf32, #tpu.memory_space<vmem>>, vector<32x32xf32>
    %c552 = arith.constant 552 : index
    %c0_121 = arith.constant 0 : index
    %319 = vector.load %arg1[%c552, %c0_121] : memref<1072x128xf32, #tpu.memory_space<vmem>>, vector<1x32xf32>
    %320 = vector.extract_strided_slice %310 {offsets = [0, 0], sizes = [32, 32], strides = [1, 1]} : vector<64x32xf32> to vector<32x32xf32>
    %321 = vector.extract_strided_slice %316 {offsets = [0, 0], sizes = [8, 32], strides = [1, 1]} : vector<16x32xf32> to vector<8x32xf32>
    %322 = vector.extract_strided_slice %317 {offsets = [0, 0], sizes = [8, 32], strides = [1, 1]} : vector<16x32xf32> to vector<8x32xf32>
    %323 = tpu.concatenate %321, %321, %321, %321 in 0 : vector<8x32xf32>, vector<8x32xf32>, vector<8x32xf32>, vector<8x32xf32> -> vector<32x32xf32>
    %324 = arith.mulf %323, %3 : vector<32x32xf32>
    %325 = tpu.concatenate %322, %322, %322, %322 in 0 : vector<8x32xf32>, vector<8x32xf32>, vector<8x32xf32>, vector<8x32xf32> -> vector<32x32xf32>
    %326 = arith.mulf %325, %3 : vector<32x32xf32>
    %cst_122 = arith.constant dense<0.000000e+00> : vector<32x32xf32>
    %327 = tpu.matmul %320, %324, %cst_122 {dimension_numbers = #tpu.dot_dimension_numbers<[1], [1], [0], [0], [0, 0, 1, 0], [], []>} : vector<32x32xf32>, vector<32x32xf32>, vector<32x32xf32> -> vector<32x32xf32>
    %cst_123 = arith.constant 0.353553385 : f32
    %328 = vector.broadcast %cst_123 : f32 to vector<32x32xf32>
    %329 = arith.mulf %327, %328 : vector<32x32xf32>
    %cst_124 = arith.constant dense<0xFF800000> : vector<32xf32>
    %330 = vector.multi_reduction <maximumf>, %329, %cst_124 [1] : vector<32x32xf32> to vector<32xf32>
    %331 = vector.shape_cast %330 : vector<32xf32> to vector<32x1xf32>
    %332 = vector.broadcast %331 : vector<32x1xf32> to vector<32x32xf32>
    %333 = arith.subf %329, %332 : vector<32x32xf32>
    %334 = math.exp %333 : vector<32x32xf32>
    %cst_125 = arith.constant dense<0.000000e+00> : vector<32x32xf32>
    %335 = tpu.matmul %334, %326, %cst_125 {dimension_numbers = #tpu.dot_dimension_numbers<[1], [0], [0], [1], [0, 0, 1, 1], [], []>} : vector<32x32xf32>, vector<32x32xf32>, vector<32x32xf32> -> vector<32x32xf32>
    %cst_126 = arith.constant dense<0.000000e+00> : vector<32x32xf32>
    %336 = tpu.matmul %334, %3, %cst_126 {dimension_numbers = #tpu.dot_dimension_numbers<[1], [0], [0], [1], [0, 0, 1, 1], [], []>} : vector<32x32xf32>, vector<32x32xf32>, vector<32x32xf32> -> vector<32x32xf32>
    %337 = tpu.reciprocal %336 {approx = true} : vector<32x32xf32> -> vector<32x32xf32>
    %338 = arith.mulf %336, %337 : vector<32x32xf32>
    %cst_127 = arith.constant 2.000000e+00 : f32
    %339 = vector.broadcast %cst_127 : f32 to vector<32x32xf32>
    %340 = arith.subf %339, %338 : vector<32x32xf32>
    %341 = arith.mulf %337, %340 : vector<32x32xf32>
    %342 = arith.mulf %335, %341 : vector<32x32xf32>
    %c0_128 = arith.constant 0 : index
    %c0_129 = arith.constant 0 : index
    %343 = vector.load %arg3[%c0_128, %c0_129] : memref<64x32xf32, #tpu.memory_space<vmem>>, vector<32x32xf32>
    tpu.vector_store %arg3[%c0_128, %c0_129], %342 {strides = array<i32>} : memref<64x32xf32, #tpu.memory_space<vmem>>, vector<32x32xf32>,
    %344 = vector.extract_strided_slice %310 {offsets = [32, 0], sizes = [32, 32], strides = [1, 1]} : vector<64x32xf32> to vector<32x32xf32>
    %345 = vector.extract_strided_slice %316 {offsets = [8, 0], sizes = [8, 32], strides = [1, 1]} : vector<16x32xf32> to vector<8x32xf32>
    %346 = vector.extract_strided_slice %317 {offsets = [8, 0], sizes = [8, 32], strides = [1, 1]} : vector<16x32xf32> to vector<8x32xf32>
    %347 = tpu.concatenate %345, %345, %345, %345 in 0 : vector<8x32xf32>, vector<8x32xf32>, vector<8x32xf32>, vector<8x32xf32> -> vector<32x32xf32>
    %348 = arith.mulf %347, %3 : vector<32x32xf32>
    %349 = tpu.concatenate %346, %346, %346, %346 in 0 : vector<8x32xf32>, vector<8x32xf32>, vector<8x32xf32>, vector<8x32xf32> -> vector<32x32xf32>
    %350 = arith.mulf %349, %3 : vector<32x32xf32>
    %cst_130 = arith.constant dense<0.000000e+00> : vector<32x32xf32>
    %351 = tpu.matmul %344, %348, %cst_130 {dimension_numbers = #tpu.dot_dimension_numbers<[1], [1], [0], [0], [0, 0, 1, 0], [], []>} : vector<32x32xf32>, vector<32x32xf32>, vector<32x32xf32> -> vector<32x32xf32>
    %cst_131 = arith.constant 0.353553385 : f32
    %352 = vector.broadcast %cst_131 : f32 to vector<32x32xf32>
    %353 = arith.mulf %351, %352 : vector<32x32xf32>
    %cst_132 = arith.constant dense<0xFF800000> : vector<32xf32>
    %354 = vector.multi_reduction <maximumf>, %353, %cst_132 [1] : vector<32x32xf32> to vector<32xf32>
    %355 = vector.shape_cast %354 : vector<32xf32> to vector<32x1xf32>
    %356 = vector.broadcast %355 : vector<32x1xf32> to vector<32x32xf32>
    %357 = arith.subf %353, %356 : vector<32x32xf32>
    %358 = math.exp %357 : vector<32x32xf32>
    %cst_133 = arith.constant dense<0.000000e+00> : vector<32x32xf32>
    %359 = tpu.matmul %358, %350, %cst_133 {dimension_numbers = #tpu.dot_dimension_numbers<[1], [0], [0], [1], [0, 0, 1, 1], [], []>} : vector<32x32xf32>, vector<32x32xf32>, vector<32x32xf32> -> vector<32x32xf32>
    %cst_134 = arith.constant dense<0.000000e+00> : vector<32x32xf32>
    %360 = tpu.matmul %358, %3, %cst_134 {dimension_numbers = #tpu.dot_dimension_numbers<[1], [0], [0], [1], [0, 0, 1, 1], [], []>} : vector<32x32xf32>, vector<32x32xf32>, vector<32x32xf32> -> vector<32x32xf32>
    %361 = tpu.reciprocal %360 {approx = true} : vector<32x32xf32> -> vector<32x32xf32>
    %362 = arith.mulf %360, %361 : vector<32x32xf32>
    %cst_135 = arith.constant 2.000000e+00 : f32
    %363 = vector.broadcast %cst_135 : f32 to vector<32x32xf32>
    %364 = arith.subf %363, %362 : vector<32x32xf32>
    %365 = arith.mulf %361, %364 : vector<32x32xf32>
    %366 = arith.mulf %359, %365 : vector<32x32xf32>
    %c32_136 = arith.constant 32 : index
    %c0_137 = arith.constant 0 : index
    %367 = vector.load %arg3[%c32_136, %c0_137] : memref<64x32xf32, #tpu.memory_space<vmem>>, vector<32x32xf32>
    tpu.vector_store %arg3[%c32_136, %c0_137], %366 {strides = array<i32>} : memref<64x32xf32, #tpu.memory_space<vmem>>, vector<32x32xf32>,
    %c0_138 = arith.constant 0 : index
    %c0_139 = arith.constant 0 : index
    %368 = vector.load %arg3[%c0_138, %c0_139] : memref<64x32xf32, #tpu.memory_space<vmem>>, vector<64x32xf32>
    %cst_140 = arith.constant dense<0.000000e+00> : vector<64x32xf32>
    %369 = tpu.matmul %368, %318, %cst_140 {dimension_numbers = #tpu.dot_dimension_numbers<[1], [0], [0], [1], [0, 0, 1, 1], [], []>} : vector<64x32xf32>, vector<32x32xf32>, vector<64x32xf32> -> vector<64x32xf32>
    %370 = vector.broadcast %319 : vector<1x32xf32> to vector<64x32xf32>
    %371 = arith.addf %369, %370 : vector<64x32xf32>
    %372 = arith.addf %305, %371 : vector<64x32xf32>
    %c688 = arith.constant 688 : index
    %c0_141 = arith.constant 0 : index
    %373 = vector.load %arg1[%c688, %c0_141] : memref<1072x128xf32, #tpu.memory_space<vmem>>, vector<1x32xf32>
    %c696 = arith.constant 696 : index
    %c0_142 = arith.constant 0 : index
    %374 = vector.load %arg1[%c696, %c0_142] : memref<1072x128xf32, #tpu.memory_space<vmem>>, vector<1x32xf32>
    %cst_143 = arith.constant dense<0.000000e+00> : vector<64xf32>
    %375 = vector.multi_reduction <add>, %372, %cst_143 [1] : vector<64x32xf32> to vector<64xf32>
    %376 = vector.shape_cast %375 : vector<64xf32> to vector<64x1xf32>
    %cst_144 = arith.constant 3.200000e+01 : f32
    %377 = vector.broadcast %cst_144 : f32 to vector<64x1xf32>
    %378 = arith.divf %376, %377 : vector<64x1xf32>
    %379 = vector.broadcast %378 : vector<64x1xf32> to vector<64x32xf32>
    %380 = arith.subf %372, %379 : vector<64x32xf32>
    %381 = arith.mulf %380, %380 : vector<64x32xf32>
    %cst_145 = arith.constant dense<0.000000e+00> : vector<64xf32>
    %382 = vector.multi_reduction <add>, %381, %cst_145 [1] : vector<64x32xf32> to vector<64xf32>
    %383 = vector.shape_cast %382 : vector<64xf32> to vector<64x1xf32>
    %cst_146 = arith.constant 3.200000e+01 : f32
    %384 = vector.broadcast %cst_146 : f32 to vector<64x1xf32>
    %385 = arith.divf %383, %384 : vector<64x1xf32>
    %386 = vector.broadcast %378 : vector<64x1xf32> to vector<64x32xf32>
    %387 = arith.subf %372, %386 : vector<64x32xf32>
    %cst_147 = arith.constant 9.99999974E-6 : f32
    %388 = vector.broadcast %cst_147 : f32 to vector<64x1xf32>
    %389 = arith.addf %385, %388 : vector<64x1xf32>
    %390 = math.rsqrt %389 : vector<64x1xf32>
    %391 = vector.broadcast %390 : vector<64x1xf32> to vector<64x32xf32>
    %392 = arith.mulf %387, %391 : vector<64x32xf32>
    %393 = vector.broadcast %373 : vector<1x32xf32> to vector<64x32xf32>
    %394 = arith.mulf %392, %393 : vector<64x32xf32>
    %395 = vector.broadcast %374 : vector<1x32xf32> to vector<64x32xf32>
    %396 = arith.addf %394, %395 : vector<64x32xf32>
    %c560 = arith.constant 560 : index
    %c0_148 = arith.constant 0 : index
    %397 = vector.load %arg1[%c560, %c0_148] : memref<1072x128xf32, #tpu.memory_space<vmem>>, vector<32x64xf32>
    %cst_149 = arith.constant dense<0.000000e+00> : vector<64x64xf32>
    %398 = tpu.matmul %396, %397, %cst_149 {dimension_numbers = #tpu.dot_dimension_numbers<[1], [0], [0], [1], [0, 0, 1, 1], [], []>} : vector<64x32xf32>, vector<32x64xf32>, vector<64x64xf32> -> vector<64x64xf32>
    %c592 = arith.constant 592 : index
    %c0_150 = arith.constant 0 : index
    %399 = vector.load %arg1[%c592, %c0_150] : memref<1072x128xf32, #tpu.memory_space<vmem>>, vector<1x64xf32>
    %400 = vector.broadcast %399 : vector<1x64xf32> to vector<64x64xf32>
    %401 = arith.addf %398, %400 : vector<64x64xf32>
    %cst_151 = arith.constant 0.000000e+00 : f32
    %402 = vector.broadcast %cst_151 : f32 to vector<64x64xf32>
    %403 = arith.maximumf %401, %402 : vector<64x64xf32>
    %c600 = arith.constant 600 : index
    %c0_152 = arith.constant 0 : index
    %404 = vector.load %arg1[%c600, %c0_152] : memref<1072x128xf32, #tpu.memory_space<vmem>>, vector<64x32xf32>
    %cst_153 = arith.constant dense<0.000000e+00> : vector<64x32xf32>
    %405 = tpu.matmul %403, %404, %cst_153 {dimension_numbers = #tpu.dot_dimension_numbers<[1], [0], [0], [1], [0, 0, 1, 1], [], []>} : vector<64x64xf32>, vector<64x32xf32>, vector<64x32xf32> -> vector<64x32xf32>
    %c664 = arith.constant 664 : index
    %c0_154 = arith.constant 0 : index
    %406 = vector.load %arg1[%c664, %c0_154] : memref<1072x128xf32, #tpu.memory_space<vmem>>, vector<1x32xf32>
    %407 = vector.broadcast %406 : vector<1x32xf32> to vector<64x32xf32>
    %408 = arith.addf %405, %407 : vector<64x32xf32>
    %409 = arith.addf %396, %408 : vector<64x32xf32>
    %c704 = arith.constant 704 : index
    %c0_155 = arith.constant 0 : index
    %410 = vector.load %arg1[%c704, %c0_155] : memref<1072x128xf32, #tpu.memory_space<vmem>>, vector<1x32xf32>
    %c712 = arith.constant 712 : index
    %c0_156 = arith.constant 0 : index
    %411 = vector.load %arg1[%c712, %c0_156] : memref<1072x128xf32, #tpu.memory_space<vmem>>, vector<1x32xf32>
    %cst_157 = arith.constant dense<0.000000e+00> : vector<64xf32>
    %412 = vector.multi_reduction <add>, %409, %cst_157 [1] : vector<64x32xf32> to vector<64xf32>
    %413 = vector.shape_cast %412 : vector<64xf32> to vector<64x1xf32>
    %cst_158 = arith.constant 3.200000e+01 : f32
    %414 = vector.broadcast %cst_158 : f32 to vector<64x1xf32>
    %415 = arith.divf %413, %414 : vector<64x1xf32>
    %416 = vector.broadcast %415 : vector<64x1xf32> to vector<64x32xf32>
    %417 = arith.subf %409, %416 : vector<64x32xf32>
    %418 = arith.mulf %417, %417 : vector<64x32xf32>
    %cst_159 = arith.constant dense<0.000000e+00> : vector<64xf32>
    %419 = vector.multi_reduction <add>, %418, %cst_159 [1] : vector<64x32xf32> to vector<64xf32>
    %420 = vector.shape_cast %419 : vector<64xf32> to vector<64x1xf32>
    %cst_160 = arith.constant 3.200000e+01 : f32
    %421 = vector.broadcast %cst_160 : f32 to vector<64x1xf32>
    %422 = arith.divf %420, %421 : vector<64x1xf32>
    %423 = vector.broadcast %415 : vector<64x1xf32> to vector<64x32xf32>
    %424 = arith.subf %409, %423 : vector<64x32xf32>
    %cst_161 = arith.constant 9.99999974E-6 : f32
    %425 = vector.broadcast %cst_161 : f32 to vector<64x1xf32>
    %426 = arith.addf %422, %425 : vector<64x1xf32>
    %427 = math.rsqrt %426 : vector<64x1xf32>
    %428 = vector.broadcast %427 : vector<64x1xf32> to vector<64x32xf32>
    %429 = arith.mulf %424, %428 : vector<64x32xf32>
    %430 = vector.broadcast %410 : vector<1x32xf32> to vector<64x32xf32>
    %431 = arith.mulf %429, %430 : vector<64x32xf32>
    %432 = vector.broadcast %411 : vector<1x32xf32> to vector<64x32xf32>
    %433 = arith.addf %431, %432 : vector<64x32xf32>
    %c720 = arith.constant 720 : index
    %c0_162 = arith.constant 0 : index
    %434 = vector.load %arg1[%c720, %c0_162] : memref<1072x128xf32, #tpu.memory_space<vmem>>, vector<32x16xf32>
    %cst_163 = arith.constant dense<0.000000e+00> : vector<64x16xf32>
    %435 = tpu.matmul %433, %434, %cst_163 {dimension_numbers = #tpu.dot_dimension_numbers<[1], [0], [0], [1], [0, 0, 1, 1], [], []>} : vector<64x32xf32>, vector<32x16xf32>, vector<64x16xf32> -> vector<64x16xf32>
    %c752 = arith.constant 752 : index
    %c0_164 = arith.constant 0 : index
    %436 = vector.load %arg1[%c752, %c0_164] : memref<1072x128xf32, #tpu.memory_space<vmem>>, vector<1x16xf32>
    %437 = vector.broadcast %436 : vector<1x16xf32> to vector<64x16xf32>
    %438 = arith.addf %435, %437 : vector<64x16xf32>
    %cst_165 = arith.constant 0.000000e+00 : f32
    %439 = vector.broadcast %cst_165 : f32 to vector<64x16xf32>
    %440 = arith.maximumf %438, %439 : vector<64x16xf32>
    %c760 = arith.constant 760 : index
    %c0_166 = arith.constant 0 : index
    %441 = vector.load %arg1[%c760, %c0_166] : memref<1072x128xf32, #tpu.memory_space<vmem>>, vector<16x4xf32>
    %cst_167 = arith.constant dense<0.000000e+00> : vector<64x4xf32>
    %442 = tpu.matmul %440, %441, %cst_167 {dimension_numbers = #tpu.dot_dimension_numbers<[1], [0], [0], [1], [0, 0, 1, 1], [], []>} : vector<64x16xf32>, vector<16x4xf32>, vector<64x4xf32> -> vector<64x4xf32>
    %c776 = arith.constant 776 : index
    %c0_168 = arith.constant 0 : index
    %443 = vector.load %arg1[%c776, %c0_168] : memref<1072x128xf32, #tpu.memory_space<vmem>>, vector<1x4xf32>
    %444 = vector.broadcast %443 : vector<1x4xf32> to vector<64x4xf32>
    %445 = arith.addf %442, %444 : vector<64x4xf32>
    %c1064 = arith.constant 1064 : index
    %c0_169 = arith.constant 0 : index
    %446 = vector.load %arg1[%c1064, %c0_169] : memref<1072x128xf32, #tpu.memory_space<vmem>>, vector<8x64xf32>
    %cst_170 = arith.constant dense<0.000000e+00> : vector<8x32xf32>
    %447 = tpu.matmul %446, %433, %cst_170 {dimension_numbers = #tpu.dot_dimension_numbers<[1], [0], [0], [1], [0, 0, 1, 1], [], []>} : vector<8x64xf32>, vector<64x32xf32>, vector<8x32xf32> -> vector<8x32xf32>
    %c784 = arith.constant 784 : index
    %c0_171 = arith.constant 0 : index
    %448 = vector.load %arg1[%c784, %c0_171] : memref<1072x128xf32, #tpu.memory_space<vmem>>, vector<32x8xf32>
    %cst_172 = arith.constant dense<0.000000e+00> : vector<8x8xf32>
    %449 = tpu.matmul %447, %448, %cst_172 {dimension_numbers = #tpu.dot_dimension_numbers<[1], [0], [0], [1], [0, 0, 1, 1], [], []>} : vector<8x32xf32>, vector<32x8xf32>, vector<8x8xf32> -> vector<8x8xf32>
    %c816 = arith.constant 816 : index
    %c0_173 = arith.constant 0 : index
    %450 = vector.load %arg1[%c816, %c0_173] : memref<1072x128xf32, #tpu.memory_space<vmem>>, vector<1x8xf32>
    %451 = vector.broadcast %450 : vector<1x8xf32> to vector<8x8xf32>
    %452 = arith.addf %449, %451 : vector<8x8xf32>
    %cst_174 = arith.constant 0.000000e+00 : f32
    %453 = vector.broadcast %cst_174 : f32 to vector<8x8xf32>
    %454 = arith.maximumf %452, %453 : vector<8x8xf32>
    %c824 = arith.constant 824 : index
    %c0_175 = arith.constant 0 : index
    %455 = vector.load %arg1[%c824, %c0_175] : memref<1072x128xf32, #tpu.memory_space<vmem>>, vector<8x1xf32>
    %cst_176 = arith.constant dense<0.000000e+00> : vector<8x1xf32>
    %456 = tpu.matmul %454, %455, %cst_176 {dimension_numbers = #tpu.dot_dimension_numbers<[1], [0], [0], [1], [0, 0, 1, 1], [], []>} : vector<8x8xf32>, vector<8x1xf32>, vector<8x1xf32> -> vector<8x1xf32>
    %c832 = arith.constant 832 : index
    %c0_177 = arith.constant 0 : index
    %457 = vector.load %arg1[%c832, %c0_177] : memref<1072x128xf32, #tpu.memory_space<vmem>>, vector<1x1xf32>
    %458 = vector.broadcast %457 : vector<1x1xf32> to vector<8x1xf32>
    %459 = arith.addf %456, %458 : vector<8x1xf32>
    %460 = arith.negf %459 : vector<8x1xf32>
    %461 = math.exp %460 : vector<8x1xf32>
    %cst_178 = arith.constant 1.000000e+00 : f32
    %462 = vector.broadcast %cst_178 : f32 to vector<8x1xf32>
    %463 = arith.addf %462, %461 : vector<8x1xf32>
    %464 = arith.divf %462, %463 : vector<8x1xf32>
    %cst_179 = arith.constant 0.000000e+00 : f32
    %465 = vector.broadcast %cst_179 : f32 to vector<64x40xf32>
    %c0_180 = arith.constant 0 : index
    %c0_181 = arith.constant 0 : index
    %466 = vector.load %arg2[%c0_180, %c0_181] : memref<64x40xf32, #tpu.memory_space<vmem>>, vector<64x40xf32>
    tpu.vector_store %arg2[%c0_180, %c0_181], %465 {strides = array<i32>} : memref<64x40xf32, #tpu.memory_space<vmem>>, vector<64x40xf32>,
    %c0_182 = arith.constant 0 : index
    %c0_183 = arith.constant 0 : index
    %467 = vector.load %arg2[%c0_182, %c0_183] : memref<64x40xf32, #tpu.memory_space<vmem>>, vector<64x32xf32>
    tpu.vector_store %arg2[%c0_182, %c0_183], %433 {strides = array<i32>} : memref<64x40xf32, #tpu.memory_space<vmem>>, vector<64x32xf32>,
    %c0_184 = arith.constant 0 : index
    %c32_185 = arith.constant 32 : index
    %468 = vector.load %arg2[%c0_184, %c32_185] : memref<64x40xf32, #tpu.memory_space<vmem>>, vector<64x4xf32>
    tpu.vector_store %arg2[%c0_184, %c32_185], %445 {strides = array<i32>} : memref<64x40xf32, #tpu.memory_space<vmem>>, vector<64x4xf32>,
    %c0_186 = arith.constant 0 : index
    %c36 = arith.constant 36 : index
    %469 = vector.load %arg2[%c0_186, %c36] : memref<64x40xf32, #tpu.memory_space<vmem>>, vector<8x1xf32>
    tpu.vector_store %arg2[%c0_186, %c36], %464 {strides = array<i32>} : memref<64x40xf32, #tpu.memory_space<vmem>>, vector<8x1xf32>,
    return
  }
}

</mosaic_0001>

<bundles_post_ra>
// kernel: squeeze.1
= control target key start
LH: loop header
LB: loop body
LE: loop exit
PB: predicated region body
PF: predicated region fallthrough
CT: control target
= control target key end

     0   :  { %s80_s0 = inlined_call_operand.vmem [shape: f32[8], index: 0, kind: input, shape index: {}]   ;;  %s81_s1 = inlined_call_operand.hbm [shape: f32[2,4], index: 1, kind: output, shape index: {}]  }
   0x1   :  { %v5_v0 = vld [vmem:[%s80_s0] sm:$0x1] }
   0x2   :  { %2 = vsyncpa [#allocation1], 0  ;;  %6 = vst [vmem:[#allocation3] sm:$0x1] %v5_v0  ;;  %vm8_vm0 = vcmask 31744   ;;  %s62_s0 = smov 124  }
   0x3   :  { %s63_s8 = smov [#allocation0]   ;;  %s27_s1 = sshll.u32 %s81_s1, 4  ;;  %s28_s1 = int_to_ptr.hbm [resolvable:$true] %s27_s1 }
   0x4   :  { %s25_s9 = sshll.u32 %s63_s8, 4  ;;  %s26_s9 = int_to_ptr.vmem [resolvable:$true] %s25_s9 }
   0x9   :  { %v10_v1 = vld [vmem:[#allocation3] sm:$0x1]  }
   0xa   :  { %v7_v2 = vld [vmem:[#allocation3] sm:$0x1]   ;;  %11 = vrot.lane.b32.xlu0 %v10_v1, %s62_s0 }
   0xb   :  { %9 = vst.msk [vmem:[#allocation2] sm:$0x1] %vm8_vm0, %v7_v2  }
  0x7c   :  { %v12_v3 = vpop.permute.xlu0 %11  }
  0x7d   :  { %15 = vst.msk [vmem:[#allocation2 + $0x1] sm:$0x1] %vm8_vm0, %v12_v3  }
  0x84   :  { %v18_v4 = vld [vmem:[#allocation2] sm:$0x3] }
  0x85   :  { %21 = vst [vmem:[#allocation0] sm:$0x3] %v18_v4 }
  0x86   :  { %30 = dma.vmem_to_hbm [thread:$0]  %s26_s9, 32, %s28_s1, [#allocation1]  }
  0x87   :  { %60 = dma.done.wait [#allocation1], 32  }
  0x88   :  { %61 = vsyncadd [#allocation1], 4294967264 }
  0x89   :  { %33 = vsyncpa [#allocation1], 1 }

// kernel: motion_decoder_forward.1
= control target key start
LH: loop header
LB: loop body
LE: loop exit
PB: predicated region body
PF: predicated region fallthrough
CT: control target
= control target key end

     0   :  { %7 = vsyncpa [#allocation4], 0  ;;  %s7864_s0 = inlined_call_operand.hbm [shape: f32[16,32], index: 0, kind: input, shape index: {}]   ;;  %s7865_s1 = inlined_call_operand.hbm [shape: f32[1072,128], index: 1, kind: input, shape index: {}]   ;;  %s7866_s2 = inlined_call_operand.vmem [shape: f32[64,40], index: 2, kind: output, shape index: {}]  }
   0x1   :  { %s13_s11 = sshll.u32 %s7864_s0, 4  ;;  %s14_s11 = int_to_ptr.hbm [resolvable:$true] %s13_s11 }
   0x2   :  { %8 = vsyncpa [#allocation6], 0  ;;  %s5677_s12 = smov [#allocation3]   ;;  %s26_s16 = sshll.u32 %s7865_s1, 4  ;;  %s27_s16 = int_to_ptr.hbm [resolvable:$true] %s26_s16 }
   0x3   :  { %s15_s13 = sshll.u32 %s5677_s12, 4  ;;  %s5678_s17 = smov 128   ;;  %s16_s13 = int_to_ptr.vmem [resolvable:$true] %s15_s13 }
   0x4   :  { %s5679_s18 = smov 8   ;;  %s5680_s19 = smov [#allocation5]  }
   0x5   :  { %21 = dma.hbm_to_vmem [thread:$0]  %s14_s11, 256, %s16_s13, [#allocation4], %s5678_s17, %s5678_s17, %s5679_s18  }
   0x6   :  { %s28_s20 = sshll.u32 %s5680_s19, 4  ;;  %s29_s20 = int_to_ptr.vmem [resolvable:$true] %s28_s20 }
   0x7   :  { %34 = dma.hbm_to_vmem [thread:$0]  %s27_s16, 17152, %s29_s20, [#allocation6], %s5678_s17, %s5678_s17, %s5679_s18  }
   0x8   :  { %5673 = dma.done.wait [#allocation4], 256  }
   0x9   :  { %5674 = vsyncadd [#allocation4], 4294967040 }
   0xa   :  { %5675 = dma.done.wait [#allocation6], 17152  }
   0xb   :  { %5676 = vsyncadd [#allocation6], 4294950144  ;;  %v76_v0 = vld [vmem:[#allocation5 + $0x18] sm:$0xff]  ;;  %v5708_v1 = vld [vmem:[#allocation5 + $0x400] sm:$0xff]  ;;  %s5681_s0 = smov 32   ;;  %vm79_vm0 = vcmask 261120  }
   0xc   :  { %v75_v2 = vld [vmem:[#allocation5 + $0x10] sm:$0xff]  ;;  %116 = vmatpush.msra.mxu0 %v76_v0  ;;  %196 = vrot.lane.b32.xlu0 %v5708_v1, %s5681_s0  ;;  %v74_v4 = vld [vmem:[#allocation5 + $0x8] sm:$0xff]  ;;  %v5717_v5 = vld [vmem:[#allocation5 + $0x3f8] sm:$0xff]  ;;  %s5682_s1 = smov 96   ;;  %s5683_s21 = smov 64  }
   0xd   :  { %v5712_v3 = vld [vmem:[#allocation5 + $0x3f0] sm:$0xff]  ;;  %532 = vmatpush.msra.mxu3 %v5708_v1  ;;  %v73_v6 = vld [vmem:[#allocation5] sm:$0xff]  ;;  %v45_v7 = vld [vmem:[#allocation5 + $0x348] sm:$0xff]  ;;  %s5686_s8 = smov 36  }
   0xe   :  { %192 = vrot.lane.b32.xlu1 %v5712_v3, %s5681_s0  ;;  %117 = vmatpush.msra.mxu0 %v75_v2  ;;  %v5720_v8 = vld [vmem:[#allocation5 + $0x3e8] sm:$0xff]  ;;  %v46_v9 = vld [vmem:[#allocation5 + $0x350] sm:$0xff]  ;;  %v5734_v12 = vld [vmem:[#allocation5 + $0x3e0] sm:$0xff] }
   0xf   :  { %533 = vmatpush.msra.mxu3 %v5717_v5  ;;  %v5729_v10 = vld [vmem:[#allocation5 + $0x3d0] sm:$0xff]  ;;  %v5731_v11 = vld [vmem:[#allocation5 + $0x3c8] sm:$0xff]  ;;  %188 = vrot.lane.b32.xlu2 %v5734_v12, %s5681_s0  ;;  %v47_v13 = vld [vmem:[#allocation5 + $0x358] sm:$0xff] }
  0x10   :  { %118 = vmatpush.msra.mxu0 %v74_v4  ;;  %v5743_v14 = vld [vmem:[#allocation5 + $0x3b8] sm:$0xff]  ;;  %v5745_v15 = vld [vmem:[#allocation5 + $0x3b0] sm:$0xff]  ;;  %v48_v17 = vld [vmem:[#allocation5 + $0x360] sm:$0xff] }
  0x11   :  { %534 = vmatpush.msra.mxu3 %v5712_v3  ;;  %v5748_v16 = vld [vmem:[#allocation5 + $0x3d8] sm:$0xff]  ;;  %v5758_v18 = vld [vmem:[#allocation5 + $0x3a8] sm:$0xff]  ;;  %v5762_v19 = vld [vmem:[#allocation5 + $0x3c0] sm:$0xff] }
  0x12   :  { %119 = vmatpush.msra.mxu0 %v73_v6  ;;  %v49_v20 = vld [vmem:[#allocation5 + $0x368] sm:$0xff]  ;;  %v50_v21 = vld [vmem:[#allocation5 + $0x370] sm:$0xff]  ;;  %v51_v22 = vld [vmem:[#allocation5 + $0x378] sm:$0xff] }
  0x13   :  { %4813 = vmatmul.msk.f32.vlgmr.msra.gmra.mxu0 %vm79_vm0, %v45_v7  ;;  %535 = vmatpush.msra.mxu3 %v5720_v8  ;;  %v52_v23 = vld [vmem:[#allocation5 + $0x380] sm:$0xff]  ;;  %v5781_v27 = vld [vmem:[#allocation5 + $0x398] sm:$0xff]  ;;  %v5784_v28 = vld [vmem:[#allocation5 + $0x390] sm:$0xff] }
  0x14   :  { %194 = vrot.lane.b32.xlu0 %v5717_v5, %s5681_s0  ;;  %v5778_v26 = vld [vmem:[#allocation5 + $0x3a0] sm:$0xff]  ;;  %v5811_v40 = vld [vmem:[#allocation5 + $0x388] sm:$0xff] }
  0x15   :  { %536 = vmatpush.msra.mxu3 %v5734_v12  ;;  %v5787_v29 = vld [vmem:[#allocation5 + $0x20] ss:$0 sm:$0xff] }
  0x16   :  { %190 = vrot.lane.b32.xlu1 %v5720_v8, %s5681_s0 }
  0x17   :  { %186 = vrot.lane.b32.xlu2 %v5748_v16, %s5681_s0  ;;  %537 = vmatpush.msra.mxu3 %v5748_v16 }
  0x19   :  { %538 = vmatpush.msra.mxu3 %v5729_v10 }
  0x1b   :  { %4814 = vmatmul.msk.f32.gmra.mxu0 %vm79_vm0, %v46_v9  ;;  %539 = vmatpush.msra.mxu3 %v5731_v11 }
  0x1c   :  { %184 = vrot.lane.b32.xlu0 %v5729_v10, %s5681_s0 }
  0x1d   :  { %540 = vmatpush.msra.mxu3 %v5762_v19 }
  0x1e   :  { %182 = vrot.lane.b32.xlu1 %v5731_v11, %s5681_s0 }
  0x1f   :  { %180 = vrot.lane.b32.xlu2 %v5762_v19, %s5681_s0  ;;  %541 = vmatpush.msra.mxu3 %v5743_v14 }
  0x21   :  { %542 = vmatpush.msra.mxu3 %v5745_v15 }
  0x23   :  { %4815 = vmatmul.msk.f32.gmra.mxu0 %vm79_vm0, %v47_v13  ;;  %543 = vmatpush.msra.mxu3 %v5758_v18 }
  0x24   :  { %178 = vrot.lane.b32.xlu0 %v5743_v14, %s5681_s0 }
  0x25   :  { %544 = vmatpush.msra.mxu3 %v5778_v26 }
  0x26   :  { %176 = vrot.lane.b32.xlu1 %v5745_v15, %s5681_s0 }
  0x27   :  { %545 = vmatpush.msra.mxu3 %v5781_v27 }
  0x29   :  { %546 = vmatpush.msra.mxu3 %v5784_v28 }
  0x2b   :  { %4816 = vmatmul.msk.f32.gmra.mxu0 %vm79_vm0, %v48_v17  ;;  %547 = vmatpush.msra.mxu3 %v5811_v40 }
  0x2c   :  { %174 = vrot.lane.b32.xlu0 %v5758_v18, %s5681_s0 }
  0x33   :  { %4817 = vmatmul.msk.f32.gmra.mxu0 %vm79_vm0, %v49_v20 }
  0x3b   :  { %4818 = vmatmul.msk.f32.gmra.mxu0 %vm79_vm0, %v50_v21 }
  0x43   :  { %4819 = vmatmul.msk.f32.gmra.mxu0 %vm79_vm0, %v51_v22 }
  0x4b   :  { %4820 = vmatmul.msk.f32.gmra.mxu0 %vm79_vm0, %v52_v23 }
  0x69   :  { %v5798_v35 = vpop.permute.xlu2 %188 }
  0x71   :  { %v5814_v41 = vpop.permute.xlu2 %186 }
  0x79   :  { %v5829_v47 = vpop.permute.xlu2 %180 }
  0x7e   :  { %v5776_v25 = vpop.permute.xlu0 %196 }
  0x80   :  { %v5792_v32 = vpop.permute.xlu1 %192 }
  0x86   :  { %v5794_v33 = vpop.permute.xlu0 %194 }
  0x88   :  { %v5844_v52 = vpop.permute.xlu1 %190 }
  0x8e   :  { %v5806_v39 = vpop.permute.xlu0 %184 }
  0x90   :  { %v121_v24 = vpop.f32.mrf.mxu0  ;;  %v5860_v57 = vpop.permute.xlu1 %182 }
  0x91   :  { %v5840_v50 = vadd.f32 %v5787_v29, %v121_v24 }
  0x93   :  { %v226_v54 = vmul.f32 %v5844_v52, %v5840_v50  ;;  %v222_v58 = vmul.f32 %v5860_v57, %v5840_v50 }
  0x96   :  { %v5827_v46 = vpop.permute.xlu0 %178 }
  0x98   :  { %v124_v30 = vpop.f32.mrf.mxu0  ;;  %v5865_v59 = vpop.permute.xlu1 %176 }
  0x99   :  { %v5790_v31 = vadd.f32 %v5787_v29, %v124_v30 }
  0x9b   :  { %v227_v34 = vmul.f32 %v5792_v32, %v5790_v31  ;;  %v223_v53 = vmul.f32 %v5806_v39, %v5790_v31  ;;  %v219_v60 = vmul.f32 %v5865_v59, %v5790_v31 }
  0x9d   :  { %336 = vrot.lane.b32.xlu0 %v227_v34, %s5682_s1 }
  0x9e   :  { %v5842_v51 = vpop.permute.xlu0 %174 }
  0x9f   :  { %v218_v55 = vmul.f32 %v5842_v51, %v5840_v50 }
  0xa0   :  { %v127_v36 = vpop.f32.mrf.mxu0 }
  0xa1   :  { %v5802_v37 = vadd.f32 %v5787_v29, %v127_v36 }
  0xa3   :  { %v228_v38 = vmul.f32 %v5794_v33, %v5802_v37  ;;  %v224_v45 = vmul.f32 %v5814_v41, %v5802_v37  ;;  %v220_v56 = vmul.f32 %v5827_v46, %v5802_v37 }
  0xa5   :  { %338 = vrot.lane.b32.xlu1 %v228_v38, %s5682_s1  ;;  %168 = vrot.lane.b32.xlu0 %v5784_v28, %s5681_s0 }
  0xa8   :  { %v130_v42 = vpop.f32.mrf.mxu0 }
  0xa9   :  { %v5817_v43 = vadd.f32 %v5787_v29, %v130_v42 }
  0xab   :  { %v229_v44 = vmul.f32 %v5776_v25, %v5817_v43  ;;  %v225_v48 = vmul.f32 %v5798_v35, %v5817_v43  ;;  %v221_v49 = vmul.f32 %v5829_v47, %v5817_v43 }
  0xad   :  { %340 = vrot.lane.b32.xlu2 %v229_v44, %s5682_s1  ;;  %170 = vrot.lane.b32.xlu1 %v5781_v27, %s5681_s0 }
  0xae   :  { %330 = vrot.lane.b32.xlu0 %v224_v45, %s5682_s1 }
  0xb0   :  { %v133_v2 = vpop.f32.mrf.mxu0 }
  0xb1   :  { %v5883_v13 = vadd.f32 %v5787_v29, %v133_v2 }
  0xb3   :  { %v593_v17 = vmul.f32 %v5860_v57, %v5883_v13 }
  0xb5   :  { %172 = vrot.lane.b32.xlu2 %v5778_v26, %s5681_s0  ;;  %332 = vrot.lane.b32.xlu1 %v225_v48, %s5682_s1 }
  0xb6   :  { %324 = vrot.lane.b32.xlu0 %v221_v49, %s5682_s1 }
  0xb8   :  { %v136_v20 = vpop.f32.mrf.mxu0 }
  0xb9   :  { %v5901_v30 = vadd.f32 %v5787_v29, %v136_v20 }
  0xbb   :  { %v590_v34 = vmul.f32 %v5865_v59, %v5901_v30 }
  0xbd   :  { %328 = vrot.lane.b32.xlu1 %v223_v53, %s5682_s1  ;;  %334 = vrot.lane.b32.xlu2 %v226_v54, %s5682_s1  ;;  %v597_v54 = vmul.f32 %v5844_v52, %v5883_v13 }
  0xbe   :  { %318 = vrot.lane.b32.xlu0 %v218_v55, %s5682_s1 }
  0xc0   :  { %v139_v38 = vpop.f32.mrf.mxu0 }
  0xc1   :  { %v5912_v44 = vadd.f32 %v5787_v29, %v139_v38 }
  0xc3   :  { %v599_v48 = vmul.f32 %v5794_v33, %v5912_v44  ;;  %v591_v55 = vmul.f32 %v5827_v46, %v5912_v44  ;;  %v595_v2 = vmul.f32 %v5814_v41, %v5912_v44 }
  0xc5   :  { %322 = vrot.lane.b32.xlu1 %v220_v56, %s5682_s1  ;;  %166 = vrot.lane.b32.xlu2 %v5811_v40, %s5681_s0  ;;  %v598_v56 = vmul.f32 %v5792_v32, %v5901_v30 }
  0xcd   :  { %326 = vrot.lane.b32.xlu2 %v222_v58, %s5682_s1 }
  0xd5   :  { %320 = vrot.lane.b32.xlu2 %v219_v60, %s5682_s1 }
 0x107   :  { %v341_v61 = vpop.permute.xlu2 %340 }
 0x108   :  { %4821 = vmatpush.xpose.msk.msra.mxu1 %vm79_vm0, %v341_v61  ;;  %v594_v61 = vmul.f32 %v5806_v39, %v5901_v30 }
 0x10f   :  { %v5871_v62 = vpop.permute.xlu2 %172  ;;  %v337_v63 = vpop.permute.xlu0 %336 }
 0x110   :  { %v217_v0 = vmul.f32 %v5871_v62, %v5817_v43 }
 0x112   :  { %316 = vrot.lane.b32.xlu1 %v217_v0, %s5682_s1  ;;  %v142_v0 = vpop.f32.mrf.mxu0 }
 0x117   :  { %v339_v4 = vpop.permute.xlu1 %338  ;;  %v5876_v6 = vpop.permute.xlu0 %168 }
 0x118   :  { %v335_v7 = vpop.permute.xlu2 %334  ;;  %4822 = vmatpush.xpose.msk.msra.mxu1 %vm79_vm0, %v339_v4  ;;  %v215_v9 = vmul.f32 %v5876_v6, %v5790_v31  ;;  %v586_v20 = vmul.f32 %v5876_v6, %v5901_v30 }
 0x11a   :  { %312 = vrot.lane.b32.xlu0 %v215_v9, %s5682_s1 }
 0x11c   :  { %4823 = vmatpush.xpose.msk.msra.mxu1 %vm79_vm0, %v337_v63  ;;  %v589_v63 = vmul.f32 %v5842_v51, %v5883_v13 }
 0x11f   :  { %v5888_v21 = vpop.permute.xlu1 %170 }
 0x120   :  { %v5890_v22 = vpop.permute.xlu2 %166  ;;  %4824 = vmatpush.xpose.msk.msra.mxu1 %vm79_vm0, %v335_v7  ;;  %v216_v23 = vmul.f32 %v5888_v21, %v5802_v37  ;;  %v331_v42 = vpop.permute.xlu0 %330  ;;  %v5946_v7 = vadd.f32 %v5787_v29, %v142_v0 }
 0x121   :  { %v214_v24 = vmul.f32 %v5890_v22, %v5840_v50  ;;  %v585_v29 = vmul.f32 %v5890_v22, %v5883_v13 }
 0x122   :  { %314 = vrot.lane.b32.xlu2 %v216_v23, %s5682_s1  ;;  %649 = vrot.lane.b32.xlu0 %v593_v17, %s5682_s1  ;;  %v600_v9 = vmul.f32 %v5776_v25, %v5946_v7  ;;  %v587_v17 = vmul.f32 %v5888_v21, %v5912_v44  ;;  %v596_v23 = vmul.f32 %v5798_v35, %v5946_v7 }
 0x123   :  { %310 = vrot.lane.b32.xlu1 %v214_v24, %s5682_s1  ;;  %v588_v24 = vmul.f32 %v5871_v62, %v5946_v7 }
 0x127   :  { %v333_v36 = vpop.permute.xlu1 %332 }
 0x128   :  { %4825 = vmatpush.xpose.msk.msra.mxu1 %vm79_vm0, %v333_v36  ;;  %v327_v49 = vpop.permute.xlu2 %326  ;;  %v325_v53 = vpop.permute.xlu0 %324 }
 0x12a   :  { %260 = vrot.lane.b32.xlu2 %v5708_v1, %s5683_s21  ;;  %643 = vrot.lane.b32.xlu0 %v590_v34, %s5682_s1 }
 0x12b   :  { %258 = vrot.lane.b32.xlu1 %v5717_v5, %s5683_s21 }
 0x12c   :  { %4826 = vmatpush.xpose.msk.msra.mxu1 %vm79_vm0, %v331_v42 }
 0x12f   :  { %v329_v45 = vpop.permute.xlu1 %328 }
 0x130   :  { %4827 = vmatpush.xpose.msk.msra.mxu1 %vm79_vm0, %v329_v45  ;;  %v321_v60 = vpop.permute.xlu2 %320  ;;  %v319_v4 = vpop.permute.xlu0 %318 }
 0x132   :  { %256 = vrot.lane.b32.xlu2 %v5712_v3, %s5683_s21  ;;  %661 = vrot.lane.b32.xlu0 %v599_v48, %s5682_s1 }
 0x133   :  { %254 = vrot.lane.b32.xlu1 %v5720_v8, %s5683_s21 }
 0x134   :  { %4828 = vmatpush.xpose.msk.msra.mxu1 %vm79_vm0, %v327_v49 }
 0x137   :  { %v323_v58 = vpop.permute.xlu1 %322 }
 0x138   :  { %4829 = vmatpush.xpose.msk.msra.mxu1 %vm79_vm0, %v325_v53 }
 0x13a   :  { %657 = vrot.lane.b32.xlu2 %v597_v54, %s5682_s1  ;;  %645 = vrot.lane.b32.xlu0 %v591_v55, %s5682_s1 }
 0x13b   :  { %659 = vrot.lane.b32.xlu1 %v598_v56, %s5682_s1 }
 0x13c   :  { %4830 = vmatpush.xpose.msk.msra.mxu1 %vm79_vm0, %v323_v58 }
 0x140   :  { %4831 = vmatpush.xpose.msk.msra.mxu1 %vm79_vm0, %v321_v60 }
 0x142   :  { %651 = vrot.lane.b32.xlu2 %v594_v61, %s5682_s1  ;;  %641 = vrot.lane.b32.xlu0 %v589_v63, %s5682_s1  ;;  %v592_v63 = vmul.f32 %v5829_v47, %v5946_v7 }
 0x143   :  { %653 = vrot.lane.b32.xlu1 %v595_v2, %s5682_s1 }
 0x144   :  { %4832 = vmatpush.xpose.msk.msra.mxu1 %vm79_vm0, %v319_v4 }
 0x14a   :  { %663 = vrot.lane.b32.xlu2 %v600_v9, %s5682_s1  ;;  %637 = vrot.lane.b32.xlu0 %v587_v17, %s5682_s1 }
 0x14b   :  { %250 = vrot.lane.b32.xlu1 %v5748_v16, %s5683_s21 }
 0x152   :  { %252 = vrot.lane.b32.xlu2 %v5734_v12, %s5683_s21  ;;  %635 = vrot.lane.b32.xlu0 %v586_v20, %s5682_s1 }
 0x153   :  { %246 = vrot.lane.b32.xlu1 %v5731_v11, %s5683_s21 }
 0x15a   :  { %248 = vrot.lane.b32.xlu2 %v5729_v10, %s5683_s21  ;;  %633 = vrot.lane.b32.xlu0 %v585_v29, %s5682_s1 }
 0x15b   :  { %242 = vrot.lane.b32.xlu1 %v5743_v14, %s5683_s21 }
 0x162   :  { %244 = vrot.lane.b32.xlu2 %v5762_v19, %s5683_s21  ;;  %655 = vrot.lane.b32.xlu0 %v596_v23, %s5682_s1 }
 0x163   :  { %238 = vrot.lane.b32.xlu1 %v5758_v18, %s5683_s21 }
 0x16a   :  { %240 = vrot.lane.b32.xlu2 %v5745_v15, %s5683_s21  ;;  %230 = vrot.lane.b32.xlu0 %v5811_v40, %s5683_s21 }
 0x16b   :  { %234 = vrot.lane.b32.xlu1 %v5781_v27, %s5683_s21 }
 0x172   :  { %236 = vrot.lane.b32.xlu2 %v5778_v26, %s5683_s21  ;;  %639 = vrot.lane.b32.xlu0 %v588_v24, %s5682_s1 }
 0x17a   :  { %232 = vrot.lane.b32.xlu2 %v5784_v28, %s5683_s21 }
 0x17c   :  { %v315_v34 = vpop.permute.xlu2 %314 }
 0x184   :  { %v317_v36 = vpop.permute.xlu1 %316  ;;  %v5991_v38 = vpop.permute.xlu2 %260 }
 0x185   :  { %7879 = vst [vmem:[#allocation9_spill] sm:$0xff] %v5991_v38  ;;  %4833 = vmatpush.xpose.msk.msra.mxu1 %vm79_vm0, %v317_v36  ;;  %v293_v60 = vmul.f32 %v5991_v38, %v5817_v43 }
 0x189   :  { %4834 = vmatpush.xpose.msk.msra.mxu1 %vm79_vm0, %v315_v34 }
 0x18c   :  { %v5995_v42 = vpop.permute.xlu2 %256  ;;  %v313_v45 = vpop.permute.xlu0 %312 }
 0x18d   :  { %4835 = vmatpush.xpose.msk.msra.mxu1 %vm79_vm0, %v313_v45 }
 0x194   :  { %v658_v48 = vpop.permute.xlu2 %657  ;;  %v5998_v49 = vpop.permute.xlu0 %649 }
 0x195   :  { %v311_v53 = vpop.permute.xlu1 %310 }
 0x196   :  { %4836 = vmatpush.xpose.msk.msra.mxu1 %vm79_vm0, %v311_v53 }
 0x199   :  { %4837 = vmatmul.msk.f32.vlgmr.msra.gmra.mxu1 %vm79_vm0, %v5840_v50 }
 0x19a   :  { %855 = vmatpush.msrb.mxu1 %v5708_v1 }
 0x19c   :  { %856 = vmatpush.msrb.mxu1 %v5717_v5  ;;  %v6005_v54 = vpop.permute.xlu2 %651  ;;  %v6007_v55 = vpop.permute.xlu0 %643 }
 0x19d   :  { %v6010_v56 = vpop.permute.xlu1 %258 }
 0x19e   :  { %857 = vmatpush.msrb.mxu1 %v5712_v3  ;;  %7880 = vst [vmem:[#allocation10_spill] sm:$0xff] %v6010_v56  ;;  %v292_v58 = vmul.f32 %v6010_v56, %v5802_v37 }
 0x1a0   :  { %858 = vmatpush.msrb.mxu1 %v5720_v8  ;;  %v5107_v1 = vpack.i.bf16 %v292_v58, %v293_v60 }
 0x1a1   :  { %4838 = vmatmul.msk.f32.gmra.mxu1 %vm79_vm0, %v5790_v31 }
 0x1a2   :  { %859 = vmatpush.msrb.mxu1 %v5734_v12  ;;  %5108 = vrot.lane.b32.xlu1 %v5107_v1, %s5683_s21  ;;  %v291_v12 = vmul.f32 %v5995_v42, %v5790_v31 }
 0x1a4   :  { %860 = vmatpush.msrb.mxu1 %v5748_v16  ;;  %v664_v3 = vpop.permute.xlu2 %663  ;;  %v662_v5 = vpop.permute.xlu0 %661 }
 0x1a5   :  { %v6023_v61 = vpop.permute.xlu1 %254  ;;  %4841 = vmatpush.xpose.msk.msrb.mxu0 %vm79_vm0, %v664_v3 }
 0x1a6   :  { %861 = vmatpush.msrb.mxu1 %v5729_v10  ;;  %v290_v8 = vmul.f32 %v6023_v61, %v5840_v50 }
 0x1a8   :  { %862 = vmatpush.msrb.mxu1 %v5731_v11  ;;  %v5112_v16 = vpack.i.bf16 %v290_v8, %v291_v12 }
 0x1a9   :  { %4839 = vmatmul.msk.f32.gmra.mxu1 %vm79_vm0, %v5802_v37  ;;  %4842 = vmatpush.xpose.msk.msrb.mxu0 %vm79_vm0, %v662_v5 }
 0x1aa   :  { %863 = vmatpush.msrb.mxu1 %v5762_v19  ;;  %647 = vrot.lane.b32.xlu1 %v592_v63, %s5682_s1 }
 0x1ab   :  { %5113 = vrot.lane.b32.xlu2 %v5112_v16, %s5683_s21 }
 0x1ac   :  { %864 = vmatpush.msrb.mxu1 %v5743_v14  ;;  %v6040_v10 = vpop.permute.xlu0 %645  ;;  %v6052_v14 = vpop.permute.xlu2 %252 }
 0x1ad   :  { %v660_v11 = vpop.permute.xlu1 %659  ;;  %7881 = vst [vmem:[#allocation11_spill] sm:$0xff] %v6052_v14  ;;  %v289_v4 = vmul.f32 %v6052_v14, %v5817_v43 }
 0x1ae   :  { %865 = vmatpush.msrb.mxu1 %v5745_v15  ;;  %4843 = vmatpush.xpose.msk.msrb.mxu0 %vm79_vm0, %v660_v11 }
 0x1b0   :  { %866 = vmatpush.msrb.mxu1 %v5758_v18 }
 0x1b1   :  { %4840 = vmatmul.msk.f32.gmra.mxu1 %vm79_vm0, %v5817_v43 }
 0x1b2   :  { %4844 = vmatpush.xpose.msk.msrb.mxu0 %vm79_vm0, %v658_v48  ;;  %867 = vmatpush.msrb.mxu1 %v5778_v26 }
 0x1b4   :  { %v6049_v19 = vpop.permute.xlu0 %641  ;;  %868 = vmatpush.msrb.mxu1 %v5781_v27  ;;  %v6064_v9 = vpop.permute.xlu2 %248 }
 0x1b5   :  { %v654_v0 = vpop.permute.xlu1 %653  ;;  %v287_v24 = vmul.f32 %v6064_v9, %v5790_v31 }
 0x1b6   :  { %869 = vmatpush.msrb.mxu1 %v5784_v28 }
 0x1b8   :  { %870 = vmatpush.msrb.mxu1 %v5811_v40 }
 0x1bc   :  { %v6056_v15 = vpop.permute.xlu0 %637  ;;  %v6075_v36 = vpop.permute.xlu2 %244 }
 0x1bd   :  { %v6058_v18 = vpop.permute.xlu1 %250  ;;  %7883 = vst [vmem:[#allocation13_spill] sm:$0xff] %v6075_v36  ;;  %v285_v58 = vmul.f32 %v6075_v36, %v5817_v43 }
 0x1be   :  { %7882 = vst [vmem:[#allocation12_spill] sm:$0xff] %v6058_v18  ;;  %v288_v2 = vmul.f32 %v6058_v18, %v5802_v37 }
 0x1c0   :  { %v5117_v17 = vpack.i.bf16 %v288_v2, %v289_v4 }
 0x1c2   :  { %5118 = vrot.lane.b32.xlu1 %v5117_v17, %s5683_s21 }
 0x1c4   :  { %v6067_v20 = vpop.permute.xlu0 %635  ;;  %v6087_v1 = vpop.permute.xlu2 %240 }
 0x1c5   :  { %v6069_v29 = vpop.permute.xlu1 %246  ;;  %v283_v12 = vmul.f32 %v6087_v1, %v5790_v31 }
 0x1c6   :  { %v286_v23 = vmul.f32 %v6069_v29, %v5840_v50 }
 0x1c8   :  { %v5122_v34 = vpack.i.bf16 %v286_v23, %v287_v24 }
 0x1ca   :  { %5123 = vrot.lane.b32.xlu2 %v5122_v34, %s5683_s21 }
 0x1cc   :  { %v6078_v45 = vpop.permute.xlu0 %633  ;;  %v6102_v16 = vpop.permute.xlu2 %236 }
 0x1cd   :  { %v6080_v48 = vpop.permute.xlu1 %242 }
 0x1ce   :  { %7884 = vst [vmem:[#allocation14_spill] sm:$0xff] %v6080_v48  ;;  %v284_v53 = vmul.f32 %v6080_v48, %v5802_v37 }
 0x1d0   :  { %v5127_v60 = vpack.i.bf16 %v284_v53, %v285_v58 }
 0x1d2   :  { %5128 = vrot.lane.b32.xlu2 %v5127_v60, %s5683_s21 }
 0x1d4   :  { %v656_v3 = vpop.permute.xlu0 %655  ;;  %v6106_v2 = vpop.permute.xlu2 %232 }
 0x1d5   :  { %v6089_v5 = vpop.permute.xlu1 %238  ;;  %4845 = vmatpush.xpose.msk.msrb.mxu0 %vm79_vm0, %v656_v3 }
 0x1d6   :  { %v282_v8 = vmul.f32 %v6089_v5, %v5840_v50 }
 0x1d8   :  { %v5132_v63 = vpack.i.bf16 %v282_v8, %v283_v12 }
 0x1d9   :  { %4846 = vmatpush.xpose.msk.msrb.mxu0 %vm79_vm0, %v654_v0 }
 0x1da   :  { %5133 = vrot.lane.b32.xlu2 %v5132_v63, %s5683_s21 }
 0x1dc   :  { %v6117_v3 = vpop.permute.xlu0 %230 }
 0x1dd   :  { %4847 = vmatpush.xpose.msk.msrb.mxu0 %vm79_vm0, %v6005_v54  ;;  %v6104_v11 = vpop.permute.xlu1 %234 }
 0x1de   :  { %v280_v63 = vmul.f32 %v6104_v11, %v5802_v37 }
 0x1e1   :  { %4848 = vmatpush.xpose.msk.msrb.mxu0 %vm79_vm0, %v5998_v49 }
 0x205   :  { %v5114_v23 = vpop.permute.xlu2 %5113 }
 0x206   :  { %v5115_v54 = vunpack.i.l.bf16 %v5114_v23  ;;  %v5116_v49 = vunpack.i.h.bf16 %v5114_v23  ;;  %v640_v23 = vpop.permute.xlu0 %639 }
 0x214   :  { %v5109_v4 = vpop.permute.xlu1 %5108 }
 0x215   :  { %v5110_v17 = vunpack.i.l.bf16 %v5109_v4  ;;  %v5111_v0 = vunpack.i.h.bf16 %v5109_v4  ;;  %v281_v4 = vmul.f32 %v6102_v16, %v5817_v43  ;;  %v279_v43 = vmul.f32 %v6106_v2, %v5790_v31 }
 0x216   :  { %v403_v24 = vpop.f32.mrf.mxu1 }
 0x217   :  { %503 = vmatpush.msra.mxu2 %v5110_v17  ;;  %v6108_v34 = vmul.f32 0.35355338, %v403_v24  ;;  %v5137_v17 = vpack.i.bf16 %v280_v63, %v281_v4  ;;  %v278_v24 = vmul.f32 %v6117_v3, %v5840_v50  ;;  %v613_v50 = vmul.f32 %v6023_v61, %v5883_v13 }
 0x218   :  { %v611_v4 = vmul.f32 %v6058_v18, %v5912_v44 }
 0x219   :  { %504 = vmatpush.msra.mxu2 %v5111_v0  ;;  %419 = vmax.xlane.f32.xlu0 %v6108_v34 }
 0x21b   :  { %505 = vmatpush.msra.mxu2 %v5115_v54  ;;  %v5142_v54 = vpack.i.bf16 %v278_v24, %v279_v43 }
 0x21c   :  { %v648_v53 = vpop.permute.xlu1 %647 }
 0x21d   :  { %506 = vmatpush.msra.mxu2 %v5116_v49  ;;  %4849 = vmatpush.xpose.msk.msrb.mxu0 %vm79_vm0, %v648_v53  ;;  %v614_v53 = vmul.f32 %v5995_v42, %v5901_v30 }
 0x21e   :  { %v406_v58 = vpop.f32.mrf.mxu1 }
 0x21f   :  { %v6112_v60 = vmul.f32 0.35355338, %v406_v58 }
 0x221   :  { %421 = vmax.xlane.f32.xlu1 %v6112_v60  ;;  %4850 = vmatpush.xpose.msk.msrb.mxu0 %vm79_vm0, %v6040_v10 }
 0x224   :  { %v5124_v10 = vpop.permute.xlu2 %5123 }
 0x225   :  { %4851 = vmatpush.xpose.msk.msrb.mxu0 %vm79_vm0, %v6007_v55  ;;  %v5126_v49 = vunpack.i.h.bf16 %v5124_v10 }
 0x226   :  { %v409_v8 = vpop.f32.mrf.mxu1 }
 0x227   :  { %v6121_v12 = vmul.f32 0.35355338, %v409_v8 }
 0x229   :  { %423 = vmax.xlane.f32.xlu2 %v6121_v12  ;;  %4852 = vmatpush.xpose.msk.msrb.mxu0 %vm79_vm0, %v6049_v19 }
 0x22c   :  { %v5129_v55 = vpop.permute.xlu2 %5128 }
 0x22d   :  { %5138 = vrot.lane.b32.xlu0 %v5137_v17, %s5683_s21  ;;  %4853 = vmatpush.xpose.msk.msrb.mxu0 %vm79_vm0, %v640_v23  ;;  %v5130_v31 = vunpack.i.l.bf16 %v5129_v55  ;;  %v5131_v58 = vunpack.i.h.bf16 %v5129_v55  ;;  %v609_v23 = vmul.f32 %v6069_v29, %v5883_v13  ;;  %v610_v55 = vmul.f32 %v6064_v9, %v5901_v30 }
 0x22e   :  { %v412_v24 = vpop.f32.mrf.mxu1 }
 0x22f   :  { %v418_v43 = vmul.f32 0.35355338, %v412_v24 }
 0x231   :  { %4854 = vmatpush.xpose.msk.msrb.mxu0 %vm79_vm0, %v6056_v15  ;;  %v5125_v15 = vunpack.i.l.bf16 %v5124_v10  ;;  %v612_v10 = vmul.f32 %v6052_v14, %v5946_v7 }
 0x233   :  { %v5157_v17 = vpack.i.bf16 %v611_v4, %v612_v10 }
 0x234   :  { %v5119_v37 = vpop.permute.xlu1 %5118 }
 0x235   :  { %4855 = vmatpush.xpose.msk.msrb.mxu0 %vm79_vm0, %v6067_v20  ;;  %v5120_v19 = vunpack.i.l.bf16 %v5119_v37  ;;  %v5121_v0 = vunpack.i.h.bf16 %v5119_v37  ;;  %v5134_v20 = vpop.permute.xlu2 %5133  ;;  %v5162_v37 = vpack.i.bf16 %v609_v23, %v610_v55 }
 0x236   :  { %v5135_v8 = vunpack.i.l.bf16 %v5134_v20  ;;  %v5136_v63 = vunpack.i.h.bf16 %v5134_v20 }
 0x237   :  { %507 = vmatpush.msra.mxu2 %v5120_v19  ;;  %v605_v19 = vmul.f32 %v6089_v5, %v5883_v13 }
 0x239   :  { %508 = vmatpush.msra.mxu2 %v5121_v0  ;;  %4856 = vmatpush.xpose.msk.msrb.mxu0 %vm79_vm0, %v6078_v45  ;;  %v5152_v45 = vpack.i.bf16 %v613_v50, %v614_v53  ;;  %v606_v0 = vmul.f32 %v6087_v1, %v5901_v30 }
 0x23a   :  { %5143 = vrot.lane.b32.xlu1 %v5142_v54, %s5683_s21 }
 0x23b   :  { %509 = vmatpush.msra.mxu2 %v5125_v15  ;;  %v5172_v54 = vpack.i.bf16 %v605_v19, %v606_v0  ;;  %v603_v15 = vmul.f32 %v6104_v11, %v5912_v44 }
 0x23c   :  { %4857 = vmatmul.msk.f32.vlgmr.msrb.gmra.mxu0 %vm79_vm0, %v5883_v13 }
 0x23d   :  { %510 = vmatpush.msra.mxu2 %v5126_v49  ;;  %v604_v49 = vmul.f32 %v6102_v16, %v5946_v7 }
 0x23f   :  { %511 = vmatpush.msra.mxu2 %v5130_v31  ;;  %v5177_v50 = vpack.i.bf16 %v603_v15, %v604_v49 }
 0x241   :  { %512 = vmatpush.msra.mxu2 %v5131_v58 }
 0x242   :  { %5153 = vrot.lane.b32.xlu1 %v5152_v45, %s5683_s21 }
 0x243   :  { %513 = vmatpush.msra.mxu2 %v5135_v8 }
 0x244   :  { %4858 = vmatmul.msk.f32.gmra.mxu0 %vm79_vm0, %v5901_v30 }
 0x245   :  { %514 = vmatpush.msra.mxu2 %v5136_v63 }
 0x24a   :  { %5158 = vrot.lane.b32.xlu1 %v5157_v17, %s5683_s21 }
 0x24c   :  { %4859 = vmatmul.msk.f32.gmra.mxu0 %vm79_vm0, %v5912_v44 }
 0x252   :  { %5163 = vrot.lane.b32.xlu1 %v5162_v37, %s5683_s21 }
 0x254   :  { %4860 = vmatmul.msk.f32.gmra.mxu0 %vm79_vm0, %v5946_v7 }
 0x257   :  { %425 = vmax.xlane.f32.xlu0 %v418_v43 }
 0x25a   :  { %5173 = vrot.lane.b32.xlu1 %v5172_v54, %s5683_s21 }
 0x26b   :  { %5178 = vrot.lane.b32.xlu0 %v5177_v50, %s5683_s21 }
 0x28c   :  { %v420_v31 = vpop.xlane.xlu0 %419 }
 0x28d   :  { %v427_v20 = vsub.f32 %v6108_v34, %v420_v31 }
 0x28f   :  { %v431_v53 = vmul.f32 1.442695, %v427_v20 }
 0x291   :  { %5337 = vpow2.f32 %v431_v53 }
 0x294   :  { %v422_v58 = vpop.xlane.xlu1 %421 }
 0x295   :  { %v428_v45 = vsub.f32 %v6112_v60, %v422_v58  ;;  %v615_v58 = vmul.f32 %v6010_v56, %v5912_v44 }
 0x297   :  { %v5338_v8 = vpop.eup %5337  ;;  %v433_v63 = vmul.f32 1.442695, %v428_v45  ;;  %v616_v45 = vmul.f32 %v5991_v38, %v5946_v7 }
 0x298   :  { %548 = vmatmul.f32.vlgmr.msra.gmra.mxu3 %v5338_v8 }
 0x299   :  { %5339 = vpow2.f32 %v433_v63  ;;  %v5147_v63 = vpack.i.bf16 %v615_v58, %v616_v45 }
 0x29c   :  { %v424_v4 = vpop.xlane.xlu2 %423 }
 0x29d   :  { %v429_v10 = vsub.f32 %v6121_v12, %v424_v4 }
 0x29f   :  { %v5340_v17 = vpop.eup %5339  ;;  %v435_v23 = vmul.f32 1.442695, %v429_v10  ;;  %v5139_v55 = vpop.permute.xlu0 %5138 }
 0x2a0   :  { %551 = vmatmul.f32.gmra.mxu3 %v5340_v17  ;;  %v5140_v37 = vunpack.i.l.bf16 %v5139_v55  ;;  %v5141_v34 = vunpack.i.h.bf16 %v5139_v55  ;;  %v601_v55 = vmul.f32 %v6117_v3, %v5883_v13 }
 0x2a1   :  { %5341 = vpow2.f32 %v435_v23 }
 0x2a2   :  { %515 = vmatpush.msra.mxu2 %v5140_v37  ;;  %v602_v37 = vmul.f32 %v6106_v2, %v5901_v30 }
 0x2a4   :  { %516 = vmatpush.msra.mxu2 %v5141_v34  ;;  %v5182_v34 = vpack.i.bf16 %v601_v55, %v602_v37 }
 0x2a7   :  { %v5342_v24 = vpop.eup %5341 }
 0x2a8   :  { %554 = vmatmul.f32.gmra.mxu3 %v5342_v24 }
 0x2ac   :  { %v5144_v19 = vpop.permute.xlu1 %5143 }
 0x2ad   :  { %v5145_v60 = vunpack.i.l.bf16 %v5144_v19  ;;  %v5146_v0 = vunpack.i.h.bf16 %v5144_v19 }
 0x2af   :  { %517 = vmatpush.msra.mxu2 %v5145_v60  ;;  %v146_v60 = vld [vmem:[#allocation5 + $0x30] sm:$0xff] }
 0x2b1   :  { %518 = vmatpush.msra.mxu2 %v5146_v0  ;;  %v145_v0 = vld [vmem:[#allocation5 + $0x28] sm:$0xff] }
 0x2b2   :  { %519 = vmatmul.f32.vlgmr.msra.gmra.mxu2 %v5338_v8 }
 0x2b9   :  { %v726_v54 = vpop.f32.mrf.mxu0 }
 0x2ba   :  { %522 = vmatmul.f32.gmra.mxu2 %v5340_v17  ;;  %v738_v12 = vmul.f32 0.35355338, %v726_v54  ;;  %v608_v17 = vmul.f32 %v6075_v36, %v5946_v7  ;;  %v147_v7 = vld [vmem:[#allocation5 + $0x38] sm:$0xff]  ;;  %v5154_v54 = vpop.permute.xlu1 %5153 }
 0x2bc   :  { %742 = vmax.xlane.f32.xlu2 %v738_v12 }
 0x2c1   :  { %v729_v15 = vpop.f32.mrf.mxu0 }
 0x2c2   :  { %525 = vmatmul.f32.gmra.mxu2 %v5342_v24  ;;  %v6179_v49 = vmul.f32 0.35355338, %v729_v15  ;;  %v5159_v45 = vpop.permute.xlu1 %5158 }
 0x2c4   :  { %744 = vmax.xlane.f32.xlu1 %v6179_v49 }
 0x2c9   :  { %v732_v50 = vpop.f32.mrf.mxu0 }
 0x2ca   :  { %v426_v31 = vpop.xlane.xlu0 %425  ;;  %v6200_v24 = vmul.f32 0.35355338, %v732_v50 }
 0x2cb   :  { %v430_v20 = vsub.f32 %v418_v43, %v426_v31  ;;  %v607_v43 = vmul.f32 %v6080_v48, %v5912_v44  ;;  %v148_v44 = vld [vmem:[#allocation5 + $0x40] sm:$0xff] }
 0x2cc   :  { %953 = vmatpush.msra.mxu1 %v148_v44 }
 0x2cd   :  { %v437_v53 = vmul.f32 1.442695, %v430_v20  ;;  %v5167_v23 = vpack.i.bf16 %v607_v43, %v608_v17 }
 0x2ce   :  { %954 = vmatpush.msra.mxu1 %v147_v7 }
 0x2cf   :  { %5343 = vpow2.f32 %v437_v53 }
 0x2d0   :  { %955 = vmatpush.msra.mxu1 %v146_v60 }
 0x2d1   :  { %v735_v8 = vpop.f32.mrf.mxu0 }
 0x2d2   :  { %v6186_v4 = vmul.f32 0.35355338, %v735_v8  ;;  %956 = vmatpush.msra.mxu1 %v145_v0  ;;  %v5155_v0 = vunpack.i.l.bf16 %v5154_v54 }
 0x2d4   :  { %5148 = vrot.lane.b32.xlu2 %v5147_v63, %s5683_s21  ;;  %748 = vmax.xlane.f32.xlu0 %v6186_v4 }
 0x2d5   :  { %v5344_v10 = vpop.eup %5343 }
 0x2d6   :  { %528 = vmatmul.f32.gmra.mxu2 %v5344_v10  ;;  %557 = vmatmul.f32.gmra.mxu3 %v5344_v10 }
 0x2dc   :  { %5168 = vrot.lane.b32.xlu2 %v5167_v23, %s5683_s21 }
 0x2e4   :  { %5183 = vrot.lane.b32.xlu2 %v5182_v34, %s5683_s21 }
 0x30d   :  { %746 = vmax.xlane.f32.xlu2 %v6200_v24 }
 0x31b   :  { %v549_v19 = vpop.f32.mrf.mxu3 }
 0x31c   :  { %5345 = vrcp.f32 %v549_v19 }
 0x322   :  { %v5346_v30 = vpop.eup %5345 }
 0x323   :  { %v552_v13 = vpop.f32.mrf.mxu3  ;;  %v565_v15 = vmul.f32 %v5346_v30, %v549_v19 }
 0x324   :  { %5347 = vrcp.f32 %v552_v13 }
 0x325   :  { %v569_v50 = vsub.f32 2.0, %v565_v15 }
 0x327   :  { %v573_v10 = vmul.f32 %v5346_v30, %v569_v50  ;;  %v5156_v30 = vunpack.i.h.bf16 %v5154_v54  ;;  %v5160_v50 = vunpack.i.l.bf16 %v5159_v45 }
 0x32a   :  { %v5348_v58 = vpop.eup %5347 }
 0x32b   :  { %v555_v20 = vpop.f32.mrf.mxu3  ;;  %v566_v63 = vmul.f32 %v5348_v58, %v552_v13 }
 0x32c   :  { %5349 = vrcp.f32 %v555_v20 }
 0x32d   :  { %v570_v55 = vsub.f32 2.0, %v566_v63 }
 0x32f   :  { %v743_v31 = vpop.xlane.xlu2 %742  ;;  %v574_v60 = vmul.f32 %v5348_v58, %v570_v55 }
 0x330   :  { %v750_v53 = vsub.f32 %v738_v12, %v743_v31  ;;  %v5164_v12 = vpop.permute.xlu1 %5163 }
 0x332   :  { %v754_v8 = vmul.f32 1.442695, %v750_v53  ;;  %v5350_v34 = vpop.eup %5349 }
 0x333   :  { %v567_v7 = vmul.f32 %v5350_v34, %v555_v20  ;;  %v5165_v20 = vunpack.i.l.bf16 %v5164_v12 }
 0x334   :  { %5351 = vpow2.f32 %v754_v8  ;;  %v5161_v8 = vunpack.i.h.bf16 %v5159_v45 }
 0x335   :  { %v520_v43 = vpop.f32.mrf.mxu2  ;;  %v571_v31 = vsub.f32 2.0, %v567_v7 }
 0x336   :  { %v577_v17 = vmul.f32 %v573_v10, %v520_v43 }
 0x337   :  { %v5149_v23 = vpop.permute.xlu2 %5148  ;;  %v575_v63 = vmul.f32 %v5350_v34, %v571_v31 }
 0x338   :  { %581 = vst.msk [vmem:[#allocation2] sm:$0xff] %vm79_vm0, %v577_v17  ;;  %v5150_v37 = vunpack.i.l.bf16 %v5149_v23  ;;  %v5151_v19 = vunpack.i.h.bf16 %v5149_v23  ;;  %v5174_v43 = vpop.permute.xlu1 %5173  ;;  %v5166_v23 = vunpack.i.h.bf16 %v5164_v12 }
 0x339   :  { %v5175_v45 = vunpack.i.l.bf16 %v5174_v43  ;;  %v5176_v7 = vunpack.i.h.bf16 %v5174_v43 }
 0x33a   :  { %v5352_v44 = vpop.eup %5351  ;;  %826 = vmatpush.msrb.mxu2 %v5150_v37 }
 0x33b   :  { %871 = vmatmul.f32.vlgmr.msrb.gmra.mxu1 %v5352_v44 }
 0x33c   :  { %827 = vmatpush.msrb.mxu2 %v5151_v19  ;;  %v5179_v19 = vpop.permute.xlu0 %5178 }
 0x33d   :  { %v523_v13 = vpop.f32.mrf.mxu2 }
 0x33e   :  { %v578_v15 = vmul.f32 %v574_v60, %v523_v13  ;;  %828 = vmatpush.msrb.mxu2 %v5155_v0  ;;  %v5180_v60 = vunpack.i.l.bf16 %v5179_v19 }
 0x33f   :  { %v908_v53 = vld [vmem:[#allocation2] sm:$0xff]  ;;  %v5169_v10 = vpop.permute.xlu2 %5168 }
 0x340   :  { %582 = vst.msk [vmem:[#allocation2 + $0x8] sm:$0xff] %vm79_vm0, %v578_v15  ;;  %829 = vmatpush.msrb.mxu2 %v5156_v30  ;;  %v5170_v54 = vunpack.i.l.bf16 %v5169_v10  ;;  %v5171_v37 = vunpack.i.h.bf16 %v5169_v10  ;;  %v745_v34 = vpop.xlane.xlu1 %744  ;;  %v5181_v15 = vunpack.i.h.bf16 %v5179_v19  ;;  %v5574_v19 = vld [vmem:[#allocation5 + $0x3c8] sm:$0xff] }
 0x341   :  { %v751_v0 = vsub.f32 %v6179_v49, %v745_v34  ;;  %v5569_v49 = vld [vmem:[#allocation5 + $0x3f0] sm:$0xff]  ;;  %v5575_v34 = vld [vmem:[#allocation5 + $0x3c0] sm:$0xff] }
 0x342   :  { %830 = vmatpush.msrb.mxu2 %v5160_v50 }
 0x343   :  { %4861 = vmatmul.msk.f32.vlgmr.msra.gmra.mxu1 %vm79_vm0, %v908_v53  ;;  %v756_v31 = vmul.f32 1.442695, %v751_v0 }
 0x344   :  { %831 = vmatpush.msrb.mxu2 %v5161_v8  ;;  %v5567_v8 = vld [vmem:[#allocation5 + $0x400] sm:$0xff] }
 0x345   :  { %v526_v58 = vpop.f32.mrf.mxu2  ;;  %5353 = vpow2.f32 %v756_v31 }
 0x346   :  { %v579_v17 = vmul.f32 %v575_v63, %v526_v58  ;;  %832 = vmatpush.msrb.mxu2 %v5165_v20  ;;  %v5568_v63 = vld [vmem:[#allocation5 + $0x3f8] sm:$0xff]  ;;  %v5570_v58 = vld [vmem:[#allocation5 + $0x3e8] sm:$0xff] }
 0x347   :  { %v909_v55 = vld [vmem:[#allocation2 + $0x8] sm:$0xff]  ;;  %v5184_v12 = vpop.permute.xlu2 %5183 }
 0x348   :  { %583 = vst.msk [vmem:[#allocation2 + $0x10] sm:$0xff] %vm79_vm0, %v579_v17  ;;  %833 = vmatpush.msrb.mxu2 %v5166_v23  ;;  %v5185_v30 = vunpack.i.l.bf16 %v5184_v12  ;;  %v5186_v50 = vunpack.i.h.bf16 %v5184_v12  ;;  %v5571_v17 = vld [vmem:[#allocation5 + $0x3e0] sm:$0xff]  ;;  %v5578_v12 = vld [vmem:[#allocation5 + $0x3a8] sm:$0xff] }
 0x34a   :  { %834 = vmatpush.msrb.mxu2 %v5170_v54  ;;  %v5572_v54 = vld [vmem:[#allocation5 + $0x3d8] sm:$0xff] }
 0x34b   :  { %4862 = vmatmul.msk.f32.gmra.mxu1 %vm79_vm0, %v909_v55  ;;  %v5354_v20 = vpop.eup %5353 }
 0x34c   :  { %835 = vmatpush.msrb.mxu2 %v5171_v37  ;;  %v5573_v37 = vld [vmem:[#allocation5 + $0x3d0] sm:$0xff] }
 0x34e   :  { %836 = vmatpush.msrb.mxu2 %v5175_v45 }
 0x34f   :  { %v910_v13 = vld [vmem:[#allocation2 + $0x10] sm:$0xff] }
 0x350   :  { %837 = vmatpush.msrb.mxu2 %v5176_v7  ;;  %v5576_v7 = vld [vmem:[#allocation5 + $0x3b8] sm:$0xff] }
 0x352   :  { %838 = vmatpush.msrb.mxu2 %v5180_v60  ;;  %v5577_v60 = vld [vmem:[#allocation5 + $0x3b0] sm:$0xff] }
 0x353   :  { %4863 = vmatmul.msk.f32.gmra.mxu1 %vm79_vm0, %v910_v13 }
 0x354   :  { %839 = vmatpush.msrb.mxu2 %v5181_v15 }
 0x356   :  { %840 = vmatpush.msrb.mxu2 %v5185_v30  ;;  %v749_v30 = vpop.xlane.xlu0 %748 }
 0x358   :  { %841 = vmatpush.msrb.mxu2 %v5186_v50  ;;  %v753_v50 = vsub.f32 %v6186_v4, %v749_v30  ;;  %v5582_v30 = vld [vmem:[#allocation5 + $0x360] sm:$0xff] }
 0x359   :  { %v558_v53 = vpop.f32.mrf.mxu3  ;;  %842 = vmatmul.f32.vlgmr.msrb.gmra.mxu2 %v5352_v44  ;;  %v529_v44 = vpop.f32.mrf.mxu2 }
 0x35a   :  { %5355 = vrcp.f32 %v558_v53  ;;  %5077 = vmatpush.msra.mxu2 %v5567_v8 }
 0x35c   :  { %5078 = vmatpush.msra.mxu2 %v5568_v63 }
 0x35e   :  { %5079 = vmatpush.msra.mxu2 %v5569_v49 }
 0x360   :  { %v5356_v10 = vpop.eup %5355  ;;  %5080 = vmatpush.msra.mxu2 %v5570_v58 }
 0x361   :  { %v568_v43 = vmul.f32 %v5356_v10, %v558_v53  ;;  %845 = vmatmul.f32.gmra.mxu2 %v5354_v20  ;;  %v760_v53 = vmul.f32 1.442695, %v753_v50 }
 0x362   :  { %5081 = vmatpush.msra.mxu2 %v5571_v17 }
 0x363   :  { %v572_v23 = vsub.f32 2.0, %v568_v43 }
 0x364   :  { %5082 = vmatpush.msra.mxu2 %v5572_v54 }
 0x365   :  { %v576_v55 = vmul.f32 %v5356_v10, %v572_v23 }
 0x366   :  { %5083 = vmatpush.msra.mxu2 %v5573_v37  ;;  %v5581_v37 = vld [vmem:[#allocation5 + $0x358] sm:$0xff] }
 0x367   :  { %v580_v45 = vmul.f32 %v576_v55, %v529_v44 }
 0x368   :  { %5084 = vmatpush.msra.mxu2 %v5574_v19 }
 0x369   :  { %584 = vst.msk [vmem:[#allocation2 + $0x18] sm:$0xff] %vm79_vm0, %v580_v45 }
 0x36a   :  { %5085 = vmatpush.msra.mxu2 %v5575_v34 }
 0x36c   :  { %5086 = vmatpush.msra.mxu2 %v5576_v7 }
 0x36e   :  { %5087 = vmatpush.msra.mxu2 %v5577_v60 }
 0x370   :  { %v911_v0 = vld [vmem:[#allocation2 + $0x18] sm:$0xff]  ;;  %5088 = vmatpush.msra.mxu2 %v5578_v12 }
 0x371   :  { %4864 = vmatmul.msk.f32.gmra.mxu1 %vm79_vm0, %v911_v0 }
 0x372   :  { %5089 = vmatpush.msra.mxu2 %v5778_v26 }
 0x374   :  { %5090 = vmatpush.msra.mxu2 %v5781_v27  ;;  %v6218_v27 = vld [vmem:[#allocation5 + $0x48] ss:$0 sm:$0xff] }
 0x376   :  { %5091 = vmatpush.msra.mxu2 %v5784_v28 }
 0x378   :  { %5092 = vmatpush.msra.mxu2 %v5811_v40 }
 0x380   :  { %v747_v13 = vpop.xlane.xlu2 %746 }
 0x381   :  { %v752_v15 = vsub.f32 %v6200_v24, %v747_v13  ;;  %v5579_v24 = vld [vmem:[#allocation5 + $0x348] sm:$0xff] }
 0x383   :  { %v758_v31 = vmul.f32 1.442695, %v752_v15 }
 0x385   :  { %5357 = vpow2.f32 %v758_v31 }
 0x386   :  { %5359 = vpow2.f32 %v760_v53 }
 0x38b   :  { %v5358_v8 = vpop.eup %5357 }
 0x38c   :  { %848 = vmatmul.f32.gmra.mxu2 %v5358_v8  ;;  %v5360_v63 = vpop.eup %5359 }
 0x394   :  { %851 = vmatmul.f32.gmra.mxu2 %v5360_v63 }
 0x39c   :  { %874 = vmatmul.f32.vlgmr.msra.gmra.mxu2 %v5354_v20  ;;  %v5580_v20 = vld [vmem:[#allocation5 + $0x350] sm:$0xff] }
 0x3a4   :  { %877 = vmatmul.f32.gmra.mxu2 %v5358_v8 }
 0x3ac   :  { %880 = vmatmul.f32.gmra.mxu2 %v5360_v63 }
 0x3b8   :  { %v872_v26 = vpop.f32.mrf.mxu1 }
 0x3b9   :  { %5361 = vrcp.f32 %v872_v26 }
 0x3bf   :  { %v5362_v23 = vpop.eup %5361 }
 0x3c0   :  { %v958_v28 = vpop.f32.mrf.mxu1  ;;  %v888_v44 = vmul.f32 %v5362_v23, %v872_v26  ;;  %v5684_v26 = vmov 32.0  }
 0x3c1   :  { %v959_v40 = vadd.f32 %v6218_v27, %v958_v28  ;;  %5363 = vrcp.f32 %v5684_v26 }
 0x3c2   :  { %v892_v34 = vsub.f32 2.0, %v888_v44 }
 0x3c3   :  { %v6221_v49 = vadd.f32 %v5579_v24, %v959_v40 }
 0x3c4   :  { %v896_v7 = vmul.f32 %v5362_v23, %v892_v34 }
 0x3c5   :  { %v992_v4 = vsel %vm79_vm0, %v6221_v49, 0.0 }
 0x3c6   :  { %993 = vadd.xlane.f32.xlu1 %v992_v4 }
 0x3c7   :  { %v5364_v40 = vpop.eup %5363 }
 0x3c8   :  { %v961_v10 = vpop.f32.mrf.mxu1  ;;  %vm1021_vm1 = vweird.f32 %v5364_v40 }
 0x3c9   :  { %v962_v58 = vadd.f32 %v6218_v27, %v961_v10 }
 0x3cb   :  { %v6226_v43 = vadd.f32 %v5580_v20, %v962_v58  ;;  %v1017_v58 = vmul.f32 32.0, %v5364_v40 }
 0x3cd   :  { %v995_v17 = vsel %vm79_vm0, %v6226_v43, 0.0  ;;  %v1018_v23 = vsub.f32 1.0, %v1017_v58 }
 0x3ce   :  { %996 = vadd.xlane.f32.xlu2 %v995_v17 }
 0x3d0   :  { %v964_v54 = vpop.f32.mrf.mxu1 }
 0x3d1   :  { %v965_v55 = vadd.f32 %v6218_v27, %v964_v54 }
 0x3d3   :  { %v6231_v45 = vadd.f32 %v5581_v37, %v965_v55 }
 0x3d5   :  { %v998_v19 = vsel %vm79_vm0, %v6231_v45, 0.0 }
 0x3d6   :  { %999 = vadd.xlane.f32.xlu1 %v998_v19  ;;  %v1019_v19 = vmul.f32 %v5364_v40, %v1018_v23 }
 0x3dc   :  { %v843_v60 = vpop.f32.mrf.mxu2 }
 0x3dd   :  { %v900_v0 = vmul.f32 %v896_v7, %v843_v60  ;;  %v1020_v60 = vadd.f32 %v5364_v40, %v1019_v19 }
 0x3df   :  { %904 = vst.msk [vmem:[#allocation2 + $0x20] sm:$0xff] %vm79_vm0, %v900_v0 }
 0x3e4   :  { %v846_v53 = vpop.f32.mrf.mxu2 }
 0x3e6   :  { %v912_v12 = vld [vmem:[#allocation2 + $0x20] sm:$0xff] }
 0x3e7   :  { %4865 = vmatmul.msk.f32.gmra.mxu1 %vm79_vm0, %v912_v12 }
 0x3ee   :  { %v967_v13 = vpop.f32.mrf.mxu1 }
 0x3ef   :  { %v968_v15 = vadd.f32 %v6218_v27, %v967_v13 }
 0x3f1   :  { %v6238_v31 = vadd.f32 %v5582_v30, %v968_v15  ;;  %v6245_v30 = vsel %vm1021_vm1, %v5364_v40, %v1020_v60  ;;  %v5583_v60 = vld [vmem:[#allocation5 + $0x368] sm:$0xff] }
 0x3f3   :  { %v1001_v50 = vsel %vm79_vm0, %v6238_v31, 0.0 }
 0x3f4   :  { %1002 = vadd.xlane.f32.xlu2 %v1001_v50 }
 0x40f   :  { %v849_v8 = vpop.f32.mrf.mxu2 }
 0x417   :  { %v852_v63 = vpop.f32.mrf.mxu2 }
 0x41f   :  { %v875_v28 = vpop.f32.mrf.mxu2 }
 0x420   :  { %5365 = vrcp.f32 %v875_v28 }
 0x426   :  { %v5366_v24 = vpop.eup %5365 }
 0x427   :  { %v889_v4 = vmul.f32 %v5366_v24, %v875_v28  ;;  %v878_v10 = vpop.f32.mrf.mxu2 }
 0x428   :  { %5367 = vrcp.f32 %v878_v10 }
 0x429   :  { %v893_v20 = vsub.f32 2.0, %v889_v4 }
 0x42b   :  { %v897_v17 = vmul.f32 %v5366_v24, %v893_v20 }
 0x42d   :  { %v901_v54 = vmul.f32 %v897_v17, %v846_v53 }
 0x42e   :  { %v5368_v55 = vpop.eup %5367 }
 0x42f   :  { %905 = vst.msk [vmem:[#allocation2 + $0x28] sm:$0xff] %vm79_vm0, %v901_v54  ;;  %v890_v44 = vmul.f32 %v5368_v55, %v878_v10  ;;  %v881_v37 = vpop.f32.mrf.mxu2 }
 0x430   :  { %5369 = vrcp.f32 %v881_v37 }
 0x431   :  { %v894_v34 = vsub.f32 2.0, %v890_v44 }
 0x433   :  { %v898_v7 = vmul.f32 %v5368_v55, %v894_v34 }
 0x435   :  { %v902_v0 = vmul.f32 %v898_v7, %v849_v8 }
 0x436   :  { %v5370_v12 = vpop.eup %5369  ;;  %v913_v13 = vld [vmem:[#allocation2 + $0x28] sm:$0xff] }
 0x437   :  { %906 = vst.msk [vmem:[#allocation2 + $0x30] sm:$0xff] %vm79_vm0, %v902_v0  ;;  %v891_v15 = vmul.f32 %v5370_v12, %v881_v37  ;;  %4866 = vmatmul.msk.f32.gmra.mxu1 %vm79_vm0, %v913_v13 }
 0x439   :  { %v895_v50 = vsub.f32 2.0, %v891_v15  ;;  %v994_v53 = vpop.xlane.xlu1 %993 }
 0x43a   :  { %v1023_v26 = vmul.f32 %v6245_v30, %v994_v53  ;;  %v1267_v53 = vld [vmem:[#allocation5 + $0x90] sm:$0xff] }
 0x43b   :  { %v899_v28 = vmul.f32 %v5370_v12, %v895_v50  ;;  %1288 = vmatpush.msrb.mxu3 %v1267_v53 }
 0x43c   :  { %v6249_v24 = vsub.f32 %v6221_v49, %v1023_v26  ;;  %v1266_v26 = vld [vmem:[#allocation5 + $0x88] sm:$0xff] }
 0x43d   :  { %v903_v4 = vmul.f32 %v899_v28, %v852_v63  ;;  %1289 = vmatpush.msrb.mxu3 %v1266_v26  ;;  %v1265_v28 = vld [vmem:[#allocation5 + $0x80] sm:$0xff] }
 0x43e   :  { %v914_v10 = vld [vmem:[#allocation2 + $0x30] sm:$0xff]  ;;  %v1039_v8 = vmul.f32 %v6249_v24, %v6249_v24 }
 0x43f   :  { %907 = vst.msk [vmem:[#allocation2 + $0x38] sm:$0xff] %vm79_vm0, %v903_v4  ;;  %4867 = vmatmul.msk.f32.gmra.mxu1 %vm79_vm0, %v914_v10  ;;  %1290 = vmatpush.msrb.mxu3 %v1265_v28  ;;  %v1264_v4 = vld [vmem:[#allocation5 + $0x78] sm:$0xff]  ;;  %v43_v10 = vld [vmem:[#allocation3] sm:$0xff] }
 0x440   :  { %v1047_v40 = vsel %vm79_vm0, %v1039_v8, 0.0  ;;  %v1195_v8 = vld [vmem:[#allocation5 + $0x60] sm:$0xff] }
 0x441   :  { %v997_v58 = vpop.xlane.xlu2 %996  ;;  %1048 = vadd.xlane.f32.xlu1 %v1047_v40  ;;  %1291 = vmatpush.msrb.mxu3 %v1264_v4  ;;  %v1194_v40 = vld [vmem:[#allocation5 + $0x58] sm:$0xff] }
 0x442   :  { %v1024_v20 = vmul.f32 %v6245_v30, %v997_v58  ;;  %4877 = vmatmul.msk.f32.vlgmr.msrb.gmra.mxu3 %vm79_vm0, %v43_v10  ;;  %v1193_v58 = vld [vmem:[#allocation5 + $0x50] sm:$0xff] }
 0x444   :  { %v6258_v17 = vsub.f32 %v6226_v43, %v1024_v20 }
 0x446   :  { %v915_v49 = vld [vmem:[#allocation2 + $0x38] sm:$0xff]  ;;  %v1040_v63 = vmul.f32 %v6258_v17, %v6258_v17 }
 0x447   :  { %4868 = vmatmul.msk.f32.gmra.mxu1 %vm79_vm0, %v915_v49 }
 0x448   :  { %v1050_v23 = vsel %vm79_vm0, %v1040_v63, 0.0 }
 0x449   :  { %1051 = vadd.xlane.f32.xlu0 %v1050_v23  ;;  %v1000_v54 = vpop.xlane.xlu1 %999 }
 0x44a   :  { %v1025_v55 = vmul.f32 %v6245_v30, %v1000_v54 }
 0x44c   :  { %v6266_v44 = vsub.f32 %v6231_v45, %v1025_v55  ;;  %v5584_v55 = vld [vmem:[#allocation5 + $0x370] sm:$0xff] }
 0x44e   :  { %v1041_v37 = vmul.f32 %v6266_v44, %v6266_v44 }
 0x450   :  { %v1053_v43 = vsel %vm79_vm0, %v1041_v37, 0.0 }
 0x451   :  { %1054 = vadd.xlane.f32.xlu2 %v1053_v43 }
 0x464   :  { %v970_v19 = vpop.f32.mrf.mxu1 }
 0x465   :  { %v971_v34 = vadd.f32 %v6218_v27, %v970_v19 }
 0x467   :  { %v1003_v7 = vpop.xlane.xlu2 %1002  ;;  %v6272_v0 = vadd.f32 %v5583_v60, %v971_v34 }
 0x468   :  { %v1026_v12 = vmul.f32 %v6245_v30, %v1003_v7 }
 0x469   :  { %v1004_v13 = vsel %vm79_vm0, %v6272_v0, 0.0 }
 0x46a   :  { %v6278_v45 = vsub.f32 %v6238_v31, %v1026_v12  ;;  %1005 = vadd.xlane.f32.xlu0 %v1004_v13  ;;  %v1196_v31 = vld [vmem:[#allocation5 + $0x68] sm:$0xff] }
 0x46b   :  { %1235 = vmatpush.msrb.mxu2 %v1196_v31 }
 0x46c   :  { %v1042_v15 = vmul.f32 %v6278_v45, %v6278_v45 }
 0x46d   :  { %1236 = vmatpush.msrb.mxu2 %v1195_v8 }
 0x46e   :  { %v1056_v50 = vsel %vm79_vm0, %v1042_v15, 0.0  ;;  %v5585_v15 = vld [vmem:[#allocation5 + $0x378] sm:$0xff] }
 0x46f   :  { %1057 = vadd.xlane.f32.xlu1 %v1056_v50  ;;  %1237 = vmatpush.msrb.mxu2 %v1194_v40 }
 0x471   :  { %1238 = vmatpush.msrb.mxu2 %v1193_v58 }
 0x4b4   :  { %v1049_v20 = vpop.xlane.xlu1 %1048  ;;  %v973_v49 = vpop.f32.mrf.mxu1 }
 0x4b5   :  { %v1071_v63 = vmul.f32 %v1049_v20, %v6245_v30  ;;  %v974_v23 = vadd.f32 %v6218_v27, %v973_v49 }
 0x4b7   :  { %v1079_v54 = vadd.f32 1e-05, %v1071_v63  ;;  %v6286_v37 = vadd.f32 %v5584_v55, %v974_v23  ;;  %v6297_v63 = vld [vmem:[#allocation5 + $0x138] ss:$0 sm:$0xff] }
 0x4b9   :  { %5371 = vrsqrt.f32 %v1079_v54  ;;  %v1007_v43 = vsel %vm79_vm0, %v6286_v37, 0.0  ;;  %vm1093_vm3 = vweird.f32 %v1079_v54 }
 0x4ba   :  { %1008 = vadd.xlane.f32.xlu1 %v1007_v43 }
 0x4bc   :  { %v1052_v19 = vpop.xlane.xlu0 %1051  ;;  %v976_v34 = vpop.f32.mrf.mxu1 }
 0x4bd   :  { %v1072_v7 = vmul.f32 %v1052_v19, %v6245_v30  ;;  %v977_v60 = vadd.f32 %v6218_v27, %v976_v34  ;;  %v6300_v19 = vld [vmem:[#allocation5 + $0x140] ss:$0 sm:$0xff] }
 0x4bf   :  { %v5372_v12 = vpop.eup %5371  ;;  %v1080_v13 = vadd.f32 1e-05, %v1072_v7  ;;  %v6292_v50 = vadd.f32 %v5585_v15, %v977_v60 }
 0x4c0   :  { %v1088_v53 = vmul.f32 %v5372_v12, %v1079_v54  ;;  %vm1094_vm2 = vweird.f32 %v5372_v12 }
 0x4c1   :  { %5373 = vrsqrt.f32 %v1080_v13  ;;  %v1010_v26 = vsel %vm79_vm0, %v6292_v50, 0.0  ;;  %vm1095_vm4 = vmor %vm1093_vm3, %vm1094_vm2  ;;  %vm1103_vm6 = vweird.f32 %v1080_v13 }
 0x4c2   :  { %v1089_v28 = vmul.f32 %v5372_v12, %v1088_v53  ;;  %1011 = vadd.xlane.f32.xlu0 %v1010_v26 }
 0x4c4   :  { %v1090_v4 = vmul.f32 0.5, %v1089_v28  ;;  %v1055_v10 = vpop.xlane.xlu2 %1054 }
 0x4c5   :  { %v1073_v31 = vmul.f32 %v1055_v10, %v6245_v30 }
 0x4c6   :  { %v1091_v8 = vsub.f32 1.5, %v1090_v4 }
 0x4c7   :  { %v5374_v40 = vpop.eup %5373  ;;  %v1081_v58 = vadd.f32 1e-05, %v1073_v31 }
 0x4c8   :  { %v1092_v20 = vmul.f32 %v5372_v12, %v1091_v8  ;;  %v1098_v49 = vmul.f32 %v5374_v40, %v1080_v13  ;;  %vm1104_vm5 = vweird.f32 %v5374_v40  ;;  %v6310_v8 = vld [vmem:[#allocation5 + $0x418] sm:$0xff] }
 0x4c9   :  { %5375 = vrsqrt.f32 %v1081_v58  ;;  %vm1105_vm7 = vmor %vm1103_vm6, %vm1104_vm5  ;;  %vm1113_vm9 = vweird.f32 %v1081_v58 }
 0x4ca   :  { %v1096_v23 = vsel %vm1095_vm4, %v5372_v12, %v1092_v20  ;;  %v1099_v55 = vmul.f32 %v5374_v40, %v1098_v49 }
 0x4cb   :  { %v1167_v43 = vmul.f32 %v1096_v23, %v6249_v24 }
 0x4cc   :  { %v1100_v34 = vmul.f32 0.5, %v1099_v55 }
 0x4cd   :  { %v1176_v7 = vmul.f32 %v6297_v63, %v1167_v43 }
 0x4ce   :  { %v1101_v60 = vsub.f32 1.5, %v1100_v34  ;;  %v44_v34 = vld [vmem:[#allocation3 + $0x8] sm:$0xff] }
 0x4cf   :  { %v5376_v15 = vpop.eup %5375  ;;  %v6304_v53 = vadd.f32 %v6300_v19, %v1176_v7  ;;  %4878 = vmatmul.msk.f32.gmra.mxu3 %vm79_vm0, %v44_v34  ;;  %v6347_v34 = vld [vmem:[#allocation5 + $0x420] sm:$0xff] }
 0x4d0   :  { %v1102_v54 = vmul.f32 %v5374_v40, %v1101_v60  ;;  %v1108_v26 = vmul.f32 %v5376_v15, %v1081_v58  ;;  %vm1114_vm8 = vweird.f32 %v5376_v15  ;;  %v979_v58 = vpop.f32.mrf.mxu1  ;;  %5093 = vmatpush.msra.mxu2 %v6347_v34 }
 0x4d1   :  { %4869 = vmatmul.msk.f32.vlgmr.msrb.gmra.mxu2 %vm79_vm0, %v6304_v53  ;;  %vm1115_vm10 = vmor %vm1113_vm9, %vm1114_vm8 }
 0x4d2   :  { %v1109_v12 = vmul.f32 %v5376_v15, %v1108_v26  ;;  %v1106_v24 = vsel %vm1105_vm7, %v5374_v40, %v1102_v54  ;;  %v980_v54 = vadd.f32 %v6218_v27, %v979_v58  ;;  %v6350_v58 = vld [vmem:[#allocation5 + $0x98] ss:$0 sm:$0xff]  ;;  %5094 = vmatpush.msra.mxu2 %v6310_v8 }
 0x4d3   :  { %v1168_v28 = vmul.f32 %v1106_v24, %v6258_v17 }
 0x4d4   :  { %v1110_v4 = vmul.f32 0.5, %v1109_v12 }
 0x4d5   :  { %v1177_v10 = vmul.f32 %v6297_v63, %v1168_v28 }
 0x4d6   :  { %v1111_v31 = vsub.f32 1.5, %v1110_v4  ;;  %1316 = vrot.lane.b32.xlu0 %v6310_v8, %s5681_s0 }
 0x4d7   :  { %v6313_v20 = vadd.f32 %v6300_v19, %v1177_v10 }
 0x4d8   :  { %v1112_v13 = vmul.f32 %v5376_v15, %v1111_v31 }
 0x4d9   :  { %4870 = vmatmul.msk.f32.gmra.mxu2 %vm79_vm0, %v6313_v20 }
 0x4da   :  { %v1116_v17 = vsel %vm1115_vm10, %v5376_v15, %v1112_v13 }
 0x4db   :  { %v1169_v40 = vmul.f32 %v1116_v17, %v6266_v44 }
 0x4dd   :  { %v1006_v49 = vpop.xlane.xlu0 %1005  ;;  %v1178_v23 = vmul.f32 %v6297_v63, %v1169_v40 }
 0x4de   :  { %v1027_v55 = vmul.f32 %v6245_v30, %v1006_v49 }
 0x4df   :  { %v6323_v43 = vadd.f32 %v6300_v19, %v1178_v23 }
 0x4e0   :  { %v6326_v7 = vsub.f32 %v6272_v0, %v1027_v55  ;;  %v5586_v0 = vld [vmem:[#allocation5 + $0x380] sm:$0xff] }
 0x4e1   :  { %4871 = vmatmul.msk.f32.gmra.mxu2 %vm79_vm0, %v6323_v43  ;;  %v6336_v24 = vadd.f32 %v5586_v0, %v980_v54 }
 0x4e2   :  { %v1058_v60 = vpop.xlane.xlu1 %1057  ;;  %v1043_v44 = vmul.f32 %v6326_v7, %v6326_v7 }
 0x4e3   :  { %v1074_v15 = vmul.f32 %v1058_v60, %v6245_v30  ;;  %v1013_v28 = vsel %vm79_vm0, %v6336_v24, 0.0  ;;  %v1293_v60 = vpop.f32.mrf.mxu3 }
 0x4e4   :  { %v1059_v26 = vsel %vm79_vm0, %v1043_v44, 0.0  ;;  %v6354_v44 = vadd.f32 %v6350_v58, %v1293_v60 }
 0x4e5   :  { %v1082_v12 = vadd.f32 1e-05, %v1074_v15  ;;  %1060 = vadd.xlane.f32.xlu2 %v1059_v26  ;;  %v6362_v26 = vld [vmem:[#allocation5 + $0x410] sm:$0xff] }
 0x4e6   :  { %v1306_v15 = vmul.f32 %v6354_v44, %v6310_v8  ;;  %v1305_v0 = vmul.f32 %v6354_v44, %v6362_v26  ;;  %5095 = vmatpush.msra.mxu2 %v6362_v26 }
 0x4e7   :  { %5377 = vrsqrt.f32 %v1082_v12  ;;  %vm1123_vm12 = vweird.f32 %v1082_v12 }
 0x4ed   :  { %v5378_v4 = vpop.eup %5377  ;;  %1014 = vadd.xlane.f32.xlu2 %v1013_v28  ;;  %v6368_v28 = vld [vmem:[#allocation5 + $0x408] sm:$0xff] }
 0x4ee   :  { %v1118_v10 = vmul.f32 %v5378_v4, %v1082_v12  ;;  %vm1124_vm11 = vweird.f32 %v5378_v4  ;;  %5096 = vmatpush.msra.mxu2 %v6368_v28 }
 0x4ef   :  { %vm1125_vm13 = vmor %vm1123_vm12, %vm1124_vm11 }
 0x4f0   :  { %v1119_v31 = vmul.f32 %v5378_v4, %v1118_v10 }
 0x4f2   :  { %v1120_v13 = vmul.f32 0.5, %v1119_v31  ;;  %v1304_v31 = vmul.f32 %v6354_v44, %v6368_v28 }
 0x4f4   :  { %v1121_v17 = vsub.f32 1.5, %v1120_v13 }
 0x4f6   :  { %v1122_v40 = vmul.f32 %v5378_v4, %v1121_v17 }
 0x4f8   :  { %v1126_v27 = vsel %vm1125_vm13, %v5378_v4, %v1122_v40 }
 0x4f9   :  { %v1170_v49 = vmul.f32 %v1126_v27, %v6278_v45  ;;  %v1307_v45 = vmul.f32 %v6354_v44, %v6347_v34 }
 0x4fb   :  { %v1179_v23 = vmul.f32 %v6297_v63, %v1170_v49  ;;  %4879 = vmatpush.xpose.msk.msra.mxu0 %vm79_vm0, %v1307_v45 }
 0x4fd   :  { %v6343_v55 = vadd.f32 %v6300_v19, %v1179_v23  ;;  %v6396_v23 = vld [vmem:[#allocation5 + $0x70] ss:$0 sm:$0xff] }
 0x4ff   :  { %4872 = vmatmul.msk.f32.gmra.mxu2 %vm79_vm0, %v6343_v55  ;;  %4880 = vmatpush.xpose.msk.msra.mxu0 %vm79_vm0, %v1306_v15 }
 0x503   :  { %4881 = vmatpush.xpose.msk.msra.mxu0 %vm79_vm0, %v1305_v0 }
 0x507   :  { %4882 = vmatpush.xpose.msk.msra.mxu0 %vm79_vm0, %v1304_v31 }
 0x50b   :  { %1478 = vmatpush.msrb.mxu0 %v6347_v34 }
 0x50d   :  { %1479 = vmatpush.msrb.mxu0 %v6310_v8 }
 0x50f   :  { %1480 = vmatpush.msrb.mxu0 %v6362_v26 }
 0x511   :  { %1481 = vmatpush.msrb.mxu0 %v6368_v28 }
 0x52d   :  { %v1009_v54 = vpop.xlane.xlu1 %1008 }
 0x52e   :  { %v1028_v12 = vmul.f32 %v6245_v30, %v1009_v54 }
 0x530   :  { %v6371_v4 = vsub.f32 %v6286_v37, %v1028_v12 }
 0x532   :  { %v1044_v10 = vmul.f32 %v6371_v4, %v6371_v4 }
 0x534   :  { %v1062_v13 = vsel %vm79_vm0, %v1044_v10, 0.0 }
 0x535   :  { %v1012_v17 = vpop.xlane.xlu0 %1011  ;;  %1063 = vadd.xlane.f32.xlu1 %v1062_v13 }
 0x536   :  { %v1029_v37 = vmul.f32 %v6245_v30, %v1012_v17 }
 0x538   :  { %v6385_v40 = vsub.f32 %v6292_v50, %v1029_v37 }
 0x53a   :  { %v1045_v27 = vmul.f32 %v6385_v40, %v6385_v40 }
 0x53c   :  { %v1065_v49 = vsel %vm79_vm0, %v1045_v27, 0.0 }
 0x53d   :  { %1066 = vadd.xlane.f32.xlu0 %v1065_v49 }
 0x54e   :  { %1318 = vrot.lane.b32.xlu1 %v6347_v34, %s5681_s0 }
 0x551   :  { %1312 = vrot.lane.b32.xlu0 %v6368_v28, %s5681_s0 }
 0x554   :  { %v1240_v50 = vpop.f32.mrf.mxu2 }
 0x555   :  { %v1241_v60 = vadd.f32 %v6396_v23, %v1240_v50 }
 0x557   :  { %4883 = vmatmul.msk.f32.vlgmr.msra.gmra.mxu0 %vm79_vm0, %v1241_v60 }
 0x558   :  { %v1061_v45 = vpop.xlane.xlu2 %1060  ;;  %1677 = vmatpush.msra.mxu0 %v6347_v34 }
 0x559   :  { %v1075_v15 = vmul.f32 %v1061_v45, %v6245_v30 }
 0x55a   :  { %1678 = vmatpush.msra.mxu0 %v6310_v8 }
 0x55b   :  { %v1083_v54 = vadd.f32 1e-05, %v1075_v15 }
 0x55c   :  { %v1243_v12 = vpop.f32.mrf.mxu2  ;;  %1679 = vmatpush.msra.mxu0 %v6362_v26 }
 0x55d   :  { %5379 = vrsqrt.f32 %v1083_v54  ;;  %v1244_v0 = vadd.f32 %v6396_v23, %v1243_v12  ;;  %vm1133_vm15 = vweird.f32 %v1083_v54 }
 0x55e   :  { %1680 = vmatpush.msra.mxu0 %v6368_v28 }
 0x55f   :  { %4884 = vmatmul.msk.f32.gmra.mxu0 %vm79_vm0, %v1244_v0 }
 0x560   :  { %v1015_v10 = vpop.xlane.xlu2 %1014 }
 0x561   :  { %v1030_v31 = vmul.f32 %v6245_v30, %v1015_v10 }
 0x563   :  { %v5380_v13 = vpop.eup %5379  ;;  %v6409_v17 = vsub.f32 %v6336_v24, %v1030_v31 }
 0x564   :  { %v1128_v37 = vmul.f32 %v5380_v13, %v1083_v54  ;;  %v1246_v27 = vpop.f32.mrf.mxu2  ;;  %vm1134_vm14 = vweird.f32 %v5380_v13  ;;  %v6427_v54 = vpop.permute.xlu0 %1316 }
 0x565   :  { %v1247_v49 = vadd.f32 %v6396_v23, %v1246_v27  ;;  %v1046_v50 = vmul.f32 %v6409_v17, %v6409_v17  ;;  %vm1135_vm1 = vmor %vm1133_vm15, %vm1134_vm14 }
 0x566   :  { %v1129_v60 = vmul.f32 %v5380_v13, %v1128_v37 }
 0x567   :  { %4885 = vmatmul.msk.f32.gmra.mxu0 %vm79_vm0, %v1247_v49  ;;  %v1068_v45 = vsel %vm79_vm0, %v1046_v50, 0.0 }
 0x568   :  { %v1130_v15 = vmul.f32 0.5, %v1129_v60  ;;  %1069 = vadd.xlane.f32.xlu2 %v1068_v45 }
 0x56a   :  { %v1131_v12 = vsub.f32 1.5, %v1130_v15 }
 0x56c   :  { %v1132_v0 = vmul.f32 %v5380_v13, %v1131_v12 }
 0x56e   :  { %v1136_v24 = vsel %vm1135_vm1, %v5380_v13, %v1132_v0 }
 0x56f   :  { %v1171_v10 = vmul.f32 %v1136_v24, %v6326_v7 }
 0x571   :  { %v1180_v31 = vmul.f32 %v6297_v63, %v1171_v10 }
 0x573   :  { %v6419_v27 = vadd.f32 %v6300_v19, %v1180_v31 }
 0x575   :  { %4873 = vmatmul.msk.f32.gmra.mxu2 %vm79_vm0, %v6419_v27 }
 0x580   :  { %1314 = vrot.lane.b32.xlu2 %v6362_v26, %s5681_s0 }
 0x582   :  { %v1249_v37 = vpop.f32.mrf.mxu2 }
 0x583   :  { %v1250_v49 = vadd.f32 %v6396_v23, %v1249_v37 }
 0x585   :  { %4886 = vmatmul.msk.f32.gmra.mxu0 %vm79_vm0, %v1250_v49 }
 0x5a8   :  { %v1064_v13 = vpop.xlane.xlu1 %1063 }
 0x5a9   :  { %v1076_v7 = vmul.f32 %v1064_v13, %v6245_v30 }
 0x5ab   :  { %v1084_v50 = vadd.f32 1e-05, %v1076_v7 }
 0x5ad   :  { %5381 = vrsqrt.f32 %v1084_v50  ;;  %vm1143_vm3 = vweird.f32 %v1084_v50 }
 0x5b0   :  { %v1067_v60 = vpop.xlane.xlu0 %1066 }
 0x5b1   :  { %v1077_v45 = vmul.f32 %v1067_v60, %v6245_v30 }
 0x5b3   :  { %v5382_v15 = vpop.eup %5381  ;;  %v1085_v12 = vadd.f32 1e-05, %v1077_v45  ;;  %v1326_v45 = vmul.f32 %v6427_v54, %v6354_v44 }
 0x5b4   :  { %v1138_v0 = vmul.f32 %v5382_v15, %v1084_v50  ;;  %vm1144_vm2 = vweird.f32 %v5382_v15 }
 0x5b5   :  { %5383 = vrsqrt.f32 %v1085_v12  ;;  %vm1145_vm4 = vmor %vm1143_vm3, %vm1144_vm2  ;;  %vm1153_vm6 = vweird.f32 %v1085_v12 }
 0x5b6   :  { %v1139_v24 = vmul.f32 %v5382_v15, %v1138_v0 }
 0x5b8   :  { %v1140_v10 = vmul.f32 0.5, %v1139_v24 }
 0x5ba   :  { %v1141_v31 = vsub.f32 1.5, %v1140_v10 }
 0x5bb   :  { %v5384_v37 = vpop.eup %5383 }
 0x5bc   :  { %v1142_v49 = vmul.f32 %v5382_v15, %v1141_v31  ;;  %v1148_v48 = vmul.f32 %v5384_v37, %v1085_v12  ;;  %vm1154_vm5 = vweird.f32 %v5384_v37 }
 0x5bd   :  { %vm1155_vm7 = vmor %vm1153_vm6, %vm1154_vm5 }
 0x5be   :  { %v1149_v36 = vmul.f32 %v5384_v37, %v1148_v48  ;;  %v1146_v13 = vsel %vm1145_vm4, %v5382_v15, %v1142_v49 }
 0x5bf   :  { %v1172_v7 = vmul.f32 %v1146_v13, %v6371_v4 }
 0x5c0   :  { %v1150_v56 = vmul.f32 0.5, %v1149_v36  ;;  %v6432_v18 = vpop.permute.xlu1 %1318 }
 0x5c1   :  { %v1181_v60 = vmul.f32 %v6297_v63, %v1172_v7  ;;  %v1327_v0 = vmul.f32 %v6432_v18, %v6354_v44 }
 0x5c2   :  { %v1151_v24 = vsub.f32 1.5, %v1150_v56 }
 0x5c3   :  { %v6440_v50 = vadd.f32 %v6300_v19, %v1181_v60  ;;  %v5187_v48 = vpack.i.bf16 %v1326_v45, %v1327_v0  ;;  %v6455_v0 = vpop.permute.xlu0 %1312 }
 0x5c4   :  { %v1152_v15 = vmul.f32 %v5384_v37, %v1151_v24 }
 0x5c5   :  { %4874 = vmatmul.msk.f32.gmra.mxu2 %vm79_vm0, %v6440_v50  ;;  %5188 = vrot.lane.b32.xlu0 %v5187_v48, %s5682_s1  ;;  %v1324_v48 = vmul.f32 %v6455_v0, %v6354_v44 }
 0x5c6   :  { %v1156_v36 = vsel %vm1155_vm7, %v5384_v37, %v1152_v15 }
 0x5c7   :  { %v1173_v4 = vmul.f32 %v1156_v36, %v6385_v40 }
 0x5c9   :  { %v1182_v10 = vmul.f32 %v6297_v63, %v1173_v4 }
 0x5cb   :  { %v6448_v56 = vadd.f32 %v6300_v19, %v1182_v10 }
 0x5cd   :  { %4875 = vmatmul.msk.f32.gmra.mxu2 %vm79_vm0, %v6448_v56 }
 0x5d4   :  { %v1369_v31 = vpop.f32.mrf.mxu0 }
 0x5d5   :  { %v1381_v49 = vmul.f32 0.35355338, %v1369_v31 }
 0x5d7   :  { %v1385_v12 = vsel %vm79_vm0, %v1381_v49, -inf }
 0x5d8   :  { %1386 = vmax.xlane.f32.xlu1 %v1385_v12 }
 0x5db   :  { %v1070_v13 = vpop.xlane.xlu2 %1069 }
 0x5dc   :  { %v1078_v7 = vmul.f32 %v1070_v13, %v6245_v30  ;;  %v1372_v60 = vpop.f32.mrf.mxu0 }
 0x5dd   :  { %v1382_v37 = vmul.f32 0.35355338, %v1372_v60 }
 0x5de   :  { %v1086_v45 = vadd.f32 1e-05, %v1078_v7 }
 0x5df   :  { %v1388_v40 = vsel %vm79_vm0, %v1382_v37, -inf }
 0x5e0   :  { %5385 = vrsqrt.f32 %v1086_v45  ;;  %1389 = vmax.xlane.f32.xlu2 %v1388_v40  ;;  %vm1163_vm9 = vweird.f32 %v1086_v45 }
 0x5e3   :  { %v6457_v24 = vpop.permute.xlu2 %1314 }
 0x5e4   :  { %v1325_v15 = vmul.f32 %v6457_v24, %v6354_v44  ;;  %v1375_v44 = vpop.f32.mrf.mxu0 }
 0x5e6   :  { %v5386_v36 = vpop.eup %5385  ;;  %v5192_v4 = vpack.i.bf16 %v1324_v48, %v1325_v15 }
 0x5e7   :  { %v1158_v10 = vmul.f32 %v5386_v36, %v1086_v45  ;;  %vm1164_vm8 = vweird.f32 %v5386_v36 }
 0x5e8   :  { %5193 = vrot.lane.b32.xlu0 %v5192_v4, %s5682_s1  ;;  %vm1165_vm10 = vmor %vm1163_vm9, %vm1164_vm8  ;;  %vm2085_vm8 = vcmask 523264  }
 0x5e9   :  { %v1159_v31 = vmul.f32 %v5386_v36, %v1158_v10  ;;  %v1383_v10 = vmul.f32 0.35355338, %v1375_v44 }
 0x5eb   :  { %v1160_v12 = vmul.f32 0.5, %v1159_v31  ;;  %v1391_v45 = vsel %vm79_vm0, %v1383_v10, -inf }
 0x5ed   :  { %v1161_v13 = vsub.f32 1.5, %v1160_v12 }
 0x5ef   :  { %v1162_v7 = vmul.f32 %v5386_v36, %v1161_v13 }
 0x5f1   :  { %v1166_v60 = vsel %vm1165_vm10, %v5386_v36, %v1162_v7  ;;  %v1296_v36 = vpop.f32.mrf.mxu3 }
 0x5f2   :  { %v1174_v40 = vmul.f32 %v1166_v60, %v6409_v17  ;;  %v6474_v17 = vadd.f32 %v6350_v58, %v1296_v36 }
 0x5f4   :  { %v1183_v38 = vmul.f32 %v6297_v63, %v1174_v40  ;;  %v1524_v63 = vmul.f32 %v6457_v24, %v6474_v17 }
 0x5f6   :  { %v6467_v14 = vadd.f32 %v6300_v19, %v1183_v38  ;;  %v1523_v38 = vmul.f32 %v6455_v0, %v6474_v17 }
 0x5f8   :  { %4876 = vmatmul.msk.f32.gmra.mxu2 %vm79_vm0, %v6467_v14  ;;  %v5202_v19 = vpack.i.bf16 %v1523_v38, %v1524_v63 }
 0x602   :  { %v1378_v48 = vpop.f32.mrf.mxu0 }
 0x603   :  { %v1384_v15 = vmul.f32 0.35355338, %v1378_v48 }
 0x605   :  { %v1394_v4 = vsel %vm79_vm0, %v1384_v15, -inf }
 0x606   :  { %1395 = vmax.xlane.f32.xlu1 %v1394_v4 }
 0x612   :  { %1392 = vmax.xlane.f32.xlu0 %v1391_v45 }
 0x626   :  { %5203 = vrot.lane.b32.xlu0 %v5202_v19, %s5682_s1  ;;  %v1520_v19 = vmul.f32 %v6474_v17, %v6362_v26 }
 0x637   :  { %v5189_v31 = vpop.permute.xlu0 %5188 }
 0x638   :  { %v5190_v12 = vunpack.i.l.bf16 %v5189_v31  ;;  %v5191_v13 = vunpack.i.h.bf16 %v5189_v31  ;;  %v1519_v31 = vmul.f32 %v6474_v17, %v6368_v28  ;;  %v1252_v28 = vpop.f32.mrf.mxu2 }
 0x63a   :  { %1449 = vmatpush.msra.mxu3 %v5190_v12 }
 0x63c   :  { %1450 = vmatpush.msra.mxu3 %v5191_v13 }
 0x64b   :  { %v1387_v7 = vpop.xlane.xlu1 %1386 }
 0x64c   :  { %v1397_v60 = vsub.f32 %v1381_v49, %v1387_v7  ;;  %v1522_v49 = vmul.f32 %v6474_v17, %v6347_v34 }
 0x64e   :  { %v1401_v40 = vmul.f32 1.442695, %v1397_v60 }
 0x650   :  { %5387 = vpow2.f32 %v1401_v40 }
 0x653   :  { %v1390_v58 = vpop.xlane.xlu2 %1389 }
 0x654   :  { %v1398_v44 = vsub.f32 %v1382_v37, %v1390_v58  ;;  %v1521_v37 = vmul.f32 %v6474_v17, %v6310_v8  ;;  %v1253_v58 = vadd.f32 %v6396_v23, %v1252_v28 }
 0x656   :  { %v5388_v48 = vpop.eup %5387  ;;  %v1403_v4 = vmul.f32 1.442695, %v1398_v44 }
 0x657   :  { %4891 = vmatmul.msk.f32.vlgmr.msrb.gmra.mxu0 %vm79_vm0, %v5388_v48 }
 0x658   :  { %5389 = vpow2.f32 %v1403_v4 }
 0x65a   :  { %v5194_v45 = vpop.permute.xlu0 %5193 }
 0x65b   :  { %v5195_v36 = vunpack.i.l.bf16 %v5194_v45  ;;  %v5196_v38 = vunpack.i.h.bf16 %v5194_v45 }
 0x65d   :  { %1451 = vmatpush.msra.mxu3 %v5195_v36 }
 0x65e   :  { %v5390_v63 = vpop.eup %5389 }
 0x65f   :  { %1452 = vmatpush.msra.mxu3 %v5196_v38  ;;  %4892 = vmatmul.msk.f32.gmra.mxu0 %vm79_vm0, %v5390_v63 }
 0x660   :  { %4887 = vmatmul.msk.f32.vlgmr.msra.gmra.mxu3 %vm79_vm0, %v5388_v48 }
 0x661   :  { %4895 = vmatpush.xpose.msk.msrb.mxu3 %vm79_vm0, %v1522_v49 }
 0x665   :  { %4896 = vmatpush.xpose.msk.msrb.mxu3 %vm79_vm0, %v1521_v37 }
 0x668   :  { %4888 = vmatmul.msk.f32.gmra.mxu3 %vm79_vm0, %v5390_v63 }
 0x669   :  { %4897 = vmatpush.xpose.msk.msrb.mxu3 %vm79_vm0, %v1520_v19 }
 0x66d   :  { %4898 = vmatpush.xpose.msk.msrb.mxu3 %vm79_vm0, %v1519_v31 }
 0x679   :  { %v1396_v13 = vpop.xlane.xlu1 %1395 }
 0x67a   :  { %v1400_v60 = vsub.f32 %v1384_v15, %v1396_v13 }
 0x67c   :  { %v1407_v40 = vmul.f32 1.442695, %v1400_v60 }
 0x685   :  { %v1393_v34 = vpop.xlane.xlu0 %1392 }
 0x686   :  { %v1399_v12 = vsub.f32 %v1383_v10, %v1393_v34  ;;  %v1255_v10 = vpop.f32.mrf.mxu2 }
 0x687   :  { %v1256_v15 = vadd.f32 %v6396_v23, %v1255_v10 }
 0x688   :  { %v1405_v7 = vmul.f32 1.442695, %v1399_v12 }
 0x68a   :  { %5391 = vpow2.f32 %v1405_v7 }
 0x68b   :  { %5393 = vpow2.f32 %v1407_v40 }
 0x68e   :  { %v1258_v44 = vpop.f32.mrf.mxu2 }
 0x68f   :  { %v1259_v48 = vadd.f32 %v6396_v23, %v1258_v44 }
 0x690   :  { %v5392_v8 = vpop.eup %5391 }
 0x691   :  { %4889 = vmatmul.msk.f32.gmra.mxu3 %vm79_vm0, %v5392_v8  ;;  %4893 = vmatmul.msk.f32.gmra.mxu0 %vm79_vm0, %v5392_v8  ;;  %v5394_v26 = vpop.eup %5393 }
 0x696   :  { %v1261_v4 = vpop.f32.mrf.mxu2 }
 0x697   :  { %v1262_v45 = vadd.f32 %v6396_v23, %v1261_v4 }
 0x699   :  { %4890 = vmatmul.msk.f32.gmra.mxu3 %vm79_vm0, %v5394_v26  ;;  %4894 = vmatmul.msk.f32.gmra.mxu0 %vm79_vm0, %v5394_v26 }
 0x6a1   :  { %4899 = vmatmul.msk.f32.vlgmr.msrb.gmra.mxu3 %vm79_vm0, %v1253_v58 }
 0x6a9   :  { %4900 = vmatmul.msk.f32.gmra.mxu3 %vm79_vm0, %v1256_v15 }
 0x6b1   :  { %4901 = vmatmul.msk.f32.gmra.mxu3 %vm79_vm0, %v1259_v48 }
 0x6b9   :  { %4902 = vmatmul.msk.f32.gmra.mxu3 %vm79_vm0, %v1262_v45 }
 0x6d4   :  { %v1483_v36 = vpop.f32.mrf.mxu0 }
 0x6d5   :  { %5395 = vrcp.f32 %v1483_v36 }
 0x6db   :  { %v5396_v38 = vpop.eup %5395 }
 0x6dc   :  { %v1499_v63 = vmul.f32 %v5396_v38, %v1483_v36  ;;  %v1486_v49 = vpop.f32.mrf.mxu0 }
 0x6dd   :  { %5397 = vrcp.f32 %v1486_v49 }
 0x6de   :  { %v1503_v37 = vsub.f32 2.0, %v1499_v63 }
 0x6e0   :  { %v1507_v19 = vmul.f32 %v5396_v38, %v1503_v37 }
 0x6e3   :  { %v5398_v31 = vpop.eup %5397  ;;  %v1454_v34 = vpop.f32.mrf.mxu3 }
 0x6e4   :  { %v1500_v12 = vmul.f32 %v5398_v31, %v1486_v49  ;;  %v1511_v13 = vmul.f32 %v1507_v19, %v1454_v34 }
 0x6e6   :  { %v1504_v7 = vsub.f32 2.0, %v1500_v12  ;;  %1515 = vst.msk [vmem:[#allocation2] sm:$0xff] %vm79_vm0, %v1511_v13 }
 0x6e8   :  { %v1508_v60 = vmul.f32 %v5398_v31, %v1504_v7 }
 0x6eb   :  { %v1457_v40 = vpop.f32.mrf.mxu3 }
 0x6ec   :  { %v1512_v23 = vmul.f32 %v1508_v60, %v1457_v40 }
 0x6ee   :  { %1516 = vst.msk [vmem:[#allocation2 + $0x8] sm:$0xff] %vm79_vm0, %v1512_v23 }
 0x70e   :  { %v1489_v8 = vpop.f32.mrf.mxu0 }
 0x70f   :  { %5399 = vrcp.f32 %v1489_v8 }
 0x714   :  { %v1460_v26 = vpop.f32.mrf.mxu3 }
 0x715   :  { %v5400_v28 = vpop.eup %5399 }
 0x716   :  { %v1501_v58 = vmul.f32 %v5400_v28, %v1489_v8  ;;  %v1492_v10 = vpop.f32.mrf.mxu0 }
 0x717   :  { %5401 = vrcp.f32 %v1492_v10 }
 0x718   :  { %v1505_v15 = vsub.f32 2.0, %v1501_v58  ;;  %v1525_v58 = vmul.f32 %v6427_v54, %v6474_v17 }
 0x71a   :  { %v1509_v44 = vmul.f32 %v5400_v28, %v1505_v15  ;;  %v1526_v28 = vmul.f32 %v6432_v18, %v6474_v17  ;;  %v1302_v15 = vld [vmem:[#allocation5 + $0xb8] sm:$0xff] }
 0x71b   :  { %1763 = vmatpush.msrb.mxu0 %v1302_v15 }
 0x71c   :  { %v1513_v48 = vmul.f32 %v1509_v44, %v1460_v26  ;;  %v1463_v4 = vpop.f32.mrf.mxu3  ;;  %v1301_v44 = vld [vmem:[#allocation5 + $0xb0] sm:$0xff] }
 0x71d   :  { %v5402_v45 = vpop.eup %5401  ;;  %1764 = vmatpush.msrb.mxu0 %v1301_v44  ;;  %v1719_v44 = vld [vmem:[#allocation2 + $0x8] sm:$0xff] }
 0x71e   :  { %1517 = vst.msk [vmem:[#allocation2 + $0x10] sm:$0xff] %vm79_vm0, %v1513_v48  ;;  %v1502_v36 = vmul.f32 %v5402_v45, %v1492_v10  ;;  %v5197_v10 = vpack.i.bf16 %v1525_v58, %v1526_v28  ;;  %v1300_v48 = vld [vmem:[#allocation5 + $0xa8] sm:$0xff] }
 0x71f   :  { %1765 = vmatpush.msrb.mxu0 %v1300_v48 }
 0x720   :  { %v1506_v38 = vsub.f32 2.0, %v1502_v36 }
 0x722   :  { %v1510_v63 = vmul.f32 %v5402_v45, %v1506_v38 }
 0x724   :  { %v1514_v49 = vmul.f32 %v1510_v63, %v1463_v4  ;;  %v1568_v37 = vpop.f32.mrf.mxu3  ;;  %v1299_v4 = vld [vmem:[#allocation5 + $0xa0] sm:$0xff] }
 0x725   :  { %v1580_v19 = vmul.f32 0.35355338, %v1568_v37  ;;  %1766 = vmatpush.msrb.mxu0 %v1299_v4 }
 0x726   :  { %1518 = vst.msk [vmem:[#allocation2 + $0x18] sm:$0xff] %vm79_vm0, %v1514_v49 }
 0x727   :  { %v1584_v31 = vsel %vm79_vm0, %v1580_v19, -inf }
 0x728   :  { %1585 = vmax.xlane.f32.xlu2 %v1584_v31 }
 0x72c   :  { %v1571_v34 = vpop.f32.mrf.mxu3 }
 0x72d   :  { %v1581_v12 = vmul.f32 0.35355338, %v1571_v34 }
 0x72f   :  { %v1587_v13 = vsel %vm79_vm0, %v1581_v12, -inf }
 0x730   :  { %1588 = vmax.xlane.f32.xlu1 %v1587_v13 }
 0x734   :  { %v1574_v7 = vpop.f32.mrf.mxu3 }
 0x735   :  { %v1582_v60 = vmul.f32 0.35355338, %v1574_v7 }
 0x737   :  { %v1590_v40 = vsel %vm79_vm0, %v1582_v60, -inf }
 0x738   :  { %1591 = vmax.xlane.f32.xlu2 %v1590_v40  ;;  %v1718_v40 = vld [vmem:[#allocation2] sm:$0xff] }
 0x73c   :  { %v1577_v23 = vpop.f32.mrf.mxu3 }
 0x73d   :  { %v1583_v8 = vmul.f32 0.35355338, %v1577_v23 }
 0x73f   :  { %v1593_v26 = vsel %vm79_vm0, %v1583_v8, -inf }
 0x740   :  { %1594 = vmax.xlane.f32.xlu1 %v1593_v26 }
 0x750   :  { %5198 = vrot.lane.b32.xlu2 %v5197_v10, %s5682_s1 }
 0x79b   :  { %v1586_v45 = vpop.xlane.xlu2 %1585 }
 0x79c   :  { %v1596_v36 = vsub.f32 %v1580_v19, %v1586_v45  ;;  %v1721_v45 = vld [vmem:[#allocation2 + $0x18] sm:$0xff] }
 0x79e   :  { %v1600_v38 = vmul.f32 1.442695, %v1596_v36 }
 0x7a0   :  { %5403 = vpow2.f32 %v1600_v38  ;;  %v6534_v38 = vld [vmem:[#allocation5 + $0xc0] ss:$0 sm:$0xff] }
 0x7a3   :  { %v1589_v63 = vpop.xlane.xlu1 %1588 }
 0x7a4   :  { %v1597_v49 = vsub.f32 %v1581_v12, %v1589_v63  ;;  %v5204_v12 = vpop.permute.xlu0 %5203 }
 0x7a5   :  { %v5206_v48 = vunpack.i.h.bf16 %v5204_v12 }
 0x7a6   :  { %v5404_v37 = vpop.eup %5403  ;;  %v1602_v31 = vmul.f32 1.442695, %v1597_v49 }
 0x7a7   :  { %4907 = vmatmul.msk.f32.vlgmr.msra.gmra.mxu0 %vm79_vm0, %v5404_v37 }
 0x7a8   :  { %5405 = vpow2.f32 %v1602_v31 }
 0x7ab   :  { %v1592_v17 = vpop.xlane.xlu2 %1591 }
 0x7ac   :  { %v1598_v34 = vsub.f32 %v1582_v60, %v1592_v17  ;;  %v5205_v60 = vunpack.i.l.bf16 %v5204_v12 }
 0x7ae   :  { %v5406_v13 = vpop.eup %5405  ;;  %v1604_v7 = vmul.f32 1.442695, %v1598_v34 }
 0x7af   :  { %4908 = vmatmul.msk.f32.vlgmr.msra.gmra.mxu2 %vm79_vm0, %v5406_v13  ;;  %4911 = vmatmul.msk.f32.vlgmr.msrb.gmra.mxu0 %vm79_vm0, %v1718_v40 }
 0x7b0   :  { %5407 = vpow2.f32 %v1604_v7 }
 0x7b3   :  { %v5199_v19 = vpop.permute.xlu2 %5198  ;;  %v1595_v23 = vpop.xlane.xlu1 %1594 }
 0x7b4   :  { %v5200_v26 = vunpack.i.l.bf16 %v5199_v19  ;;  %v1599_v28 = vsub.f32 %v1583_v8, %v1595_v23  ;;  %v5201_v10 = vunpack.i.h.bf16 %v5199_v19  ;;  %v1720_v8 = vld [vmem:[#allocation2 + $0x10] sm:$0xff] }
 0x7b6   :  { %v5408_v58 = vpop.eup %5407  ;;  %v1606_v15 = vmul.f32 1.442695, %v1599_v28  ;;  %1648 = vmatpush.msrb.mxu1 %v5200_v26 }
 0x7b7   :  { %4909 = vmatmul.msk.f32.gmra.mxu2 %vm79_vm0, %v5408_v58  ;;  %4912 = vmatmul.msk.f32.gmra.mxu0 %vm79_vm0, %v1719_v44 }
 0x7b8   :  { %5409 = vpow2.f32 %v1606_v15  ;;  %1649 = vmatpush.msrb.mxu1 %v5201_v10 }
 0x7ba   :  { %1650 = vmatpush.msrb.mxu1 %v5205_v60 }
 0x7bc   :  { %1651 = vmatpush.msrb.mxu1 %v5206_v48 }
 0x7bd   :  { %4903 = vmatmul.msk.f32.vlgmr.msrb.gmra.mxu1 %vm79_vm0, %v5404_v37 }
 0x7be   :  { %v5410_v4 = vpop.eup %5409 }
 0x7bf   :  { %4910 = vmatmul.msk.f32.gmra.mxu2 %vm79_vm0, %v5410_v4  ;;  %4913 = vmatmul.msk.f32.gmra.mxu0 %vm79_vm0, %v1720_v8 }
 0x7c5   :  { %4904 = vmatmul.msk.f32.gmra.mxu1 %vm79_vm0, %v5406_v13 }
 0x7c7   :  { %4914 = vmatmul.msk.f32.gmra.mxu0 %vm79_vm0, %v1721_v45 }
 0x7cd   :  { %4905 = vmatmul.msk.f32.gmra.mxu1 %vm79_vm0, %v5408_v58 }
 0x7d5   :  { %4906 = vmatmul.msk.f32.gmra.mxu1 %vm79_vm0, %v5410_v4 }
 0x824   :  { %v1682_v36 = vpop.f32.mrf.mxu0 }
 0x825   :  { %5411 = vrcp.f32 %v1682_v36 }
 0x82b   :  { %v5412_v37 = vpop.eup %5411 }
 0x82c   :  { %v1768_v63 = vpop.f32.mrf.mxu0  ;;  %v1698_v17 = vmul.f32 %v5412_v37, %v1682_v36 }
 0x82d   :  { %v1769_v49 = vadd.f32 %v6534_v38, %v1768_v63 }
 0x82e   :  { %v1702_v40 = vsub.f32 2.0, %v1698_v17 }
 0x82f   :  { %v1792_v31 = vadd.f32 %v1769_v49, %v6304_v53 }
 0x830   :  { %v1706_v28 = vmul.f32 %v5412_v37, %v1702_v40 }
 0x831   :  { %v1802_v34 = vsel %vm79_vm0, %v1792_v31, 0.0 }
 0x832   :  { %v1685_v13 = vpop.f32.mrf.mxu2  ;;  %1803 = vadd.xlane.f32.xlu1 %v1802_v34 }
 0x833   :  { %5413 = vrcp.f32 %v1685_v13 }
 0x834   :  { %v1771_v7 = vpop.f32.mrf.mxu0 }
 0x835   :  { %v1772_v19 = vadd.f32 %v6534_v38, %v1771_v7 }
 0x837   :  { %v1793_v23 = vadd.f32 %v1772_v19, %v6313_v20 }
 0x839   :  { %v5414_v26 = vpop.eup %5413  ;;  %v1805_v12 = vsel %vm79_vm0, %v1793_v23, 0.0 }
 0x83a   :  { %v1699_v58 = vmul.f32 %v5414_v26, %v1685_v13  ;;  %v1653_v10 = vpop.f32.mrf.mxu1  ;;  %v1688_v15 = vpop.f32.mrf.mxu2  ;;  %1806 = vadd.xlane.f32.xlu1 %v1805_v12 }
 0x83b   :  { %v1710_v53 = vmul.f32 %v1706_v28, %v1653_v10  ;;  %5415 = vrcp.f32 %v1688_v15 }
 0x83c   :  { %v1774_v44 = vpop.f32.mrf.mxu0  ;;  %v1703_v60 = vsub.f32 2.0, %v1699_v58 }
 0x83d   :  { %1714 = vst.msk [vmem:[#allocation2 + $0x20] sm:$0xff] %vm79_vm0, %v1710_v53  ;;  %v1775_v48 = vadd.f32 %v6534_v38, %v1774_v44 }
 0x83e   :  { %v1707_v45 = vmul.f32 %v5414_v26, %v1703_v60 }
 0x83f   :  { %v1794_v4 = vadd.f32 %v1775_v48, %v6323_v43 }
 0x841   :  { %v5416_v8 = vpop.eup %5415  ;;  %v1808_v20 = vsel %vm79_vm0, %v1794_v4, 0.0 }
 0x842   :  { %v1700_v36 = vmul.f32 %v5416_v8, %v1688_v15  ;;  %1809 = vadd.xlane.f32.xlu0 %v1808_v20  ;;  %v1656_v63 = vpop.f32.mrf.mxu1  ;;  %v1691_v49 = vpop.f32.mrf.mxu2 }
 0x843   :  { %v1711_v37 = vmul.f32 %v1707_v45, %v1656_v63  ;;  %5417 = vrcp.f32 %v1691_v49 }
 0x844   :  { %v1777_v17 = vpop.f32.mrf.mxu0  ;;  %v1722_v34 = vld [vmem:[#allocation2 + $0x20] sm:$0xff]  ;;  %v1704_v13 = vsub.f32 2.0, %v1700_v36 }
 0x845   :  { %1715 = vst.msk [vmem:[#allocation2 + $0x28] sm:$0xff] %vm79_vm0, %v1711_v37  ;;  %v1778_v7 = vadd.f32 %v6534_v38, %v1777_v17  ;;  %4915 = vmatmul.msk.f32.gmra.mxu0 %vm79_vm0, %v1722_v34 }
 0x846   :  { %v1708_v19 = vmul.f32 %v5416_v8, %v1704_v13 }
 0x847   :  { %v1795_v43 = vadd.f32 %v1778_v7, %v6343_v55 }
 0x849   :  { %v5418_v40 = vpop.eup %5417  ;;  %v1811_v26 = vsel %vm79_vm0, %v1795_v43, 0.0 }
 0x84a   :  { %v1701_v28 = vmul.f32 %v5418_v40, %v1691_v49  ;;  %v1659_v12 = vpop.f32.mrf.mxu1  ;;  %1812 = vadd.xlane.f32.xlu1 %v1811_v26 }
 0x84b   :  { %v1712_v58 = vmul.f32 %v1708_v19, %v1659_v12 }
 0x84c   :  { %v1723_v10 = vld [vmem:[#allocation2 + $0x28] sm:$0xff]  ;;  %v1705_v15 = vsub.f32 2.0, %v1701_v28 }
 0x84d   :  { %1716 = vst.msk [vmem:[#allocation2 + $0x30] sm:$0xff] %vm79_vm0, %v1712_v58  ;;  %4916 = vmatmul.msk.f32.gmra.mxu0 %vm79_vm0, %v1723_v10 }
 0x84e   :  { %v1709_v53 = vmul.f32 %v5418_v40, %v1705_v15 }
 0x852   :  { %v1662_v44 = vpop.f32.mrf.mxu1 }
 0x853   :  { %v1713_v60 = vmul.f32 %v1709_v53, %v1662_v44 }
 0x854   :  { %v1724_v48 = vld [vmem:[#allocation2 + $0x30] sm:$0xff] }
 0x855   :  { %1717 = vst.msk [vmem:[#allocation2 + $0x38] sm:$0xff] %vm79_vm0, %v1713_v60  ;;  %4917 = vmatmul.msk.f32.gmra.mxu0 %vm79_vm0, %v1724_v48 }
 0x85c   :  { %v1725_v55 = vld [vmem:[#allocation2 + $0x38] sm:$0xff] }
 0x85d   :  { %4918 = vmatmul.msk.f32.gmra.mxu0 %vm79_vm0, %v1725_v55 }
 0x8a5   :  { %v1804_v8 = vpop.xlane.xlu1 %1803 }
 0x8a6   :  { %v1826_v20 = vmul.f32 %v1804_v8, %v6245_v30 }
 0x8a8   :  { %v6557_v45 = vsub.f32 %v1792_v31, %v1826_v20 }
 0x8aa   :  { %v1842_v36 = vmul.f32 %v6557_v45, %v6557_v45 }
 0x8ac   :  { %v1850_v63 = vsel %vm79_vm0, %v1842_v36, 0.0 }
 0x8ad   :  { %1851 = vadd.xlane.f32.xlu2 %v1850_v63  ;;  %v1807_v49 = vpop.xlane.xlu1 %1806 }
 0x8ae   :  { %v1827_v37 = vmul.f32 %v1807_v49, %v6245_v30 }
 0x8b0   :  { %v6563_v17 = vsub.f32 %v1793_v23, %v1827_v37 }
 0x8b2   :  { %v1843_v34 = vmul.f32 %v6563_v17, %v6563_v17 }
 0x8b4   :  { %v1853_v13 = vsel %vm79_vm0, %v1843_v34, 0.0  ;;  %v1999_v34 = vld [vmem:[#allocation5 + $0xe0] sm:$0xff] }
 0x8b5   :  { %v1810_v7 = vpop.xlane.xlu0 %1809  ;;  %1854 = vadd.xlane.f32.xlu1 %v1853_v13  ;;  %2038 = vmatpush.msra.mxu3 %v1999_v34  ;;  %v1998_v13 = vld [vmem:[#allocation5 + $0xd8] sm:$0xff]  ;;  %v6610_v34 = vld [vmem:[#allocation5 + $0x150] ss:$0 sm:$0xff] }
 0x8b6   :  { %v1828_v31 = vmul.f32 %v1810_v7, %v6245_v30  ;;  %v1996_v7 = vld [vmem:[#allocation5 + $0xc8] sm:$0xff] }
 0x8b7   :  { %2039 = vmatpush.msra.mxu3 %v1998_v13 }
 0x8b8   :  { %v6569_v40 = vsub.f32 %v1794_v4, %v1828_v31 }
 0x8ba   :  { %v1844_v19 = vmul.f32 %v6569_v40, %v6569_v40 }
 0x8bc   :  { %v1856_v26 = vsel %vm79_vm0, %v1844_v19, 0.0 }
 0x8bd   :  { %1857 = vadd.xlane.f32.xlu1 %v1856_v26  ;;  %v1813_v28 = vpop.xlane.xlu1 %1812 }
 0x8be   :  { %v1829_v23 = vmul.f32 %v1813_v28, %v6245_v30 }
 0x8c0   :  { %v6575_v12 = vsub.f32 %v1795_v43, %v1829_v23 }
 0x8c2   :  { %v1780_v58 = vpop.f32.mrf.mxu0  ;;  %v1845_v10 = vmul.f32 %v6575_v12, %v6575_v12 }
 0x8c3   :  { %v1781_v15 = vadd.f32 %v6534_v38, %v1780_v58 }
 0x8c4   :  { %v1859_v4 = vsel %vm79_vm0, %v1845_v10, 0.0 }
 0x8c5   :  { %1860 = vadd.xlane.f32.xlu1 %v1859_v4  ;;  %v6582_v53 = vadd.f32 %v1781_v15, %v6419_v27 }
 0x8c7   :  { %v1814_v48 = vsel %vm79_vm0, %v6582_v53, 0.0 }
 0x8ca   :  { %v1783_v44 = vpop.f32.mrf.mxu0 }
 0x8cb   :  { %v1784_v60 = vadd.f32 %v6534_v38, %v1783_v44 }
 0x8cd   :  { %1815 = vadd.xlane.f32.xlu1 %v1814_v48  ;;  %v6588_v43 = vadd.f32 %v1784_v60, %v6440_v50 }
 0x8cf   :  { %v1817_v20 = vsel %vm79_vm0, %v6588_v43, 0.0 }
 0x8d2   :  { %v1786_v55 = vpop.f32.mrf.mxu0 }
 0x8d3   :  { %v1787_v8 = vadd.f32 %v6534_v38, %v1786_v55 }
 0x8d5   :  { %1818 = vadd.xlane.f32.xlu1 %v1817_v20  ;;  %v6594_v27 = vadd.f32 %v1787_v8, %v6448_v56  ;;  %v1997_v56 = vld [vmem:[#allocation5 + $0xd0] sm:$0xff] }
 0x8d6   :  { %2040 = vmatpush.msra.mxu3 %v1997_v56 }
 0x8d7   :  { %v1820_v36 = vsel %vm79_vm0, %v6594_v27, 0.0 }
 0x8d8   :  { %1821 = vadd.xlane.f32.xlu0 %v1820_v36  ;;  %2041 = vmatpush.msra.mxu3 %v1996_v7  ;;  %v6607_v36 = vld [vmem:[#allocation5 + $0x148] ss:$0 sm:$0xff] }
 0x8da   :  { %v1789_v63 = vpop.f32.mrf.mxu0 }
 0x8db   :  { %v1790_v49 = vadd.f32 %v6534_v38, %v1789_v63 }
 0x8dd   :  { %v6600_v50 = vadd.f32 %v1790_v49, %v6467_v14 }
 0x8df   :  { %v1823_v37 = vsel %vm79_vm0, %v6600_v50, 0.0 }
 0x8e0   :  { %1824 = vadd.xlane.f32.xlu2 %v1823_v37 }
 0x920   :  { %v1852_v31 = vpop.xlane.xlu2 %1851 }
 0x921   :  { %v1874_v19 = vmul.f32 %v1852_v31, %v6245_v30 }
 0x923   :  { %v1882_v26 = vadd.f32 1e-05, %v1874_v19 }
 0x925   :  { %5419 = vrsqrt.f32 %v1882_v26  ;;  %vm1896_vm12 = vweird.f32 %v1882_v26 }
 0x928   :  { %v1855_v38 = vpop.xlane.xlu1 %1854 }
 0x929   :  { %v1875_v14 = vmul.f32 %v1855_v38, %v6245_v30 }
 0x92b   :  { %v5420_v28 = vpop.eup %5419  ;;  %v1883_v23 = vadd.f32 1e-05, %v1875_v14 }
 0x92c   :  { %v1891_v58 = vmul.f32 %v5420_v28, %v1882_v26  ;;  %vm1897_vm11 = vweird.f32 %v5420_v28 }
 0x92d   :  { %5421 = vrsqrt.f32 %v1883_v23  ;;  %vm1898_vm13 = vmor %vm1896_vm12, %vm1897_vm11  ;;  %vm1906_vm15 = vweird.f32 %v1883_v23 }
 0x92e   :  { %v1892_v10 = vmul.f32 %v5420_v28, %v1891_v58  ;;  %v2082_v58 = vld [vmem:[#allocation5 + $0x128] sm:$0xff] }
 0x92f   :  { %2118 = vmatpush.msra.mxu1 %v2082_v58 }
 0x930   :  { %v1893_v15 = vmul.f32 0.5, %v1892_v10  ;;  %v1858_v4 = vpop.xlane.xlu1 %1857 }
 0x931   :  { %v1876_v44 = vmul.f32 %v1858_v4, %v6245_v30 }
 0x932   :  { %v1894_v60 = vsub.f32 1.5, %v1893_v15  ;;  %v2080_v15 = vld [vmem:[#allocation5 + $0x118] sm:$0xff] }
 0x933   :  { %v5422_v48 = vpop.eup %5421  ;;  %v1884_v55 = vadd.f32 1e-05, %v1876_v44 }
 0x934   :  { %v1895_v8 = vmul.f32 %v5420_v28, %v1894_v60  ;;  %v1901_v20 = vmul.f32 %v5422_v48, %v1883_v23  ;;  %vm1907_vm14 = vweird.f32 %v5422_v48 }
 0x935   :  { %5423 = vrsqrt.f32 %v1884_v55  ;;  %vm1908_vm1 = vmor %vm1906_vm15, %vm1907_vm14  ;;  %vm1916_vm3 = vweird.f32 %v1884_v55 }
 0x936   :  { %v1899_v63 = vsel %vm1898_vm13, %v5420_v28, %v1895_v8  ;;  %v1902_v49 = vmul.f32 %v5422_v48, %v1901_v20  ;;  %v2081_v28 = vld [vmem:[#allocation5 + $0x120] sm:$0xff] }
 0x937   :  { %v1970_v37 = vmul.f32 %v1899_v63, %v6557_v45  ;;  %2119 = vmatpush.msra.mxu1 %v2081_v28 }
 0x938   :  { %v1903_v13 = vmul.f32 0.5, %v1902_v49  ;;  %v1861_v56 = vpop.xlane.xlu1 %1860 }
 0x939   :  { %v1979_v7 = vmul.f32 %v6607_v36, %v1970_v37  ;;  %v1877_v31 = vmul.f32 %v1861_v56, %v6245_v30  ;;  %2120 = vmatpush.msra.mxu1 %v2080_v15 }
 0x93a   :  { %v1904_v19 = vsub.f32 1.5, %v1903_v13 }
 0x93b   :  { %v5424_v26 = vpop.eup %5423  ;;  %v1885_v38 = vadd.f32 1e-05, %v1877_v31  ;;  %v6615_v14 = vadd.f32 %v6610_v34, %v1979_v7 }
 0x93c   :  { %v1905_v10 = vmul.f32 %v5422_v48, %v1904_v19  ;;  %v1911_v45 = vmul.f32 %v5424_v26, %v1884_v55  ;;  %vm1917_vm2 = vweird.f32 %v5424_v26 }
 0x93d   :  { %5425 = vrsqrt.f32 %v1885_v38  ;;  %4919 = vmatmul.msk.f32.vlgmr.msra.gmra.mxu3 %vm79_vm0, %v6615_v14  ;;  %vm1918_vm4 = vmor %vm1916_vm3, %vm1917_vm2  ;;  %vm1926_vm6 = vweird.f32 %v1885_v38 }
 0x93e   :  { %v1912_v4 = vmul.f32 %v5424_v26, %v1911_v45  ;;  %v1909_v44 = vsel %vm1908_vm1, %v5422_v48, %v1905_v10 }
 0x93f   :  { %v1971_v60 = vmul.f32 %v1909_v44, %v6563_v17 }
 0x940   :  { %v1913_v8 = vmul.f32 0.5, %v1912_v4  ;;  %v1816_v20 = vpop.xlane.xlu1 %1815 }
 0x941   :  { %v1830_v63 = vmul.f32 %v1816_v20, %v6245_v30  ;;  %v1980_v23 = vmul.f32 %v6607_v36, %v1971_v60 }
 0x942   :  { %v1914_v49 = vsub.f32 1.5, %v1913_v8 }
 0x943   :  { %v5426_v37 = vpop.eup %5425  ;;  %v6623_v13 = vsub.f32 %v6582_v53, %v1830_v63  ;;  %v6626_v56 = vadd.f32 %v6610_v34, %v1980_v23 }
 0x944   :  { %v1915_v48 = vmul.f32 %v5424_v26, %v1914_v49  ;;  %v1921_v7 = vmul.f32 %v5426_v37, %v1885_v38  ;;  %vm1927_vm5 = vweird.f32 %v5426_v37 }
 0x945   :  { %4920 = vmatmul.msk.f32.gmra.mxu3 %vm79_vm0, %v6626_v56  ;;  %v1846_v17 = vmul.f32 %v6623_v13, %v6623_v13  ;;  %vm1928_vm7 = vmor %vm1926_vm6, %vm1927_vm5 }
 0x946   :  { %v1922_v31 = vmul.f32 %v5426_v37, %v1921_v7  ;;  %v1919_v19 = vsel %vm1918_vm4, %v5424_v26, %v1915_v48 }
 0x947   :  { %v1862_v58 = vsel %vm79_vm0, %v1846_v17, 0.0  ;;  %v1972_v53 = vmul.f32 %v1919_v19, %v6569_v40  ;;  %v2079_v19 = vld [vmem:[#allocation5 + $0x110] sm:$0xff] }
 0x948   :  { %v1923_v28 = vmul.f32 0.5, %v1922_v31  ;;  %1863 = vadd.xlane.f32.xlu1 %v1862_v58  ;;  %v1819_v10 = vpop.xlane.xlu1 %1818  ;;  %2121 = vmatpush.msra.mxu1 %v2079_v19  ;;  %v2078_v58 = vld [vmem:[#allocation5 + $0x108] sm:$0xff] }
 0x949   :  { %v1831_v45 = vmul.f32 %v1819_v10, %v6245_v30  ;;  %v1981_v55 = vmul.f32 %v6607_v36, %v1972_v53  ;;  %v2077_v53 = vld [vmem:[#allocation5 + $0x100] sm:$0xff]  ;;  %v2075_v10 = vld [vmem:[#allocation5 + $0xf0] sm:$0xff] }
 0x94a   :  { %v1924_v15 = vsub.f32 1.5, %v1923_v28  ;;  %2122 = vmatpush.msra.mxu1 %v2078_v58  ;;  %v2076_v28 = vld [vmem:[#allocation5 + $0xf8] sm:$0xff] }
 0x94b   :  { %v6637_v4 = vsub.f32 %v6588_v43, %v1831_v45  ;;  %v1822_v44 = vpop.xlane.xlu0 %1821  ;;  %v6640_v60 = vadd.f32 %v6610_v34, %v1981_v55  ;;  %v5587_v45 = vld [vmem:[#allocation5 + $0x400] sm:$0xff]  ;;  %v5589_v55 = vld [vmem:[#allocation5 + $0x3f0] sm:$0xff] }
 0x94c   :  { %v1925_v26 = vmul.f32 %v5426_v37, %v1924_v15  ;;  %v1832_v40 = vmul.f32 %v1822_v44, %v6245_v30  ;;  %2123 = vmatpush.msra.mxu1 %v2077_v53  ;;  %v5590_v15 = vld [vmem:[#allocation5 + $0x3e8] sm:$0xff]  ;;  %v5591_v44 = vld [vmem:[#allocation5 + $0x3e0] sm:$0xff]  ;;  %v5601_v53 = vld [vmem:[#allocation5 + $0x390] sm:$0xff] }
 0x94d   :  { %4921 = vmatmul.msk.f32.gmra.mxu3 %vm79_vm0, %v6640_v60  ;;  %v1847_v8 = vmul.f32 %v6637_v4, %v6637_v4 }
 0x94e   :  { %v6648_v20 = vsub.f32 %v6594_v27, %v1832_v40  ;;  %v1929_v43 = vsel %vm1928_vm7, %v5426_v37, %v1925_v26  ;;  %2124 = vmatpush.msra.mxu1 %v2076_v28  ;;  %v5592_v26 = vld [vmem:[#allocation5 + $0x3d8] sm:$0xff]  ;;  %v5593_v40 = vld [vmem:[#allocation5 + $0x3d0] sm:$0xff] }
 0x94f   :  { %v1865_v63 = vsel %vm79_vm0, %v1847_v8, 0.0  ;;  %v1973_v23 = vmul.f32 %v1929_v43, %v6575_v12  ;;  %v5594_v8 = vld [vmem:[#allocation5 + $0x3c8] sm:$0xff]  ;;  %v5595_v43 = vld [vmem:[#allocation5 + $0x3c0] sm:$0xff] }
 0x950   :  { %1866 = vadd.xlane.f32.xlu0 %v1865_v63  ;;  %v1848_v38 = vmul.f32 %v6648_v20, %v6648_v20  ;;  %2125 = vmatpush.msra.mxu1 %v2075_v10  ;;  %v5596_v63 = vld [vmem:[#allocation5 + $0x3b8] sm:$0xff] }
 0x951   :  { %v1982_v49 = vmul.f32 %v6607_v36, %v1973_v23  ;;  %v5597_v23 = vld [vmem:[#allocation5 + $0x3b0] sm:$0xff] }
 0x952   :  { %v1868_v48 = vsel %vm79_vm0, %v1848_v38, 0.0  ;;  %2701 = vmatpush.msrb.mxu1 %v5587_v45  ;;  %v5602_v45 = vld [vmem:[#allocation5 + $0x388] sm:$0xff] }
 0x953   :  { %v1825_v7 = vpop.xlane.xlu2 %1824  ;;  %1869 = vadd.xlane.f32.xlu2 %v1868_v48  ;;  %v6657_v17 = vadd.f32 %v6610_v34, %v1982_v49  ;;  %v5598_v49 = vld [vmem:[#allocation5 + $0x3a8] sm:$0xff] }
 0x954   :  { %v1833_v27 = vmul.f32 %v1825_v7, %v6245_v30  ;;  %v6669_v7 = vld [vmem:[#allocation5 + $0xe8] ss:$0 sm:$0xff] }
 0x955   :  { %4922 = vmatmul.msk.f32.gmra.mxu3 %vm79_vm0, %v6657_v17 }
 0x956   :  { %v6663_v12 = vsub.f32 %v6600_v50, %v1833_v27  ;;  %v5588_v50 = vld [vmem:[#allocation5 + $0x3f8] sm:$0xff]  ;;  %v5599_v27 = vld [vmem:[#allocation5 + $0x3a0] sm:$0xff] }
 0x957   :  { %2702 = vmatpush.msrb.mxu1 %v5588_v50 }
 0x958   :  { %v1849_v37 = vmul.f32 %v6663_v12, %v6663_v12 }
 0x959   :  { %2703 = vmatpush.msrb.mxu1 %v5589_v55 }
 0x95a   :  { %v1871_v31 = vsel %vm79_vm0, %v1849_v37, 0.0 }
 0x95b   :  { %1872 = vadd.xlane.f32.xlu1 %v1871_v31  ;;  %2704 = vmatpush.msrb.mxu1 %v5590_v15  ;;  %v5600_v31 = vld [vmem:[#allocation5 + $0x398] sm:$0xff] }
 0x95d   :  { %2705 = vmatpush.msrb.mxu1 %v5591_v44 }
 0x95f   :  { %2706 = vmatpush.msrb.mxu1 %v5592_v26 }
 0x961   :  { %2707 = vmatpush.msrb.mxu1 %v5593_v40 }
 0x963   :  { %2708 = vmatpush.msrb.mxu1 %v5594_v8 }
 0x965   :  { %2709 = vmatpush.msrb.mxu1 %v5595_v43 }
 0x967   :  { %2710 = vmatpush.msrb.mxu1 %v5596_v63 }
 0x969   :  { %2711 = vmatpush.msrb.mxu1 %v5597_v23 }
 0x96b   :  { %2712 = vmatpush.msrb.mxu1 %v5598_v49 }
 0x96d   :  { %2713 = vmatpush.msrb.mxu1 %v5599_v27 }
 0x96f   :  { %2714 = vmatpush.msrb.mxu1 %v5600_v31 }
 0x971   :  { %2715 = vmatpush.msrb.mxu1 %v5601_v53 }
 0x973   :  { %2716 = vmatpush.msrb.mxu1 %v5602_v45 }
 0x9bb   :  { %v1864_v38 = vpop.xlane.xlu1 %1863 }
 0x9bc   :  { %v1878_v48 = vmul.f32 %v1864_v38, %v6245_v30 }
 0x9be   :  { %v1886_v37 = vadd.f32 1e-05, %v1878_v48 }
 0x9c0   :  { %5427 = vrsqrt.f32 %v1886_v37  ;;  %v2043_v19 = vpop.f32.mrf.mxu3  ;;  %vm1936_vm10 = vweird.f32 %v1886_v37 }
 0x9c1   :  { %v2044_v58 = vadd.f32 %v6669_v7, %v2043_v19 }
 0x9c3   :  { %v2067_v28 = vmax.f32 %v2044_v58, 0.0  ;;  %v1867_v10 = vpop.xlane.xlu0 %1866 }
 0x9c4   :  { %v1879_v50 = vmul.f32 %v1867_v10, %v6245_v30 }
 0x9c5   :  { %4927 = vmatmul.msk.f32.vlgmr.msra.gmra.mxu1 %vm2085_vm8, %v2067_v28 }
 0x9c6   :  { %v5428_v55 = vpop.eup %5427  ;;  %v1887_v15 = vadd.f32 1e-05, %v1879_v50  ;;  %v1870_v44 = vpop.xlane.xlu2 %1869 }
 0x9c7   :  { %v1931_v26 = vmul.f32 %v5428_v55, %v1886_v37  ;;  %v1880_v40 = vmul.f32 %v1870_v44, %v6245_v30  ;;  %vm1937_vm9 = vweird.f32 %v5428_v55 }
 0x9c8   :  { %5429 = vrsqrt.f32 %v1887_v15  ;;  %v2046_v8 = vpop.f32.mrf.mxu3  ;;  %vm1938_vm11 = vmor %vm1936_vm10, %vm1937_vm9  ;;  %vm1946_vm13 = vweird.f32 %v1887_v15 }
 0x9c9   :  { %v1932_v43 = vmul.f32 %v5428_v55, %v1931_v26  ;;  %v1888_v63 = vadd.f32 1e-05, %v1880_v40  ;;  %v2047_v23 = vadd.f32 %v6669_v7, %v2046_v8 }
 0x9cb   :  { %v1933_v38 = vmul.f32 0.5, %v1932_v43  ;;  %5431 = vrsqrt.f32 %v1888_v63  ;;  %v2068_v49 = vmax.f32 %v2047_v23, 0.0  ;;  %vm1956_vm1 = vweird.f32 %v1888_v63 }
 0x9cd   :  { %v1934_v48 = vsub.f32 1.5, %v1933_v38  ;;  %4928 = vmatmul.msk.f32.gmra.mxu1 %vm2085_vm8, %v2068_v49 }
 0x9ce   :  { %v5430_v27 = vpop.eup %5429  ;;  %v1873_v31 = vpop.xlane.xlu1 %1872 }
 0x9cf   :  { %v1935_v19 = vmul.f32 %v5428_v55, %v1934_v48  ;;  %v1941_v58 = vmul.f32 %v5430_v27, %v1887_v15  ;;  %v1881_v53 = vmul.f32 %v1873_v31, %v6245_v30  ;;  %vm1947_vm12 = vweird.f32 %v5430_v27 }
 0x9d0   :  { %v2049_v28 = vpop.f32.mrf.mxu3  ;;  %vm1948_vm14 = vmor %vm1946_vm13, %vm1947_vm12 }
 0x9d1   :  { %v5432_v10 = vpop.eup %5431  ;;  %v1939_v45 = vsel %vm1938_vm11, %v5428_v55, %v1935_v19  ;;  %v1942_v50 = vmul.f32 %v5430_v27, %v1941_v58  ;;  %v1889_v44 = vadd.f32 1e-05, %v1881_v53  ;;  %v2050_v26 = vadd.f32 %v6669_v7, %v2049_v28 }
 0x9d2   :  { %v1951_v40 = vmul.f32 %v5432_v10, %v1888_v63  ;;  %v1974_v8 = vmul.f32 %v1939_v45, %v6623_v13  ;;  %vm1957_vm15 = vweird.f32 %v5432_v10 }
 0x9d3   :  { %v1943_v43 = vmul.f32 0.5, %v1942_v50  ;;  %5433 = vrsqrt.f32 %v1889_v44  ;;  %v2069_v23 = vmax.f32 %v2050_v26, 0.0  ;;  %vm1958_vm2 = vmor %vm1956_vm1, %vm1957_vm15  ;;  %vm1966_vm4 = vweird.f32 %v1889_v44 }
 0x9d4   :  { %v1952_v38 = vmul.f32 %v5432_v10, %v1951_v40  ;;  %v1983_v37 = vmul.f32 %v6607_v36, %v1974_v8 }
 0x9d5   :  { %v1944_v49 = vsub.f32 1.5, %v1943_v43  ;;  %4929 = vmatmul.msk.f32.gmra.mxu1 %vm2085_vm8, %v2069_v23 }
 0x9d6   :  { %v1953_v48 = vmul.f32 0.5, %v1952_v38  ;;  %v6683_v55 = vadd.f32 %v6610_v34, %v1983_v37 }
 0x9d7   :  { %v1945_v31 = vmul.f32 %v5430_v27, %v1944_v49 }
 0x9d8   :  { %v1954_v19 = vsub.f32 1.5, %v1953_v48  ;;  %v2052_v13 = vpop.f32.mrf.mxu3  ;;  %4923 = vmatmul.msk.f32.gmra.mxu3 %vm79_vm0, %v6683_v55 }
 0x9d9   :  { %v5434_v58 = vpop.eup %5433  ;;  %v2053_v53 = vadd.f32 %v6669_v7, %v2052_v13  ;;  %v1949_v28 = vsel %vm1948_vm14, %v5430_v27, %v1945_v31 }
 0x9da   :  { %v1955_v45 = vmul.f32 %v5432_v10, %v1954_v19  ;;  %v1961_v50 = vmul.f32 %v5434_v58, %v1889_v44  ;;  %v1975_v26 = vmul.f32 %v1949_v28, %v6637_v4  ;;  %vm1967_vm3 = vweird.f32 %v5434_v58  ;;  %v6710_v44 = vld [vmem:[#allocation5 + $0x130] ss:$0 sm:$0xff] }
 0x9db   :  { %v2070_v40 = vmax.f32 %v2053_v53, 0.0  ;;  %vm1968_vm5 = vmor %vm1966_vm4, %vm1967_vm3 }
 0x9dc   :  { %v1959_v8 = vsel %vm1958_vm2, %v5432_v10, %v1955_v45  ;;  %v1962_v15 = vmul.f32 %v5434_v58, %v1961_v50  ;;  %v1984_v43 = vmul.f32 %v6607_v36, %v1975_v26 }
 0x9dd   :  { %4930 = vmatmul.msk.f32.gmra.mxu1 %vm2085_vm8, %v2070_v40  ;;  %v1976_v37 = vmul.f32 %v1959_v8, %v6648_v20 }
 0x9de   :  { %v1963_v23 = vmul.f32 0.5, %v1962_v15  ;;  %v6692_v38 = vadd.f32 %v6610_v34, %v1984_v43 }
 0x9df   :  { %v1985_v63 = vmul.f32 %v6607_v36, %v1976_v37 }
 0x9e0   :  { %v1964_v27 = vsub.f32 1.5, %v1963_v23  ;;  %4924 = vmatmul.msk.f32.gmra.mxu3 %vm79_vm0, %v6692_v38 }
 0x9e1   :  { %v6699_v49 = vadd.f32 %v6610_v34, %v1985_v63 }
 0x9e2   :  { %v1965_v4 = vmul.f32 %v5434_v58, %v1964_v27 }
 0x9e4   :  { %v1969_v10 = vsel %vm1968_vm5, %v5434_v58, %v1965_v4 }
 0x9e5   :  { %v1977_v48 = vmul.f32 %v1969_v10, %v6663_v12 }
 0x9e7   :  { %v1986_v20 = vmul.f32 %v6607_v36, %v1977_v48 }
 0x9e8   :  { %4925 = vmatmul.msk.f32.gmra.mxu3 %vm79_vm0, %v6699_v49 }
 0x9e9   :  { %v6706_v31 = vadd.f32 %v6610_v34, %v1986_v20 }
 0x9f0   :  { %4926 = vmatmul.msk.f32.gmra.mxu3 %vm79_vm0, %v6706_v31 }
 0xa42   :  { %v2127_v19 = vpop.f32.mrf.mxu1 }
 0xa43   :  { %v2128_v13 = vadd.f32 %v6710_v44, %v2127_v19 }
 0xa45   :  { %v2151_v58 = vadd.f32 %v2128_v13, %v6615_v14 }
 0xa47   :  { %v2161_v12 = vsel %vm79_vm0, %v2151_v58, 0.0 }
 0xa48   :  { %2162 = vadd.xlane.f32.xlu0 %v2161_v12 }
 0xa4a   :  { %v2130_v53 = vpop.f32.mrf.mxu1 }
 0xa4b   :  { %v2131_v28 = vadd.f32 %v6710_v44, %v2130_v53 }
 0xa4d   :  { %v2152_v36 = vadd.f32 %v2131_v28, %v6626_v56 }
 0xa4f   :  { %v2164_v34 = vsel %vm79_vm0, %v2152_v36, 0.0 }
 0xa50   :  { %2165 = vadd.xlane.f32.xlu2 %v2164_v34 }
 0xa52   :  { %v2133_v45 = vpop.f32.mrf.mxu1 }
 0xa53   :  { %v2134_v50 = vadd.f32 %v6710_v44, %v2133_v45 }
 0xa55   :  { %v2153_v26 = vadd.f32 %v2134_v50, %v6640_v60 }
 0xa57   :  { %v2167_v40 = vsel %vm79_vm0, %v2153_v26, 0.0 }
 0xa58   :  { %2168 = vadd.xlane.f32.xlu1 %v2167_v40 }
 0xa5a   :  { %v2136_v14 = vpop.f32.mrf.mxu1 }
 0xa5b   :  { %v2137_v8 = vadd.f32 %v6710_v44, %v2136_v14  ;;  %v2055_v15 = vpop.f32.mrf.mxu3 }
 0xa5c   :  { %v2056_v43 = vadd.f32 %v6669_v7, %v2055_v15 }
 0xa5d   :  { %v2154_v23 = vadd.f32 %v2137_v8, %v6657_v17 }
 0xa5e   :  { %v2071_v56 = vmax.f32 %v2056_v43, 0.0 }
 0xa5f   :  { %v2170_v37 = vsel %vm79_vm0, %v2154_v23, 0.0 }
 0xa60   :  { %2171 = vadd.xlane.f32.xlu0 %v2170_v37  ;;  %4931 = vmatmul.msk.f32.gmra.mxu1 %vm2085_vm8, %v2071_v56 }
 0xa63   :  { %v2058_v27 = vpop.f32.mrf.mxu3 }
 0xa64   :  { %v2059_v60 = vadd.f32 %v6669_v7, %v2058_v27 }
 0xa66   :  { %v2072_v4 = vmax.f32 %v2059_v60, 0.0 }
 0xa68   :  { %4932 = vmatmul.msk.f32.gmra.mxu1 %vm2085_vm8, %v2072_v4 }
 0xa6b   :  { %v2061_v63 = vpop.f32.mrf.mxu3 }
 0xa6c   :  { %v2062_v10 = vadd.f32 %v6669_v7, %v2061_v63 }
 0xa6e   :  { %v2073_v48 = vmax.f32 %v2062_v10, 0.0 }
 0xa70   :  { %4933 = vmatmul.msk.f32.gmra.mxu1 %vm2085_vm8, %v2073_v48 }
 0xa73   :  { %v2064_v20 = vpop.f32.mrf.mxu3 }
 0xa74   :  { %v2065_v17 = vadd.f32 %v6669_v7, %v2064_v20 }
 0xa76   :  { %v2074_v19 = vmax.f32 %v2065_v17, 0.0 }
 0xa78   :  { %4934 = vmatmul.msk.f32.gmra.mxu1 %vm2085_vm8, %v2074_v19 }
 0xabb   :  { %v2163_v13 = vpop.xlane.xlu0 %2162 }
 0xabc   :  { %v2185_v12 = vmul.f32 %v2163_v13, %v6245_v30 }
 0xabe   :  { %v6733_v53 = vsub.f32 %v2151_v58, %v2185_v12 }
 0xac0   :  { %v2201_v28 = vmul.f32 %v6733_v53, %v6733_v53 }
 0xac2   :  { %v2209_v34 = vsel %vm79_vm0, %v2201_v28, 0.0 }
 0xac3   :  { %v2166_v45 = vpop.xlane.xlu2 %2165  ;;  %2210 = vadd.xlane.f32.xlu2 %v2209_v34 }
 0xac4   :  { %v2186_v50 = vmul.f32 %v2166_v45, %v6245_v30 }
 0xac6   :  { %v6739_v40 = vsub.f32 %v2152_v36, %v2186_v50 }
 0xac8   :  { %v2202_v7 = vmul.f32 %v6739_v40, %v6739_v40 }
 0xaca   :  { %v2212_v14 = vsel %vm79_vm0, %v2202_v7, 0.0  ;;  %v2358_v7 = vld [vmem:[#allocation5 + $0x180] sm:$0xff] }
 0xacb   :  { %2213 = vadd.xlane.f32.xlu1 %v2212_v14  ;;  %v2169_v8 = vpop.xlane.xlu1 %2168  ;;  %2397 = vmatpush.msrb.mxu2 %v2358_v7  ;;  %v2357_v14 = vld [vmem:[#allocation5 + $0x178] sm:$0xff]  ;;  %v6786_v7 = vld [vmem:[#allocation5 + $0x160] ss:$0 sm:$0xff] }
 0xacc   :  { %v2187_v58 = vmul.f32 %v2169_v8, %v6245_v30  ;;  %v2355_v8 = vld [vmem:[#allocation5 + $0x168] sm:$0xff] }
 0xacd   :  { %2398 = vmatpush.msrb.mxu2 %v2357_v14 }
 0xace   :  { %v6745_v15 = vsub.f32 %v2153_v26, %v2187_v58 }
 0xad0   :  { %v2203_v43 = vmul.f32 %v6745_v15, %v6745_v15 }
 0xad2   :  { %v2215_v56 = vsel %vm79_vm0, %v2203_v43, 0.0 }
 0xad3   :  { %v2172_v37 = vpop.xlane.xlu0 %2171  ;;  %2216 = vadd.xlane.f32.xlu0 %v2215_v56 }
 0xad4   :  { %v2188_v36 = vmul.f32 %v2172_v37, %v6245_v30 }
 0xad6   :  { %v6751_v27 = vsub.f32 %v2154_v23, %v2188_v36 }
 0xad8   :  { %v2204_v60 = vmul.f32 %v6751_v27, %v6751_v27 }
 0xada   :  { %v2218_v4 = vsel %vm79_vm0, %v2204_v60, 0.0 }
 0xadb   :  { %2219 = vadd.xlane.f32.xlu2 %v2218_v4 }
 0xadd   :  { %v2139_v63 = vpop.f32.mrf.mxu1 }
 0xade   :  { %v2140_v26 = vadd.f32 %v6710_v44, %v2139_v63 }
 0xae0   :  { %v6758_v10 = vadd.f32 %v2140_v26, %v6683_v55 }
 0xae2   :  { %v2173_v48 = vsel %vm79_vm0, %v6758_v10, 0.0 }
 0xae3   :  { %2174 = vadd.xlane.f32.xlu1 %v2173_v48 }
 0xae5   :  { %v2142_v20 = vpop.f32.mrf.mxu1 }
 0xae6   :  { %v2143_v23 = vadd.f32 %v6710_v44, %v2142_v20 }
 0xae8   :  { %v6764_v17 = vadd.f32 %v2143_v23, %v6692_v38 }
 0xaea   :  { %v2176_v19 = vsel %vm79_vm0, %v6764_v17, 0.0 }
 0xaeb   :  { %2177 = vadd.xlane.f32.xlu0 %v2176_v19 }
 0xaed   :  { %v2145_v13 = vpop.f32.mrf.mxu1 }
 0xaee   :  { %v2146_v12 = vadd.f32 %v6710_v44, %v2145_v13 }
 0xaf0   :  { %v6770_v55 = vadd.f32 %v2146_v12, %v6699_v49  ;;  %v2356_v49 = vld [vmem:[#allocation5 + $0x170] sm:$0xff] }
 0xaf1   :  { %2399 = vmatpush.msrb.mxu2 %v2356_v49 }
 0xaf2   :  { %v2179_v28 = vsel %vm79_vm0, %v6770_v55, 0.0 }
 0xaf3   :  { %2180 = vadd.xlane.f32.xlu2 %v2179_v28  ;;  %2400 = vmatpush.msrb.mxu2 %v2355_v8  ;;  %v6783_v28 = vld [vmem:[#allocation5 + $0x158] ss:$0 sm:$0xff] }
 0xaf5   :  { %v2148_v34 = vpop.f32.mrf.mxu1 }
 0xaf6   :  { %v2149_v45 = vadd.f32 %v6710_v44, %v2148_v34 }
 0xaf8   :  { %v6776_v38 = vadd.f32 %v2149_v45, %v6706_v31 }
 0xafa   :  { %v2182_v50 = vsel %vm79_vm0, %v6776_v38, 0.0 }
 0xafb   :  { %2183 = vadd.xlane.f32.xlu1 %v2182_v50 }
 0xb36   :  { %v2211_v58 = vpop.xlane.xlu2 %2210 }
 0xb37   :  { %v2233_v43 = vmul.f32 %v2211_v58, %v6245_v30 }
 0xb39   :  { %v2241_v56 = vadd.f32 1e-05, %v2233_v43 }
 0xb3b   :  { %5435 = vrsqrt.f32 %v2241_v56  ;;  %vm2255_vm7 = vweird.f32 %v2241_v56 }
 0xb3e   :  { %v2214_v44 = vpop.xlane.xlu1 %2213 }
 0xb3f   :  { %v2234_v31 = vmul.f32 %v2214_v44, %v6245_v30 }
 0xb41   :  { %v5436_v37 = vpop.eup %5435  ;;  %v2242_v36 = vadd.f32 1e-05, %v2234_v31 }
 0xb42   :  { %v2250_v60 = vmul.f32 %v5436_v37, %v2241_v56  ;;  %vm2256_vm6 = vweird.f32 %v5436_v37 }
 0xb43   :  { %5437 = vrsqrt.f32 %v2242_v36  ;;  %vm2257_vm9 = vmor %vm2255_vm7, %vm2256_vm6  ;;  %vm2265_vm11 = vweird.f32 %v2242_v36 }
 0xb44   :  { %v2251_v4 = vmul.f32 %v5436_v37, %v2250_v60 }
 0xb46   :  { %v2252_v63 = vmul.f32 0.5, %v2251_v4  ;;  %v2217_v26 = vpop.xlane.xlu0 %2216 }
 0xb47   :  { %v2235_v48 = vmul.f32 %v2217_v26, %v6245_v30 }
 0xb48   :  { %v2253_v20 = vsub.f32 1.5, %v2252_v63 }
 0xb49   :  { %v5438_v23 = vpop.eup %5437  ;;  %v2243_v19 = vadd.f32 1e-05, %v2235_v48 }
 0xb4a   :  { %v2254_v13 = vmul.f32 %v5436_v37, %v2253_v20  ;;  %v2260_v12 = vmul.f32 %v5438_v23, %v2242_v36  ;;  %vm2266_vm10 = vweird.f32 %v5438_v23 }
 0xb4b   :  { %5439 = vrsqrt.f32 %v2243_v19  ;;  %vm2267_vm12 = vmor %vm2265_vm11, %vm2266_vm10  ;;  %vm2275_vm14 = vweird.f32 %v2243_v19 }
 0xb4c   :  { %v2258_v34 = vsel %vm2257_vm9, %v5436_v37, %v2254_v13  ;;  %v2261_v45 = vmul.f32 %v5438_v23, %v2260_v12 }
 0xb4d   :  { %v2329_v50 = vmul.f32 %v2258_v34, %v6733_v53 }
 0xb4e   :  { %v2262_v14 = vmul.f32 0.5, %v2261_v45  ;;  %v2220_v49 = vpop.xlane.xlu2 %2219 }
 0xb4f   :  { %v2338_v8 = vmul.f32 %v6783_v28, %v2329_v50  ;;  %v2236_v58 = vmul.f32 %v2220_v49, %v6245_v30 }
 0xb50   :  { %v2263_v43 = vsub.f32 1.5, %v2262_v14 }
 0xb51   :  { %v5440_v56 = vpop.eup %5439  ;;  %v2244_v44 = vadd.f32 1e-05, %v2236_v58  ;;  %v6791_v31 = vadd.f32 %v6786_v7, %v2338_v8 }
 0xb52   :  { %v2264_v60 = vmul.f32 %v5438_v23, %v2263_v43  ;;  %v2270_v37 = vmul.f32 %v5440_v56, %v2243_v19  ;;  %vm2276_vm13 = vweird.f32 %v5440_v56 }
 0xb53   :  { %5441 = vrsqrt.f32 %v2244_v44  ;;  %4935 = vmatmul.msk.f32.vlgmr.msrb.gmra.mxu2 %vm79_vm0, %v6791_v31  ;;  %vm2277_vm15 = vmor %vm2275_vm14, %vm2276_vm13  ;;  %vm2285_vm2 = vweird.f32 %v2244_v44 }
 0xb54   :  { %v2268_v53 = vsel %vm2267_vm12, %v5438_v23, %v2264_v60  ;;  %v2271_v4 = vmul.f32 %v5440_v56, %v2270_v37 }
 0xb55   :  { %v2330_v63 = vmul.f32 %v2268_v53, %v6739_v40 }
 0xb56   :  { %v2272_v26 = vmul.f32 0.5, %v2271_v4  ;;  %v2175_v48 = vpop.xlane.xlu1 %2174 }
 0xb57   :  { %v2189_v20 = vmul.f32 %v2175_v48, %v6245_v30  ;;  %v2339_v13 = vmul.f32 %v6783_v28, %v2330_v63 }
 0xb58   :  { %v2273_v12 = vsub.f32 1.5, %v2272_v26 }
 0xb59   :  { %v5442_v34 = vpop.eup %5441  ;;  %v6799_v36 = vsub.f32 %v6758_v10, %v2189_v20  ;;  %v6802_v45 = vadd.f32 %v6786_v7, %v2339_v13 }
 0xb5a   :  { %v2274_v50 = vmul.f32 %v5440_v56, %v2273_v12  ;;  %v2280_v23 = vmul.f32 %v5442_v34, %v2244_v44  ;;  %vm2286_vm1 = vweird.f32 %v5442_v34 }
 0xb5b   :  { %4936 = vmatmul.msk.f32.gmra.mxu2 %vm79_vm0, %v6802_v45  ;;  %v2205_v40 = vmul.f32 %v6799_v36, %v6799_v36  ;;  %vm2287_vm3 = vmor %vm2285_vm2, %vm2286_vm1 }
 0xb5c   :  { %v2278_v14 = vsel %vm2277_vm15, %v5440_v56, %v2274_v50  ;;  %v2281_v49 = vmul.f32 %v5442_v34, %v2280_v23 }
 0xb5d   :  { %v2331_v8 = vmul.f32 %v2278_v14, %v6745_v15  ;;  %v2221_v10 = vsel %vm79_vm0, %v2205_v40, 0.0 }
 0xb5e   :  { %v2282_v58 = vmul.f32 0.5, %v2281_v49  ;;  %v2178_v43 = vpop.xlane.xlu0 %2177  ;;  %2222 = vadd.xlane.f32.xlu0 %v2221_v10 }
 0xb5f   :  { %v2190_v60 = vmul.f32 %v2178_v43, %v6245_v30  ;;  %v2340_v19 = vmul.f32 %v6783_v28, %v2331_v8 }
 0xb60   :  { %v2283_v37 = vsub.f32 1.5, %v2282_v58 }
 0xb61   :  { %v6813_v53 = vsub.f32 %v6764_v17, %v2190_v60  ;;  %v6816_v4 = vadd.f32 %v6786_v7, %v2340_v19 }
 0xb62   :  { %v2284_v56 = vmul.f32 %v5442_v34, %v2283_v37 }
 0xb63   :  { %4937 = vmatmul.msk.f32.gmra.mxu2 %vm79_vm0, %v6816_v4  ;;  %v2206_v15 = vmul.f32 %v6813_v53, %v6813_v53 }
 0xb64   :  { %v2288_v63 = vsel %vm2287_vm3, %v5442_v34, %v2284_v56  ;;  %v6848_v56 = vld [vmem:[#allocation5 + $0x188] ss:$0 sm:$0xff] }
 0xb65   :  { %v2332_v26 = vmul.f32 %v2288_v63, %v6751_v27  ;;  %v2224_v48 = vsel %vm79_vm0, %v2206_v15, 0.0 }
 0xb66   :  { %v2181_v20 = vpop.xlane.xlu2 %2180  ;;  %2225 = vadd.xlane.f32.xlu2 %v2224_v48 }
 0xb67   :  { %v2191_v17 = vmul.f32 %v2181_v20, %v6245_v30  ;;  %v2341_v13 = vmul.f32 %v6783_v28, %v2332_v26 }
 0xb69   :  { %v6827_v44 = vsub.f32 %v6770_v55, %v2191_v17  ;;  %v6830_v12 = vadd.f32 %v6786_v7, %v2341_v13 }
 0xb6b   :  { %4938 = vmatmul.msk.f32.gmra.mxu2 %vm79_vm0, %v6830_v12  ;;  %v2207_v27 = vmul.f32 %v6827_v44, %v6827_v44 }
 0xb6d   :  { %v2227_v34 = vsel %vm79_vm0, %v2207_v27, 0.0 }
 0xb6e   :  { %2228 = vadd.xlane.f32.xlu1 %v2227_v34  ;;  %v2184_v50 = vpop.xlane.xlu1 %2183 }
 0xb6f   :  { %v2192_v23 = vmul.f32 %v2184_v50, %v6245_v30 }
 0xb71   :  { %v6839_v40 = vsub.f32 %v6776_v38, %v2192_v23 }
 0xb73   :  { %v2208_v55 = vmul.f32 %v6839_v40, %v6839_v40 }
 0xb75   :  { %v2230_v14 = vsel %vm79_vm0, %v2208_v55, 0.0 }
 0xb76   :  { %2231 = vadd.xlane.f32.xlu2 %v2230_v14 }
 0xbd1   :  { %v2223_v49 = vpop.xlane.xlu0 %2222 }
 0xbd2   :  { %v2237_v8 = vmul.f32 %v2223_v49, %v6245_v30 }
 0xbd4   :  { %v2245_v10 = vadd.f32 1e-05, %v2237_v8 }
 0xbd6   :  { %5443 = vrsqrt.f32 %v2245_v10  ;;  %v6845_v58 = vpop.f32.mrf.mxu2  ;;  %vm2295_vm5 = vweird.f32 %v2245_v10 }
 0xbd9   :  { %v2226_v43 = vpop.xlane.xlu2 %2225 }
 0xbda   :  { %v2238_v60 = vmul.f32 %v2226_v43, %v6245_v30 }
 0xbdc   :  { %v5444_v19 = vpop.eup %5443  ;;  %v2246_v37 = vadd.f32 1e-05, %v2238_v60 }
 0xbdd   :  { %v2290_v38 = vmul.f32 %v5444_v19, %v2245_v10  ;;  %vm2296_vm4 = vweird.f32 %v5444_v19 }
 0xbde   :  { %5445 = vrsqrt.f32 %v2246_v37  ;;  %v2405_v15 = vpop.f32.mrf.mxu2  ;;  %vm2297_vm6 = vmor %vm2295_vm5, %vm2296_vm4  ;;  %vm2305_vm9 = vweird.f32 %v2246_v37 }
 0xbdf   :  { %v2291_v63 = vmul.f32 %v5444_v19, %v2290_v38  ;;  %v6851_v26 = vadd.f32 %v6848_v56, %v2405_v15 }
 0xbe1   :  { %v2292_v48 = vmul.f32 0.5, %v2291_v63  ;;  %v2229_v20 = vpop.xlane.xlu1 %2228  ;;  %v2444_v17 = vmul.f32 %v6851_v26, %v5792_v32 }
 0xbe2   :  { %v2239_v13 = vmul.f32 %v2229_v20, %v6245_v30 }
 0xbe3   :  { %v2293_v27 = vsub.f32 1.5, %v2292_v48  ;;  %2505 = vrot.lane.b32.xlu2 %v2444_v17, %s5682_s1  ;;  %v2440_v48 = vmul.f32 %v6851_v26, %v5806_v39 }
 0xbe4   :  { %v5446_v34 = vpop.eup %5445  ;;  %v2247_v50 = vadd.f32 1e-05, %v2239_v13 }
 0xbe5   :  { %v2294_v23 = vmul.f32 %v5444_v19, %v2293_v27  ;;  %v2300_v55 = vmul.f32 %v5446_v34, %v2246_v37  ;;  %vm2306_vm7 = vweird.f32 %v5446_v34 }
 0xbe6   :  { %5447 = vrsqrt.f32 %v2247_v50  ;;  %v2408_v14 = vpop.f32.mrf.mxu2  ;;  %vm2307_vm10 = vmor %vm2305_vm9, %vm2306_vm7  ;;  %vm2315_vm12 = vweird.f32 %v2247_v50 }
 0xbe7   :  { %v2298_v49 = vsel %vm2297_vm6, %v5444_v19, %v2294_v23  ;;  %v2301_v8 = vmul.f32 %v5446_v34, %v2300_v55  ;;  %v6858_v43 = vadd.f32 %v6848_v56, %v2408_v14 }
 0xbe8   :  { %v2333_v60 = vmul.f32 %v2298_v49, %v6799_v36 }
 0xbe9   :  { %v2302_v38 = vmul.f32 0.5, %v2301_v8  ;;  %v2232_v15 = vpop.xlane.xlu2 %2231  ;;  %v2445_v63 = vmul.f32 %v6858_v43, %v5794_v33 }
 0xbea   :  { %v2240_v10 = vmul.f32 %v2232_v15, %v6245_v30  ;;  %v2342_v20 = vmul.f32 %v6783_v28, %v2333_v60  ;;  %v2441_v15 = vmul.f32 %v6858_v43, %v5814_v41 }
 0xbeb   :  { %v2303_v17 = vsub.f32 1.5, %v2302_v38  ;;  %2507 = vrot.lane.b32.xlu1 %v2445_v63, %s5682_s1  ;;  %2497 = vrot.lane.b32.xlu2 %v2440_v48, %s5682_s1  ;;  %v2437_v63 = vmul.f32 %v6858_v43, %v5827_v46 }
 0xbec   :  { %v5448_v19 = vpop.eup %5447  ;;  %v2248_v36 = vadd.f32 1e-05, %v2240_v10  ;;  %v6870_v13 = vadd.f32 %v6786_v7, %v2342_v20  ;;  %v6893_v20 = vadd.f32 %v6848_v56, %v6845_v58 }
 0xbed   :  { %v2304_v27 = vmul.f32 %v5446_v34, %v2303_v17  ;;  %v2310_v23 = vmul.f32 %v5448_v19, %v2247_v50  ;;  %vm2316_vm11 = vweird.f32 %v5448_v19 }
 0xbee   :  { %5449 = vrsqrt.f32 %v2248_v36  ;;  %v2411_v55 = vpop.f32.mrf.mxu2  ;;  %4939 = vmatmul.msk.f32.gmra.mxu2 %vm79_vm0, %v6870_v13  ;;  %vm2317_vm13 = vmor %vm2315_vm12, %vm2316_vm11  ;;  %vm2325_vm15 = vweird.f32 %v2248_v36 }
 0xbef   :  { %v2308_v14 = vsel %vm2307_vm10, %v5446_v34, %v2304_v27  ;;  %v2311_v49 = vmul.f32 %v5448_v19, %v2310_v23  ;;  %v6875_v8 = vadd.f32 %v6848_v56, %v2411_v55 }
 0xbf0   :  { %v2334_v60 = vmul.f32 %v2308_v14, %v6813_v53 }
 0xbf1   :  { %v2312_v38 = vmul.f32 0.5, %v2311_v49  ;;  %v2446_v37 = vmul.f32 %v6875_v8, %v5776_v25  ;;  %v2434_v58 = vmul.f32 %v6875_v8, %v5871_v62 }
 0xbf2   :  { %v2343_v48 = vmul.f32 %v6783_v28, %v2334_v60  ;;  %v2438_v60 = vmul.f32 %v6875_v8, %v5829_v47 }
 0xbf3   :  { %v2313_v10 = vsub.f32 1.5, %v2312_v38  ;;  %2499 = vrot.lane.b32.xlu1 %v2441_v15, %s5682_s1  ;;  %2509 = vrot.lane.b32.xlu0 %v2446_v37, %s5682_s1  ;;  %v2443_v38 = vmul.f32 %v6893_v20, %v5844_v52 }
 0xbf4   :  { %v5450_v34 = vpop.eup %5449  ;;  %2491 = vrot.lane.b32.xlu2 %v2437_v63, %s5682_s1  ;;  %v6889_v53 = vadd.f32 %v6786_v7, %v2343_v48  ;;  %v2435_v48 = vmul.f32 %v6893_v20, %v5842_v51 }
 0xbf5   :  { %v2314_v17 = vmul.f32 %v5448_v19, %v2313_v10  ;;  %v2320_v27 = vmul.f32 %v5450_v34, %v2248_v36  ;;  %vm2326_vm14 = vweird.f32 %v5450_v34  ;;  %v2442_v10 = vmul.f32 %v6875_v8, %v5798_v35 }
 0xbf6   :  { %4940 = vmatmul.msk.f32.gmra.mxu2 %vm79_vm0, %v6889_v53  ;;  %vm2327_vm1 = vmor %vm2325_vm15, %vm2326_vm14 }
 0xbf7   :  { %v2318_v23 = vsel %vm2317_vm13, %v5448_v19, %v2314_v17  ;;  %v2321_v55 = vmul.f32 %v5450_v34, %v2320_v27  ;;  %v2431_v17 = vmul.f32 %v6893_v20, %v5890_v22 }
 0xbf8   :  { %v2335_v14 = vmul.f32 %v2318_v23, %v6827_v44  ;;  %v2439_v23 = vmul.f32 %v6893_v20, %v5860_v57 }
 0xbf9   :  { %v2322_v49 = vmul.f32 0.5, %v2321_v55 }
 0xbfa   :  { %v2344_v50 = vmul.f32 %v6783_v28, %v2335_v14  ;;  %v2452_v14 = vmul.f32 %v6851_v26, %v6087_v1 }
 0xbfb   :  { %v2323_v15 = vsub.f32 1.5, %v2322_v49  ;;  %2493 = vrot.lane.b32.xlu1 %v2438_v60, %s5682_s1  ;;  %2503 = vrot.lane.b32.xlu0 %v2443_v38, %s5682_s1  ;;  %v2455_v49 = vmul.f32 %v6893_v20, %v6069_v29  ;;  %v2451_v60 = vmul.f32 %v6893_v20, %v6089_v5 }
 0xbfc   :  { %2485 = vrot.lane.b32.xlu2 %v2434_v58, %s5682_s1  ;;  %v6909_v44 = vadd.f32 %v6786_v7, %v2344_v50  ;;  %v2436_v58 = vmul.f32 %v6851_v26, %v5865_v59 }
 0xbfd   :  { %v2324_v19 = vmul.f32 %v5450_v34, %v2323_v15  ;;  %v5217_v50 = vpack.i.bf16 %v2451_v60, %v2452_v14  ;;  %v2448_v15 = vmul.f32 %v6851_v26, %v6106_v2 }
 0xbfe   :  { %4941 = vmatmul.msk.f32.gmra.mxu2 %vm79_vm0, %v6909_v44 }
 0xbff   :  { %v2328_v37 = vsel %vm2327_vm1, %v5450_v34, %v2324_v19  ;;  %v2459_v34 = vmul.f32 %v6893_v20, %v6023_v61  ;;  %v2450_v19 = vmul.f32 %v6875_v8, %v6102_v16 }
 0xc00   :  { %v2336_v63 = vmul.f32 %v2328_v37, %v6839_v40  ;;  %v2460_v40 = vmul.f32 %v6851_v26, %v5995_v42  ;;  %v2447_v37 = vmul.f32 %v6893_v20, %v6117_v3 }
 0xc02   :  { %v2345_v27 = vmul.f32 %v6783_v28, %v2336_v63  ;;  %v2432_v28 = vmul.f32 %v6851_v26, %v5876_v6  ;;  %v5207_v55 = vpack.i.bf16 %v2459_v34, %v2460_v40  ;;  %v2449_v63 = vmul.f32 %v6858_v43, %v6104_v11  ;;  %v7886_v34 = vld [vmem:[#allocation9_spill] sm:$0xff] }
 0xc03   :  { %2487 = vrot.lane.b32.xlu1 %v2435_v48, %s5682_s1  ;;  %2501 = vrot.lane.b32.xlu0 %v2442_v10, %s5682_s1  ;;  %v5222_v48 = vpack.i.bf16 %v2447_v37, %v2448_v15  ;;  %v2433_v10 = vmul.f32 %v6858_v43, %v5888_v21 }
 0xc04   :  { %2479 = vrot.lane.b32.xlu2 %v2431_v17, %s5682_s1  ;;  %v6925_v36 = vadd.f32 %v6786_v7, %v2345_v27  ;;  %v2456_v7 = vmul.f32 %v6851_v26, %v6064_v9  ;;  %v5242_v17 = vpack.i.bf16 %v2449_v63, %v2450_v19  ;;  %v7885_v27 = vld [vmem:[#allocation11_spill] sm:$0xff] }
 0xc05   :  { %v2458_v40 = vmul.f32 %v6875_v8, %v7885_v27 }
 0xc06   :  { %4942 = vmatmul.msk.f32.gmra.mxu2 %vm79_vm0, %v6925_v36  ;;  %v5212_v38 = vpack.i.bf16 %v2455_v49, %v2456_v7  ;;  %v7888_v7 = vld [vmem:[#allocation10_spill] sm:$0xff] }
 0xc07   :  { %v2461_v14 = vmul.f32 %v6858_v43, %v7888_v7 }
 0xc0b   :  { %2481 = vrot.lane.b32.xlu1 %v2432_v28, %s5682_s1  ;;  %2495 = vrot.lane.b32.xlu0 %v2439_v23, %s5682_s1  ;;  %v2462_v28 = vmul.f32 %v6875_v8, %v7886_v34  ;;  %v7887_v23 = vld [vmem:[#allocation12_spill] sm:$0xff] }
 0xc0c   :  { %5208 = vrot.lane.b32.xlu2 %v5207_v55, %s5683_s21  ;;  %v2457_v55 = vmul.f32 %v6858_v43, %v7887_v23 }
 0xc0d   :  { %v5227_v60 = vpack.i.bf16 %v2461_v14, %v2462_v28 }
 0xc0e   :  { %v5232_v49 = vpack.i.bf16 %v2457_v55, %v2458_v40 }
 0xc13   :  { %5213 = vrot.lane.b32.xlu1 %v5212_v38, %s5683_s21  ;;  %2489 = vrot.lane.b32.xlu0 %v2436_v58, %s5682_s1  ;;  %v7889_v38 = vld [vmem:[#allocation13_spill] sm:$0xff] }
 0xc14   :  { %5218 = vrot.lane.b32.xlu2 %v5217_v50, %s5683_s21  ;;  %v2454_v58 = vmul.f32 %v6875_v8, %v7889_v38  ;;  %v7890_v50 = vld [vmem:[#allocation14_spill] sm:$0xff] }
 0xc15   :  { %v2453_v15 = vmul.f32 %v6858_v43, %v7890_v50 }
 0xc17   :  { %v5237_v19 = vpack.i.bf16 %v2453_v15, %v2454_v58 }
 0xc1b   :  { %5223 = vrot.lane.b32.xlu1 %v5222_v48, %s5683_s21  ;;  %2483 = vrot.lane.b32.xlu0 %v2433_v10, %s5682_s1 }
 0xc1c   :  { %5243 = vrot.lane.b32.xlu2 %v5242_v17, %s5683_s21 }
 0xc23   :  { %5233 = vrot.lane.b32.xlu1 %v5232_v49, %s5683_s21  ;;  %5228 = vrot.lane.b32.xlu0 %v5227_v60, %s5683_s21 }
 0xc2b   :  { %5238 = vrot.lane.b32.xlu1 %v5237_v19, %s5683_s21 }
 0xc3d   :  { %v2506_v63 = vpop.permute.xlu2 %2505 }
 0xc45   :  { %v2498_v28 = vpop.permute.xlu2 %2497 }
 0xc4e   :  { %v2492_v19 = vpop.permute.xlu2 %2491 }
 0xc5d   :  { %v2508_v37 = vpop.permute.xlu1 %2507 }
 0xc65   :  { %v2510_v48 = vpop.permute.xlu0 %2509  ;;  %v2500_v10 = vpop.permute.xlu1 %2499 }
 0xc66   :  { %4943 = vmatpush.xpose.msk.msra.mxu0 %vm79_vm0, %v2510_v48 }
 0xc6a   :  { %4944 = vmatpush.xpose.msk.msra.mxu0 %vm79_vm0, %v2508_v37 }
 0xc6d   :  { %v2504_v17 = vpop.permute.xlu0 %2503  ;;  %v2494_v40 = vpop.permute.xlu1 %2493 }
 0xc6e   :  { %4945 = vmatpush.xpose.msk.msra.mxu0 %vm79_vm0, %v2506_v63 }
 0xc71   :  { %v2414_v55 = vpop.f32.mrf.mxu2 }
 0xc72   :  { %v6985_v14 = vadd.f32 %v6848_v56, %v2414_v55  ;;  %4946 = vmatpush.xpose.msk.msra.mxu0 %vm79_vm0, %v2504_v17 }
 0xc74   :  { %v2766_v49 = vmul.f32 %v6985_v14, %v5844_v52  ;;  %v2762_v60 = vmul.f32 %v6985_v14, %v5860_v57 }
 0xc75   :  { %v2502_v58 = vpop.permute.xlu0 %2501  ;;  %v2488_v15 = vpop.permute.xlu1 %2487 }
 0xc76   :  { %2826 = vrot.lane.b32.xlu1 %v2766_v49, %s5682_s1  ;;  %2818 = vrot.lane.b32.xlu2 %v2762_v60, %s5682_s1  ;;  %v2486_v60 = vpop.permute.xlu2 %2485 }
 0xc77   :  { %4947 = vmatpush.xpose.msk.msra.mxu0 %vm79_vm0, %v2502_v58 }
 0xc79   :  { %v2417_v37 = vpop.f32.mrf.mxu2 }
 0xc7a   :  { %v6996_v63 = vadd.f32 %v6848_v56, %v2417_v37 }
 0xc7b   :  { %4948 = vmatpush.xpose.msk.msra.mxu0 %vm79_vm0, %v2500_v10 }
 0xc7c   :  { %v2759_v52 = vmul.f32 %v6996_v63, %v5865_v59  ;;  %v2767_v57 = vmul.f32 %v6996_v63, %v5792_v32  ;;  %v2763_v59 = vmul.f32 %v6996_v63, %v5806_v39 }
 0xc7d   :  { %v2496_v48 = vpop.permute.xlu0 %2495  ;;  %v2482_v17 = vpop.permute.xlu1 %2481 }
 0xc7e   :  { %2812 = vrot.lane.b32.xlu0 %v2759_v52, %s5682_s1  ;;  %2828 = vrot.lane.b32.xlu2 %v2767_v57, %s5682_s1 }
 0xc7f   :  { %4949 = vmatpush.xpose.msk.msra.mxu0 %vm79_vm0, %v2498_v28 }
 0xc81   :  { %v2420_v55 = vpop.f32.mrf.mxu2 }
 0xc82   :  { %v7007_v49 = vadd.f32 %v6848_v56, %v2420_v55 }
 0xc83   :  { %4950 = vmatpush.xpose.msk.msra.mxu0 %vm79_vm0, %v2496_v48 }
 0xc84   :  { %v2768_v32 = vmul.f32 %v7007_v49, %v5794_v33  ;;  %v2760_v10 = vmul.f32 %v7007_v49, %v5827_v46  ;;  %v2764_v33 = vmul.f32 %v7007_v49, %v5814_v41  ;;  %v2480_v46 = vpop.permute.xlu2 %2479 }
 0xc85   :  { %v2490_v58 = vpop.permute.xlu0 %2489  ;;  %v5214_v37 = vpop.permute.xlu1 %5213 }
 0xc86   :  { %2820 = vrot.lane.b32.xlu2 %v2763_v59, %s5682_s1  ;;  %2830 = vrot.lane.b32.xlu1 %v2768_v32, %s5682_s1 }
 0xc87   :  { %2814 = vrot.lane.b32.xlu0 %v2760_v10, %s5682_s1  ;;  %4951 = vmatpush.xpose.msk.msra.mxu0 %vm79_vm0, %v2494_v40 }
 0xc89   :  { %v2423_v28 = vpop.f32.mrf.mxu2 }
 0xc8a   :  { %v7021_v52 = vadd.f32 %v6848_v56, %v2423_v28 }
 0xc8b   :  { %4952 = vmatpush.xpose.msk.msra.mxu0 %vm79_vm0, %v2492_v19 }
 0xc8c   :  { %v2769_v39 = vmul.f32 %v7021_v52, %v5776_v25  ;;  %v2761_v56 = vmul.f32 %v7021_v52, %v5829_v47  ;;  %v2765_v41 = vmul.f32 %v7021_v52, %v5798_v35  ;;  %v5209_v25 = vpop.permute.xlu2 %5208 }
 0xc8d   :  { %v2484_v57 = vpop.permute.xlu0 %2483  ;;  %v5224_v48 = vpop.permute.xlu1 %5223  ;;  %v5210_v32 = vunpack.i.l.bf16 %v5209_v25  ;;  %v5211_v47 = vunpack.i.h.bf16 %v5209_v25  ;;  %v5605_v25 = vld [vmem:[#allocation5 + $0x3f0] sm:$0xff] }
 0xc8e   :  { %2822 = vrot.lane.b32.xlu2 %v2764_v33, %s5682_s1 }
 0xc8f   :  { %2832 = vrot.lane.b32.xlu0 %v2769_v39, %s5682_s1  ;;  %4953 = vmatpush.xpose.msk.msra.mxu0 %vm79_vm0, %v2490_v58  ;;  %v5215_v58 = vunpack.i.l.bf16 %v5214_v37 }
 0xc93   :  { %4954 = vmatpush.xpose.msk.msra.mxu0 %vm79_vm0, %v2488_v15 }
 0xc94   :  { %v5219_v10 = vpop.permute.xlu2 %5218 }
 0xc95   :  { %v5229_v40 = vpop.permute.xlu0 %5228  ;;  %v5234_v59 = vpop.permute.xlu1 %5233 }
 0xc96   :  { %v5230_v19 = vunpack.i.l.bf16 %v5229_v40  ;;  %2816 = vrot.lane.b32.xlu2 %v2761_v56, %s5682_s1  ;;  %v5231_v55 = vunpack.i.h.bf16 %v5229_v40  ;;  %v5235_v15 = vunpack.i.l.bf16 %v5234_v59  ;;  %v5236_v35 = vunpack.i.h.bf16 %v5234_v59  ;;  %v5608_v59 = vld [vmem:[#allocation5 + $0x3d8] sm:$0xff] }
 0xc97   :  { %2824 = vrot.lane.b32.xlu0 %v2765_v41, %s5682_s1  ;;  %4955 = vmatpush.xpose.msk.msra.mxu0 %vm79_vm0, %v2486_v60  ;;  %v5216_v60 = vunpack.i.h.bf16 %v5214_v37  ;;  %v5221_v56 = vunpack.i.h.bf16 %v5219_v10  ;;  %v5225_v37 = vunpack.i.l.bf16 %v5224_v48  ;;  %v5226_v41 = vunpack.i.h.bf16 %v5224_v48  ;;  %v5609_v48 = vld [vmem:[#allocation5 + $0x3d0] sm:$0xff] }
 0xc98   :  { %2672 = vmatpush.msrb.mxu3 %v5230_v19  ;;  %v5604_v19 = vld [vmem:[#allocation5 + $0x3f8] sm:$0xff] }
 0xc9a   :  { %2673 = vmatpush.msrb.mxu3 %v5231_v55  ;;  %v5606_v55 = vld [vmem:[#allocation5 + $0x3e8] sm:$0xff] }
 0xc9b   :  { %4956 = vmatpush.xpose.msk.msra.mxu0 %vm79_vm0, %v2484_v57  ;;  %v5220_v57 = vunpack.i.l.bf16 %v5219_v10  ;;  %v5615_v10 = vld [vmem:[#allocation5 + $0x3a0] sm:$0xff] }
 0xc9c   :  { %2674 = vmatpush.msrb.mxu3 %v5210_v32  ;;  %v5610_v32 = vld [vmem:[#allocation5 + $0x3c8] sm:$0xff] }
 0xc9d   :  { %v5239_v28 = vpop.permute.xlu1 %5238 }
 0xc9e   :  { %2675 = vmatpush.msrb.mxu3 %v5211_v47  ;;  %v5240_v33 = vunpack.i.l.bf16 %v5239_v28  ;;  %v5241_v39 = vunpack.i.h.bf16 %v5239_v28  ;;  %v5612_v47 = vld [vmem:[#allocation5 + $0x3b8] sm:$0xff]  ;;  %v5618_v28 = vld [vmem:[#allocation5 + $0x388] sm:$0xff] }
 0xc9f   :  { %4957 = vmatpush.xpose.msk.msra.mxu0 %vm79_vm0, %v2482_v17  ;;  %v5244_v17 = vpop.permute.xlu2 %5243 }
 0xca0   :  { %2676 = vmatpush.msrb.mxu3 %v5235_v15  ;;  %v5245_v40 = vunpack.i.l.bf16 %v5244_v17  ;;  %v5613_v15 = vld [vmem:[#allocation5 + $0x3b0] sm:$0xff] }
 0xca2   :  { %2677 = vmatpush.msrb.mxu3 %v5236_v35  ;;  %v5614_v35 = vld [vmem:[#allocation5 + $0x3a8] sm:$0xff] }
 0xca3   :  { %4958 = vmatpush.xpose.msk.msra.mxu0 %vm79_vm0, %v2480_v46  ;;  %v5246_v46 = vunpack.i.h.bf16 %v5244_v17 }
 0xca4   :  { %2678 = vmatpush.msrb.mxu3 %v5215_v58  ;;  %v5616_v58 = vld [vmem:[#allocation5 + $0x398] sm:$0xff] }
 0xca6   :  { %4959 = vmatmul.msk.f32.vlgmr.msra.gmra.mxu0 %vm79_vm0, %v6893_v20  ;;  %2679 = vmatpush.msrb.mxu3 %v5216_v60  ;;  %v5603_v20 = vld [vmem:[#allocation5 + $0x400] sm:$0xff] }
 0xca8   :  { %2680 = vmatpush.msrb.mxu3 %v5240_v33 }
 0xcaa   :  { %2681 = vmatpush.msrb.mxu3 %v5241_v39 }
 0xcac   :  { %2682 = vmatpush.msrb.mxu3 %v5220_v57 }
 0xcae   :  { %4960 = vmatmul.msk.f32.gmra.mxu0 %vm79_vm0, %v6851_v26  ;;  %2683 = vmatpush.msrb.mxu3 %v5221_v56  ;;  %v5607_v26 = vld [vmem:[#allocation5 + $0x3e0] sm:$0xff] }
 0xcb0   :  { %2684 = vmatpush.msrb.mxu3 %v5245_v40 }
 0xcb2   :  { %2685 = vmatpush.msrb.mxu3 %v5246_v46 }
 0xcb4   :  { %2686 = vmatpush.msrb.mxu3 %v5225_v37 }
 0xcb6   :  { %4961 = vmatmul.msk.f32.gmra.mxu0 %vm79_vm0, %v6858_v43  ;;  %2687 = vmatpush.msrb.mxu3 %v5226_v41  ;;  %v5611_v43 = vld [vmem:[#allocation5 + $0x3c0] sm:$0xff] }
 0xcb8   :  { %3024 = vmatpush.msra.mxu3 %v5603_v20 }
 0xcba   :  { %3025 = vmatpush.msra.mxu3 %v5604_v19 }
 0xcbc   :  { %3026 = vmatpush.msra.mxu3 %v5605_v25 }
 0xcbe   :  { %3027 = vmatpush.msra.mxu3 %v5606_v55  ;;  %4962 = vmatmul.msk.f32.gmra.mxu0 %vm79_vm0, %v6875_v8  ;;  %v5617_v8 = vld [vmem:[#allocation5 + $0x390] sm:$0xff] }
 0xcc0   :  { %3028 = vmatpush.msra.mxu3 %v5607_v26 }
 0xcc2   :  { %3029 = vmatpush.msra.mxu3 %v5608_v59 }
 0xcc4   :  { %3030 = vmatpush.msra.mxu3 %v5609_v48 }
 0xcc6   :  { %3031 = vmatpush.msra.mxu3 %v5610_v32  ;;  %v2758_v32 = vmul.f32 %v6985_v14, %v5842_v51  ;;  %v2785_v51 = vmul.f32 %v7021_v52, %v7886_v34 }
 0xcc8   :  { %3032 = vmatpush.msra.mxu3 %v5611_v43  ;;  %v2757_v43 = vmul.f32 %v7021_v52, %v5871_v62  ;;  %v2754_v62 = vmul.f32 %v6985_v14, %v5890_v22  ;;  %v2780_v22 = vmul.f32 %v7007_v49, %v7887_v23 }
 0xcca   :  { %3033 = vmatpush.msra.mxu3 %v5612_v47  ;;  %v2756_v47 = vmul.f32 %v7007_v49, %v5888_v21  ;;  %v2782_v21 = vmul.f32 %v6985_v14, %v6023_v61  ;;  %v2778_v61 = vmul.f32 %v6985_v14, %v6069_v29 }
 0xccc   :  { %3034 = vmatpush.msra.mxu3 %v5613_v15  ;;  %v2755_v15 = vmul.f32 %v6996_v63, %v5876_v6  ;;  %v2783_v6 = vmul.f32 %v6996_v63, %v5995_v42  ;;  %v2779_v42 = vmul.f32 %v6996_v63, %v6064_v9 }
 0xcce   :  { %3035 = vmatpush.msra.mxu3 %v5614_v35  ;;  %v2784_v35 = vmul.f32 %v7007_v49, %v7888_v7  ;;  %v2781_v7 = vmul.f32 %v7021_v52, %v7885_v27 }
 0xcd0   :  { %3036 = vmatpush.msra.mxu3 %v5615_v10  ;;  %v2819_v33 = vpop.permute.xlu2 %2818  ;;  %v5247_v10 = vpack.i.bf16 %v2784_v35, %v2785_v51 }
 0xcd2   :  { %3037 = vmatpush.msra.mxu3 %v5616_v58  ;;  %v5252_v58 = vpack.i.bf16 %v2782_v21, %v2783_v6 }
 0xcd4   :  { %3038 = vmatpush.msra.mxu3 %v5617_v8 }
 0xcd6   :  { %3039 = vmatpush.msra.mxu3 %v5618_v28  ;;  %v5257_v28 = vpack.i.bf16 %v2780_v22, %v2781_v7  ;;  %v2429_v22 = vld [vmem:[#allocation5 + $0x1a8] sm:$0xff] }
 0xcd7   :  { %3122 = vmatpush.msra.mxu1 %v2429_v22  ;;  %v2777_v22 = vmul.f32 %v7021_v52, %v7889_v38 }
 0xcd8   :  { %v2829_v17 = vpop.permute.xlu2 %2828 }
 0xce0   :  { %v2821_v46 = vpop.permute.xlu2 %2820 }
 0xce8   :  { %v2827_v57 = vpop.permute.xlu1 %2826  ;;  %v2823_v41 = vpop.permute.xlu2 %2822 }
 0xcf0   :  { %v2813_v60 = vpop.permute.xlu0 %2812  ;;  %v2817_v20 = vpop.permute.xlu2 %2816 }
 0xcf8   :  { %v2831_v40 = vpop.permute.xlu1 %2830 }
 0xcf9   :  { %v2815_v39 = vpop.permute.xlu0 %2814 }
 0xd01   :  { %v2833_v56 = vpop.permute.xlu0 %2832 }
 0xd02   :  { %4963 = vmatpush.xpose.msk.msra.mxu2 %vm79_vm0, %v2833_v56 }
 0xd06   :  { %4964 = vmatpush.xpose.msk.msra.mxu2 %vm79_vm0, %v2831_v40 }
 0xd09   :  { %v2825_v37 = vpop.permute.xlu0 %2824 }
 0xd0a   :  { %4965 = vmatpush.xpose.msk.msra.mxu2 %vm79_vm0, %v2829_v17 }
 0xd0e   :  { %4966 = vmatpush.xpose.msk.msra.mxu2 %vm79_vm0, %v2827_v57 }
 0xd12   :  { %4967 = vmatpush.xpose.msk.msra.mxu2 %vm79_vm0, %v2825_v37 }
 0xd16   :  { %4968 = vmatpush.xpose.msk.msra.mxu2 %vm79_vm0, %v2823_v41 }
 0xd1a   :  { %4969 = vmatpush.xpose.msk.msra.mxu2 %vm79_vm0, %v2821_v46 }
 0xd1e   :  { %4970 = vmatpush.xpose.msk.msra.mxu2 %vm79_vm0, %v2819_v33 }
 0xd22   :  { %4971 = vmatpush.xpose.msk.msra.mxu2 %vm79_vm0, %v2817_v20 }
 0xd23   :  { %v2572_v19 = vpop.f32.mrf.mxu0 }
 0xd24   :  { %v2584_v25 = vmul.f32 0.35355338, %v2572_v19 }
 0xd26   :  { %2588 = vmax.xlane.f32.xlu0 %v2584_v25  ;;  %4972 = vmatpush.xpose.msk.msra.mxu2 %vm79_vm0, %v2815_v39 }
 0xd2a   :  { %4973 = vmatpush.xpose.msk.msra.mxu2 %vm79_vm0, %v2813_v60  ;;  %v5262_v60 = vpack.i.bf16 %v2778_v61, %v2779_v42  ;;  %v2426_v42 = vld [vmem:[#allocation5 + $0x190] sm:$0xff] }
 0xd2b   :  { %v2575_v55 = vpop.f32.mrf.mxu0 }
 0xd2c   :  { %v2585_v26 = vmul.f32 0.35355338, %v2575_v55 }
 0xd2e   :  { %2590 = vmax.xlane.f32.xlu1 %v2585_v26 }
 0xd33   :  { %v2578_v59 = vpop.f32.mrf.mxu0 }
 0xd34   :  { %v2586_v48 = vmul.f32 0.35355338, %v2578_v59 }
 0xd36   :  { %2592 = vmax.xlane.f32.xlu2 %v2586_v48 }
 0xd3a   :  { %2810 = vrot.lane.b32.xlu0 %v2758_v32, %s5682_s1 }
 0xd3b   :  { %v2581_v34 = vpop.f32.mrf.mxu0 }
 0xd3c   :  { %v2587_v8 = vmul.f32 0.35355338, %v2581_v34 }
 0xd47   :  { %2808 = vrot.lane.b32.xlu1 %v2757_v43, %s5682_s1 }
 0xd4e   :  { %2806 = vrot.lane.b32.xlu2 %v2756_v47, %s5682_s1 }
 0xd4f   :  { %2804 = vrot.lane.b32.xlu1 %v2755_v15, %s5682_s1 }
 0xd56   :  { %5248 = vrot.lane.b32.xlu2 %v5247_v10, %s5683_s21 }
 0xd57   :  { %2802 = vrot.lane.b32.xlu1 %v2754_v62, %s5682_s1 }
 0xd5e   :  { %5253 = vrot.lane.b32.xlu2 %v5252_v58, %s5683_s21 }
 0xd64   :  { %2594 = vmax.xlane.f32.xlu0 %v2587_v8 }
 0xd66   :  { %5258 = vrot.lane.b32.xlu2 %v5257_v28, %s5683_s21  ;;  %v2428_v28 = vld [vmem:[#allocation5 + $0x1a0] sm:$0xff] }
 0xd67   :  { %3123 = vmatpush.msra.mxu1 %v2428_v28 }
 0xd78   :  { %5263 = vrot.lane.b32.xlu0 %v5262_v60, %s5683_s21 }
 0xd99   :  { %v2589_v33 = vpop.xlane.xlu0 %2588 }
 0xd9a   :  { %v2596_v39 = vsub.f32 %v2584_v25, %v2589_v33 }
 0xd9c   :  { %v2600_v27 = vmul.f32 1.442695, %v2596_v39 }
 0xd9e   :  { %5451 = vpow2.f32 %v2600_v27 }
 0xda1   :  { %v2591_v57 = vpop.xlane.xlu1 %2590 }
 0xda2   :  { %v2597_v17 = vsub.f32 %v2585_v26, %v2591_v57 }
 0xda4   :  { %v5452_v23 = vpop.eup %5451  ;;  %v2602_v56 = vmul.f32 1.442695, %v2597_v17 }
 0xda5   :  { %2688 = vmatmul.f32.vlgmr.msrb.gmra.mxu3 %v5452_v23  ;;  %2717 = vmatmul.f32.vlgmr.msrb.gmra.mxu1 %v5452_v23 }
 0xda6   :  { %5453 = vpow2.f32 %v2602_v56 }
 0xda9   :  { %v2593_v40 = vpop.xlane.xlu2 %2592 }
 0xdaa   :  { %v2598_v46 = vsub.f32 %v2586_v48, %v2593_v40 }
 0xdac   :  { %v5454_v9 = vpop.eup %5453  ;;  %v2604_v37 = vmul.f32 1.442695, %v2598_v46  ;;  %v2811_v41 = vpop.permute.xlu0 %2810 }
 0xdad   :  { %2691 = vmatmul.f32.gmra.mxu3 %v5454_v9  ;;  %2720 = vmatmul.f32.gmra.mxu1 %v5454_v9 }
 0xdae   :  { %5455 = vpow2.f32 %v2604_v37  ;;  %4974 = vmatpush.xpose.msk.msra.mxu2 %vm79_vm0, %v2811_v41 }
 0xdb1   :  { %v2807_v29 = vpop.permute.xlu2 %2806 }
 0xdb4   :  { %v5456_v20 = vpop.eup %5455 }
 0xdb5   :  { %2694 = vmatmul.f32.gmra.mxu3 %v5456_v20  ;;  %2723 = vmatmul.f32.gmra.mxu1 %v5456_v20 }
 0xdb9   :  { %v5249_v19 = vpop.permute.xlu2 %5248  ;;  %v2809_v25 = vpop.permute.xlu1 %2808 }
 0xdba   :  { %v5250_v55 = vunpack.i.l.bf16 %v5249_v19  ;;  %4975 = vmatpush.xpose.msk.msra.mxu2 %vm79_vm0, %v2809_v25  ;;  %v5251_v26 = vunpack.i.h.bf16 %v5249_v19 }
 0xdbc   :  { %2995 = vmatpush.msrb.mxu0 %v5250_v55 }
 0xdbe   :  { %4976 = vmatpush.xpose.msk.msra.mxu2 %vm79_vm0, %v2807_v29  ;;  %2996 = vmatpush.msrb.mxu0 %v5251_v26 }
 0xdc1   :  { %v5254_v59 = vpop.permute.xlu2 %5253  ;;  %v2805_v48 = vpop.permute.xlu1 %2804 }
 0xdc2   :  { %v5255_v32 = vunpack.i.l.bf16 %v5254_v59  ;;  %4977 = vmatpush.xpose.msk.msra.mxu2 %vm79_vm0, %v2805_v48  ;;  %v5256_v43 = vunpack.i.h.bf16 %v5254_v59 }
 0xdc4   :  { %2997 = vmatpush.msrb.mxu0 %v5255_v32 }
 0xdc6   :  { %2998 = vmatpush.msrb.mxu0 %v5256_v43 }
 0xdc9   :  { %v5259_v47 = vpop.permute.xlu2 %5258  ;;  %v2803_v15 = vpop.permute.xlu1 %2802 }
 0xdca   :  { %v5260_v51 = vunpack.i.l.bf16 %v5259_v47  ;;  %4978 = vmatpush.xpose.msk.msra.mxu2 %vm79_vm0, %v2803_v15  ;;  %v5261_v35 = vunpack.i.h.bf16 %v5259_v47 }
 0xdcc   :  { %2999 = vmatpush.msrb.mxu0 %v5260_v51 }
 0xdcd   :  { %4979 = vmatmul.msk.f32.vlgmr.msra.gmra.mxu2 %vm79_vm0, %v6985_v14 }
 0xdce   :  { %3000 = vmatpush.msrb.mxu0 %v5261_v35 }
 0xdd5   :  { %4980 = vmatmul.msk.f32.gmra.mxu2 %vm79_vm0, %v6996_v63 }
 0xdd7   :  { %v2595_v10 = vpop.xlane.xlu0 %2594 }
 0xdd8   :  { %v2599_v62 = vsub.f32 %v2587_v8, %v2595_v10  ;;  %v2427_v8 = vld [vmem:[#allocation5 + $0x198] sm:$0xff] }
 0xdd9   :  { %3124 = vmatpush.msra.mxu1 %v2427_v8 }
 0xdda   :  { %v2606_v6 = vmul.f32 1.442695, %v2599_v62 }
 0xddb   :  { %3125 = vmatpush.msra.mxu1 %v2426_v42  ;;  %v2776_v42 = vmul.f32 %v7007_v49, %v7890_v50  ;;  %v2773_v50 = vmul.f32 %v7021_v52, %v6102_v16 }
 0xddc   :  { %5457 = vpow2.f32 %v2606_v6 }
 0xddd   :  { %4981 = vmatmul.msk.f32.gmra.mxu2 %vm79_vm0, %v7007_v49 }
 0xde2   :  { %v5458_v21 = vpop.eup %5457 }
 0xde3   :  { %2697 = vmatmul.f32.gmra.mxu3 %v5458_v21  ;;  %2726 = vmatmul.f32.gmra.mxu1 %v5458_v21  ;;  %v2775_v21 = vmul.f32 %v6996_v63, %v6087_v1  ;;  %v2771_v1 = vmul.f32 %v6996_v63, %v6106_v2 }
 0xde5   :  { %4982 = vmatmul.msk.f32.gmra.mxu2 %vm79_vm0, %v7021_v52 }
 0xdea   :  { %v5264_v58 = vpop.permute.xlu0 %5263 }
 0xdeb   :  { %v5265_v34 = vunpack.i.l.bf16 %v5264_v58  ;;  %v5266_v7 = vunpack.i.h.bf16 %v5264_v58 }
 0xded   :  { %3001 = vmatpush.msrb.mxu0 %v5265_v34 }
 0xdef   :  { %3002 = vmatpush.msrb.mxu0 %v5266_v7  ;;  %v2774_v7 = vmul.f32 %v6985_v14, %v6089_v5  ;;  %v2770_v5 = vmul.f32 %v6985_v14, %v6117_v3  ;;  %v7140_v3 = vld [vmem:[#allocation5 + $0x1b0] ss:$0 sm:$0xff] }
 0xdf1   :  { %v5272_v8 = vpack.i.bf16 %v2774_v7, %v2775_v21  ;;  %v5282_v38 = vpack.i.bf16 %v2770_v5, %v2771_v1 }
 0xe22   :  { %v2718_v61 = vpop.f32.mrf.mxu1 }
 0xe23   :  { %5459 = vrcp.f32 %v2718_v61 }
 0xe28   :  { %v2689_v27 = vpop.f32.mrf.mxu3 }
 0xe29   :  { %v5460_v60 = vpop.eup %5459 }
 0xe2a   :  { %v2734_v33 = vmul.f32 %v5460_v60, %v2718_v61  ;;  %v2721_v39 = vpop.f32.mrf.mxu1 }
 0xe2b   :  { %5461 = vrcp.f32 %v2721_v39 }
 0xe2c   :  { %v2738_v57 = vsub.f32 2.0, %v2734_v33  ;;  %v5267_v33 = vpack.i.bf16 %v2776_v42, %v2777_v22  ;;  %v3429_v42 = vld [vmem:[#allocation5 + $0x1f8] sm:$0xff] }
 0xe2e   :  { %v2742_v17 = vmul.f32 %v5460_v60, %v2738_v57  ;;  %v2772_v57 = vmul.f32 %v7007_v49, %v6104_v11 }
 0xe30   :  { %v2746_v23 = vmul.f32 %v2742_v17, %v2689_v27  ;;  %v2692_v37 = vpop.f32.mrf.mxu3  ;;  %v5277_v2 = vpack.i.bf16 %v2772_v57, %v2773_v50 }
 0xe31   :  { %v5462_v56 = vpop.eup %5461 }
 0xe32   :  { %2750 = vst.msk [vmem:[#allocation2] sm:$0xff] %vm79_vm0, %v2746_v23  ;;  %v2735_v40 = vmul.f32 %v5462_v56, %v2721_v39  ;;  %v2724_v46 = vpop.f32.mrf.mxu1 }
 0xe33   :  { %5463 = vrcp.f32 %v2724_v46 }
 0xe34   :  { %v2739_v9 = vsub.f32 2.0, %v2735_v40 }
 0xe36   :  { %v2743_v41 = vmul.f32 %v5462_v56, %v2739_v9 }
 0xe38   :  { %v2747_v29 = vmul.f32 %v2743_v41, %v2692_v37  ;;  %v2695_v59 = vpop.f32.mrf.mxu3 }
 0xe39   :  { %v5464_v20 = vpop.eup %5463  ;;  %v3077_v19 = vld [vmem:[#allocation2] sm:$0xff] }
 0xe3a   :  { %2751 = vst.msk [vmem:[#allocation2 + $0x8] sm:$0xff] %vm79_vm0, %v2747_v29  ;;  %v2736_v25 = vmul.f32 %v5464_v20, %v2724_v46  ;;  %4983 = vmatmul.msk.f32.vlgmr.msra.gmra.mxu1 %vm79_vm0, %v3077_v19 }
 0xe3c   :  { %v2740_v55 = vsub.f32 2.0, %v2736_v25 }
 0xe3e   :  { %v2744_v26 = vmul.f32 %v5464_v20, %v2740_v55 }
 0xe40   :  { %v2748_v48 = vmul.f32 %v2744_v26, %v2695_v59 }
 0xe41   :  { %v3078_v32 = vld [vmem:[#allocation2 + $0x8] sm:$0xff] }
 0xe42   :  { %2752 = vst.msk [vmem:[#allocation2 + $0x10] sm:$0xff] %vm79_vm0, %v2748_v48  ;;  %4984 = vmatmul.msk.f32.gmra.mxu1 %vm79_vm0, %v3078_v32 }
 0xe49   :  { %v3079_v43 = vld [vmem:[#allocation2 + $0x10] sm:$0xff] }
 0xe4a   :  { %4985 = vmatmul.msk.f32.gmra.mxu1 %vm79_vm0, %v3079_v43 }
 0xe50   :  { %v2895_v47 = vpop.f32.mrf.mxu2 }
 0xe51   :  { %v2907_v15 = vmul.f32 0.35355338, %v2895_v47 }
 0xe53   :  { %2911 = vmax.xlane.f32.xlu1 %v2907_v15 }
 0xe58   :  { %v2898_v51 = vpop.f32.mrf.mxu2 }
 0xe59   :  { %v2908_v35 = vmul.f32 0.35355338, %v2898_v51 }
 0xe5b   :  { %2913 = vmax.xlane.f32.xlu0 %v2908_v35 }
 0xe60   :  { %v2727_v10 = vpop.f32.mrf.mxu1  ;;  %v2901_v62 = vpop.f32.mrf.mxu2 }
 0xe61   :  { %5465 = vrcp.f32 %v2727_v10  ;;  %v2909_v6 = vmul.f32 0.35355338, %v2901_v62 }
 0xe63   :  { %2915 = vmax.xlane.f32.xlu2 %v2909_v6 }
 0xe66   :  { %v2698_v60 = vpop.f32.mrf.mxu3 }
 0xe67   :  { %v5466_v58 = vpop.eup %5465 }
 0xe68   :  { %v2737_v34 = vmul.f32 %v5466_v58, %v2727_v10  ;;  %v2904_v63 = vpop.f32.mrf.mxu2 }
 0xe69   :  { %v7137_v17 = vmul.f32 0.35355338, %v2904_v63 }
 0xe6a   :  { %v2741_v28 = vsub.f32 2.0, %v2737_v34 }
 0xe6c   :  { %v2745_v61 = vmul.f32 %v5466_v58, %v2741_v28  ;;  %5273 = vrot.lane.b32.xlu1 %v5272_v8, %s5683_s21 }
 0xe6e   :  { %v2749_v39 = vmul.f32 %v2745_v61, %v2698_v60  ;;  %v3428_v61 = vld [vmem:[#allocation5 + $0x1f0] sm:$0xff] }
 0xe6f   :  { %5268 = vrot.lane.b32.xlu0 %v5267_v33, %s5683_s21  ;;  %v3427_v33 = vld [vmem:[#allocation5 + $0x1e8] sm:$0xff] }
 0xe70   :  { %2753 = vst.msk [vmem:[#allocation2 + $0x18] sm:$0xff] %vm79_vm0, %v2749_v39  ;;  %v3426_v39 = vld [vmem:[#allocation5 + $0x1e0] sm:$0xff] }
 0xe74   :  { %5283 = vrot.lane.b32.xlu1 %v5282_v38, %s5683_s21 }
 0xe77   :  { %v3080_v27 = vld [vmem:[#allocation2 + $0x18] sm:$0xff] }
 0xe78   :  { %4986 = vmatmul.msk.f32.gmra.mxu1 %vm79_vm0, %v3080_v27  ;;  %v5620_v27 = vld [vmem:[#allocation3 + $0x8] sm:$0xff] }
 0xe7b   :  { %5278 = vrot.lane.b32.xlu2 %v5277_v2, %s5683_s21 }
 0xe99   :  { %2917 = vmax.xlane.f32.xlu0 %v7137_v17 }
 0xeb7   :  { %v3127_v14 = vpop.f32.mrf.mxu1 }
 0xeb8   :  { %v3128_v23 = vadd.f32 %v7140_v3, %v3127_v14 }
 0xeba   :  { %v7144_v16 = vadd.f32 %v3128_v23, %v6791_v31 }
 0xebc   :  { %v3161_v11 = vsel %vm79_vm0, %v7144_v16, 0.0 }
 0xebd   :  { %3162 = vadd.xlane.f32.xlu1 %v3161_v11 }
 0xebf   :  { %v3130_v49 = vpop.f32.mrf.mxu1 }
 0xec0   :  { %v3131_v52 = vadd.f32 %v7140_v3, %v3130_v49 }
 0xec2   :  { %v7150_v56 = vadd.f32 %v3131_v52, %v6802_v45 }
 0xec4   :  { %v3164_v40 = vsel %vm79_vm0, %v7150_v56, 0.0 }
 0xec5   :  { %3165 = vadd.xlane.f32.xlu0 %v3164_v40 }
 0xec6   :  { %v2912_v46 = vpop.xlane.xlu1 %2911 }
 0xec7   :  { %v2919_v9 = vsub.f32 %v2907_v15, %v2912_v46  ;;  %v3133_v37 = vpop.f32.mrf.mxu1 }
 0xec8   :  { %v3134_v31 = vadd.f32 %v7140_v3, %v3133_v37 }
 0xec9   :  { %v2923_v41 = vmul.f32 1.442695, %v2919_v9 }
 0xeca   :  { %v7156_v29 = vadd.f32 %v3134_v31, %v6816_v4 }
 0xecb   :  { %5467 = vpow2.f32 %v2923_v41 }
 0xecc   :  { %v3167_v20 = vsel %vm79_vm0, %v7156_v29, 0.0 }
 0xecd   :  { %3168 = vadd.xlane.f32.xlu2 %v3167_v20 }
 0xece   :  { %v2914_v45 = vpop.xlane.xlu0 %2913 }
 0xecf   :  { %v2920_v19 = vsub.f32 %v2908_v35, %v2914_v45 }
 0xed1   :  { %v5468_v25 = vpop.eup %5467  ;;  %v2925_v55 = vmul.f32 1.442695, %v2920_v19 }
 0xed2   :  { %3040 = vmatmul.f32.vlgmr.msra.gmra.mxu3 %v5468_v25 }
 0xed3   :  { %5469 = vpow2.f32 %v2925_v55 }
 0xed6   :  { %v2916_v26 = vpop.xlane.xlu2 %2915 }
 0xed7   :  { %v2921_v59 = vsub.f32 %v2909_v6, %v2916_v26 }
 0xed9   :  { %v5470_v48 = vpop.eup %5469  ;;  %v2927_v32 = vmul.f32 1.442695, %v2921_v59 }
 0xeda   :  { %3043 = vmatmul.f32.gmra.mxu3 %v5470_v48 }
 0xedb   :  { %5471 = vpow2.f32 %v2927_v32 }
 0xede   :  { %v5274_v4 = vpop.permute.xlu1 %5273  ;;  %v5279_v35 = vpop.permute.xlu2 %5278 }
 0xedf   :  { %v5275_v10 = vunpack.i.l.bf16 %v5274_v4  ;;  %v5276_v62 = vunpack.i.h.bf16 %v5274_v4  ;;  %v5280_v21 = vunpack.i.l.bf16 %v5279_v35  ;;  %v5281_v6 = vunpack.i.h.bf16 %v5279_v35 }
 0xee1   :  { %v5472_v43 = vpop.eup %5471  ;;  %v5269_v47 = vpop.permute.xlu0 %5268 }
 0xee2   :  { %v5270_v15 = vunpack.i.l.bf16 %v5269_v47  ;;  %3046 = vmatmul.f32.gmra.mxu3 %v5472_v43  ;;  %v5271_v51 = vunpack.i.h.bf16 %v5269_v47 }
 0xee4   :  { %3003 = vmatpush.msrb.mxu0 %v5270_v15 }
 0xee6   :  { %3004 = vmatpush.msrb.mxu0 %v5271_v51  ;;  %v5284_v58 = vpop.permute.xlu1 %5283 }
 0xee7   :  { %v5285_v34 = vunpack.i.l.bf16 %v5284_v58  ;;  %v5286_v7 = vunpack.i.h.bf16 %v5284_v58 }
 0xee8   :  { %3005 = vmatpush.msrb.mxu0 %v5275_v10 }
 0xeea   :  { %3006 = vmatpush.msrb.mxu0 %v5276_v62 }
 0xeec   :  { %3007 = vmatpush.msrb.mxu0 %v5280_v21 }
 0xeee   :  { %3008 = vmatpush.msrb.mxu0 %v5281_v6 }
 0xef0   :  { %3009 = vmatpush.msrb.mxu0 %v5285_v34 }
 0xef2   :  { %3010 = vmatpush.msrb.mxu0 %v5286_v7 }
 0xef3   :  { %3011 = vmatmul.f32.vlgmr.msrb.gmra.mxu0 %v5468_v25 }
 0xef4   :  { %3444 = vmatpush.msra.mxu0 %v3429_v42 }
 0xef5   :  { %v3136_v22 = vpop.f32.mrf.mxu1 }
 0xef6   :  { %v3137_v28 = vadd.f32 %v7140_v3, %v3136_v22  ;;  %3445 = vmatpush.msra.mxu0 %v3428_v61 }
 0xef8   :  { %v3154_v8 = vadd.f32 %v3137_v28, %v6830_v12  ;;  %3446 = vmatpush.msra.mxu0 %v3427_v33  ;;  %v5619_v12 = vld [vmem:[#allocation3] sm:$0xff] }
 0xef9   :  { %v3358_v33 = vld [vmem:[#allocation5 + $0x1d0] sm:$0xff] }
 0xefa   :  { %v3170_v60 = vsel %vm79_vm0, %v3154_v8, 0.0  ;;  %3447 = vmatpush.msra.mxu0 %v3426_v39  ;;  %3397 = vmatpush.msrb.mxu2 %v3358_v33 }
 0xefb   :  { %3014 = vmatmul.f32.gmra.mxu0 %v5470_v48  ;;  %3171 = vadd.xlane.f32.xlu0 %v3170_v60 }
 0xf03   :  { %3017 = vmatmul.f32.gmra.mxu0 %v5472_v43 }
 0xf0c   :  { %v2918_v1 = vpop.xlane.xlu0 %2917 }
 0xf0d   :  { %v2922_v5 = vsub.f32 %v7137_v17, %v2918_v1  ;;  %v3357_v1 = vld [vmem:[#allocation5 + $0x1c8] sm:$0xff] }
 0xf0e   :  { %3398 = vmatpush.msrb.mxu2 %v3357_v1 }
 0xf0f   :  { %v2929_v38 = vmul.f32 1.442695, %v2922_v5 }
 0xf11   :  { %5473 = vpow2.f32 %v2929_v38  ;;  %v3356_v38 = vld [vmem:[#allocation5 + $0x1c0] sm:$0xff] }
 0xf12   :  { %3399 = vmatpush.msrb.mxu2 %v3356_v38 }
 0xf17   :  { %v5474_v50 = vpop.eup %5473 }
 0xf18   :  { %3020 = vmatmul.f32.gmra.mxu0 %v5474_v50  ;;  %3049 = vmatmul.f32.gmra.mxu3 %v5474_v50 }
 0xf20   :  { %4999 = vmatmul.msk.f32.vlgmr.msra.gmra.mxu0 %vm79_vm0, %v5619_v12 }
 0xf28   :  { %5000 = vmatmul.msk.f32.gmra.mxu0 %vm79_vm0, %v5620_v27  ;;  %v3355_v27 = vld [vmem:[#allocation5 + $0x1b8] sm:$0xff] }
 0xf29   :  { %3400 = vmatpush.msrb.mxu2 %v3355_v27 }
 0xf30   :  { %v3163_v57 = vpop.xlane.xlu1 %3162 }
 0xf31   :  { %v3185_v2 = vmul.f32 %v3163_v57, %v6245_v30 }
 0xf33   :  { %v7168_v63 = vsub.f32 %v7144_v16, %v3185_v2  ;;  %v7199_v2 = vld [vmem:[#allocation5 + $0x420] sm:$0xff] }
 0xf34   :  { %3817 = vmatpush.msra.mxu2 %v7199_v2 }
 0xf35   :  { %v3201_v17 = vmul.f32 %v7168_v63, %v7168_v63 }
 0xf37   :  { %v3209_v14 = vsel %vm79_vm0, %v3201_v17, 0.0 }
 0xf38   :  { %v3166_v23 = vpop.xlane.xlu0 %3165  ;;  %3210 = vadd.xlane.f32.xlu0 %v3209_v14 }
 0xf39   :  { %v3186_v11 = vmul.f32 %v3166_v23, %v6245_v30  ;;  %v7204_v23 = vld [vmem:[#allocation5 + $0x418] sm:$0xff] }
 0xf3a   :  { %3818 = vmatpush.msra.mxu2 %v7204_v23 }
 0xf3b   :  { %v7175_v49 = vsub.f32 %v7150_v56, %v3186_v11 }
 0xf3d   :  { %v3202_v52 = vmul.f32 %v7175_v49, %v7175_v49 }
 0xf3f   :  { %v3212_v40 = vsel %vm79_vm0, %v3202_v52, 0.0  ;;  %v7207_v52 = vld [vmem:[#allocation5 + $0x410] sm:$0xff] }
 0xf40   :  { %v3169_v46 = vpop.xlane.xlu2 %3168  ;;  %3213 = vadd.xlane.f32.xlu0 %v3212_v40  ;;  %3819 = vmatpush.msra.mxu2 %v7207_v52  ;;  %v7210_v40 = vld [vmem:[#allocation5 + $0x408] sm:$0xff] }
 0xf41   :  { %v3187_v16 = vmul.f32 %v3169_v46, %v6245_v30 }
 0xf42   :  { %3820 = vmatpush.msra.mxu2 %v7210_v40 }
 0xf43   :  { %v7182_v9 = vsub.f32 %v7156_v29, %v3187_v16 }
 0xf45   :  { %v3203_v37 = vmul.f32 %v7182_v9, %v7182_v9 }
 0xf47   :  { %v3215_v31 = vsel %vm79_vm0, %v3203_v37, 0.0 }
 0xf48   :  { %3216 = vadd.xlane.f32.xlu1 %v3215_v31 }
 0xf55   :  { %v3041_v56 = vpop.f32.mrf.mxu3 }
 0xf56   :  { %5475 = vrcp.f32 %v3041_v56 }
 0xf5c   :  { %v5476_v20 = vpop.eup %5475 }
 0xf5d   :  { %v3044_v41 = vpop.f32.mrf.mxu3  ;;  %v3057_v45 = vmul.f32 %v5476_v20, %v3041_v56 }
 0xf5e   :  { %5477 = vrcp.f32 %v3044_v41 }
 0xf5f   :  { %v3061_v19 = vsub.f32 2.0, %v3057_v45 }
 0xf61   :  { %v3065_v48 = vmul.f32 %v5476_v20, %v3061_v19 }
 0xf64   :  { %v5478_v55 = vpop.eup %5477 }
 0xf65   :  { %v3047_v25 = vpop.f32.mrf.mxu3  ;;  %v3058_v59 = vmul.f32 %v5478_v55, %v3044_v41 }
 0xf66   :  { %5479 = vrcp.f32 %v3047_v25 }
 0xf67   :  { %v3062_v47 = vsub.f32 2.0, %v3058_v59 }
 0xf69   :  { %v3066_v62 = vmul.f32 %v5478_v55, %v3062_v47 }
 0xf6c   :  { %v5480_v51 = vpop.eup %5479 }
 0xf6d   :  { %v3059_v35 = vmul.f32 %v5480_v51, %v3047_v25 }
 0xf6e   :  { %v3172_v26 = vpop.xlane.xlu0 %3171 }
 0xf6f   :  { %v3188_v29 = vmul.f32 %v3172_v26, %v6245_v30  ;;  %v3063_v34 = vsub.f32 2.0, %v3059_v35 }
 0xf70   :  { %v3012_v32 = vpop.f32.mrf.mxu0 }
 0xf71   :  { %v7188_v43 = vsub.f32 %v3154_v8, %v3188_v29  ;;  %v3069_v4 = vmul.f32 %v3065_v48, %v3012_v32  ;;  %v3067_v7 = vmul.f32 %v5480_v51, %v3063_v34  ;;  %v7216_v32 = vld [vmem:[#allocation5 + $0x2a0] ss:$0 sm:$0xff] }
 0xf73   :  { %3073 = vst.msk [vmem:[#allocation2 + $0x20] sm:$0xff] %vm79_vm0, %v3069_v4  ;;  %v3204_v15 = vmul.f32 %v7188_v43, %v7188_v43 }
 0xf75   :  { %v3218_v10 = vsel %vm79_vm0, %v3204_v15, 0.0  ;;  %v7218_v15 = vld [vmem:[#allocation5 + $0x2a8] ss:$0 sm:$0xff] }
 0xf76   :  { %3219 = vadd.xlane.f32.xlu0 %v3218_v10 }
 0xf78   :  { %v3015_v21 = vpop.f32.mrf.mxu0 }
 0xf79   :  { %v3070_v58 = vmul.f32 %v3066_v62, %v3015_v21 }
 0xf7a   :  { %v3081_v6 = vld [vmem:[#allocation2 + $0x20] sm:$0xff] }
 0xf7b   :  { %3074 = vst.msk [vmem:[#allocation2 + $0x28] sm:$0xff] %vm79_vm0, %v3070_v58  ;;  %4987 = vmatmul.msk.f32.gmra.mxu1 %vm79_vm0, %v3081_v6 }
 0xf80   :  { %v3018_v22 = vpop.f32.mrf.mxu0 }
 0xf81   :  { %v3071_v28 = vmul.f32 %v3067_v7, %v3018_v22 }
 0xf82   :  { %v3082_v8 = vld [vmem:[#allocation2 + $0x28] sm:$0xff] }
 0xf83   :  { %3075 = vst.msk [vmem:[#allocation2 + $0x30] sm:$0xff] %vm79_vm0, %v3071_v28  ;;  %4988 = vmatmul.msk.f32.gmra.mxu1 %vm79_vm0, %v3082_v8 }
 0xf8a   :  { %v3083_v42 = vld [vmem:[#allocation2 + $0x30] sm:$0xff] }
 0xf8b   :  { %4989 = vmatmul.msk.f32.gmra.mxu1 %vm79_vm0, %v3083_v42 }
 0xf95   :  { %v3021_v12 = vpop.f32.mrf.mxu0 }
 0xf9b   :  { %v3050_v61 = vpop.f32.mrf.mxu3 }
 0xf9c   :  { %5481 = vrcp.f32 %v3050_v61 }
 0xfa2   :  { %v5482_v60 = vpop.eup %5481 }
 0xfa3   :  { %v3060_v39 = vmul.f32 %v5482_v60, %v3050_v61 }
 0xfa5   :  { %v3064_v5 = vsub.f32 2.0, %v3060_v39 }
 0xfa7   :  { %v3068_v50 = vmul.f32 %v5482_v60, %v3064_v5 }
 0xfa9   :  { %v3072_v57 = vmul.f32 %v3068_v50, %v3021_v12 }
 0xfab   :  { %3076 = vst.msk [vmem:[#allocation2 + $0x38] sm:$0xff] %vm79_vm0, %v3072_v57  ;;  %v3211_v17 = vpop.xlane.xlu0 %3210 }
 0xfac   :  { %v3233_v14 = vmul.f32 %v3211_v17, %v6245_v30 }
 0xfae   :  { %v3241_v11 = vadd.f32 1e-05, %v3233_v14 }
 0xfb0   :  { %5483 = vrsqrt.f32 %v3241_v11  ;;  %vm3255_vm3 = vweird.f32 %v3241_v11 }
 0xfb2   :  { %v3084_v46 = vld [vmem:[#allocation2 + $0x38] sm:$0xff] }
 0xfb3   :  { %4990 = vmatmul.msk.f32.gmra.mxu1 %vm79_vm0, %v3084_v46  ;;  %v3214_v16 = vpop.xlane.xlu0 %3213 }
 0xfb4   :  { %v3234_v37 = vmul.f32 %v3214_v16, %v6245_v30 }
 0xfb6   :  { %v5484_v31 = vpop.eup %5483  ;;  %v3242_v56 = vadd.f32 1e-05, %v3234_v37 }
 0xfb7   :  { %v3250_v41 = vmul.f32 %v5484_v31, %v3241_v11  ;;  %vm3256_vm2 = vweird.f32 %v5484_v31 }
 0xfb8   :  { %5485 = vrsqrt.f32 %v3242_v56  ;;  %vm3257_vm4 = vmor %vm3255_vm3, %vm3256_vm2  ;;  %vm3265_vm6 = vweird.f32 %v3242_v56 }
 0xfb9   :  { %v3251_v20 = vmul.f32 %v5484_v31, %v3250_v41 }
 0xfbb   :  { %v3252_v45 = vmul.f32 0.5, %v3251_v20  ;;  %v3217_v19 = vpop.xlane.xlu1 %3216 }
 0xfbc   :  { %v3235_v25 = vmul.f32 %v3217_v19, %v6245_v30 }
 0xfbd   :  { %v3253_v55 = vsub.f32 1.5, %v3252_v45 }
 0xfbe   :  { %v5486_v26 = vpop.eup %5485  ;;  %v3243_v59 = vadd.f32 1e-05, %v3235_v25 }
 0xfbf   :  { %v3254_v29 = vmul.f32 %v5484_v31, %v3253_v55  ;;  %v3260_v48 = vmul.f32 %v5486_v26, %v3242_v56  ;;  %vm3266_vm5 = vweird.f32 %v5486_v26 }
 0xfc0   :  { %5487 = vrsqrt.f32 %v3243_v59  ;;  %vm3267_vm7 = vmor %vm3265_vm6, %vm3266_vm5  ;;  %vm3275_vm10 = vweird.f32 %v3243_v59 }
 0xfc1   :  { %v3258_v4 = vsel %vm3257_vm4, %v5484_v31, %v3254_v29  ;;  %v3261_v47 = vmul.f32 %v5486_v26, %v3260_v48  ;;  %v7258_v29 = vld [vmem:[#allocation5 + $0x200] ss:$0 sm:$0xff] }
 0xfc2   :  { %v3329_v51 = vmul.f32 %v3258_v4, %v7168_v63 }
 0xfc3   :  { %v3262_v10 = vmul.f32 0.5, %v3261_v47 }
 0xfc4   :  { %v3338_v35 = vmul.f32 %v7216_v32, %v3329_v51 }
 0xfc5   :  { %v3263_v62 = vsub.f32 1.5, %v3262_v10 }
 0xfc6   :  { %v5488_v21 = vpop.eup %5487  ;;  %v7223_v58 = vadd.f32 %v7218_v15, %v3338_v35 }
 0xfc7   :  { %v3264_v6 = vmul.f32 %v5486_v26, %v3263_v62  ;;  %v3270_v34 = vmul.f32 %v5488_v21, %v3243_v59  ;;  %vm3276_vm9 = vweird.f32 %v5488_v21 }
 0xfc8   :  { %4991 = vmatmul.msk.f32.vlgmr.msrb.gmra.mxu2 %vm79_vm0, %v7223_v58  ;;  %vm3277_vm11 = vmor %vm3275_vm10, %vm3276_vm9 }
 0xfc9   :  { %v3268_v7 = vsel %vm3267_vm7, %v5486_v26, %v3264_v6  ;;  %v3271_v22 = vmul.f32 %v5488_v21, %v3270_v34  ;;  %v7282_v6 = vld [vmem:[#allocation5 + $0x1d8] ss:$0 sm:$0xff] }
 0xfca   :  { %v3330_v63 = vmul.f32 %v3268_v7, %v7175_v49 }
 0xfcb   :  { %v3272_v28 = vmul.f32 0.5, %v3271_v22 }
 0xfcc   :  { %v3339_v8 = vmul.f32 %v7216_v32, %v3330_v63 }
 0xfcd   :  { %v3273_v42 = vsub.f32 1.5, %v3272_v28 }
 0xfce   :  { %v7230_v61 = vadd.f32 %v7218_v15, %v3339_v8 }
 0xfcf   :  { %v3274_v60 = vmul.f32 %v5488_v21, %v3273_v42 }
 0xfd0   :  { %4992 = vmatmul.msk.f32.gmra.mxu2 %vm79_vm0, %v7230_v61 }
 0xfd1   :  { %v3278_v33 = vsel %vm3277_vm11, %v5488_v21, %v3274_v60 }
 0xfd2   :  { %v3331_v39 = vmul.f32 %v3278_v33, %v7182_v9 }
 0xfd4   :  { %v3340_v1 = vmul.f32 %v7216_v32, %v3331_v39 }
 0xfd6   :  { %v7237_v49 = vadd.f32 %v7218_v15, %v3340_v1 }
 0xfd8   :  { %4993 = vmatmul.msk.f32.gmra.mxu2 %vm79_vm0, %v7237_v49 }
 0xfe9   :  { %v3220_v5 = vpop.xlane.xlu0 %3219 }
 0xfea   :  { %v3236_v38 = vmul.f32 %v3220_v5, %v6245_v30 }
 0xfec   :  { %v3244_v50 = vadd.f32 1e-05, %v3236_v38 }
 0xfee   :  { %5489 = vrsqrt.f32 %v3244_v50  ;;  %vm3285_vm13 = vweird.f32 %v3244_v50 }
 0xff4   :  { %v5490_v12 = vpop.eup %5489 }
 0xff5   :  { %v3280_v27 = vmul.f32 %v5490_v12, %v3244_v50  ;;  %vm3286_vm12 = vweird.f32 %v5490_v12 }
 0xff6   :  { %vm3287_vm14 = vmor %vm3285_vm13, %vm3286_vm12 }
 0xff7   :  { %v3281_v57 = vmul.f32 %v5490_v12, %v3280_v27 }
 0xff8   :  { %v3139_v17 = vpop.f32.mrf.mxu1 }
 0xff9   :  { %v3282_v14 = vmul.f32 0.5, %v3281_v57  ;;  %v3140_v9 = vadd.f32 %v7140_v3, %v3139_v17 }
 0xffb   :  { %v3283_v11 = vsub.f32 1.5, %v3282_v14  ;;  %v3155_v46 = vadd.f32 %v3140_v9, %v6870_v13 }
 0xffd   :  { %v3284_v16 = vmul.f32 %v5490_v12, %v3283_v11  ;;  %v3173_v37 = vsel %vm79_vm0, %v3155_v46, 0.0 }
 0xffe   :  { %3174 = vadd.xlane.f32.xlu1 %v3173_v37 }
 0xfff   :  { %v3288_v31 = vsel %vm3287_vm14, %v5490_v12, %v3284_v16 }
0x1000   :  { %v3332_v56 = vmul.f32 %v3288_v31, %v7188_v43  ;;  %v3142_v41 = vpop.f32.mrf.mxu1 }
0x1001   :  { %v3143_v20 = vadd.f32 %v7140_v3, %v3142_v41 }
0x1002   :  { %v3341_v45 = vmul.f32 %v7216_v32, %v3332_v56 }
0x1003   :  { %v3156_v19 = vadd.f32 %v3143_v20, %v6889_v53  ;;  %v3449_v53 = vpop.f32.mrf.mxu0 }
0x1004   :  { %v7250_v25 = vadd.f32 %v7218_v15, %v3341_v45  ;;  %v7261_v48 = vadd.f32 %v7258_v29, %v3449_v53 }
0x1005   :  { %v3176_v13 = vsel %vm79_vm0, %v3156_v19, 0.0 }
0x1006   :  { %3177 = vadd.xlane.f32.xlu0 %v3176_v13  ;;  %4994 = vmatmul.msk.f32.gmra.mxu2 %vm79_vm0, %v7250_v25  ;;  %v3463_v4 = vmul.f32 %v7199_v2, %v7261_v48  ;;  %v3462_v47 = vmul.f32 %v7204_v23, %v7261_v48  ;;  %v3460_v51 = vmul.f32 %v7210_v40, %v7261_v48 }
0x1007   :  { %v3467_v16 = vmul.f32 %v7261_v48, %v6432_v18 }
0x1008   :  { %v3145_v55 = vpop.f32.mrf.mxu1  ;;  %5001 = vmatpush.xpose.msk.msrb.mxu3 %vm79_vm0, %v3463_v4 }
0x1009   :  { %v3146_v26 = vadd.f32 %v7140_v3, %v3145_v55 }
0x100b   :  { %v3157_v43 = vadd.f32 %v3146_v26, %v6909_v44  ;;  %v3461_v44 = vmul.f32 %v7207_v52, %v7261_v48 }
0x100c   :  { %5002 = vmatpush.xpose.msk.msrb.mxu3 %vm79_vm0, %v3462_v47 }
0x100d   :  { %v3179_v59 = vsel %vm79_vm0, %v3157_v43, 0.0 }
0x100e   :  { %3180 = vadd.xlane.f32.xlu2 %v3179_v59 }
0x1010   :  { %5003 = vmatpush.xpose.msk.msrb.mxu3 %vm79_vm0, %v3461_v44  ;;  %v3464_v44 = vmul.f32 %v7261_v48, %v6455_v0 }
0x1014   :  { %5004 = vmatpush.xpose.msk.msrb.mxu3 %vm79_vm0, %v3460_v51  ;;  %v3465_v51 = vmul.f32 %v7261_v48, %v6457_v24 }
0x1018   :  { %3618 = vmatpush.msra.mxu3 %v7199_v2 }
0x101a   :  { %3619 = vmatpush.msra.mxu3 %v7204_v23 }
0x101c   :  { %3620 = vmatpush.msra.mxu3 %v7207_v52 }
0x101e   :  { %3621 = vmatpush.msra.mxu3 %v7210_v40 }
0x1030   :  { %v3148_v10 = vpop.f32.mrf.mxu1 }
0x1031   :  { %v3149_v35 = vadd.f32 %v7140_v3, %v3148_v10  ;;  %v5292_v10 = vpack.i.bf16 %v3464_v44, %v3465_v51 }
0x1033   :  { %v3158_v62 = vadd.f32 %v3149_v35, %v6925_v36 }
0x1035   :  { %v3182_v21 = vsel %vm79_vm0, %v3158_v62, 0.0 }
0x1036   :  { %3183 = vadd.xlane.f32.xlu1 %v3182_v21 }
0x104b   :  { %v3402_v34 = vpop.f32.mrf.mxu2 }
0x104c   :  { %v3403_v7 = vadd.f32 %v7282_v6, %v3402_v34 }
0x104e   :  { %5005 = vmatmul.msk.f32.vlgmr.msrb.gmra.mxu3 %vm79_vm0, %v3403_v7 }
0x1053   :  { %v3405_v22 = vpop.f32.mrf.mxu2 }
0x1054   :  { %v3406_v63 = vadd.f32 %v7282_v6, %v3405_v22 }
0x1056   :  { %5006 = vmatmul.msk.f32.gmra.mxu3 %vm79_vm0, %v3406_v63 }
0x105b   :  { %v3408_v3 = vpop.f32.mrf.mxu2 }
0x105c   :  { %v3409_v36 = vadd.f32 %v7282_v6, %v3408_v3 }
0x105e   :  { %5007 = vmatmul.msk.f32.gmra.mxu3 %vm79_vm0, %v3409_v36 }
0x1071   :  { %v3175_v28 = vpop.xlane.xlu1 %3174 }
0x1072   :  { %v3189_v8 = vmul.f32 %v3175_v28, %v6245_v30 }
0x1074   :  { %v7291_v42 = vsub.f32 %v3155_v46, %v3189_v8  ;;  %v3466_v46 = vmul.f32 %v7261_v48, %v6427_v54 }
0x1076   :  { %v3205_v60 = vmul.f32 %v7291_v42, %v7291_v42  ;;  %v5287_v37 = vpack.i.bf16 %v3466_v46, %v3467_v16 }
0x1078   :  { %v3221_v33 = vsel %vm79_vm0, %v3205_v60, 0.0 }
0x1079   :  { %3222 = vadd.xlane.f32.xlu0 %v3221_v33  ;;  %v3178_v39 = vpop.xlane.xlu0 %3177 }
0x107a   :  { %v3190_v1 = vmul.f32 %v3178_v39, %v6245_v30 }
0x107c   :  { %v7297_v5 = vsub.f32 %v3156_v19, %v3190_v1 }
0x107e   :  { %v3206_v38 = vmul.f32 %v7297_v5, %v7297_v5 }
0x1080   :  { %v3224_v50 = vsel %vm79_vm0, %v3206_v38, 0.0 }
0x1081   :  { %v3181_v12 = vpop.xlane.xlu2 %3180  ;;  %3225 = vadd.xlane.f32.xlu2 %v3224_v50 }
0x1082   :  { %v3191_v27 = vmul.f32 %v3181_v12, %v6245_v30 }
0x1084   :  { %v7303_v57 = vsub.f32 %v3157_v43, %v3191_v27 }
0x1086   :  { %v3207_v17 = vmul.f32 %v7303_v57, %v7303_v57 }
0x1088   :  { %v3227_v14 = vsel %vm79_vm0, %v3207_v17, 0.0 }
0x1089   :  { %3228 = vadd.xlane.f32.xlu1 %v3227_v14  ;;  %v3411_v9 = vpop.f32.mrf.mxu2 }
0x108a   :  { %v3412_v11 = vadd.f32 %v7282_v6, %v3411_v9 }
0x108c   :  { %5008 = vmatmul.msk.f32.gmra.mxu3 %vm79_vm0, %v3412_v11 }
0x10a2   :  { %5288 = vrot.lane.b32.xlu1 %v5287_v37, %s5682_s1 }
0x10a9   :  { %v3184_v31 = vpop.xlane.xlu1 %3183 }
0x10aa   :  { %v3192_v56 = vmul.f32 %v3184_v31, %v6245_v30 }
0x10ac   :  { %v7316_v41 = vsub.f32 %v3158_v62, %v3192_v56 }
0x10ae   :  { %v3208_v20 = vmul.f32 %v7316_v41, %v7316_v41 }
0x10b0   :  { %v3230_v45 = vsel %vm79_vm0, %v3208_v20, 0.0 }
0x10b1   :  { %3231 = vadd.xlane.f32.xlu0 %v3230_v45 }
0x10d1   :  { %v3509_v19 = vpop.f32.mrf.mxu3 }
0x10d2   :  { %v7321_v13 = vmul.f32 0.35355338, %v3509_v19 }
0x10d4   :  { %v3525_v55 = vsel %vm79_vm0, %v7321_v13, -inf }
0x10d5   :  { %3526 = vmax.xlane.f32.xlu2 %v3525_v55 }
0x10d9   :  { %v3512_v26 = vpop.f32.mrf.mxu3 }
0x10da   :  { %v7325_v43 = vmul.f32 0.35355338, %v3512_v26 }
0x10dc   :  { %v3528_v59 = vsel %vm79_vm0, %v7325_v43, -inf }
0x10dd   :  { %3529 = vmax.xlane.f32.xlu0 %v3528_v59 }
0x10e1   :  { %v3515_v53 = vpop.f32.mrf.mxu3 }
0x10e2   :  { %v7329_v4 = vmul.f32 0.35355338, %v3515_v53 }
0x10e4   :  { %v3531_v47 = vsel %vm79_vm0, %v7329_v4, -inf }
0x10e5   :  { %3532 = vmax.xlane.f32.xlu0 %v3531_v47 }
0x10ec   :  { %v3223_v35 = vpop.xlane.xlu0 %3222 }
0x10ed   :  { %v3237_v62 = vmul.f32 %v3223_v35, %v6245_v30  ;;  %5293 = vrot.lane.b32.xlu2 %v5292_v10, %s5682_s1 }
0x10ef   :  { %v3245_v21 = vadd.f32 1e-05, %v3237_v62 }
0x10f1   :  { %5491 = vrsqrt.f32 %v3245_v21  ;;  %vm3295_vm1 = vweird.f32 %v3245_v21 }
0x10f4   :  { %v3226_v34 = vpop.xlane.xlu2 %3225 }
0x10f5   :  { %v3238_v7 = vmul.f32 %v3226_v34, %v6245_v30 }
0x10f7   :  { %v5492_v22 = vpop.eup %5491  ;;  %v3246_v63 = vadd.f32 1e-05, %v3238_v7 }
0x10f8   :  { %v3290_v3 = vmul.f32 %v5492_v22, %v3245_v21  ;;  %vm3296_vm15 = vweird.f32 %v5492_v22 }
0x10f9   :  { %5493 = vrsqrt.f32 %v3246_v63  ;;  %vm3297_vm2 = vmor %vm3295_vm1, %vm3296_vm15  ;;  %vm3305_vm4 = vweird.f32 %v3246_v63 }
0x10fa   :  { %v3291_v36 = vmul.f32 %v5492_v22, %v3290_v3 }
0x10fc   :  { %v3292_v28 = vmul.f32 0.5, %v3291_v36  ;;  %v3229_v8 = vpop.xlane.xlu1 %3228 }
0x10fd   :  { %v3239_v48 = vmul.f32 %v3229_v8, %v6245_v30 }
0x10fe   :  { %v3293_v60 = vsub.f32 1.5, %v3292_v28 }
0x10ff   :  { %v5494_v33 = vpop.eup %5493  ;;  %v3247_v39 = vadd.f32 1e-05, %v3239_v48 }
0x1100   :  { %v3294_v1 = vmul.f32 %v5492_v22, %v3293_v60  ;;  %v3300_v38 = vmul.f32 %v5494_v33, %v3246_v63  ;;  %vm3306_vm3 = vweird.f32 %v5494_v33 }
0x1101   :  { %5495 = vrsqrt.f32 %v3247_v39  ;;  %vm3307_vm5 = vmor %vm3305_vm4, %vm3306_vm3  ;;  %vm3315_vm7 = vweird.f32 %v3247_v39 }
0x1102   :  { %v3298_v50 = vsel %vm3297_vm2, %v5492_v22, %v3294_v1  ;;  %v3301_v12 = vmul.f32 %v5494_v33, %v3300_v38 }
0x1103   :  { %v3333_v27 = vmul.f32 %v3298_v50, %v7291_v42 }
0x1104   :  { %v3302_v17 = vmul.f32 0.5, %v3301_v12  ;;  %v3452_v12 = vpop.f32.mrf.mxu0 }
0x1105   :  { %v3342_v14 = vmul.f32 %v7216_v32, %v3333_v27 }
0x1106   :  { %v3303_v9 = vsub.f32 1.5, %v3302_v17 }
0x1107   :  { %v5496_v11 = vpop.eup %5495  ;;  %v7344_v46 = vadd.f32 %v7218_v15, %v3342_v14  ;;  %v7376_v14 = vadd.f32 %v7258_v29, %v3452_v12 }
0x1108   :  { %v3304_v16 = vmul.f32 %v5494_v33, %v3303_v9  ;;  %v3310_v37 = vmul.f32 %v5496_v11, %v3247_v39  ;;  %vm3316_vm6 = vweird.f32 %v5496_v11 }
0x1109   :  { %4995 = vmatmul.msk.f32.gmra.mxu2 %vm79_vm0, %v7344_v46  ;;  %vm3317_vm9 = vmor %vm3315_vm7, %vm3316_vm6  ;;  %v3661_v29 = vmul.f32 %v7204_v23, %v7376_v14  ;;  %v3660_v23 = vmul.f32 %v7207_v52, %v7376_v14 }
0x110a   :  { %v3308_v31 = vsel %vm3307_vm5, %v5494_v33, %v3304_v16  ;;  %v3311_v56 = vmul.f32 %v5496_v11, %v3310_v37  ;;  %v3662_v16 = vmul.f32 %v7199_v2, %v7376_v14 }
0x110b   :  { %v3334_v42 = vmul.f32 %v3308_v31, %v7297_v5 }
0x110c   :  { %v3312_v20 = vmul.f32 0.5, %v3311_v56 }
0x110d   :  { %v3343_v45 = vmul.f32 %v7216_v32, %v3334_v42 }
0x110e   :  { %v3313_v19 = vsub.f32 1.5, %v3312_v20 }
0x110f   :  { %v3518_v55 = vpop.f32.mrf.mxu3  ;;  %v7351_v26 = vadd.f32 %v7218_v15, %v3343_v45 }
0x1110   :  { %v3314_v59 = vmul.f32 %v5496_v11, %v3313_v19  ;;  %v7353_v53 = vmul.f32 0.35355338, %v3518_v55 }
0x1111   :  { %4996 = vmatmul.msk.f32.gmra.mxu2 %vm79_vm0, %v7351_v26 }
0x1112   :  { %v3318_v47 = vsel %vm3317_vm9, %v5496_v11, %v3314_v59  ;;  %v3534_v5 = vsel %vm79_vm0, %v7353_v53, -inf }
0x1113   :  { %v3335_v44 = vmul.f32 %v3318_v47, %v7303_v57  ;;  %3535 = vmax.xlane.f32.xlu0 %v3534_v5 }
0x1114   :  { %v5289_v51 = vpop.permute.xlu1 %5288 }
0x1115   :  { %v5290_v10 = vunpack.i.l.bf16 %v5289_v51  ;;  %v3344_v35 = vmul.f32 %v7216_v32, %v3335_v44  ;;  %v5291_v62 = vunpack.i.h.bf16 %v5289_v51  ;;  %v3458_v44 = vld [vmem:[#allocation5 + $0x220] sm:$0xff]  ;;  %v3457_v51 = vld [vmem:[#allocation5 + $0x218] sm:$0xff] }
0x1116   :  { %3903 = vmatpush.msrb.mxu3 %v3458_v44 }
0x1117   :  { %3589 = vmatpush.msrb.mxu0 %v5290_v10  ;;  %v7362_v21 = vadd.f32 %v7218_v15, %v3344_v35  ;;  %v3456_v10 = vld [vmem:[#allocation5 + $0x210] sm:$0xff]  ;;  %v3455_v35 = vld [vmem:[#allocation5 + $0x208] sm:$0xff] }
0x1118   :  { %3904 = vmatpush.msrb.mxu3 %v3457_v51  ;;  %v7426_v51 = vld [vmem:[#allocation5 + $0x228] ss:$0 sm:$0xff] }
0x1119   :  { %4997 = vmatmul.msk.f32.gmra.mxu2 %vm79_vm0, %v7362_v21  ;;  %3590 = vmatpush.msrb.mxu0 %v5291_v62 }
0x111a   :  { %3905 = vmatpush.msrb.mxu3 %v3456_v10  ;;  %v3663_v10 = vmul.f32 %v7376_v14, %v6455_v0 }
0x111c   :  { %3906 = vmatpush.msrb.mxu3 %v3455_v35  ;;  %v3664_v35 = vmul.f32 %v7376_v14, %v6457_v24 }
0x1124   :  { %v3232_v34 = vpop.xlane.xlu0 %3231 }
0x1125   :  { %v3240_v7 = vmul.f32 %v3232_v34, %v6245_v30 }
0x1127   :  { %v3248_v22 = vadd.f32 1e-05, %v3240_v7 }
0x1129   :  { %5497 = vrsqrt.f32 %v3248_v22  ;;  %vm3325_vm11 = vweird.f32 %v3248_v22 }
0x112f   :  { %v5498_v57 = vpop.eup %5497 }
0x1130   :  { %v3320_v63 = vmul.f32 %v5498_v57, %v3248_v22  ;;  %vm3326_vm10 = vweird.f32 %v5498_v57 }
0x1131   :  { %vm3327_vm12 = vmor %vm3325_vm11, %vm3326_vm10 }
0x1132   :  { %v3321_v3 = vmul.f32 %v5498_v57, %v3320_v63 }
0x1134   :  { %v3322_v36 = vmul.f32 0.5, %v3321_v3 }
0x1136   :  { %v3323_v28 = vsub.f32 1.5, %v3322_v36 }
0x1138   :  { %v3324_v8 = vmul.f32 %v5498_v57, %v3323_v28 }
0x113a   :  { %v3328_v48 = vsel %vm3327_vm12, %v5498_v57, %v3324_v8 }
0x113b   :  { %v3336_v60 = vmul.f32 %v3328_v48, %v7316_v41 }
0x113d   :  { %v3345_v33 = vmul.f32 %v7216_v32, %v3336_v60 }
0x113f   :  { %v7370_v39 = vadd.f32 %v7218_v15, %v3345_v33 }
0x1141   :  { %4998 = vmatmul.msk.f32.gmra.mxu2 %vm79_vm0, %v7370_v39 }
0x1148   :  { %v3527_v1 = vpop.xlane.xlu2 %3526 }
0x1149   :  { %v3537_v38 = vsub.f32 %v7321_v13, %v3527_v1 }
0x114b   :  { %v3541_v50 = vmul.f32 1.442695, %v3537_v38 }
0x114d   :  { %5499 = vpow2.f32 %v3541_v50 }
0x1150   :  { %v5294_v27 = vpop.permute.xlu2 %5293  ;;  %v3530_v17 = vpop.xlane.xlu0 %3529 }
0x1151   :  { %v5295_v41 = vunpack.i.l.bf16 %v5294_v27  ;;  %v3538_v32 = vsub.f32 %v7325_v43, %v3530_v17  ;;  %v5296_v15 = vunpack.i.h.bf16 %v5294_v27 }
0x1153   :  { %v5500_v9 = vpop.eup %5499  ;;  %v3543_v11 = vmul.f32 1.442695, %v3538_v32  ;;  %3591 = vmatpush.msrb.mxu0 %v5295_v41 }
0x1154   :  { %5013 = vmatmul.msk.f32.vlgmr.msra.gmra.mxu3 %vm79_vm0, %v5500_v9 }
0x1155   :  { %5501 = vpow2.f32 %v3543_v11  ;;  %3592 = vmatpush.msrb.mxu0 %v5296_v15 }
0x1156   :  { %5009 = vmatmul.msk.f32.vlgmr.msrb.gmra.mxu0 %vm79_vm0, %v5500_v9 }
0x1157   :  { %5017 = vmatpush.xpose.msk.msra.mxu0 %vm79_vm0, %v3662_v16 }
0x1158   :  { %v3533_v13 = vpop.xlane.xlu0 %3532 }
0x1159   :  { %v3539_v43 = vsub.f32 %v7329_v4, %v3533_v13  ;;  %v3659_v4 = vmul.f32 %v7210_v40, %v7376_v14 }
0x115b   :  { %v5502_v37 = vpop.eup %5501  ;;  %v3545_v31 = vmul.f32 1.442695, %v3539_v43  ;;  %5018 = vmatpush.xpose.msk.msra.mxu0 %vm79_vm0, %v3661_v29 }
0x115c   :  { %5014 = vmatmul.msk.f32.gmra.mxu3 %vm79_vm0, %v5502_v37 }
0x115d   :  { %5503 = vpow2.f32 %v3545_v31 }
0x115e   :  { %5010 = vmatmul.msk.f32.gmra.mxu0 %vm79_vm0, %v5502_v37 }
0x115f   :  { %5019 = vmatpush.xpose.msk.msra.mxu0 %vm79_vm0, %v3660_v23 }
0x1163   :  { %v5504_v2 = vpop.eup %5503  ;;  %5020 = vmatpush.xpose.msk.msra.mxu0 %vm79_vm0, %v3659_v4 }
0x1164   :  { %5015 = vmatmul.msk.f32.gmra.mxu3 %vm79_vm0, %v5504_v2 }
0x1166   :  { %5011 = vmatmul.msk.f32.gmra.mxu0 %vm79_vm0, %v5504_v2 }
0x1186   :  { %v3536_v56 = vpop.xlane.xlu0 %3535 }
0x1187   :  { %v3540_v42 = vsub.f32 %v7353_v53, %v3536_v56 }
0x1189   :  { %v3547_v20 = vmul.f32 1.442695, %v3540_v42 }
0x118b   :  { %5505 = vpow2.f32 %v3547_v20 }
0x118c   :  { %v3414_v19 = vpop.f32.mrf.mxu2 }
0x118d   :  { %v3415_v52 = vadd.f32 %v7282_v6, %v3414_v19 }
0x1191   :  { %v5506_v45 = vpop.eup %5505 }
0x1192   :  { %5012 = vmatmul.msk.f32.gmra.mxu0 %vm79_vm0, %v5506_v45  ;;  %5016 = vmatmul.msk.f32.gmra.mxu3 %vm79_vm0, %v5506_v45 }
0x1194   :  { %v3417_v55 = vpop.f32.mrf.mxu2 }
0x1195   :  { %v3418_v40 = vadd.f32 %v7282_v6, %v3417_v55 }
0x119a   :  { %5021 = vmatmul.msk.f32.vlgmr.msra.gmra.mxu0 %vm79_vm0, %v3415_v52 }
0x119c   :  { %v3420_v59 = vpop.f32.mrf.mxu2 }
0x119d   :  { %v3421_v53 = vadd.f32 %v7282_v6, %v3420_v59  ;;  %v3666_v59 = vmul.f32 %v7376_v14, %v6432_v18  ;;  %v5302_v18 = vpack.i.bf16 %v3663_v10, %v3664_v35 }
0x11a2   :  { %5022 = vmatmul.msk.f32.gmra.mxu0 %vm79_vm0, %v3418_v40  ;;  %v3665_v40 = vmul.f32 %v7376_v14, %v6427_v54 }
0x11aa   :  { %5023 = vmatmul.msk.f32.gmra.mxu0 %vm79_vm0, %v3421_v53  ;;  %v5297_v53 = vpack.i.bf16 %v3665_v40, %v3666_v59 }
0x11c4   :  { %v3423_v47 = vpop.f32.mrf.mxu2 }
0x11c5   :  { %v3424_v5 = vadd.f32 %v7282_v6, %v3423_v47 }
0x11c7   :  { %5024 = vmatmul.msk.f32.gmra.mxu0 %vm79_vm0, %v3424_v5 }
0x11d3   :  { %v3594_v57 = vpop.f32.mrf.mxu0 }
0x11d7   :  { %v3623_v62 = vpop.f32.mrf.mxu3 }
0x11d8   :  { %5507 = vrcp.f32 %v3623_v62 }
0x11db   :  { %v3597_v60 = vpop.f32.mrf.mxu0 }
0x11de   :  { %v5508_v34 = vpop.eup %5507 }
0x11df   :  { %v3639_v7 = vmul.f32 %v5508_v34, %v3623_v62  ;;  %v3626_v22 = vpop.f32.mrf.mxu3 }
0x11e0   :  { %5509 = vrcp.f32 %v3626_v22 }
0x11e1   :  { %v3643_v63 = vsub.f32 2.0, %v3639_v7 }
0x11e3   :  { %v3647_v3 = vmul.f32 %v5508_v34, %v3643_v63  ;;  %v3600_v41 = vpop.f32.mrf.mxu0 }
0x11e5   :  { %v3651_v6 = vmul.f32 %v3647_v3, %v3594_v57 }
0x11e6   :  { %v5510_v36 = vpop.eup %5509 }
0x11e7   :  { %3655 = vst.msk [vmem:[#allocation2] sm:$0xff] %vm79_vm0, %v3651_v6  ;;  %v3640_v28 = vmul.f32 %v5510_v36, %v3626_v22  ;;  %v3629_v8 = vpop.f32.mrf.mxu3 }
0x11e8   :  { %5511 = vrcp.f32 %v3629_v8 }
0x11e9   :  { %v3644_v48 = vsub.f32 2.0, %v3640_v28 }
0x11eb   :  { %v3648_v33 = vmul.f32 %v5510_v36, %v3644_v48 }
0x11ed   :  { %v3652_v1 = vmul.f32 %v3648_v33, %v3597_v60 }
0x11ee   :  { %v5512_v38 = vpop.eup %5511  ;;  %v3858_v50 = vld [vmem:[#allocation2] sm:$0xff] }
0x11ef   :  { %3656 = vst.msk [vmem:[#allocation2 + $0x8] sm:$0xff] %vm79_vm0, %v3652_v1  ;;  %v3641_v12 = vmul.f32 %v5512_v38, %v3629_v8  ;;  %5033 = vmatmul.msk.f32.vlgmr.msrb.gmra.mxu3 %vm79_vm0, %v3858_v50 }
0x11f1   :  { %v3645_v27 = vsub.f32 2.0, %v3641_v12 }
0x11f3   :  { %v3649_v17 = vmul.f32 %v5512_v38, %v3645_v27 }
0x11f5   :  { %v3653_v32 = vmul.f32 %v3649_v17, %v3600_v41 }
0x11f6   :  { %v3859_v9 = vld [vmem:[#allocation2 + $0x8] sm:$0xff] }
0x11f7   :  { %3657 = vst.msk [vmem:[#allocation2 + $0x10] sm:$0xff] %vm79_vm0, %v3653_v32  ;;  %5034 = vmatmul.msk.f32.gmra.mxu3 %vm79_vm0, %v3859_v9 }
0x11fe   :  { %v3860_v15 = vld [vmem:[#allocation2 + $0x10] sm:$0xff] }
0x11ff   :  { %5035 = vmatmul.msk.f32.gmra.mxu3 %vm79_vm0, %v3860_v15 }
0x120f   :  { %v3603_v11 = vpop.f32.mrf.mxu0 }
0x1215   :  { %v3632_v16 = vpop.f32.mrf.mxu3 }
0x1216   :  { %5513 = vrcp.f32 %v3632_v16 }
0x1217   :  { %v3708_v29 = vpop.f32.mrf.mxu0 }
0x1218   :  { %v3720_v13 = vmul.f32 0.35355338, %v3708_v29 }
0x121a   :  { %v3724_v43 = vsel %vm79_vm0, %v3720_v13, -inf }
0x121b   :  { %3725 = vmax.xlane.f32.xlu1 %v3724_v43 }
0x121c   :  { %v5514_v37 = vpop.eup %5513 }
0x121d   :  { %v3642_v31 = vmul.f32 %v5514_v37, %v3632_v16 }
0x121f   :  { %v3646_v2 = vsub.f32 2.0, %v3642_v31  ;;  %v3711_v23 = vpop.f32.mrf.mxu0 }
0x1220   :  { %v3721_v4 = vmul.f32 0.35355338, %v3711_v23 }
0x1221   :  { %v3650_v56 = vmul.f32 %v5514_v37, %v3646_v2 }
0x1222   :  { %v3727_v42 = vsel %vm79_vm0, %v3721_v4, -inf }
0x1223   :  { %v3654_v20 = vmul.f32 %v3650_v56, %v3603_v11  ;;  %3728 = vmax.xlane.f32.xlu0 %v3727_v42 }
0x1225   :  { %3658 = vst.msk [vmem:[#allocation2 + $0x18] sm:$0xff] %vm79_vm0, %v3654_v20 }
0x1227   :  { %v3714_v45 = vpop.f32.mrf.mxu0 }
0x1228   :  { %v3722_v19 = vmul.f32 0.35355338, %v3714_v45 }
0x122a   :  { %v3730_v52 = vsel %vm79_vm0, %v3722_v19, -inf }
0x122b   :  { %3731 = vmax.xlane.f32.xlu2 %v3730_v52 }
0x122c   :  { %v3861_v55 = vld [vmem:[#allocation2 + $0x18] sm:$0xff] }
0x122d   :  { %5036 = vmatmul.msk.f32.gmra.mxu3 %vm79_vm0, %v3861_v55 }
0x1237   :  { %5298 = vrot.lane.b32.xlu0 %v5297_v53, %s5682_s1 }
0x1244   :  { %v3717_v47 = vpop.f32.mrf.mxu0 }
0x1245   :  { %v3723_v5 = vmul.f32 0.35355338, %v3717_v47 }
0x1247   :  { %v3733_v44 = vsel %vm79_vm0, %v3723_v5, -inf }
0x1261   :  { %3734 = vmax.xlane.f32.xlu0 %v3733_v44 }
0x1272   :  { %v3908_v54 = vpop.f32.mrf.mxu3 }
0x1273   :  { %v3909_v62 = vadd.f32 %v7426_v51, %v3908_v54 }
0x1275   :  { %v7434_v34 = vadd.f32 %v3909_v62, %v7223_v58  ;;  %5303 = vrot.lane.b32.xlu0 %v5302_v18, %s5682_s1 }
0x1277   :  { %v3942_v7 = vsel %vm79_vm0, %v7434_v34, 0.0 }
0x1278   :  { %3943 = vadd.xlane.f32.xlu1 %v3942_v7 }
0x127a   :  { %v3911_v22 = vpop.f32.mrf.mxu3 }
0x127b   :  { %v3912_v6 = vadd.f32 %v7426_v51, %v3911_v22 }
0x127d   :  { %v7447_v60 = vadd.f32 %v3912_v6, %v7230_v61 }
0x127f   :  { %v3945_v33 = vsel %vm79_vm0, %v7447_v60, 0.0 }
0x1282   :  { %v3914_v57 = vpop.f32.mrf.mxu3 }
0x1283   :  { %v3915_v0 = vadd.f32 %v7426_v51, %v3914_v57 }
0x1285   :  { %v7441_v63 = vadd.f32 %v3915_v0, %v7237_v49 }
0x1287   :  { %v3948_v24 = vsel %vm79_vm0, %v7441_v63, 0.0 }
0x1288   :  { %3949 = vadd.xlane.f32.xlu2 %v3948_v24 }
0x128e   :  { %v3726_v14 = vpop.xlane.xlu1 %3725 }
0x128f   :  { %v3736_v58 = vsub.f32 %v3720_v13, %v3726_v14 }
0x1291   :  { %v3740_v3 = vmul.f32 1.442695, %v3736_v58 }
0x1293   :  { %5515 = vpow2.f32 %v3740_v3 }
0x1296   :  { %v3729_v36 = vpop.xlane.xlu0 %3728 }
0x1297   :  { %v3737_v28 = vsub.f32 %v3721_v4, %v3729_v36 }
0x1299   :  { %v5516_v8 = vpop.eup %5515  ;;  %v3742_v48 = vmul.f32 1.442695, %v3737_v28 }
0x129a   :  { %5029 = vmatmul.msk.f32.vlgmr.msra.gmra.mxu2 %vm79_vm0, %v5516_v8 }
0x129b   :  { %5517 = vpow2.f32 %v3742_v48 }
0x129e   :  { %v3732_v49 = vpop.xlane.xlu2 %3731 }
0x129f   :  { %v3738_v1 = vsub.f32 %v3722_v19, %v3732_v49  ;;  %3946 = vadd.xlane.f32.xlu0 %v3945_v33 }
0x12a1   :  { %v5518_v38 = vpop.eup %5517  ;;  %v3744_v50 = vmul.f32 1.442695, %v3738_v1 }
0x12a2   :  { %5030 = vmatmul.msk.f32.gmra.mxu2 %vm79_vm0, %v5518_v38 }
0x12a3   :  { %5519 = vpow2.f32 %v3744_v50 }
0x12a9   :  { %v5520_v12 = vpop.eup %5519  ;;  %v5299_v27 = vpop.permute.xlu0 %5298 }
0x12aa   :  { %v5300_v17 = vunpack.i.l.bf16 %v5299_v27  ;;  %5031 = vmatmul.msk.f32.gmra.mxu2 %vm79_vm0, %v5520_v12  ;;  %v5301_v61 = vunpack.i.h.bf16 %v5299_v27 }
0x12ac   :  { %3788 = vmatpush.msrb.mxu1 %v5300_v17 }
0x12ae   :  { %3789 = vmatpush.msrb.mxu1 %v5301_v61 }
0x12b0   :  { %v3917_v41 = vpop.f32.mrf.mxu3 }
0x12b1   :  { %v3918_v32 = vadd.f32 %v7426_v51, %v3917_v41 }
0x12b3   :  { %v7456_v9 = vadd.f32 %v3918_v32, %v7250_v25 }
0x12b5   :  { %v3951_v15 = vsel %vm79_vm0, %v7456_v9, 0.0 }
0x12b6   :  { %3952 = vadd.xlane.f32.xlu1 %v3951_v15 }
0x12d4   :  { %v3735_v11 = vpop.xlane.xlu0 %3734 }
0x12d5   :  { %v3739_v16 = vsub.f32 %v3723_v5, %v3735_v11 }
0x12d7   :  { %v3746_v29 = vmul.f32 1.442695, %v3739_v16 }
0x12d9   :  { %5521 = vpow2.f32 %v3746_v29 }
0x12df   :  { %v5522_v13 = vpop.eup %5521 }
0x12e0   :  { %5032 = vmatmul.msk.f32.gmra.mxu2 %vm79_vm0, %v5522_v13 }
0x12e7   :  { %v5304_v43 = vpop.permute.xlu0 %5303 }
0x12e8   :  { %v5305_v37 = vunpack.i.l.bf16 %v5304_v43  ;;  %v5306_v31 = vunpack.i.h.bf16 %v5304_v43 }
0x12ea   :  { %3790 = vmatpush.msrb.mxu1 %v5305_v37 }
0x12eb   :  { %v3944_v28 = vpop.xlane.xlu1 %3943 }
0x12ec   :  { %3791 = vmatpush.msrb.mxu1 %v5306_v31  ;;  %v3966_v48 = vmul.f32 %v3944_v28, %v6245_v30 }
0x12ed   :  { %5025 = vmatmul.msk.f32.vlgmr.msrb.gmra.mxu1 %vm79_vm0, %v5516_v8 }
0x12ee   :  { %v7477_v1 = vsub.f32 %v7434_v34, %v3966_v48 }
0x12f0   :  { %v3982_v61 = vmul.f32 %v7477_v1, %v7477_v1 }
0x12f5   :  { %5026 = vmatmul.msk.f32.gmra.mxu1 %vm79_vm0, %v5518_v38 }
0x12fb   :  { %v3950_v15 = vpop.xlane.xlu2 %3949 }
0x12fc   :  { %v3968_v16 = vmul.f32 %v3950_v15, %v6245_v30 }
0x12fd   :  { %5027 = vmatmul.msk.f32.gmra.mxu1 %vm79_vm0, %v5520_v12 }
0x1305   :  { %5028 = vmatmul.msk.f32.gmra.mxu1 %vm79_vm0, %v5522_v13 }
0x1312   :  { %v3947_v50 = vpop.xlane.xlu0 %3946 }
0x1313   :  { %v3967_v27 = vmul.f32 %v3947_v50, %v6245_v30 }
0x1315   :  { %v7486_v32 = vsub.f32 %v7447_v60, %v3967_v27  ;;  %v7496_v60 = vsub.f32 %v7441_v63, %v3968_v16  ;;  %v7541_v16 = vld [vmem:[#allocation5 + $0x2b8] ss:$0 sm:$0xff] }
0x1317   :  { %v3983_v13 = vmul.f32 %v7486_v32, %v7486_v32 }
0x1319   :  { %v3993_v43 = vsel %vm79_vm0, %v3983_v13, 0.0 }
0x131d   :  { %v3822_v25 = vpop.f32.mrf.mxu2 }
0x131e   :  { %5523 = vrcp.f32 %v3822_v25 }
0x1324   :  { %v5524_v23 = vpop.eup %5523 }
0x1325   :  { %v3825_v2 = vpop.f32.mrf.mxu2  ;;  %v3838_v4 = vmul.f32 %v5524_v23, %v3822_v25 }
0x1326   :  { %5525 = vrcp.f32 %v3825_v2 }
0x1327   :  { %v3842_v56 = vsub.f32 2.0, %v3838_v4  ;;  %v3984_v4 = vmul.f32 %v7496_v60, %v7496_v60 }
0x1329   :  { %v3846_v19 = vmul.f32 %v5524_v23, %v3842_v56  ;;  %v3953_v31 = vpop.xlane.xlu1 %3952  ;;  %v3996_v56 = vsel %vm79_vm0, %v3984_v4, 0.0 }
0x132c   :  { %v5526_v20 = vpop.eup %5525 }
0x132d   :  { %v3828_v42 = vpop.f32.mrf.mxu2  ;;  %v3839_v45 = vmul.f32 %v5526_v20, %v3825_v2  ;;  %v3969_v2 = vmul.f32 %v3953_v31, %v6245_v30 }
0x132e   :  { %5527 = vrcp.f32 %v3828_v42 }
0x132f   :  { %v3843_v40 = vsub.f32 2.0, %v3839_v45  ;;  %v7506_v63 = vsub.f32 %v7456_v9, %v3969_v2 }
0x1331   :  { %v3847_v5 = vmul.f32 %v5526_v20, %v3843_v40  ;;  %v3985_v20 = vmul.f32 %v7506_v63, %v7506_v63 }
0x1333   :  { %v3999_v45 = vsel %vm79_vm0, %v3985_v20, 0.0 }
0x1334   :  { %v5528_v53 = vpop.eup %5527 }
0x1335   :  { %v3840_v47 = vmul.f32 %v5528_v53, %v3828_v42 }
0x1337   :  { %v3844_v54 = vsub.f32 2.0, %v3840_v47 }
0x1339   :  { %v3848_v7 = vmul.f32 %v5528_v53, %v3844_v54 }
0x1363   :  { %v3831_v59 = vpop.f32.mrf.mxu2 }
0x1364   :  { %5529 = vrcp.f32 %v3831_v59 }
0x136a   :  { %v3793_v52 = vpop.f32.mrf.mxu1  ;;  %v5530_v62 = vpop.eup %5529 }
0x136b   :  { %v3850_v55 = vmul.f32 %v3846_v19, %v3793_v52  ;;  %v3841_v18 = vmul.f32 %v5530_v62, %v3831_v59  ;;  %v4138_v52 = vld [vmem:[#allocation5 + $0x240] sm:$0xff]  ;;  %v4136_v59 = vld [vmem:[#allocation5 + $0x230] sm:$0xff] }
0x136d   :  { %3854 = vst.msk [vmem:[#allocation2 + $0x20] sm:$0xff] %vm79_vm0, %v3850_v55  ;;  %v3845_v24 = vsub.f32 2.0, %v3841_v18  ;;  %v4137_v55 = vld [vmem:[#allocation5 + $0x238] sm:$0xff] }
0x136f   :  { %v3849_v14 = vmul.f32 %v5530_v62, %v3845_v24 }
0x1372   :  { %v3796_v44 = vpop.f32.mrf.mxu1 }
0x1373   :  { %v3851_v10 = vmul.f32 %v3847_v5, %v3796_v44 }
0x1374   :  { %v3862_v35 = vld [vmem:[#allocation2 + $0x20] sm:$0xff] }
0x1375   :  { %3855 = vst.msk [vmem:[#allocation2 + $0x28] sm:$0xff] %vm79_vm0, %v3851_v10  ;;  %5037 = vmatmul.msk.f32.gmra.mxu3 %vm79_vm0, %v3862_v35 }
0x137a   :  { %v3799_v22 = vpop.f32.mrf.mxu1 }
0x137b   :  { %v3852_v57 = vmul.f32 %v3848_v7, %v3799_v22 }
0x137c   :  { %v3863_v0 = vld [vmem:[#allocation2 + $0x28] sm:$0xff] }
0x137d   :  { %3856 = vst.msk [vmem:[#allocation2 + $0x30] sm:$0xff] %vm79_vm0, %v3852_v57  ;;  %5038 = vmatmul.msk.f32.gmra.mxu3 %vm79_vm0, %v3863_v0 }
0x1382   :  { %v3802_v58 = vpop.f32.mrf.mxu1 }
0x1383   :  { %v3853_v3 = vmul.f32 %v3849_v14, %v3802_v58 }
0x1384   :  { %v3864_v6 = vld [vmem:[#allocation2 + $0x30] sm:$0xff] }
0x1385   :  { %3857 = vst.msk [vmem:[#allocation2 + $0x38] sm:$0xff] %vm79_vm0, %v3853_v3  ;;  %5039 = vmatmul.msk.f32.gmra.mxu3 %vm79_vm0, %v3864_v6 }
0x138c   :  { %v3865_v36 = vld [vmem:[#allocation2 + $0x38] sm:$0xff] }
0x138d   :  { %5040 = vmatmul.msk.f32.gmra.mxu3 %vm79_vm0, %v3865_v36 }
0x13f8   :  { %v3920_v8 = vpop.f32.mrf.mxu3 }
0x13f9   :  { %v3921_v49 = vadd.f32 %v7426_v51, %v3920_v8 }
0x13fb   :  { %v3936_v33 = vadd.f32 %v3921_v49, %v7344_v46  ;;  %v3990_v46 = vsel %vm79_vm0, %v3982_v61, 0.0 }
0x13fd   :  { %v3954_v38 = vsel %vm79_vm0, %v3936_v33, 0.0 }
0x13fe   :  { %3955 = vadd.xlane.f32.xlu2 %v3954_v38 }
0x1400   :  { %v3923_v12 = vpop.f32.mrf.mxu3 }
0x1401   :  { %v3924_v17 = vadd.f32 %v7426_v51, %v3923_v12 }
0x1403   :  { %v3937_v41 = vadd.f32 %v3924_v17, %v7351_v26 }
0x1405   :  { %v3957_v34 = vsel %vm79_vm0, %v3937_v41, 0.0 }
0x1406   :  { %3991 = vadd.xlane.f32.xlu2 %v3990_v46  ;;  %3958 = vadd.xlane.f32.xlu1 %v3957_v34  ;;  %v7537_v46 = vld [vmem:[#allocation5 + $0x2b0] ss:$0 sm:$0xff] }
0x1408   :  { %v3926_v11 = vpop.f32.mrf.mxu3 }
0x1409   :  { %v3927_v29 = vadd.f32 %v7426_v51, %v3926_v11 }
0x140b   :  { %v3938_v26 = vadd.f32 %v3927_v29, %v7362_v21 }
0x140d   :  { %v3960_v37 = vsel %vm79_vm0, %v3938_v26, 0.0 }
0x140e   :  { %3994 = vadd.xlane.f32.xlu2 %v3993_v43  ;;  %3961 = vadd.xlane.f32.xlu1 %v3960_v37 }
0x1410   :  { %v3929_v25 = vpop.f32.mrf.mxu3 }
0x1411   :  { %v3930_v23 = vadd.f32 %v7426_v51, %v3929_v25  ;;  %v4139_v51 = vld [vmem:[#allocation5 + $0x248] sm:$0xff] }
0x1412   :  { %4178 = vmatpush.msrb.mxu0 %v4139_v51 }
0x1413   :  { %v3939_v21 = vadd.f32 %v3930_v23, %v7370_v39 }
0x1414   :  { %4179 = vmatpush.msrb.mxu0 %v4138_v52 }
0x1415   :  { %v3963_v42 = vsel %vm79_vm0, %v3939_v21, 0.0 }
0x1416   :  { %3997 = vadd.xlane.f32.xlu2 %v3996_v56  ;;  %3964 = vadd.xlane.f32.xlu1 %v3963_v42 }
0x1417   :  { %4180 = vmatpush.msrb.mxu0 %v4137_v55 }
0x1419   :  { %4181 = vmatpush.msrb.mxu0 %v4136_v59 }
0x141e   :  { %4000 = vadd.xlane.f32.xlu1 %v3999_v45 }
0x1471   :  { %v3956_v19 = vpop.xlane.xlu2 %3955 }
0x1472   :  { %v3970_v39 = vmul.f32 %v3956_v19, %v6245_v30 }
0x1474   :  { %v7514_v9 = vsub.f32 %v3936_v33, %v3970_v39 }
0x1476   :  { %v3986_v40 = vmul.f32 %v7514_v9, %v7514_v9 }
0x1478   :  { %v4002_v53 = vsel %vm79_vm0, %v3986_v40, 0.0 }
0x1479   :  { %4003 = vadd.xlane.f32.xlu2 %v4002_v53  ;;  %v3992_v47 = vpop.xlane.xlu2 %3991  ;;  %v3959_v5 = vpop.xlane.xlu1 %3958 }
0x147a   :  { %v4014_v44 = vmul.f32 %v3992_v47, %v6245_v30  ;;  %v3971_v10 = vmul.f32 %v3959_v5, %v6245_v30 }
0x147c   :  { %v4022_v35 = vadd.f32 1e-05, %v4014_v44  ;;  %v7521_v54 = vsub.f32 %v3937_v41, %v3971_v10 }
0x147e   :  { %5531 = vrsqrt.f32 %v4022_v35  ;;  %v3987_v62 = vmul.f32 %v7521_v54, %v7521_v54  ;;  %vm4036_vm14 = vweird.f32 %v4022_v35 }
0x1480   :  { %v4005_v18 = vsel %vm79_vm0, %v3987_v62, 0.0 }
0x1481   :  { %v3995_v7 = vpop.xlane.xlu2 %3994  ;;  %4006 = vadd.xlane.f32.xlu0 %v4005_v18  ;;  %v3962_v22 = vpop.xlane.xlu1 %3961 }
0x1482   :  { %v4015_v57 = vmul.f32 %v3995_v7, %v6245_v30  ;;  %v3972_v0 = vmul.f32 %v3962_v22, %v6245_v30  ;;  %v4222_v22 = vld [vmem:[#allocation5 + $0x290] sm:$0xff] }
0x1483   :  { %4257 = vmatpush.msra.mxu1 %v4222_v22 }
0x1484   :  { %v5532_v24 = vpop.eup %5531  ;;  %v4023_v14 = vadd.f32 1e-05, %v4015_v57  ;;  %v7528_v58 = vsub.f32 %v3938_v26, %v3972_v0  ;;  %v4221_v0 = vld [vmem:[#allocation5 + $0x288] sm:$0xff] }
0x1485   :  { %v4031_v3 = vmul.f32 %v5532_v24, %v4022_v35  ;;  %vm4037_vm13 = vweird.f32 %v5532_v24  ;;  %4258 = vmatpush.msra.mxu1 %v4221_v0 }
0x1486   :  { %5533 = vrsqrt.f32 %v4023_v14  ;;  %v3988_v6 = vmul.f32 %v7528_v58, %v7528_v58  ;;  %vm4038_vm15 = vmor %vm4036_vm14, %vm4037_vm13  ;;  %vm4046_vm2 = vweird.f32 %v4023_v14 }
0x1487   :  { %v4032_v36 = vmul.f32 %v5532_v24, %v4031_v3 }
0x1488   :  { %v4008_v28 = vsel %vm79_vm0, %v3988_v6, 0.0  ;;  %v4219_v6 = vld [vmem:[#allocation5 + $0x278] sm:$0xff] }
0x1489   :  { %v4033_v8 = vmul.f32 0.5, %v4032_v36  ;;  %v3998_v48 = vpop.xlane.xlu2 %3997  ;;  %4009 = vadd.xlane.f32.xlu1 %v4008_v28  ;;  %v3965_v49 = vpop.xlane.xlu1 %3964  ;;  %v4217_v28 = vld [vmem:[#allocation5 + $0x268] sm:$0xff] }
0x148a   :  { %v4016_v33 = vmul.f32 %v3998_v48, %v6245_v30  ;;  %v3973_v38 = vmul.f32 %v3965_v49, %v6245_v30  ;;  %v4216_v48 = vld [vmem:[#allocation5 + $0x260] sm:$0xff] }
0x148b   :  { %v4034_v50 = vsub.f32 1.5, %v4033_v8 }
0x148c   :  { %v5534_v12 = vpop.eup %5533  ;;  %v4024_v27 = vadd.f32 1e-05, %v4016_v33  ;;  %v7535_v17 = vsub.f32 %v3939_v21, %v3973_v38 }
0x148d   :  { %v4035_v61 = vmul.f32 %v5532_v24, %v4034_v50  ;;  %v4041_v41 = vmul.f32 %v5534_v12, %v4023_v14  ;;  %vm4047_vm1 = vweird.f32 %v5534_v12  ;;  %v4220_v14 = vld [vmem:[#allocation5 + $0x280] sm:$0xff]  ;;  %v4215_v50 = vld [vmem:[#allocation5 + $0x258] sm:$0xff] }
0x148e   :  { %5535 = vrsqrt.f32 %v4024_v27  ;;  %v3989_v34 = vmul.f32 %v7535_v17, %v7535_v17  ;;  %vm4048_vm3 = vmor %vm4046_vm2, %vm4047_vm1  ;;  %vm4056_vm5 = vweird.f32 %v4024_v27  ;;  %4259 = vmatpush.msra.mxu1 %v4220_v14 }
0x148f   :  { %v4039_v15 = vsel %vm4038_vm15, %v5532_v24, %v4035_v61  ;;  %v4042_v11 = vmul.f32 %v5534_v12, %v4041_v41 }
0x1490   :  { %v4110_v29 = vmul.f32 %v4039_v15, %v7477_v1  ;;  %v4011_v13 = vsel %vm79_vm0, %v3989_v34, 0.0  ;;  %4260 = vmatpush.msra.mxu1 %v4219_v6 }
0x1491   :  { %v4043_v26 = vmul.f32 0.5, %v4042_v11  ;;  %4012 = vadd.xlane.f32.xlu2 %v4011_v13  ;;  %v4001_v43 = vpop.xlane.xlu1 %4000 }
0x1492   :  { %v4119_v37 = vmul.f32 %v7537_v46, %v4110_v29  ;;  %v4017_v31 = vmul.f32 %v4001_v43, %v6245_v30 }
0x1493   :  { %v4044_v25 = vsub.f32 1.5, %v4043_v26 }
0x1494   :  { %v5536_v2 = vpop.eup %5535  ;;  %v7548_v23 = vadd.f32 %v7541_v16, %v4119_v37  ;;  %v4025_v4 = vadd.f32 1e-05, %v4017_v31 }
0x1495   :  { %v4045_v21 = vmul.f32 %v5534_v12, %v4044_v25  ;;  %v4051_v56 = vmul.f32 %v5536_v2, %v4024_v27  ;;  %vm4057_vm4 = vweird.f32 %v5536_v2 }
0x1496   :  { %5537 = vrsqrt.f32 %v4025_v4  ;;  %5041 = vmatmul.msk.f32.vlgmr.msrb.gmra.mxu0 %vm79_vm0, %v7548_v23  ;;  %vm4058_vm6 = vmor %vm4056_vm5, %vm4057_vm4  ;;  %vm4066_vm9 = vweird.f32 %v4025_v4 }
0x1497   :  { %v4049_v1 = vsel %vm4048_vm3, %v5534_v12, %v4045_v21  ;;  %v4052_v42 = vmul.f32 %v5536_v2, %v4051_v56 }
0x1498   :  { %v4111_v20 = vmul.f32 %v4049_v1, %v7486_v32 }
0x1499   :  { %v4053_v45 = vmul.f32 0.5, %v4052_v42 }
0x149a   :  { %v4120_v51 = vmul.f32 %v7537_v46, %v4111_v20 }
0x149b   :  { %v4054_v19 = vsub.f32 1.5, %v4053_v45 }
0x149c   :  { %v5538_v39 = vpop.eup %5537  ;;  %v7555_v52 = vadd.f32 %v7541_v16, %v4120_v51 }
0x149d   :  { %v4055_v55 = vmul.f32 %v5536_v2, %v4054_v19  ;;  %v4061_v40 = vmul.f32 %v5538_v39, %v4025_v4  ;;  %vm4067_vm7 = vweird.f32 %v5538_v39 }
0x149e   :  { %5042 = vmatmul.msk.f32.gmra.mxu0 %vm79_vm0, %v7555_v52  ;;  %vm4068_vm10 = vmor %vm4066_vm9, %vm4067_vm7  ;;  %vm4743_vm9 = vcmask 326656  }
0x149f   :  { %v4059_v59 = vsel %vm4058_vm6, %v5536_v2, %v4055_v55  ;;  %v4062_v53 = vmul.f32 %v5538_v39, %v4061_v40 }
0x14a0   :  { %v4112_v32 = vmul.f32 %v4059_v59, %v7496_v60 }
0x14a1   :  { %v4063_v47 = vmul.f32 0.5, %v4062_v53 }
0x14a2   :  { %v4121_v5 = vmul.f32 %v7537_v46, %v4112_v32 }
0x14a3   :  { %v4064_v44 = vsub.f32 1.5, %v4063_v47 }
0x14a4   :  { %v7562_v10 = vadd.f32 %v7541_v16, %v4121_v5  ;;  %v5329_v5 = vld [vmem:[#allocation5 + $0x250] ss:$0 sm:$0xff] }
0x14a5   :  { %v4065_v35 = vmul.f32 %v5538_v39, %v4064_v44 }
0x14a6   :  { %5043 = vmatmul.msk.f32.gmra.mxu0 %vm79_vm0, %v7562_v10 }
0x14a7   :  { %v4069_v62 = vsel %vm4068_vm10, %v5538_v39, %v4065_v35 }
0x14a8   :  { %v4113_v18 = vmul.f32 %v4069_v62, %v7506_v63  ;;  %v4218_v63 = vld [vmem:[#allocation5 + $0x270] sm:$0xff] }
0x14a9   :  { %4261 = vmatpush.msra.mxu1 %v4218_v63 }
0x14aa   :  { %v4122_v7 = vmul.f32 %v7537_v46, %v4113_v18 }
0x14ab   :  { %4262 = vmatpush.msra.mxu1 %v4217_v28 }
0x14ac   :  { %v7569_v60 = vadd.f32 %v7541_v16, %v4122_v7 }
0x14ad   :  { %4263 = vmatpush.msra.mxu1 %v4216_v48 }
0x14ae   :  { %5044 = vmatmul.msk.f32.gmra.mxu0 %vm79_vm0, %v7569_v60 }
0x14af   :  { %4264 = vmatpush.msra.mxu1 %v4215_v50 }
0x14ec   :  { %v4004_v57 = vpop.xlane.xlu2 %4003 }
0x14ed   :  { %v4018_v24 = vmul.f32 %v4004_v57, %v6245_v30 }
0x14ef   :  { %v4026_v3 = vadd.f32 1e-05, %v4018_v24 }
0x14f1   :  { %5539 = vrsqrt.f32 %v4026_v3  ;;  %vm4076_vm12 = vweird.f32 %v4026_v3 }
0x14f4   :  { %v4007_v36 = vpop.xlane.xlu0 %4006 }
0x14f5   :  { %v4019_v8 = vmul.f32 %v4007_v36, %v6245_v30 }
0x14f7   :  { %v5540_v49 = vpop.eup %5539  ;;  %v4027_v33 = vadd.f32 1e-05, %v4019_v8 }
0x14f8   :  { %v4071_v38 = vmul.f32 %v5540_v49, %v4026_v3  ;;  %vm4077_vm11 = vweird.f32 %v5540_v49 }
0x14f9   :  { %5541 = vrsqrt.f32 %v4027_v33  ;;  %vm4078_vm13 = vmor %vm4076_vm12, %vm4077_vm11  ;;  %vm4086_vm15 = vweird.f32 %v4027_v33 }
0x14fa   :  { %v4072_v12 = vmul.f32 %v5540_v49, %v4071_v38 }
0x14fc   :  { %v4073_v27 = vmul.f32 0.5, %v4072_v12  ;;  %v4010_v61 = vpop.xlane.xlu1 %4009 }
0x14fd   :  { %v4020_v41 = vmul.f32 %v4010_v61, %v6245_v30 }
0x14fe   :  { %v4074_v34 = vsub.f32 1.5, %v4073_v27 }
0x14ff   :  { %v5542_v15 = vpop.eup %5541  ;;  %v4028_v11 = vadd.f32 1e-05, %v4020_v41 }
0x1500   :  { %v4075_v29 = vmul.f32 %v5540_v49, %v4074_v34  ;;  %v4081_v13 = vmul.f32 %v5542_v15, %v4027_v33  ;;  %vm4087_vm14 = vweird.f32 %v5542_v15 }
0x1501   :  { %5543 = vrsqrt.f32 %v4028_v11  ;;  %vm4088_vm1 = vmor %vm4086_vm15, %vm4087_vm14  ;;  %vm4096_vm3 = vweird.f32 %v4028_v11 }
0x1502   :  { %v4079_v26 = vsel %vm4078_vm13, %v5540_v49, %v4075_v29  ;;  %v4082_v43 = vmul.f32 %v5542_v15, %v4081_v13 }
0x1503   :  { %v4114_v37 = vmul.f32 %v4079_v26, %v7514_v9 }
0x1504   :  { %v4083_v31 = vmul.f32 0.5, %v4082_v43  ;;  %v4013_v25 = vpop.xlane.xlu2 %4012 }
0x1505   :  { %v4021_v2 = vmul.f32 %v4013_v25, %v6245_v30  ;;  %v4123_v4 = vmul.f32 %v7537_v46, %v4114_v37 }
0x1506   :  { %v4084_v21 = vsub.f32 1.5, %v4083_v31 }
0x1507   :  { %v5544_v56 = vpop.eup %5543  ;;  %v4029_v1 = vadd.f32 1e-05, %v4021_v2  ;;  %v7580_v42 = vadd.f32 %v7541_v16, %v4123_v4  ;;  %v5330_v4 = vld [vmem:[#allocation5 + $0x298] ss:$0 sm:$0xff] }
0x1508   :  { %v4085_v20 = vmul.f32 %v5542_v15, %v4084_v21  ;;  %v4091_v45 = vmul.f32 %v5544_v56, %v4028_v11  ;;  %vm4097_vm2 = vweird.f32 %v5544_v56 }
0x1509   :  { %5545 = vrsqrt.f32 %v4029_v1  ;;  %5045 = vmatmul.msk.f32.gmra.mxu0 %vm79_vm0, %v7580_v42  ;;  %vm4098_vm4 = vmor %vm4096_vm3, %vm4097_vm2  ;;  %vm4106_vm6 = vweird.f32 %v4029_v1 }
0x150a   :  { %v4089_v9 = vsel %vm4088_vm1, %v5542_v15, %v4085_v20  ;;  %v4092_v51 = vmul.f32 %v5544_v56, %v4091_v45 }
0x150b   :  { %v4115_v19 = vmul.f32 %v4089_v9, %v7521_v54 }
0x150c   :  { %v4093_v39 = vmul.f32 0.5, %v4092_v51 }
0x150d   :  { %v4124_v55 = vmul.f32 %v7537_v46, %v4115_v19 }
0x150e   :  { %v4094_v40 = vsub.f32 1.5, %v4093_v39 }
0x150f   :  { %v5546_v59 = vpop.eup %5545  ;;  %v7587_v53 = vadd.f32 %v7541_v16, %v4124_v55 }
0x1510   :  { %v4095_v32 = vmul.f32 %v5544_v56, %v4094_v40  ;;  %v4101_v47 = vmul.f32 %v5546_v59, %v4029_v1  ;;  %vm4107_vm5 = vweird.f32 %v5546_v59 }
0x1511   :  { %5046 = vmatmul.msk.f32.gmra.mxu0 %vm79_vm0, %v7587_v53  ;;  %vm4108_vm7 = vmor %vm4106_vm6, %vm4107_vm5 }
0x1512   :  { %v4099_v44 = vsel %vm4098_vm4, %v5544_v56, %v4095_v32  ;;  %v4102_v35 = vmul.f32 %v5546_v59, %v4101_v47 }
0x1513   :  { %v4116_v54 = vmul.f32 %v4099_v44, %v7528_v58  ;;  %v4183_v62 = vpop.f32.mrf.mxu0 }
0x1514   :  { %v4103_v18 = vmul.f32 0.5, %v4102_v35  ;;  %v4184_v7 = vadd.f32 %v5329_v5, %v4183_v62 }
0x1515   :  { %v4125_v22 = vmul.f32 %v7537_v46, %v4116_v54 }
0x1516   :  { %v4104_v57 = vsub.f32 1.5, %v4103_v18  ;;  %v4207_v0 = vmax.f32 %v4184_v7, 0.0 }
0x1517   :  { %v4134_v24 = vadd.f32 %v7541_v16, %v4125_v22 }
0x1518   :  { %v4105_v14 = vmul.f32 %v5546_v59, %v4104_v57  ;;  %5049 = vmatmul.msk.f32.vlgmr.msra.gmra.mxu1 %vm2085_vm8, %v4207_v0 }
0x1519   :  { %5047 = vmatmul.msk.f32.gmra.mxu0 %vm79_vm0, %v4134_v24 }
0x151a   :  { %v4109_v3 = vsel %vm4108_vm7, %v5546_v59, %v4105_v14 }
0x151b   :  { %v4117_v58 = vmul.f32 %v4109_v3, %v7535_v17  ;;  %v4186_v6 = vpop.f32.mrf.mxu0 }
0x151c   :  { %v4187_v63 = vadd.f32 %v5329_v5, %v4186_v6 }
0x151d   :  { %v4126_v36 = vmul.f32 %v7537_v46, %v4117_v58 }
0x151e   :  { %v4208_v28 = vmax.f32 %v4187_v63, 0.0 }
0x151f   :  { %v4135_v8 = vadd.f32 %v7541_v16, %v4126_v36 }
0x1520   :  { %5050 = vmatmul.msk.f32.gmra.mxu1 %vm2085_vm8, %v4208_v28 }
0x1521   :  { %5048 = vmatmul.msk.f32.gmra.mxu0 %vm79_vm0, %v4135_v8 }
0x1523   :  { %v4189_v48 = vpop.f32.mrf.mxu0 }
0x1524   :  { %v4190_v49 = vadd.f32 %v5329_v5, %v4189_v48 }
0x1526   :  { %v4209_v33 = vmax.f32 %v4190_v49, 0.0 }
0x1528   :  { %5051 = vmatmul.msk.f32.gmra.mxu1 %vm2085_vm8, %v4209_v33 }
0x152b   :  { %v4192_v38 = vpop.f32.mrf.mxu0 }
0x152c   :  { %v4193_v50 = vadd.f32 %v5329_v5, %v4192_v38 }
0x152e   :  { %v4210_v12 = vmax.f32 %v4193_v50, 0.0 }
0x1530   :  { %5052 = vmatmul.msk.f32.gmra.mxu1 %vm2085_vm8, %v4210_v12 }
0x1586   :  { %v4195_v17 = vpop.f32.mrf.mxu0 }
0x1587   :  { %v4196_v27 = vadd.f32 %v5329_v5, %v4195_v17 }
0x1589   :  { %v4211_v46 = vmax.f32 %v4196_v27, 0.0 }
0x158b   :  { %5053 = vmatmul.msk.f32.gmra.mxu1 %vm2085_vm8, %v4211_v46 }
0x158e   :  { %v4198_v16 = vpop.f32.mrf.mxu0 }
0x158f   :  { %v4199_v61 = vadd.f32 %v5329_v5, %v4198_v16 }
0x1591   :  { %v4212_v41 = vmax.f32 %v4199_v61, 0.0 }
0x1593   :  { %5054 = vmatmul.msk.f32.gmra.mxu1 %vm2085_vm8, %v4212_v41 }
0x1595   :  { %v4266_v43 = vpop.f32.mrf.mxu1 }
0x1596   :  { %v4201_v34 = vpop.f32.mrf.mxu0  ;;  %v4267_v44 = vadd.f32 %v5330_v4, %v4266_v43 }
0x1597   :  { %v4202_v15 = vadd.f32 %v5329_v5, %v4201_v34 }
0x1598   :  { %v4290_v62 = vadd.f32 %v4267_v44, %v7548_v23 }
0x1599   :  { %v4213_v11 = vmax.f32 %v4202_v15, 0.0 }
0x159a   :  { %v4300_v57 = vsel %vm79_vm0, %v4290_v62, 0.0 }
0x159b   :  { %5055 = vmatmul.msk.f32.gmra.mxu1 %vm2085_vm8, %v4213_v11 }
0x159d   :  { %v4269_v37 = vpop.f32.mrf.mxu1 }
0x159e   :  { %v4204_v29 = vpop.f32.mrf.mxu0  ;;  %v4270_v7 = vadd.f32 %v5330_v4, %v4269_v37 }
0x159f   :  { %v4205_v13 = vadd.f32 %v5329_v5, %v4204_v29 }
0x15a1   :  { %v4214_v26 = vmax.f32 %v4205_v13, 0.0 }
0x15a3   :  { %5056 = vmatmul.msk.f32.gmra.mxu1 %vm2085_vm8, %v4214_v26 }
0x15a5   :  { %v4272_v31 = vpop.f32.mrf.mxu1 }
0x15a6   :  { %v4273_v20 = vadd.f32 %v5330_v4, %v4272_v31 }
0x15a8   :  { %v4292_v51 = vadd.f32 %v4273_v20, %v7562_v10 }
0x15aa   :  { %v4306_v40 = vsel %vm79_vm0, %v4292_v51, 0.0 }
0x15ad   :  { %v4275_v25 = vpop.f32.mrf.mxu1 }
0x15ae   :  { %v4276_v55 = vadd.f32 %v5330_v4, %v4275_v25 }
0x15b0   :  { %v4293_v47 = vadd.f32 %v4276_v55, %v7569_v60  ;;  %v4291_v60 = vadd.f32 %v4270_v7, %v7555_v52 }
0x15b2   :  { %v4309_v10 = vsel %vm79_vm0, %v4293_v47, 0.0  ;;  %v4303_v0 = vsel %vm79_vm0, %v4291_v60, 0.0 }
0x1608   :  { %v4278_v2 = vpop.f32.mrf.mxu1 }
0x1609   :  { %v4279_v35 = vadd.f32 %v5330_v4, %v4278_v2 }
0x160b   :  { %v4294_v18 = vadd.f32 %v4279_v35, %v7580_v42  ;;  %v4497_v35 = vld [vmem:[#allocation5 + $0x2e8] sm:$0xff] }
0x160c   :  { %4536 = vmatpush.msrb.mxu2 %v4497_v35 }
0x160d   :  { %v4312_v22 = vsel %vm79_vm0, %v4294_v18, 0.0 }
0x1610   :  { %v4281_v21 = vpop.f32.mrf.mxu1 }
0x1611   :  { %v4282_v56 = vadd.f32 %v5330_v4, %v4281_v21 }
0x1613   :  { %v4295_v1 = vadd.f32 %v4282_v56, %v7587_v53 }
0x1615   :  { %v4315_v45 = vsel %vm79_vm0, %v4295_v1, 0.0 }
0x1616   :  { %4316 = vadd.xlane.f32.xlu2 %v4315_v45  ;;  %v5685_v45 = vmov 0.0  }
0x1617   :  { %4745 = vst.msk [vmem:[%s7866_s2 + $0x8] sm:$0xff] %vm4743_vm9, %v5685_v45 }
0x1618   :  { %v4284_v9 = vpop.f32.mrf.mxu1  ;;  %4744 = vst.msk [vmem:[%s7866_s2] sm:$0xff] %vm4743_vm9, %v5685_v45 }
0x1619   :  { %v4285_v19 = vadd.f32 %v5330_v4, %v4284_v9  ;;  %4746 = vst.msk [vmem:[%s7866_s2 + $0x10] sm:$0xff] %vm4743_vm9, %v5685_v45 }
0x161a   :  { %4747 = vst.msk [vmem:[%s7866_s2 + $0x18] sm:$0xff] %vm4743_vm9, %v5685_v45 }
0x161b   :  { %v4296_v39 = vadd.f32 %v4285_v19, %v4134_v24  ;;  %4748 = vst.msk [vmem:[%s7866_s2 + $0x20] sm:$0xff] %vm4743_vm9, %v5685_v45 }
0x161c   :  { %4749 = vst.msk [vmem:[%s7866_s2 + $0x28] sm:$0xff] %vm4743_vm9, %v5685_v45 }
0x161d   :  { %v4318_v59 = vsel %vm79_vm0, %v4296_v39, 0.0  ;;  %4750 = vst.msk [vmem:[%s7866_s2 + $0x30] sm:$0xff] %vm4743_vm9, %v5685_v45 }
0x161e   :  { %4307 = vadd.xlane.f32.xlu2 %v4306_v40  ;;  %4319 = vadd.xlane.f32.xlu1 %v4318_v59  ;;  %4751 = vst.msk [vmem:[%s7866_s2 + $0x38] sm:$0xff] %vm4743_vm9, %v5685_v45 }
0x1620   :  { %v4287_v32 = vpop.f32.mrf.mxu1 }
0x1621   :  { %v4288_v53 = vadd.f32 %v5330_v4, %v4287_v32 }
0x1623   :  { %v4297_v5 = vadd.f32 %v4288_v53, %v4135_v8 }
0x1625   :  { %v4321_v54 = vsel %vm79_vm0, %v4297_v5, 0.0 }
0x1626   :  { %4322 = vadd.xlane.f32.xlu0 %v4321_v54  ;;  %4310 = vadd.xlane.f32.xlu1 %v4309_v10 }
0x162e   :  { %4313 = vadd.xlane.f32.xlu0 %v4312_v22  ;;  %4301 = vadd.xlane.f32.xlu1 %v4300_v57  ;;  %v4496_v22 = vld [vmem:[#allocation5 + $0x2e0] sm:$0xff] }
0x162f   :  { %4537 = vmatpush.msrb.mxu2 %v4496_v22 }
0x1636   :  { %4304 = vadd.xlane.f32.xlu0 %v4303_v0 }
0x1689   :  { %v4317_v24 = vpop.xlane.xlu2 %4316 }
0x168a   :  { %v4329_v14 = vmul.f32 %v4317_v24, %v6245_v30 }
0x168c   :  { %v7622_v3 = vsub.f32 %v4295_v1, %v4329_v14  ;;  %v4495_v14 = vld [vmem:[#allocation5 + $0x2d8] sm:$0xff] }
0x168d   :  { %4538 = vmatpush.msrb.mxu2 %v4495_v14 }
0x168e   :  { %v4345_v23 = vmul.f32 %v7622_v3, %v7622_v3 }
0x1690   :  { %v4363_v42 = vsel %vm79_vm0, %v4345_v23, 0.0 }
0x1691   :  { %v4308_v58 = vpop.xlane.xlu2 %4307  ;;  %4364 = vadd.xlane.f32.xlu1 %v4363_v42  ;;  %v4320_v6 = vpop.xlane.xlu1 %4319 }
0x1692   :  { %v4326_v63 = vmul.f32 %v4308_v58, %v6245_v30  ;;  %v4330_v52 = vmul.f32 %v4320_v6, %v6245_v30 }
0x1694   :  { %v7629_v36 = vsub.f32 %v4292_v51, %v4326_v63  ;;  %v7631_v28 = vsub.f32 %v4296_v39, %v4330_v52  ;;  %v7707_v63 = vld [vmem:[#allocation5 + $0x2c0] ss:$0 sm:$0xff]  ;;  %v4494_v52 = vld [vmem:[#allocation5 + $0x2d0] sm:$0xff] }
0x1695   :  { %4539 = vmatpush.msrb.mxu2 %v4494_v52 }
0x1696   :  { %v4342_v8 = vmul.f32 %v7629_v36, %v7629_v36  ;;  %v4346_v48 = vmul.f32 %v7631_v28, %v7631_v28 }
0x1698   :  { %v4354_v49 = vsel %vm79_vm0, %v4342_v8, 0.0  ;;  %v4366_v33 = vsel %vm79_vm0, %v4346_v48, 0.0 }
0x1699   :  { %v4323_v38 = vpop.xlane.xlu0 %4322  ;;  %4355 = vadd.xlane.f32.xlu1 %v4354_v49  ;;  %4367 = vadd.xlane.f32.xlu0 %v4366_v33  ;;  %v4311_v50 = vpop.xlane.xlu1 %4310  ;;  %v7710_v33 = vld [vmem:[#allocation5 + $0x2c8] ss:$0 sm:$0xff] }
0x169a   :  { %v4331_v12 = vmul.f32 %v4323_v38, %v6245_v30  ;;  %v4327_v17 = vmul.f32 %v4311_v50, %v6245_v30 }
0x169c   :  { %v7641_v27 = vsub.f32 %v4297_v5, %v4331_v12  ;;  %v7643_v46 = vsub.f32 %v4293_v47, %v4327_v17 }
0x169e   :  { %v4347_v16 = vmul.f32 %v7641_v27, %v7641_v27  ;;  %v4343_v61 = vmul.f32 %v7643_v46, %v7643_v46 }
0x16a0   :  { %v4369_v41 = vsel %vm79_vm0, %v4347_v16, 0.0  ;;  %v4357_v34 = vsel %vm79_vm0, %v4343_v61, 0.0 }
0x16a1   :  { %4370 = vadd.xlane.f32.xlu2 %v4369_v41  ;;  %v4314_v15 = vpop.xlane.xlu0 %4313  ;;  %4358 = vadd.xlane.f32.xlu0 %v4357_v34  ;;  %v4302_v11 = vpop.xlane.xlu1 %4301 }
0x16a2   :  { %v4328_v29 = vmul.f32 %v4314_v15, %v6245_v30  ;;  %v4324_v13 = vmul.f32 %v4302_v11, %v6245_v30 }
0x16a4   :  { %v7653_v26 = vsub.f32 %v4294_v18, %v4328_v29  ;;  %v7655_v43 = vsub.f32 %v4290_v62, %v4324_v13 }
0x16a6   :  { %v4344_v37 = vmul.f32 %v7653_v26, %v7653_v26  ;;  %v4340_v31 = vmul.f32 %v7655_v43, %v7655_v43 }
0x16a8   :  { %v4360_v25 = vsel %vm79_vm0, %v4344_v37, 0.0  ;;  %v4348_v2 = vsel %vm79_vm0, %v4340_v31, 0.0 }
0x16a9   :  { %4361 = vadd.xlane.f32.xlu2 %v4360_v25  ;;  %v4305_v4 = vpop.xlane.xlu0 %4304  ;;  %4349 = vadd.xlane.f32.xlu0 %v4348_v2 }
0x16aa   :  { %v4325_v21 = vmul.f32 %v4305_v4, %v6245_v30 }
0x16ac   :  { %v7664_v56 = vsub.f32 %v4291_v60, %v4325_v21 }
0x16ae   :  { %v4341_v1 = vmul.f32 %v7664_v56, %v7664_v56 }
0x16b0   :  { %v4351_v20 = vsel %vm79_vm0, %v4341_v1, 0.0 }
0x16b1   :  { %4352 = vadd.xlane.f32.xlu2 %v4351_v20 }
0x1704   :  { %v4365_v9 = vpop.xlane.xlu1 %4364 }
0x1705   :  { %v4377_v51 = vmul.f32 %v4365_v9, %v6245_v30 }
0x1707   :  { %v4385_v19 = vadd.f32 1e-05, %v4377_v51 }
0x1709   :  { %5547 = vrsqrt.f32 %v4385_v19  ;;  %vm4444_vm11 = vweird.f32 %v4385_v19 }
0x170c   :  { %v4368_v39 = vpop.xlane.xlu0 %4367  ;;  %v4356_v55 = vpop.xlane.xlu1 %4355 }
0x170d   :  { %v4378_v40 = vmul.f32 %v4368_v39, %v6245_v30  ;;  %v4374_v59 = vmul.f32 %v4356_v55, %v6245_v30 }
0x170f   :  { %v5548_v32 = vpop.eup %5547  ;;  %v4386_v47 = vadd.f32 1e-05, %v4378_v40  ;;  %v7696_v53 = vadd.f32 1e-05, %v4374_v59 }
0x1710   :  { %v4439_v5 = vmul.f32 %v5548_v32, %v4385_v19  ;;  %vm4445_vm10 = vweird.f32 %v5548_v32 }
0x1711   :  { %5549 = vrsqrt.f32 %v4386_v47  ;;  %vm4446_vm12 = vmor %vm4444_vm11, %vm4445_vm10  ;;  %vm4454_vm15 = vweird.f32 %v4386_v47  ;;  %vm4414_vm2 = vweird.f32 %v7696_v53 }
0x1712   :  { %v4440_v44 = vmul.f32 %v5548_v32, %v4439_v5  ;;  %5551 = vrsqrt.f32 %v7696_v53 }
0x1714   :  { %v4441_v54 = vmul.f32 0.5, %v4440_v44  ;;  %v4371_v10 = vpop.xlane.xlu2 %4370  ;;  %v4359_v62 = vpop.xlane.xlu0 %4358 }
0x1715   :  { %v4379_v18 = vmul.f32 %v4371_v10, %v6245_v30  ;;  %v4375_v7 = vmul.f32 %v4359_v62, %v6245_v30 }
0x1716   :  { %v4442_v57 = vsub.f32 1.5, %v4441_v54 }
0x1717   :  { %v5550_v60 = vpop.eup %5549  ;;  %v7701_v0 = vadd.f32 1e-05, %v4379_v18  ;;  %v7703_v24 = vadd.f32 1e-05, %v4375_v7 }
0x1718   :  { %v5552_v23 = vpop.eup %5551  ;;  %v4443_v42 = vmul.f32 %v5548_v32, %v4442_v57  ;;  %v4449_v58 = vmul.f32 %v5550_v60, %v4386_v47  ;;  %vm4455_vm13 = vweird.f32 %v5550_v60 }
0x1719   :  { %v4409_v6 = vmul.f32 %v5552_v23, %v7696_v53  ;;  %5553 = vrsqrt.f32 %v7701_v0  ;;  %vm4415_vm14 = vweird.f32 %v5552_v23  ;;  %vm4456_vm1 = vmor %vm4454_vm15, %vm4455_vm13  ;;  %vm4464_vm6 = vweird.f32 %v7701_v0 }
0x171a   :  { %v4447_v8 = vsel %vm4446_vm12, %v5548_v32, %v4443_v42  ;;  %v4450_v48 = vmul.f32 %v5550_v60, %v4449_v58  ;;  %5555 = vrsqrt.f32 %v7703_v24  ;;  %vm4416_vm3 = vmor %vm4414_vm2, %vm4415_vm14  ;;  %vm4424_vm9 = vweird.f32 %v7703_v24 }
0x171b   :  { %v4410_v49 = vmul.f32 %v5552_v23, %v4409_v6  ;;  %v4473_v38 = vmul.f32 %v4447_v8, %v7622_v3 }
0x171c   :  { %v4451_v50 = vmul.f32 0.5, %v4450_v48  ;;  %v4362_v12 = vpop.xlane.xlu2 %4361  ;;  %v4350_v17 = vpop.xlane.xlu0 %4349 }
0x171d   :  { %v4411_v16 = vmul.f32 0.5, %v4410_v49  ;;  %v4376_v61 = vmul.f32 %v4362_v12, %v6245_v30  ;;  %v4372_v41 = vmul.f32 %v4350_v17, %v6245_v30  ;;  %v4482_v34 = vmul.f32 %v7707_v63, %v4473_v38 }
0x171e   :  { %v4452_v15 = vsub.f32 1.5, %v4451_v50 }
0x171f   :  { %v5554_v11 = vpop.eup %5553  ;;  %v4412_v29 = vsub.f32 1.5, %v4411_v16  ;;  %v7716_v13 = vadd.f32 1e-05, %v4376_v61  ;;  %v7718_v37 = vadd.f32 1e-05, %v4372_v41  ;;  %v7721_v3 = vadd.f32 %v7710_v33, %v4482_v34 }
0x1720   :  { %v5556_v31 = vpop.eup %5555  ;;  %v4453_v25 = vmul.f32 %v5550_v60, %v4452_v15  ;;  %v4459_v2 = vmul.f32 %v5554_v11, %v7701_v0  ;;  %vm4465_vm4 = vweird.f32 %v5554_v11 }
0x1721   :  { %v4413_v4 = vmul.f32 %v5552_v23, %v4412_v29  ;;  %v4419_v21 = vmul.f32 %v5556_v31, %v7703_v24  ;;  %5557 = vrsqrt.f32 %v7716_v13  ;;  %4757 = vst.msk [vmem:[%s7866_s2 + $0x28] sm:$0xff] %vm79_vm0, %v7721_v3  ;;  %vm4425_vm5 = vweird.f32 %v5556_v31  ;;  %vm4466_vm7 = vmor %vm4464_vm6, %vm4465_vm4 }
0x1722   :  { %v4457_v1 = vsel %vm4456_vm1, %v5550_v60, %v4453_v25  ;;  %v4460_v20 = vmul.f32 %v5554_v11, %v4459_v2  ;;  %5559 = vrsqrt.f32 %v7718_v37  ;;  %vm4426_vm10 = vmor %vm4424_vm9, %vm4425_vm5  ;;  %vm4434_vm13 = vweird.f32 %v7716_v13  ;;  %v4643_v2 = vld [vmem:[#allocation5 + $0x428] sm:$0xff] }
0x1723   :  { %v4417_v45 = vsel %vm4416_vm3, %v5552_v23, %v4413_v4  ;;  %v4420_v9 = vmul.f32 %v5556_v31, %v4419_v21  ;;  %v4474_v51 = vmul.f32 %v4457_v1, %v7631_v28  ;;  %vm4394_vm15 = vweird.f32 %v7718_v37  ;;  %v4573_v4 = vld [vmem:[#allocation5 + $0x2f8] sm:$0xff]  ;;  %v4667_v1 = vld [vmem:[#allocation5 + $0x310] sm:$0xff] }
0x1724   :  { %v4461_v19 = vmul.f32 0.5, %v4460_v20  ;;  %v4353_v39 = vpop.xlane.xlu2 %4352  ;;  %v4470_v55 = vmul.f32 %v4417_v45, %v7629_v36  ;;  %v4668_v21 = vld [vmem:[#allocation5 + $0x318] sm:$0xff]  ;;  %v5333_v20 = vld [vmem:[#allocation5 + $0x2f0] ss:$0 sm:$0xff]  ;;  %vm4792_vm5 = vcmask 294144  }
0x1725   :  { %v4421_v40 = vmul.f32 0.5, %v4420_v9  ;;  %v4373_v59 = vmul.f32 %v4353_v39, %v6245_v30  ;;  %v4483_v32 = vmul.f32 %v7707_v63, %v4474_v51 }
0x1726   :  { %v4462_v47 = vsub.f32 1.5, %v4461_v19  ;;  %v4479_v53 = vmul.f32 %v7707_v63, %v4470_v55 }
0x1727   :  { %v5558_v5 = vpop.eup %5557  ;;  %v4422_v44 = vsub.f32 1.5, %v4421_v40  ;;  %v4381_v35 = vadd.f32 1e-05, %v4373_v59  ;;  %v7740_v54 = vadd.f32 %v7710_v33, %v4483_v32 }
0x1728   :  { %v5560_v28 = vpop.eup %5559  ;;  %v4463_v10 = vmul.f32 %v5554_v11, %v4462_v47  ;;  %v4429_v36 = vmul.f32 %v5558_v5, %v7716_v13  ;;  %v7745_v30 = vadd.f32 %v7710_v33, %v4479_v53  ;;  %vm4435_vm11 = vweird.f32 %v5558_v5 }
0x1729   :  { %v4423_v62 = vmul.f32 %v5556_v31, %v4422_v44  ;;  %v4389_v18 = vmul.f32 %v5560_v28, %v7718_v37  ;;  %5561 = vrsqrt.f32 %v4381_v35  ;;  %4758 = vst.msk [vmem:[%s7866_s2 + $0x30] sm:$0xff] %vm79_vm0, %v7740_v54  ;;  %vm4395_vm12 = vweird.f32 %v5560_v28  ;;  %vm4436_vm14 = vmor %vm4434_vm13, %vm4435_vm11  ;;  %v4697_v44 = vld [vmem:[#allocation5 + $0x338] sm:$0xff] }
0x172a   :  { %v4467_v7 = vsel %vm4466_vm7, %v5554_v11, %v4463_v10  ;;  %v4430_v22 = vmul.f32 %v5558_v5, %v4429_v36  ;;  %4754 = vst.msk [vmem:[%s7866_s2 + $0x10] sm:$0xff] %vm79_vm0, %v7745_v30  ;;  %vm4396_vm1 = vmor %vm4394_vm15, %vm4395_vm12  ;;  %vm4404_vm3 = vweird.f32 %v4381_v35  ;;  %4719 = vmatpush.msrb.mxu1 %v4697_v44  ;;  %vm4805_vm11 = vcmask 302368  }
0x172b   :  { %v4475_v57 = vmul.f32 %v4467_v7, %v7641_v27  ;;  %v4427_v60 = vsel %vm4426_vm10, %v5556_v31, %v4423_v62  ;;  %v4390_v0 = vmul.f32 %v5560_v28, %v4389_v18 }
0x172c   :  { %v4431_v24 = vmul.f32 0.5, %v4430_v22  ;;  %v4471_v14 = vmul.f32 %v4427_v60, %v7643_v46 }
0x172d   :  { %v4391_v23 = vmul.f32 0.5, %v4390_v0  ;;  %v4484_v42 = vmul.f32 %v7707_v63, %v4475_v57  ;;  %v5335_v0 = vld [vmem:[#allocation5 + $0x330] ss:$0 sm:$0xff] }
0x172e   :  { %v4432_v58 = vsub.f32 1.5, %v4431_v24  ;;  %v4480_v6 = vmul.f32 %v7707_v63, %v4471_v14 }
0x172f   :  { %v5562_v52 = vpop.eup %5561  ;;  %v4392_v8 = vsub.f32 1.5, %v4391_v23  ;;  %v4493_v48 = vadd.f32 %v7710_v33, %v4484_v42  ;;  %v5334_v23 = vld [vmem:[#allocation5 + $0x308] ss:$0 sm:$0xff] }
0x1730   :  { %v4433_v49 = vmul.f32 %v5558_v5, %v4432_v58  ;;  %v4399_v27 = vmul.f32 %v5562_v52, %v4381_v35  ;;  %v4489_v38 = vadd.f32 %v7710_v33, %v4480_v6  ;;  %vm4405_vm2 = vweird.f32 %v5562_v52 }
0x1731   :  { %v4393_v46 = vmul.f32 %v5560_v28, %v4392_v8  ;;  %4655 = vmatpush.msra.mxu0 %v4493_v48  ;;  %4759 = vst.msk [vmem:[%s7866_s2 + $0x38] sm:$0xff] %vm79_vm0, %v4493_v48  ;;  %vm4406_vm4 = vmor %vm4404_vm3, %vm4405_vm2 }
0x1732   :  { %v4437_v50 = vsel %vm4436_vm14, %v5558_v5, %v4433_v49  ;;  %v4400_v12 = vmul.f32 %v5562_v52, %v4399_v27  ;;  %4755 = vst.msk [vmem:[%s7866_s2 + $0x18] sm:$0xff] %vm79_vm0, %v4489_v38 }
0x1733   :  { %v4397_v17 = vsel %vm4396_vm1, %v5560_v28, %v4393_v46  ;;  %4656 = vmatpush.msra.mxu0 %v7740_v54  ;;  %v4472_v16 = vmul.f32 %v4437_v50, %v7653_v26 }
0x1734   :  { %v4468_v61 = vmul.f32 %v4397_v17, %v7655_v43  ;;  %v4401_v41 = vmul.f32 0.5, %v4400_v12 }
0x1735   :  { %4657 = vmatpush.msra.mxu0 %v7721_v3  ;;  %v4481_v34 = vmul.f32 %v7707_v63, %v4472_v16 }
0x1736   :  { %v4477_v15 = vmul.f32 %v7707_v63, %v4468_v61  ;;  %v4402_v11 = vsub.f32 1.5, %v4401_v41 }
0x1737   :  { %v4490_v29 = vadd.f32 %v7710_v33, %v4481_v34 }
0x1738   :  { %v4486_v13 = vadd.f32 %v7710_v33, %v4477_v15  ;;  %v4403_v37 = vmul.f32 %v5562_v52, %v4402_v11 }
0x1739   :  { %4658 = vmatpush.msra.mxu0 %v4490_v29  ;;  %4756 = vst.msk [vmem:[%s7866_s2 + $0x20] sm:$0xff] %vm79_vm0, %v4490_v29 }
0x173a   :  { %v4407_v26 = vsel %vm4406_vm4, %v5562_v52, %v4403_v37  ;;  %5057 = vmatmul.msk.f32.vlgmr.msrb.gmra.mxu2 %vm79_vm0, %v4486_v13  ;;  %4752 = vst.msk [vmem:[%s7866_s2] sm:$0xff] %vm79_vm0, %v4486_v13 }
0x173b   :  { %v4469_v43 = vmul.f32 %v4407_v26, %v7664_v56  ;;  %4659 = vmatpush.msra.mxu0 %v4489_v38  ;;  %v4670_v56 = vld [vmem:[#allocation5 + $0x328] sm:$0xff] }
0x173d   :  { %4660 = vmatpush.msra.mxu0 %v7745_v30  ;;  %v4478_v31 = vmul.f32 %v7707_v63, %v4469_v43  ;;  %v4669_v63 = vld [vmem:[#allocation5 + $0x320] sm:$0xff] }
0x173f   :  { %v4487_v25 = vadd.f32 %v7710_v33, %v4478_v31  ;;  %v4574_v33 = vld [vmem:[#allocation5 + $0x300] sm:$0xff] }
0x1740   :  { %4616 = vmatpush.msra.mxu3 %v4574_v33 }
0x1741   :  { %4661 = vmatpush.msra.mxu0 %v4487_v25  ;;  %4753 = vst.msk [vmem:[%s7866_s2 + $0x8] sm:$0xff] %vm79_vm0, %v4487_v25 }
0x1742   :  { %5058 = vmatmul.msk.f32.gmra.mxu2 %vm79_vm0, %v4487_v25  ;;  %4617 = vmatpush.msra.mxu3 %v4573_v4 }
0x1743   :  { %4662 = vmatpush.msra.mxu0 %v4486_v13 }
0x1744   :  { %5073 = vmatmul.msk.f32.vlgmr.msra.gmra.mxu0 %vm2085_vm8, %v4643_v2  ;;  %vm4577_vm8 = vcmask 130048  }
0x1745   :  { %4688 = vmatpush.msrb.mxu0 %v4670_v56 }
0x1747   :  { %4689 = vmatpush.msrb.mxu0 %v4669_v63 }
0x1749   :  { %4690 = vmatpush.msrb.mxu0 %v4668_v21 }
0x174a   :  { %5059 = vmatmul.msk.f32.gmra.mxu2 %vm79_vm0, %v7745_v30 }
0x174b   :  { %4691 = vmatpush.msrb.mxu0 %v4667_v1 }
0x1752   :  { %5060 = vmatmul.msk.f32.gmra.mxu2 %vm79_vm0, %v4489_v38 }
0x175a   :  { %5061 = vmatmul.msk.f32.gmra.mxu2 %vm79_vm0, %v4490_v29  ;;  %v5336_v29 = vld [vmem:[#allocation5 + $0x340] ss:$0 sm:$0xff] }
0x1762   :  { %5062 = vmatmul.msk.f32.gmra.mxu2 %vm79_vm0, %v7721_v3 }
0x176a   :  { %5063 = vmatmul.msk.f32.gmra.mxu2 %vm79_vm0, %v7740_v54 }
0x1772   :  { %5064 = vmatmul.msk.f32.gmra.mxu2 %vm79_vm0, %v4493_v48 }
0x17bd   :  { %v4541_v45 = vpop.f32.mrf.mxu2 }
0x17be   :  { %v4542_v3 = vadd.f32 %v5333_v20, %v4541_v45 }
0x17c0   :  { %v4565_v9 = vmax.f32 %v4542_v3, 0.0 }
0x17c1   :  { %v4664_v51 = vpop.f32.mrf.mxu0 }
0x17c2   :  { %5065 = vmatmul.msk.f32.vlgmr.msra.gmra.mxu3 %vm4577_vm8, %v4565_v9  ;;  %5074 = vmatmul.msk.f32.vlgmr.msrb.gmra.mxu0 %vm79_vm0, %v4664_v51  ;;  %vm4700_vm0 = vcmask 64512  }
0x17c5   :  { %v4544_v19 = vpop.f32.mrf.mxu2 }
0x17c6   :  { %v4545_v39 = vadd.f32 %v5333_v20, %v4544_v19 }
0x17c8   :  { %v4566_v55 = vmax.f32 %v4545_v39, 0.0 }
0x17ca   :  { %5066 = vmatmul.msk.f32.gmra.mxu3 %vm4577_vm8, %v4566_v55 }
0x17cd   :  { %v4547_v40 = vpop.f32.mrf.mxu2 }
0x17ce   :  { %v4548_v59 = vadd.f32 %v5333_v20, %v4547_v40 }
0x17d0   :  { %v4567_v32 = vmax.f32 %v4548_v59, 0.0 }
0x17d2   :  { %5067 = vmatmul.msk.f32.gmra.mxu3 %vm4577_vm8, %v4567_v32 }
0x17d5   :  { %v4550_v47 = vpop.f32.mrf.mxu2 }
0x17d6   :  { %v4551_v53 = vadd.f32 %v5333_v20, %v4550_v47 }
0x17d8   :  { %v4568_v5 = vmax.f32 %v4551_v53, 0.0 }
0x17da   :  { %5068 = vmatmul.msk.f32.gmra.mxu3 %vm4577_vm8, %v4568_v5 }
0x17dd   :  { %v4553_v35 = vpop.f32.mrf.mxu2 }
0x17de   :  { %v4554_v54 = vadd.f32 %v5333_v20, %v4553_v35 }
0x17e0   :  { %v4569_v28 = vmax.f32 %v4554_v54, 0.0 }
0x17e2   :  { %5069 = vmatmul.msk.f32.gmra.mxu3 %vm4577_vm8, %v4569_v28 }
0x17e5   :  { %v4556_v10 = vpop.f32.mrf.mxu2 }
0x17e6   :  { %v4557_v36 = vadd.f32 %v5333_v20, %v4556_v10 }
0x17e8   :  { %v4570_v30 = vmax.f32 %v4557_v36, 0.0 }
0x17ea   :  { %5070 = vmatmul.msk.f32.gmra.mxu3 %vm4577_vm8, %v4570_v30 }
0x17ed   :  { %v4559_v62 = vpop.f32.mrf.mxu2 }
0x17ee   :  { %v4560_v18 = vadd.f32 %v5333_v20, %v4559_v62 }
0x17f0   :  { %v4571_v7 = vmax.f32 %v4560_v18, 0.0 }
0x17f2   :  { %5071 = vmatmul.msk.f32.gmra.mxu3 %vm4577_vm8, %v4571_v7 }
0x17f5   :  { %v4562_v22 = vpop.f32.mrf.mxu2 }
0x17f6   :  { %v4563_v57 = vadd.f32 %v5333_v20, %v4562_v22 }
0x17f8   :  { %v4572_v60 = vmax.f32 %v4563_v57, 0.0 }
0x17fa   :  { %5072 = vmatmul.msk.f32.gmra.mxu3 %vm4577_vm8, %v4572_v60 }
0x183f   :  { %v4693_v24 = vpop.f32.mrf.mxu0 }
0x1840   :  { %v4694_v14 = vadd.f32 %v5335_v0, %v4693_v24 }
0x1842   :  { %v4696_v42 = vmax.f32 %v4694_v14, 0.0 }
0x1844   :  { %5075 = vmatmul.msk.f32.vlgmr.msrb.gmra.mxu1 %vm4700_vm0, %v4696_v42 }
0x1845   :  { %v4619_v58 = vpop.f32.mrf.mxu3 }
0x1846   :  { %v4620_v6 = vadd.f32 %v5334_v23, %v4619_v58 }
0x1848   :  { %4768 = vrot.lane.b32.xlu1 %v4620_v6, %s5681_s0 }
0x184d   :  { %v4622_v52 = vpop.f32.mrf.mxu3 }
0x184e   :  { %v4623_v8 = vadd.f32 %v5334_v23, %v4622_v52 }
0x1850   :  { %4770 = vrot.lane.b32.xlu2 %v4623_v8, %s5681_s0 }
0x1855   :  { %v4625_v48 = vpop.f32.mrf.mxu3 }
0x1856   :  { %v4626_v49 = vadd.f32 %v5334_v23, %v4625_v48 }
0x1858   :  { %4772 = vrot.lane.b32.xlu0 %v4626_v49, %s5681_s0 }
0x185d   :  { %v4628_v27 = vpop.f32.mrf.mxu3 }
0x185e   :  { %v4629_v38 = vadd.f32 %v5334_v23, %v4628_v27 }
0x1860   :  { %4774 = vrot.lane.b32.xlu1 %v4629_v38, %s5681_s0 }
0x1865   :  { %v4631_v46 = vpop.f32.mrf.mxu3 }
0x1866   :  { %v4632_v50 = vadd.f32 %v5334_v23, %v4631_v46 }
0x1868   :  { %4776 = vrot.lane.b32.xlu0 %v4632_v50, %s5681_s0 }
0x186d   :  { %v4634_v12 = vpop.f32.mrf.mxu3 }
0x186e   :  { %v4635_v17 = vadd.f32 %v5334_v23, %v4634_v12 }
0x1870   :  { %4778 = vrot.lane.b32.xlu2 %v4635_v17, %s5681_s0 }
0x1875   :  { %v4637_v16 = vpop.f32.mrf.mxu3 }
0x1876   :  { %v4638_v61 = vadd.f32 %v5334_v23, %v4637_v16 }
0x1878   :  { %4780 = vrot.lane.b32.xlu1 %v4638_v61, %s5681_s0 }
0x187d   :  { %v4640_v41 = vpop.f32.mrf.mxu3 }
0x187e   :  { %v4641_v34 = vadd.f32 %v5334_v23, %v4640_v41 }
0x1880   :  { %4782 = vrot.lane.b32.xlu0 %v4641_v34, %s5681_s0 }
0x18aa   :  { %v4771_v15 = vpop.permute.xlu2 %4770 }
0x18ab   :  { %4794 = vst.msk [vmem:[%s7866_s2 + $0x8] sm:$0xff] %vm4792_vm5, %v4771_v15 }
0x18ba   :  { %v4769_v11 = vpop.permute.xlu1 %4768 }
0x18bb   :  { %4793 = vst.msk [vmem:[%s7866_s2] sm:$0xff] %vm4792_vm5, %v4769_v11 }
0x18c1   :  { %v4721_v13 = vpop.f32.mrf.mxu1 }
0x18c2   :  { %v4722_v37 = vadd.f32 %v5336_v29, %v4721_v13 }
0x18c4   :  { %v5076_v26 = vmul.f32 -1.442695, %v4722_v37 }
0x18c6   :  { %5563 = vpow2.f32 %v5076_v26 }
0x18ca   :  { %v4779_v43 = vpop.permute.xlu2 %4778  ;;  %v4773_v31 = vpop.permute.xlu0 %4772 }
0x18cb   :  { %4798 = vst.msk [vmem:[%s7866_s2 + $0x28] sm:$0xff] %vm4792_vm5, %v4779_v43 }
0x18cc   :  { %v5564_v25 = vpop.eup %5563  ;;  %4795 = vst.msk [vmem:[%s7866_s2 + $0x10] sm:$0xff] %vm4792_vm5, %v4773_v31 }
0x18cd   :  { %v4727_v2 = vadd.f32 1.0, %v5564_v25 }
0x18cf   :  { %5565 = vrcp.f32 %v4727_v2  ;;  %v4739_v21 = vand.u32 2147483648, %v4727_v2  ;;  %v4737_v45 = vand.u32 2147483647, %v4727_v2  ;;  %vm4733_vm7 = vweird.f32 %v4727_v2 }
0x18d1   :  { %v4740_v9 = vor.u32 1.1754944e-38, %v4739_v21  ;;  %vm4738_vm10 = vcmp.eq.f32.partialorder %v4737_v45, 8.507059e+37 }
0x18d2   :  { %v4775_v56 = vpop.permute.xlu1 %4774 }
0x18d3   :  { %4796 = vst.msk [vmem:[%s7866_s2 + $0x18] sm:$0xff] %vm4792_vm5, %v4775_v56 }
0x18d5   :  { %v5566_v63 = vpop.eup %5565 }
0x18d6   :  { %v4729_v33 = vmul.f32 %v5566_v63, %v4727_v2  ;;  %vm4734_vm6 = vweird.f32 %v5566_v63 }
0x18d7   :  { %vm4735_vm9 = vmor %vm4733_vm7, %vm4734_vm6 }
0x18d8   :  { %v4730_v4 = vsub.f32 1.0, %v4729_v33 }
0x18da   :  { %v4777_v1 = vpop.permute.xlu0 %4776  ;;  %v4731_v20 = vmul.f32 %v5566_v63, %v4730_v4 }
0x18db   :  { %4797 = vst.msk [vmem:[%s7866_s2 + $0x20] sm:$0xff] %vm4792_vm5, %v4777_v1 }
0x18dc   :  { %v4732_v3 = vadd.f32 %v5566_v63, %v4731_v20 }
0x18de   :  { %v4736_v51 = vsel %vm4735_vm9, %v5566_v63, %v4732_v3 }
0x18df   :  { %v4741_v19 = vsel %vm4738_vm10, %v4740_v9, %v4736_v51 }
0x18e0   :  { %4802 = vrot.lane.b32.xlu2 %v4741_v19, %s5686_s8 }
0x18ea   :  { %v4781_v39 = vpop.permute.xlu1 %4780 }
0x18eb   :  { %4799 = vst.msk [vmem:[%s7866_s2 + $0x30] sm:$0xff] %vm4792_vm5, %v4781_v39 }
0x18f2   :  { %v4783_v55 = vpop.permute.xlu0 %4782 }
0x18f3   :  { %4800 = vst.msk [vmem:[%s7866_s2 + $0x38] sm:$0xff] %vm4792_vm5, %v4783_v55 }
0x193a   :  { %v4803_v40 = vpop.permute.xlu2 %4802 }
0x193b   :  { %4806 = vst.msk [vmem:[%s7866_s2] sm:$0xff] %vm4805_vm11, %v4803_v40 }
0x193c   :  { %4811 = vsyncpa [#allocation4], 1 }
0x193d   :  { %4812 = vsyncpa [#allocation6], 1 }

</bundles_post_ra>
